<compile_context>
chip_gen: v6e
topology: v6e:2x2x1
jax: 0.10.0
libtpu: 0.0.40
codegen_flags: <defaults>
</compile_context>

<pallas_src>
import jax
import jax.numpy as jnp
import numpy as np
from jax import lax
from jax.experimental import pallas as pl
from jax.experimental.pallas import tpu as pltpu

BN_EPS = 1e-5


# ----------------------------------------------------------------------------
# Fused BasicBlock kernel
# ----------------------------------------------------------------------------
def basic_block_kernel(x_ref, w1_ref, b1_ref, w2_ref, b2_ref, o_ref,
                       pad_ref, patch_ref):
    # x_ref:  (1, H, W, C) bf16            o_ref:  (1, H, W, C) bf16
    # w*_ref: (9*C, C) bf16 (BN folded)    b*_ref: (1, C) f32 (BN folded)
    # pad_ref:   (H+2, W+2, C) bf16  zero-padded activation slab   (scratch)
    # patch_ref: (H*W, 9*C)    bf16  im2col patch matrix           (scratch)
    _, H, W, C = x_ref.shape
    HW = H * W

    # Re-zero only the two border rows each step (cheap, and correct even
    # though scratch contents are undefined on a core's first iteration).
    zrow = jnp.zeros((1, W + 2, C), pad_ref.dtype)
    pad_ref[pl.ds(0, 1), :, :] = zrow
    pad_ref[pl.ds(H + 1, 1), :, :] = zrow

    # Interior writer: full-width rows 1..H with the W-direction zero border
    # built by concatenation (single clean full-extent store, no masked
    # column writes, no per-step whole-slab zeroing).
    zcol = jnp.zeros((H, 1, C), pad_ref.dtype)

    def store_interior(v_hwc):                       # v_hwc: (H, W, C) bf16
        pad_ref[pl.ds(1, H), :, :] = jnp.concatenate([zcol, v_hwc, zcol],
                                                     axis=1)

    # Load x once: bf16 feeds the slab, f32 copy is the residual branch.
    # TODO(synk): residual is bf16-quantized at the kernel boundary; feed a
    #             separate f32 x stream if tighter skip-path accuracy needed.
    x = x_ref[0]                                     # (H, W, C) bf16
    store_interior(x)

    def build_patch():
        # im2col: column block k <- tap (dy, dx) of the padded slab.
        for k in range(9):
            dy, dx = divmod(k, 3)
            tap = pad_ref[pl.ds(dy, H), pl.ds(dx, W), :]      # (H, W, C) bf16
            patch_ref[:, pl.ds(k * C, C)] = tap.reshape(HW, C)

    # ---- conv1 (3x3, pad=1, no bias) + folded bn1 + relu: one K=9C matmul --
    build_patch()
    y1 = jnp.dot(patch_ref[...], w1_ref[...],
                 preferred_element_type=jnp.float32) + b1_ref[...]
    # Epilogue written straight back into the slab interior as bf16.
    store_interior(jnp.maximum(y1, 0.0).astype(pad_ref.dtype).reshape(H, W, C))

    # ---- conv2 (3x3, pad=1, no bias) + folded bn2 + residual + relu --------
    build_patch()
    y2 = jnp.dot(patch_ref[...], w2_ref[...],
                 preferred_element_type=jnp.float32) + b2_ref[...]
    res = x.reshape(HW, C).astype(jnp.float32)
    out = jnp.maximum(y2 + res, 0.0)
    o_ref[0] = out.reshape(H, W, C).astype(o_ref.dtype)


# ----------------------------------------------------------------------------
# Parameter folding (wrapper-side glue, tiny tensors only)
# ----------------------------------------------------------------------------
def _fold_conv_bn(w_oihw, gamma, beta, mean, var):
    """(Cout, Cin, 3, 3) torch weight -> (9*Cin, Cout) bf16, BN scale folded.

    Row ordering matches the im2col patch columns: row = k*Cin + cin with
    k = ky*3 + kx.  Bias = beta - mean*scale, returned as (1, Cout) f32.
    """
    scale = gamma / jnp.sqrt(var + BN_EPS)
    bias = beta - mean * scale
    w = jnp.transpose(w_oihw, (2, 3, 1, 0))          # (ky, kx, Cin, Cout)
    w = w * scale[None, None, None, :]
    cin, cout = w.shape[2], w.shape[3]
    return (w.reshape(9 * cin, cout).astype(jnp.bfloat16),
            bias.reshape(1, cout).astype(jnp.float32))


# ----------------------------------------------------------------------------
# Wrapper
# ----------------------------------------------------------------------------
def basic_block_forward(x_nchw, params):
    N, Cin, H, W = x_nchw.shape
    C = params["w1"].shape[0]
    assert Cin == C and params["w1"].shape[1] == Cin, \
        "stride=1 / downsample=None => in_channel == out_channel"

    # NCHW -> NHWC (channels on lanes); bf16 halves the HBM read.
    x = jnp.transpose(x_nchw, (0, 2, 3, 1)).astype(jnp.bfloat16)

    w1, b1 = _fold_conv_bn(params["w1"], params["bn1_g"], params["bn1_b"],
                           params["bn1_m"], params["bn1_v"])
    w2, b2 = _fold_conv_bn(params["w2"], params["bn2_g"], params["bn2_b"],
                           params["bn2_m"], params["bn2_v"])

    # Scoped-VMEM budget derived from the (double-buffered) tiles + scratch,
    # capped generation-aware (v7x: 64 MiB/TC vs 128 MiB on v5e/v6e).
    bf16, f32 = 2, 4
    elems = H * W * C
    need = (2 * elems * bf16                              # x tile, 2 buffers
            + 2 * elems * bf16                            # out tile, 2 buffers
            + 2 * 2 * (9 * C * C * bf16 + C * f32)        # weights + biases
            + (H + 2) * (W + 2) * C * bf16                # padded slab scratch
            + 9 * elems * bf16                            # im2col patch scratch
            + 6 * elems * f32)                            # f32 temporaries
    try:
        vmem_cap = int(pltpu.get_tpu_info().vmem_capacity_bytes)
    except Exception:                                     # conservative default
        vmem_cap = 64 * 1024 * 1024
    vmem_bytes = int(min(max(2 * need, 4 * 1024 * 1024), (3 * vmem_cap) // 4))

    out_nhwc = pl.pallas_call(
        basic_block_kernel,
        out_shape=jax.ShapeDtypeStruct((N, H, W, C), jnp.bfloat16),
        grid=(N,),
        in_specs=[
            pl.BlockSpec((1, H, W, C), lambda n: (n, 0, 0, 0)),   # x
            pl.BlockSpec((9 * C, C), lambda n: (0, 0)),           # w1 (folded)
            pl.BlockSpec((1, C), lambda n: (0, 0)),               # b1 (folded)
            pl.BlockSpec((9 * C, C), lambda n: (0, 0)),           # w2 (folded)
            pl.BlockSpec((1, C), lambda n: (0, 0)),               # b2 (folded)
        ],
        out_specs=pl.BlockSpec((1, H, W, C), lambda n: (n, 0, 0, 0)),
        scratch_shapes=[
            pltpu.VMEM((H + 2, W + 2, C), jnp.bfloat16),          # padded slab
            pltpu.VMEM((H * W, 9 * C), jnp.bfloat16),             # im2col patch
        ],
        compiler_params=pltpu.CompilerParams(
            dimension_semantics=("parallel",),
            vmem_limit_bytes=vmem_bytes),
    )(x, w1, b1, w2, b2)

    return jnp.transpose(out_nhwc, (0, 3, 1, 2)).astype(x_nchw.dtype)


# ----------------------------------------------------------------------------
# Pure-JAX f32 reference (correctness check only)
# ----------------------------------------------------------------------------
def ref_forward(x_nchw, p):
    dn = ("NHWC", "HWIO", "NHWC")
    x = jnp.transpose(x_nchw, (0, 2, 3, 1)).astype(jnp.float32)

    def bn(y, g, b, m, v):
        return (y - m) / jnp.sqrt(v + BN_EPS) * g + b

    w1 = jnp.transpose(p["w1"], (2, 3, 1, 0))
    w2 = jnp.transpose(p["w2"], (2, 3, 1, 0))
    y = lax.conv_general_dilated(x, w1, (1, 1), ((1, 1), (1, 1)),
                                 dimension_numbers=dn,
                                 precision=lax.Precision.HIGHEST)
    y = jax.nn.relu(bn(y, p["bn1_g"], p["bn1_b"], p["bn1_m"], p["bn1_v"]))
    y = lax.conv_general_dilated(y, w2, (1, 1), ((1, 1), (1, 1)),
                                 dimension_numbers=dn,
                                 precision=lax.Precision.HIGHEST)
    y = bn(y, p["bn2_g"], p["bn2_b"], p["bn2_m"], p["bn2_v"])
    y = jax.nn.relu(y + x)
    return jnp.transpose(y, (0, 3, 1, 2))


# ----------------------------------------------------------------------------
def make_params(key, channel):
    ks = jax.random.split(key, 4)
    f32 = jnp.float32
    wstd = (2.0 / (9 * channel)) ** 0.5
    p = {
        "w1": wstd * jax.random.normal(ks[0], (channel, channel, 3, 3), f32),
        "w2": wstd * jax.random.normal(ks[1], (channel, channel, 3, 3), f32),
    }
    # BatchNorm (inference mode): gamma, beta, running mean, running var
    for i, name in enumerate(("bn1", "bn2")):
        kk = jax.random.split(ks[2 + i], 4)
        p[f"{name}_g"] = 1.0 + 0.1 * jax.random.normal(kk[0], (channel,), f32)
        p[f"{name}_b"] = 0.1 * jax.random.normal(kk[1], (channel,), f32)
        p[f"{name}_m"] = 0.1 * jax.random.normal(kk[2], (channel,), f32)
        p[f"{name}_v"] = 1.0 + 0.1 * jax.random.uniform(kk[3], (channel,), f32)
    return p


if __name__ == "__main__":
    # BasicBlock with stride=1, downsample=None => in_channel == out_channel.
    # C=128 keeps the channel (lane) dimension dense: full 128-lane stores.
    N, H, W = 2, 16, 16
    channel = 128

    key = jax.random.PRNGKey(0)
    kx, kp = jax.random.split(key)
    x = jax.random.normal(kx, (N, channel, H, W), jnp.float32)
    params = make_params(kp, channel)

    out = jax.block_until_ready(jax.jit(basic_block_forward)(x, params))
    ref = jax.block_until_ready(ref_forward(x, params))

    assert out.shape == (N, channel, H, W), out.shape
    # bf16 matmul operands / bf16 inter-conv activations / bf16 output
    # vs. a pure-f32 HIGHEST-precision reference.
    np.testing.assert_allclose(np.asarray(out), np.asarray(ref),
                               rtol=3e-2, atol=1e-1)
    print("KERNEL_OK")
</pallas_src>

<mosaic_0001>
module attributes {stable_mosaic.version = 11 : i64} {
  func.func @basic_block_kernel(%arg0: i32, %arg1: memref<1x16x16x128xbf16, #tpu.memory_space<vmem>>, %arg2: memref<1152x128xbf16, #tpu.memory_space<vmem>>, %arg3: memref<1x128xf32, #tpu.memory_space<vmem>>, %arg4: memref<1152x128xbf16, #tpu.memory_space<vmem>>, %arg5: memref<1x128xf32, #tpu.memory_space<vmem>>, %arg6: memref<1x16x16x128xbf16, #tpu.memory_space<vmem>>, %arg7: memref<18x18x128xbf16, #tpu.memory_space<vmem>>, %arg8: memref<256x1152xbf16, #tpu.memory_space<vmem>>) attributes {dimension_semantics = [#tpu.dimension_semantics<parallel>], iteration_bounds = array<i64: 2>, scalar_prefetch = 0 : i64, scratch_operands = 2 : i64, tpu.core_type = #tpu.core_type<tc>, window_params = [{transform_indices = @transform_0, window_bounds = array<i64: 1, 16, 16, 128>}, {pipeline_mode = #tpu.pipeline_mode<synchronous>, transform_indices = @transform_1, window_bounds = array<i64: 1152, 128>}, {pipeline_mode = #tpu.pipeline_mode<synchronous>, transform_indices = @transform_2, window_bounds = array<i64: 1, 128>}, {pipeline_mode = #tpu.pipeline_mode<synchronous>, transform_indices = @transform_3, window_bounds = array<i64: 1152, 128>}, {pipeline_mode = #tpu.pipeline_mode<synchronous>, transform_indices = @transform_4, window_bounds = array<i64: 1, 128>}, {transform_indices = @transform_5, window_bounds = array<i64: 1, 16, 16, 128>}]} {
    %cst = arith.constant 0.000000e+00 : bf16
    %0 = vector.broadcast %cst : bf16 to vector<1x18x128xbf16>
    %c0 = arith.constant 0 : index
    %c0_0 = arith.constant 0 : index
    %c0_1 = arith.constant 0 : index
    %1 = vector.load %arg7[%c0, %c0_0, %c0_1] : memref<18x18x128xbf16, #tpu.memory_space<vmem>>, vector<1x18x128xbf16>
    tpu.vector_store %arg7[%c0, %c0_0, %c0_1], %0 {strides = array<i32>} : memref<18x18x128xbf16, #tpu.memory_space<vmem>>, vector<1x18x128xbf16>,
    %c17 = arith.constant 17 : index
    %c0_2 = arith.constant 0 : index
    %c0_3 = arith.constant 0 : index
    %2 = vector.load %arg7[%c17, %c0_2, %c0_3] : memref<18x18x128xbf16, #tpu.memory_space<vmem>>, vector<1x18x128xbf16>
    tpu.vector_store %arg7[%c17, %c0_2, %c0_3], %0 {strides = array<i32>} : memref<18x18x128xbf16, #tpu.memory_space<vmem>>, vector<1x18x128xbf16>,
    %cst_4 = arith.constant 0.000000e+00 : bf16
    %3 = vector.broadcast %cst_4 : bf16 to vector<16x1x128xbf16>
    %c0_5 = arith.constant 0 : index
    %c0_6 = arith.constant 0 : index
    %c0_7 = arith.constant 0 : index
    %c0_8 = arith.constant 0 : index
    %4 = vector.load %arg1[%c0_5, %c0_6, %c0_7, %c0_8] : memref<1x16x16x128xbf16, #tpu.memory_space<vmem>>, vector<1x16x16x128xbf16>
    %5 = vector.shape_cast %4 : vector<1x16x16x128xbf16> to vector<16x16x128xbf16>
    %6 = tpu.concatenate %3, %5, %3 in 1 : vector<16x1x128xbf16>, vector<16x16x128xbf16>, vector<16x1x128xbf16> -> vector<16x18x128xbf16>
    %c1 = arith.constant 1 : index
    %c0_9 = arith.constant 0 : index
    %c0_10 = arith.constant 0 : index
    %7 = vector.load %arg7[%c1, %c0_9, %c0_10] : memref<18x18x128xbf16, #tpu.memory_space<vmem>>, vector<16x18x128xbf16>
    tpu.vector_store %arg7[%c1, %c0_9, %c0_10], %6 {strides = array<i32>} : memref<18x18x128xbf16, #tpu.memory_space<vmem>>, vector<16x18x128xbf16>,
    %c0_11 = arith.constant 0 : index
    %c0_12 = arith.constant 0 : index
    %c0_13 = arith.constant 0 : index
    %8 = vector.load %arg7[%c0_11, %c0_12, %c0_13] : memref<18x18x128xbf16, #tpu.memory_space<vmem>>, vector<16x16x128xbf16>
    %9 = vector.shape_cast %8 : vector<16x16x128xbf16> to vector<256x128xbf16>
    %c0_14 = arith.constant 0 : index
    %c0_15 = arith.constant 0 : index
    %10 = vector.load %arg8[%c0_14, %c0_15] : memref<256x1152xbf16, #tpu.memory_space<vmem>>, vector<256x128xbf16>
    tpu.vector_store %arg8[%c0_14, %c0_15], %9 {strides = array<i32>} : memref<256x1152xbf16, #tpu.memory_space<vmem>>, vector<256x128xbf16>,
    %c0_16 = arith.constant 0 : index
    %c1_17 = arith.constant 1 : index
    %c0_18 = arith.constant 0 : index
    %11 = vector.load %arg7[%c0_16, %c1_17, %c0_18] : memref<18x18x128xbf16, #tpu.memory_space<vmem>>, vector<16x16x128xbf16>
    %12 = vector.shape_cast %11 : vector<16x16x128xbf16> to vector<256x128xbf16>
    %c0_19 = arith.constant 0 : index
    %c128 = arith.constant 128 : index
    %13 = vector.load %arg8[%c0_19, %c128] : memref<256x1152xbf16, #tpu.memory_space<vmem>>, vector<256x128xbf16>
    tpu.vector_store %arg8[%c0_19, %c128], %12 {strides = array<i32>} : memref<256x1152xbf16, #tpu.memory_space<vmem>>, vector<256x128xbf16>,
    %c0_20 = arith.constant 0 : index
    %c2 = arith.constant 2 : index
    %c0_21 = arith.constant 0 : index
    %14 = vector.load %arg7[%c0_20, %c2, %c0_21] : memref<18x18x128xbf16, #tpu.memory_space<vmem>>, vector<16x16x128xbf16>
    %15 = vector.shape_cast %14 : vector<16x16x128xbf16> to vector<256x128xbf16>
    %c0_22 = arith.constant 0 : index
    %c256 = arith.constant 256 : index
    %16 = vector.load %arg8[%c0_22, %c256] : memref<256x1152xbf16, #tpu.memory_space<vmem>>, vector<256x128xbf16>
    tpu.vector_store %arg8[%c0_22, %c256], %15 {strides = array<i32>} : memref<256x1152xbf16, #tpu.memory_space<vmem>>, vector<256x128xbf16>,
    %c1_23 = arith.constant 1 : index
    %c0_24 = arith.constant 0 : index
    %c0_25 = arith.constant 0 : index
    %17 = vector.load %arg7[%c1_23, %c0_24, %c0_25] : memref<18x18x128xbf16, #tpu.memory_space<vmem>>, vector<16x16x128xbf16>
    %18 = vector.shape_cast %17 : vector<16x16x128xbf16> to vector<256x128xbf16>
    %c0_26 = arith.constant 0 : index
    %c384 = arith.constant 384 : index
    %19 = vector.load %arg8[%c0_26, %c384] : memref<256x1152xbf16, #tpu.memory_space<vmem>>, vector<256x128xbf16>
    tpu.vector_store %arg8[%c0_26, %c384], %18 {strides = array<i32>} : memref<256x1152xbf16, #tpu.memory_space<vmem>>, vector<256x128xbf16>,
    %c1_27 = arith.constant 1 : index
    %c1_28 = arith.constant 1 : index
    %c0_29 = arith.constant 0 : index
    %20 = vector.load %arg7[%c1_27, %c1_28, %c0_29] : memref<18x18x128xbf16, #tpu.memory_space<vmem>>, vector<16x16x128xbf16>
    %21 = vector.shape_cast %20 : vector<16x16x128xbf16> to vector<256x128xbf16>
    %c0_30 = arith.constant 0 : index
    %c512 = arith.constant 512 : index
    %22 = vector.load %arg8[%c0_30, %c512] : memref<256x1152xbf16, #tpu.memory_space<vmem>>, vector<256x128xbf16>
    tpu.vector_store %arg8[%c0_30, %c512], %21 {strides = array<i32>} : memref<256x1152xbf16, #tpu.memory_space<vmem>>, vector<256x128xbf16>,
    %c1_31 = arith.constant 1 : index
    %c2_32 = arith.constant 2 : index
    %c0_33 = arith.constant 0 : index
    %23 = vector.load %arg7[%c1_31, %c2_32, %c0_33] : memref<18x18x128xbf16, #tpu.memory_space<vmem>>, vector<16x16x128xbf16>
    %24 = vector.shape_cast %23 : vector<16x16x128xbf16> to vector<256x128xbf16>
    %c0_34 = arith.constant 0 : index
    %c640 = arith.constant 640 : index
    %25 = vector.load %arg8[%c0_34, %c640] : memref<256x1152xbf16, #tpu.memory_space<vmem>>, vector<256x128xbf16>
    tpu.vector_store %arg8[%c0_34, %c640], %24 {strides = array<i32>} : memref<256x1152xbf16, #tpu.memory_space<vmem>>, vector<256x128xbf16>,
    %c2_35 = arith.constant 2 : index
    %c0_36 = arith.constant 0 : index
    %c0_37 = arith.constant 0 : index
    %26 = vector.load %arg7[%c2_35, %c0_36, %c0_37] : memref<18x18x128xbf16, #tpu.memory_space<vmem>>, vector<16x16x128xbf16>
    %27 = vector.shape_cast %26 : vector<16x16x128xbf16> to vector<256x128xbf16>
    %c0_38 = arith.constant 0 : index
    %c768 = arith.constant 768 : index
    %28 = vector.load %arg8[%c0_38, %c768] : memref<256x1152xbf16, #tpu.memory_space<vmem>>, vector<256x128xbf16>
    tpu.vector_store %arg8[%c0_38, %c768], %27 {strides = array<i32>} : memref<256x1152xbf16, #tpu.memory_space<vmem>>, vector<256x128xbf16>,
    %c2_39 = arith.constant 2 : index
    %c1_40 = arith.constant 1 : index
    %c0_41 = arith.constant 0 : index
    %29 = vector.load %arg7[%c2_39, %c1_40, %c0_41] : memref<18x18x128xbf16, #tpu.memory_space<vmem>>, vector<16x16x128xbf16>
    %30 = vector.shape_cast %29 : vector<16x16x128xbf16> to vector<256x128xbf16>
    %c0_42 = arith.constant 0 : index
    %c896 = arith.constant 896 : index
    %31 = vector.load %arg8[%c0_42, %c896] : memref<256x1152xbf16, #tpu.memory_space<vmem>>, vector<256x128xbf16>
    tpu.vector_store %arg8[%c0_42, %c896], %30 {strides = array<i32>} : memref<256x1152xbf16, #tpu.memory_space<vmem>>, vector<256x128xbf16>,
    %c2_43 = arith.constant 2 : index
    %c2_44 = arith.constant 2 : index
    %c0_45 = arith.constant 0 : index
    %32 = vector.load %arg7[%c2_43, %c2_44, %c0_45] : memref<18x18x128xbf16, #tpu.memory_space<vmem>>, vector<16x16x128xbf16>
    %33 = vector.shape_cast %32 : vector<16x16x128xbf16> to vector<256x128xbf16>
    %c0_46 = arith.constant 0 : index
    %c1024 = arith.constant 1024 : index
    %34 = vector.load %arg8[%c0_46, %c1024] : memref<256x1152xbf16, #tpu.memory_space<vmem>>, vector<256x128xbf16>
    tpu.vector_store %arg8[%c0_46, %c1024], %33 {strides = array<i32>} : memref<256x1152xbf16, #tpu.memory_space<vmem>>, vector<256x128xbf16>,
    %c0_47 = arith.constant 0 : index
    %c0_48 = arith.constant 0 : index
    %35 = vector.load %arg8[%c0_47, %c0_48] : memref<256x1152xbf16, #tpu.memory_space<vmem>>, vector<256x1152xbf16>
    %c0_49 = arith.constant 0 : index
    %c0_50 = arith.constant 0 : index
    %36 = vector.load %arg2[%c0_49, %c0_50] : memref<1152x128xbf16, #tpu.memory_space<vmem>>, vector<1152x128xbf16>
    %cst_51 = arith.constant dense<0.000000e+00> : vector<256x128xf32>
    %37 = tpu.matmul %35, %36, %cst_51 {dimension_numbers = #tpu.dot_dimension_numbers<[1], [0], [0], [1], [0, 0, 1, 1], [], []>} : vector<256x1152xbf16>, vector<1152x128xbf16>, vector<256x128xf32> -> vector<256x128xf32>
    %c0_52 = arith.constant 0 : index
    %c0_53 = arith.constant 0 : index
    %38 = vector.load %arg3[%c0_52, %c0_53] : memref<1x128xf32, #tpu.memory_space<vmem>>, vector<1x128xf32>
    %39 = vector.broadcast %38 : vector<1x128xf32> to vector<256x128xf32>
    %40 = arith.addf %37, %39 : vector<256x128xf32>
    %cst_54 = arith.constant 0.000000e+00 : f32
    %41 = vector.broadcast %cst_54 : f32 to vector<256x128xf32>
    %42 = arith.maximumf %40, %41 : vector<256x128xf32>
    %43 = arith.truncf %42 : vector<256x128xf32> to vector<256x128xbf16>
    %44 = vector.shape_cast %43 : vector<256x128xbf16> to vector<16x16x128xbf16>
    %45 = tpu.concatenate %3, %44, %3 in 1 : vector<16x1x128xbf16>, vector<16x16x128xbf16>, vector<16x1x128xbf16> -> vector<16x18x128xbf16>
    %c1_55 = arith.constant 1 : index
    %c0_56 = arith.constant 0 : index
    %c0_57 = arith.constant 0 : index
    %46 = vector.load %arg7[%c1_55, %c0_56, %c0_57] : memref<18x18x128xbf16, #tpu.memory_space<vmem>>, vector<16x18x128xbf16>
    tpu.vector_store %arg7[%c1_55, %c0_56, %c0_57], %45 {strides = array<i32>} : memref<18x18x128xbf16, #tpu.memory_space<vmem>>, vector<16x18x128xbf16>,
    %c0_58 = arith.constant 0 : index
    %c0_59 = arith.constant 0 : index
    %c0_60 = arith.constant 0 : index
    %47 = vector.load %arg7[%c0_58, %c0_59, %c0_60] : memref<18x18x128xbf16, #tpu.memory_space<vmem>>, vector<16x16x128xbf16>
    %48 = vector.shape_cast %47 : vector<16x16x128xbf16> to vector<256x128xbf16>
    %c0_61 = arith.constant 0 : index
    %c0_62 = arith.constant 0 : index
    %49 = vector.load %arg8[%c0_61, %c0_62] : memref<256x1152xbf16, #tpu.memory_space<vmem>>, vector<256x128xbf16>
    tpu.vector_store %arg8[%c0_61, %c0_62], %48 {strides = array<i32>} : memref<256x1152xbf16, #tpu.memory_space<vmem>>, vector<256x128xbf16>,
    %c0_63 = arith.constant 0 : index
    %c1_64 = arith.constant 1 : index
    %c0_65 = arith.constant 0 : index
    %50 = vector.load %arg7[%c0_63, %c1_64, %c0_65] : memref<18x18x128xbf16, #tpu.memory_space<vmem>>, vector<16x16x128xbf16>
    %51 = vector.shape_cast %50 : vector<16x16x128xbf16> to vector<256x128xbf16>
    %c0_66 = arith.constant 0 : index
    %c128_67 = arith.constant 128 : index
    %52 = vector.load %arg8[%c0_66, %c128_67] : memref<256x1152xbf16, #tpu.memory_space<vmem>>, vector<256x128xbf16>
    tpu.vector_store %arg8[%c0_66, %c128_67], %51 {strides = array<i32>} : memref<256x1152xbf16, #tpu.memory_space<vmem>>, vector<256x128xbf16>,
    %c0_68 = arith.constant 0 : index
    %c2_69 = arith.constant 2 : index
    %c0_70 = arith.constant 0 : index
    %53 = vector.load %arg7[%c0_68, %c2_69, %c0_70] : memref<18x18x128xbf16, #tpu.memory_space<vmem>>, vector<16x16x128xbf16>
    %54 = vector.shape_cast %53 : vector<16x16x128xbf16> to vector<256x128xbf16>
    %c0_71 = arith.constant 0 : index
    %c256_72 = arith.constant 256 : index
    %55 = vector.load %arg8[%c0_71, %c256_72] : memref<256x1152xbf16, #tpu.memory_space<vmem>>, vector<256x128xbf16>
    tpu.vector_store %arg8[%c0_71, %c256_72], %54 {strides = array<i32>} : memref<256x1152xbf16, #tpu.memory_space<vmem>>, vector<256x128xbf16>,
    %c1_73 = arith.constant 1 : index
    %c0_74 = arith.constant 0 : index
    %c0_75 = arith.constant 0 : index
    %56 = vector.load %arg7[%c1_73, %c0_74, %c0_75] : memref<18x18x128xbf16, #tpu.memory_space<vmem>>, vector<16x16x128xbf16>
    %57 = vector.shape_cast %56 : vector<16x16x128xbf16> to vector<256x128xbf16>
    %c0_76 = arith.constant 0 : index
    %c384_77 = arith.constant 384 : index
    %58 = vector.load %arg8[%c0_76, %c384_77] : memref<256x1152xbf16, #tpu.memory_space<vmem>>, vector<256x128xbf16>
    tpu.vector_store %arg8[%c0_76, %c384_77], %57 {strides = array<i32>} : memref<256x1152xbf16, #tpu.memory_space<vmem>>, vector<256x128xbf16>,
    %c1_78 = arith.constant 1 : index
    %c1_79 = arith.constant 1 : index
    %c0_80 = arith.constant 0 : index
    %59 = vector.load %arg7[%c1_78, %c1_79, %c0_80] : memref<18x18x128xbf16, #tpu.memory_space<vmem>>, vector<16x16x128xbf16>
    %60 = vector.shape_cast %59 : vector<16x16x128xbf16> to vector<256x128xbf16>
    %c0_81 = arith.constant 0 : index
    %c512_82 = arith.constant 512 : index
    %61 = vector.load %arg8[%c0_81, %c512_82] : memref<256x1152xbf16, #tpu.memory_space<vmem>>, vector<256x128xbf16>
    tpu.vector_store %arg8[%c0_81, %c512_82], %60 {strides = array<i32>} : memref<256x1152xbf16, #tpu.memory_space<vmem>>, vector<256x128xbf16>,
    %c1_83 = arith.constant 1 : index
    %c2_84 = arith.constant 2 : index
    %c0_85 = arith.constant 0 : index
    %62 = vector.load %arg7[%c1_83, %c2_84, %c0_85] : memref<18x18x128xbf16, #tpu.memory_space<vmem>>, vector<16x16x128xbf16>
    %63 = vector.shape_cast %62 : vector<16x16x128xbf16> to vector<256x128xbf16>
    %c0_86 = arith.constant 0 : index
    %c640_87 = arith.constant 640 : index
    %64 = vector.load %arg8[%c0_86, %c640_87] : memref<256x1152xbf16, #tpu.memory_space<vmem>>, vector<256x128xbf16>
    tpu.vector_store %arg8[%c0_86, %c640_87], %63 {strides = array<i32>} : memref<256x1152xbf16, #tpu.memory_space<vmem>>, vector<256x128xbf16>,
    %c2_88 = arith.constant 2 : index
    %c0_89 = arith.constant 0 : index
    %c0_90 = arith.constant 0 : index
    %65 = vector.load %arg7[%c2_88, %c0_89, %c0_90] : memref<18x18x128xbf16, #tpu.memory_space<vmem>>, vector<16x16x128xbf16>
    %66 = vector.shape_cast %65 : vector<16x16x128xbf16> to vector<256x128xbf16>
    %c0_91 = arith.constant 0 : index
    %c768_92 = arith.constant 768 : index
    %67 = vector.load %arg8[%c0_91, %c768_92] : memref<256x1152xbf16, #tpu.memory_space<vmem>>, vector<256x128xbf16>
    tpu.vector_store %arg8[%c0_91, %c768_92], %66 {strides = array<i32>} : memref<256x1152xbf16, #tpu.memory_space<vmem>>, vector<256x128xbf16>,
    %c2_93 = arith.constant 2 : index
    %c1_94 = arith.constant 1 : index
    %c0_95 = arith.constant 0 : index
    %68 = vector.load %arg7[%c2_93, %c1_94, %c0_95] : memref<18x18x128xbf16, #tpu.memory_space<vmem>>, vector<16x16x128xbf16>
    %69 = vector.shape_cast %68 : vector<16x16x128xbf16> to vector<256x128xbf16>
    %c0_96 = arith.constant 0 : index
    %c896_97 = arith.constant 896 : index
    %70 = vector.load %arg8[%c0_96, %c896_97] : memref<256x1152xbf16, #tpu.memory_space<vmem>>, vector<256x128xbf16>
    tpu.vector_store %arg8[%c0_96, %c896_97], %69 {strides = array<i32>} : memref<256x1152xbf16, #tpu.memory_space<vmem>>, vector<256x128xbf16>,
    %c2_98 = arith.constant 2 : index
    %c2_99 = arith.constant 2 : index
    %c0_100 = arith.constant 0 : index
    %71 = vector.load %arg7[%c2_98, %c2_99, %c0_100] : memref<18x18x128xbf16, #tpu.memory_space<vmem>>, vector<16x16x128xbf16>
    %72 = vector.shape_cast %71 : vector<16x16x128xbf16> to vector<256x128xbf16>
    %c0_101 = arith.constant 0 : index
    %c1024_102 = arith.constant 1024 : index
    %73 = vector.load %arg8[%c0_101, %c1024_102] : memref<256x1152xbf16, #tpu.memory_space<vmem>>, vector<256x128xbf16>
    tpu.vector_store %arg8[%c0_101, %c1024_102], %72 {strides = array<i32>} : memref<256x1152xbf16, #tpu.memory_space<vmem>>, vector<256x128xbf16>,
    %c0_103 = arith.constant 0 : index
    %c0_104 = arith.constant 0 : index
    %74 = vector.load %arg8[%c0_103, %c0_104] : memref<256x1152xbf16, #tpu.memory_space<vmem>>, vector<256x1152xbf16>
    %c0_105 = arith.constant 0 : index
    %c0_106 = arith.constant 0 : index
    %75 = vector.load %arg4[%c0_105, %c0_106] : memref<1152x128xbf16, #tpu.memory_space<vmem>>, vector<1152x128xbf16>
    %cst_107 = arith.constant dense<0.000000e+00> : vector<256x128xf32>
    %76 = tpu.matmul %74, %75, %cst_107 {dimension_numbers = #tpu.dot_dimension_numbers<[1], [0], [0], [1], [0, 0, 1, 1], [], []>} : vector<256x1152xbf16>, vector<1152x128xbf16>, vector<256x128xf32> -> vector<256x128xf32>
    %c0_108 = arith.constant 0 : index
    %c0_109 = arith.constant 0 : index
    %77 = vector.load %arg5[%c0_108, %c0_109] : memref<1x128xf32, #tpu.memory_space<vmem>>, vector<1x128xf32>
    %78 = vector.broadcast %77 : vector<1x128xf32> to vector<256x128xf32>
    %79 = arith.addf %76, %78 : vector<256x128xf32>
    %80 = vector.shape_cast %5 : vector<16x16x128xbf16> to vector<256x128xbf16>
    %81 = arith.extf %80 : vector<256x128xbf16> to vector<256x128xf32>
    %82 = arith.addf %79, %81 : vector<256x128xf32>
    %cst_110 = arith.constant 0.000000e+00 : f32
    %83 = vector.broadcast %cst_110 : f32 to vector<256x128xf32>
    %84 = arith.maximumf %82, %83 : vector<256x128xf32>
    %85 = vector.shape_cast %84 : vector<256x128xf32> to vector<16x16x128xf32>
    %86 = arith.truncf %85 : vector<16x16x128xf32> to vector<16x16x128xbf16>
    %c0_111 = arith.constant 0 : index
    %c0_112 = arith.constant 0 : index
    %c0_113 = arith.constant 0 : index
    %c0_114 = arith.constant 0 : index
    %87 = vector.load %arg6[%c0_111, %c0_112, %c0_113, %c0_114] : memref<1x16x16x128xbf16, #tpu.memory_space<vmem>>, vector<1x16x16x128xbf16>
    %88 = vector.shape_cast %87 : vector<1x16x16x128xbf16> to vector<16x16x128xbf16>
    %89 = vector.shape_cast %86 : vector<16x16x128xbf16> to vector<1x16x16x128xbf16>
    tpu.vector_store %arg6[%c0_111, %c0_112, %c0_113, %c0_114], %89 {strides = array<i32>} : memref<1x16x16x128xbf16, #tpu.memory_space<vmem>>, vector<1x16x16x128xbf16>,
    return
  }
  func.func @transform_0(%arg0: i32) -> (i32, i32, i32, i32) {
    %c0_i32 = arith.constant 0 : i32
    %c0_i32_0 = arith.constant 0 : i32
    %c0_i32_1 = arith.constant 0 : i32
    %c0_i32_2 = arith.constant 0 : i32
    return %arg0, %c0_i32, %c0_i32_0, %c0_i32_1 : i32, i32, i32, i32
  }
  func.func @transform_1(%arg0: i32) -> (i32, i32) {
    %c0_i32 = arith.constant 0 : i32
    %c0_i32_0 = arith.constant 0 : i32
    %c0_i32_1 = arith.constant 0 : i32
    return %c0_i32, %c0_i32_0 : i32, i32
  }
  func.func @transform_2(%arg0: i32) -> (i32, i32) {
    %c0_i32 = arith.constant 0 : i32
    %c0_i32_0 = arith.constant 0 : i32
    %c0_i32_1 = arith.constant 0 : i32
    return %c0_i32, %c0_i32_0 : i32, i32
  }
  func.func @transform_3(%arg0: i32) -> (i32, i32) {
    %c0_i32 = arith.constant 0 : i32
    %c0_i32_0 = arith.constant 0 : i32
    %c0_i32_1 = arith.constant 0 : i32
    return %c0_i32, %c0_i32_0 : i32, i32
  }
  func.func @transform_4(%arg0: i32) -> (i32, i32) {
    %c0_i32 = arith.constant 0 : i32
    %c0_i32_0 = arith.constant 0 : i32
    %c0_i32_1 = arith.constant 0 : i32
    return %c0_i32, %c0_i32_0 : i32, i32
  }
  func.func @transform_5(%arg0: i32) -> (i32, i32, i32, i32) {
    %c0_i32 = arith.constant 0 : i32
    %c0_i32_0 = arith.constant 0 : i32
    %c0_i32_1 = arith.constant 0 : i32
    %c0_i32_2 = arith.constant 0 : i32
    return %arg0, %c0_i32, %c0_i32_0, %c0_i32_1 : i32, i32, i32, i32
  }
}

</mosaic_0001>

<bundles_post_ra>
// kernel: basic_block_forward.1
= control target key start
LH: loop header
LB: loop body
LE: loop exit
PB: predicated region body
PF: predicated region fallthrough
CT: control target
= control target key end

     0   :  { %s13585_s18 = smov 0   ;;  %s16852_s0 = inlined_call_operand.vmem [shape: bf16[2,16,16,128], index: 0, kind: input, shape index: {}]   ;;  %s16853_s1 = inlined_call_operand.vmem [shape: bf16[1152,128], index: 1, kind: input, shape index: {}]   ;;  %s16854_s2 = inlined_call_operand.vmem [shape: f32[1,128], index: 2, kind: input, shape index: {}]   ;;  %s16855_s3 = inlined_call_operand.vmem [shape: bf16[1152,128], index: 3, kind: input, shape index: {}]   ;;  %s16856_s4 = inlined_call_operand.vmem [shape: f32[1,128], index: 4, kind: input, shape index: {}]   ;;  %s16857_s5 = inlined_call_operand.vmem [shape: bf16[2,16,16,128], index: 5, kind: output, shape index: {}]  }
   0x1 LB: > { %s11075_s19 = sadd.s32 4294967295, %s13552_s18   ;;  %p11079_p0 = scmp.ge.s32.totalorder %s13552_s18, 1  ;;  %s13552_s18 = sphi %s13585_s18, %s15_s18  }
   0x2   : > { %p187_p1 = scmp.lt.s32.totalorder %s13552_s18, 3 }
   0x4   : > { %p188_p2 = pnand %p11079_p0, %p187_p1 }
   0x6   : > { %191 = sbr.rel (%p188_p2) target bundleno = 1356 (0x54c), region = 40 }
   0xb   : > { %v12938_v0 = vld [vmem:[%s16853_s1 + $0x78] sm:$0xff]   ;;  %v13554_v2 = vmov 0   ;;  %v12942_v5 = vld [vmem:[%s16853_s1 + $0x70] sm:$0xff]   ;;  %v12946_v9 = vld [vmem:[%s16853_s1 + $0x68] sm:$0xff]   ;;  %p215_p3 = scmp.lt.s32.totalorder %s11075_s19, 1  ;;  %vm489_vm0 = vcmask 1040384  }
   0xc   : > { %v12939_v1 = vld [vmem:[%s16853_s1 + $0x38] sm:$0xff]   ;;  %226 = vst [vmem:[#allocation2] sm:$0xf] %v13554_v2  ;;  %227 = vst [vmem:[#allocation2 + $0x4] sm:$0xf] %v13554_v2  ;;  %11889 = vmatprep.subr.bf16.mxu0 %v12938_v0  ;;  %v12943_v6 = vld [vmem:[%s16853_s1 + $0x30] sm:$0xff]  }
   0xd   : > { %228 = vst [vmem:[#allocation2 + $0x8] sm:$0x1] %v13554_v2  ;;  %230 = vst [vmem:[#allocation2 + $0xcc] sm:$0xf] %v13554_v2  ;;  %v12940_v3 = vld [vmem:[%s16853_s1 + $0xf8] sm:$0xff]   ;;  %11890 = vmatpush3.bf16.msra.mxu0 %v12939_v1  ;;  %v12944_v7 = vld [vmem:[%s16853_s1 + $0xf0] sm:$0xff]  }
   0xe   : > { %231 = vst [vmem:[#allocation2 + $0xd0] sm:$0xf] %v13554_v2  ;;  %232 = vst [vmem:[#allocation2 + $0xd4] sm:$0x1] %v13554_v2  ;;  %v12941_v4 = vld [vmem:[%s16853_s1 + $0xb8] sm:$0xff]   ;;  %12001 = vmatprep.subr.bf16.mxu1 %v12940_v3  ;;  %11891 = vmatprep.subr.bf16.mxu0 %v12942_v5  ;;  %v12945_v8 = vld [vmem:[%s16853_s1 + $0xb0] sm:$0xff]  }
   0xf   : > { %12002 = vmatpush3.bf16.msra.mxu1 %v12941_v4  ;;  %v12947_v10 = vld [vmem:[%s16853_s1 + $0x28] sm:$0xff]   ;;  %v12950_v13 = vld [vmem:[%s16853_s1 + $0x60] sm:$0xff]   ;;  %v12954_v17 = vld [vmem:[%s16853_s1 + $0x58] sm:$0xff]   ;;  %s17065_s19 = smov (!%p215_p3, %s11075_s19), 1  ;;  %vm1408_vm1 = vcmask 1042432   ;;  %vm1409_vm2 = vcmask 1046532  }
  0x10   : > { %12003 = vmatprep.subr.bf16.mxu1 %v12944_v7  ;;  %v12948_v11 = vld [vmem:[%s16853_s1 + $0xe8] sm:$0xff]   ;;  %v12951_v14 = vld [vmem:[%s16853_s1 + $0x20] sm:$0xff]   ;;  %v12955_v18 = vld [vmem:[%s16853_s1 + $0x18] sm:$0xff]   ;;  %s11760_s9 = sshll.u32 %s17065_s19, 7  ;;  %vm861_vm3 = vsmask.f32 3328 }
  0x11   : > { %11892 = vmatpush3.bf16.msra.mxu0 %v12943_v6  ;;  %v12949_v12 = vld [vmem:[%s16853_s1 + $0xa8] sm:$0xff]   ;;  %v12952_v15 = vld [vmem:[%s16853_s1 + $0xe0] sm:$0xff]   ;;  %v12956_v19 = vld [vmem:[%s16853_s1 + $0xd8] sm:$0xff]   ;;  %s13698_s14 = scalar_lea.vmem %s16852_s0, %s11760_s9  ;;  %vm862_vm4 = vsmask.f32 7440  ;;  %v16864_v57 = vmov 0  ;;  %s16729_s24 = scalar_lea.vmem %s16857_s5, %s11760_s9 }
  0x12   : > { %11893 = vmatprep.subr.bf16.mxu0 %v12946_v9  ;;  %v12953_v16 = vld [vmem:[%s16853_s1 + $0xa0] sm:$0xff]   ;;  %v12957_v20 = vld [vmem:[%s16853_s1 + $0x98] sm:$0xff]   ;;  %v12958_v21 = vld [vmem:[%s16853_s1 + $0x50] sm:$0xff]   ;;  %vm490_vm6 = vsmask.f32 256 }
  0x13   : > { %12004 = vmatpush3.bf16.msra.mxu1 %v12945_v8  ;;  %v12959_v22 = vld [vmem:[%s16853_s1 + $0x10] sm:$0xff]   ;;  %v12962_v25 = vld [vmem:[%s16853_s1 + $0x48] sm:$0xff]   ;;  %v12966_v29 = vld [vmem:[%s16853_s1 + $0x40] sm:$0xff]  }
  0x14   : > { %12005 = vmatprep.subr.bf16.mxu1 %v12948_v11  ;;  %v12960_v23 = vld [vmem:[%s16853_s1 + $0xd0] sm:$0xff]   ;;  %v12963_v26 = vld [vmem:[%s16853_s1 + $0x8] sm:$0xff]   ;;  %v12967_v30 = vld [vmem:[%s16853_s1] sm:$0xff]  }
  0x15   : > { %11894 = vmatpush3.bf16.msra.mxu0 %v12947_v10  ;;  %v12961_v24 = vld [vmem:[%s16853_s1 + $0x90] sm:$0xff]   ;;  %v12964_v27 = vld [vmem:[%s16853_s1 + $0xc8] sm:$0xff]   ;;  %v12968_v31 = vld [vmem:[%s16853_s1 + $0xc0] sm:$0xff]  }
  0x16   : > { %11895 = vmatprep.subr.bf16.mxu0 %v12950_v13  ;;  %v12965_v28 = vld [vmem:[%s16853_s1 + $0x88] sm:$0xff]   ;;  %v749_v32 = vld [vmem:[#allocation2] sm:$0xf]  ;;  %v750_v33 = vld [vmem:[#allocation2 + $0x4] sm:$0xf] }
  0x17   : > { %12006 = vmatpush3.bf16.msra.mxu1 %v12949_v12  ;;  %v813_v34 = vld [vmem:[#allocation2] sm:$0xf]  ;;  %781 = vst [vmem:[#allocation3] sm:$0xf] %v749_v32  ;;  %782 = vst [vmem:[#allocation3 + $0x24] sm:$0xf] %v750_v33 }
  0x18   : > { %12007 = vmatprep.subr.bf16.mxu1 %v12952_v15  ;;  %v814_v35 = vld [vmem:[#allocation2 + $0x4] sm:$0xf]  ;;  %v815_v36 = vld [vmem:[#allocation2 + $0x8] sm:$0x1]  ;;  %v865_v37 = vshrl.u32 %v813_v34, 16  ;;  %v868_v38 = vshll.u32 %v813_v34, 16  ;;  %vm13709_vm5 = vmor %vm861_vm3, %vm862_vm4 }
  0x19   : > { %11896 = vmatpush3.bf16.msra.mxu0 %v12951_v14  ;;  %v874_v39 = vshll.u32 %v814_v35, 16  ;;  %v12971_v40 = vld [vmem:[%s16853_s1 + $0x80] sm:$0xff]   ;;  %v878_v41 = vshrl.u32 %v814_v35, 16  ;;  %v884_v42 = vshll.u32 %v815_v36, 16  ;;  %v6050_v51 = vld [vmem:[#allocation2 + $0x8] sm:$0x1]  ;;  %vm13717_vm7 = vmor %vm1408_vm1, %vm1409_vm2 }
  0x1a   : > { %11897 = vmatprep.subr.bf16.mxu0 %v12954_v17  ;;  %v867_v43 = vrot.slane %v865_v37, 4  ;;  %v870_v44 = vrot.slane %v868_v38, 5  ;;  %v6048_v46 = vld [vmem:[#allocation2] sm:$0xf]  ;;  %v6049_v50 = vld [vmem:[#allocation2 + $0x4] sm:$0xf]  ;;  %vm13724_vm8 = vmand %vm489_vm0, %vm490_vm6 }
  0x1b   : > { %12008 = vmatpush3.bf16.msra.mxu1 %v12953_v16  ;;  %v876_v45 = vrot.slane %v874_v39, 5  ;;  %v233_v47 = vld [vmem:[%s13698_s14] sm:$0xff]   ;;  %v880_v48 = vrot.slane %v878_v41, 4  ;;  %v886_v49 = vrot.slane %v884_v42, 5  ;;  %v6097_v53 = vshrl.u32 %v6048_v46, 16  ;;  %v12975_v56 = vld [vmem:[%s16853_s1 + $0x178] sm:$0xff]  }
  0x1c   : > { %12009 = vmatprep.subr.bf16.mxu1 %v12956_v19  ;;  %v871_v52 = vor.u32 %v870_v44, %v867_v43  ;;  %v6100_v54 = vshll.u32 %v6048_v46, 16  ;;  %v6106_v55 = vshll.u32 %v6049_v50, 16  ;;  %v16865_v57 = vsel %vm13709_vm5, 4294967295, %v16864_v57  ;;  %v1312_v2 = vld [vmem:[#allocation2] sm:$0xe]  ;;  %v237_v41 = vld [vmem:[%s13698_s14 + $0x10] sm:$0xff]  }
  0x1d   : > { %11898 = vmatpush3.bf16.msra.mxu0 %v12955_v18  ;;  %16866 = vst [vmem:[#allocation4_spill] sm:$0xff] %v16865_v57  ;;  %v881_v58 = vor.u32 %v880_v48, %v876_v45  ;;  %v6110_v59 = vshrl.u32 %v6049_v50, 16  ;;  %v6116_v60 = vshll.u32 %v6050_v51, 16  ;;  %v346_v61 = vshrl.u32 %v233_v47, 16  ;;  %v1313_v7 = vld [vmem:[#allocation2 + $0x4] sm:$0xf] }
  0x1e   : > { %11899 = vmatprep.subr.bf16.mxu0 %v12958_v21  ;;  %v872_v62 = vrot.slane %v871_v52, 4  ;;  %v6099_v63 = vrot.slane %v6097_v53, 4  ;;  %v6102_v0 = vrot.slane %v6100_v54, 5  ;;  %v6108_v1 = vrot.slane %v6106_v55, 5  ;;  %v1314_v11 = vld [vmem:[#allocation2 + $0x8] sm:$0x1] }
  0x1f   : > { %12010 = vmatpush3.bf16.msra.mxu1 %v12957_v20  ;;  %v882_v3 = vrot.slane %v881_v58, 4  ;;  %v6112_v4 = vrot.slane %v6110_v59, 4  ;;  %v6118_v5 = vrot.slane %v6116_v60, 5  ;;  %v348_v6 = vrot.slane %v346_v61, 7  ;;  %v13728_v18 = vld [vmem:[#allocation2 + $0x4] sm:$0xf] }
  0x20   : > { %12011 = vmatprep.subr.bf16.mxu1 %v12960_v23  ;;  %v877_v8 = vsel %vm13709_vm5, %v872_v62, %v876_v45  ;;  %v6103_v9 = vor.u32 %v6102_v0, %v6099_v63  ;;  %v349_v10 = vshll.u32 %v233_v47, 16  ;;  %v16867_v12 = vmov 0  ;;  %v235_v23 = vld [vmem:[%s13698_s14 + $0x8] sm:$0xff]   ;;  %v5985_v32 = vld [vmem:[#allocation2 + $0x4] sm:$0xf]  ;;  %v239_v42 = vld [vmem:[%s13698_s14 + $0x18] sm:$0xff]  }
  0x21   : > { %11900 = vmatpush3.bf16.msra.mxu0 %v12959_v22  ;;  %v16868_v12 = vsel %vm13717_vm7, 4294967295, %v16867_v12  ;;  %v887_v13 = vsel %vm13709_vm5, %v882_v3, %v886_v49  ;;  %1280 = vst [vmem:[#allocation3 + $0x4] sm:$0xf] %v877_v8  ;;  %v6113_v14 = vor.u32 %v6112_v4, %v6108_v1  ;;  %v16870_v15 = vmov 0  ;;  %v6546_v36 = vld [vmem:[#allocation2 + $0x8] sm:$0x1] }
  0x22   : > { %11901 = vmatprep.subr.bf16.mxu0 %v12962_v25  ;;  %16869 = vst [vmem:[#allocation5_spill] sm:$0xff] %v16868_v12  ;;  %v16871_v15 = vsel %vm13724_vm8, 4294967295, %v16870_v15  ;;  %v11148_v16 = vrot.slane %v1312_v2, 9  ;;  %v1413_v17 = vrot.slane %v1313_v7, 5  ;;  %1281 = vst [vmem:[#allocation3 + $0x28] sm:$0xf] %v887_v13  ;;  %v351_v20 = vor.u32 %v349_v10, %v348_v6 }
  0x23   : > { %12012 = vmatpush3.bf16.msra.mxu1 %v12961_v24  ;;  %16872 = vst [vmem:[#allocation6_spill] sm:$0xff] %v16871_v15  ;;  %v6104_v19 = vrot.slane %v6103_v9, 4  ;;  %v508_v21 = vsel %vm13724_vm8, %v348_v6, 0  ;;  %v1416_v22 = vrot.slane %v1314_v11, 5  ;;  %v6114_v24 = vrot.slane %v6113_v14, 4  ;;  %v12986_v52 = vld [vmem:[%s16853_s1 + $0x170] sm:$0xff]  }
  0x24   : > { %12013 = vmatprep.subr.bf16.mxu1 %v12964_v27  ;;  %v11102_v25 = vcombine.low %v508_v21, %v508_v21  ;;  %v1415_v27 = vrot.slane %v1413_v17, 4  ;;  %v353_v45 = vshrl.u32 %v235_v23, 16  ;;  %v356_v46 = vshll.u32 %v235_v23, 16  ;;  %v12988_v55 = vld [vmem:[%s16853_s1 + $0x130] sm:$0xff]   ;;  %v13756_v59 = vld [vmem:[%s13698_s14 + $0x20] sm:$0xff]   ;;  %v13759_v60 = vld [vmem:[%s13698_s14 + $0x28] sm:$0xff]  }
  0x25   : > { %11902 = vmatpush3.bf16.msra.mxu0 %v12963_v26  ;;  %v1414_v26 = vsel %vm13717_vm7, %v11148_v16, %v1413_v17  ;;  %v6109_v37 = vsel %vm13709_vm5, %v6104_v19, %v6108_v1  ;;  %v6119_v38 = vsel %vm13709_vm5, %v6114_v24, %v6118_v5  ;;  %v6645_v49 = vrot.slane %v6546_v36, 5  ;;  %v13002_v6 = vld [vmem:[%s16853_s1 + $0x168] sm:$0xff]  }
  0x26   : > { %11903 = vmatprep.subr.bf16.mxu0 %v12966_v29  ;;  %1555 = vst [vmem:[#allocation3 + $0x8] sm:$0xf] %v1414_v26  ;;  %v6544_v29 = vld [vmem:[#allocation2] sm:$0xe]  ;;  %703 = vst [vmem:[#allocation2 + $0x14] sm:$0x1] %v11102_v25  ;;  %v1417_v35 = vsel %vm13717_vm7, %v1415_v27, %v1416_v22 }
  0x27   : > { %12014 = vmatpush3.bf16.msra.mxu1 %v12965_v28  ;;  %v492_v28 = vsel %vm13724_vm8, 0, %v351_v20  ;;  %1556 = vst [vmem:[#allocation3 + $0x2c] sm:$0xf] %v1417_v35  ;;  %v11461_v39 = vrot.slane %v6544_v29, 9  ;;  %v355_v51 = vrot.slane %v353_v45, 7  ;;  %v360_v53 = vshrl.u32 %v237_v41, 16 }
  0x28   : > { %12015 = vmatprep.subr.bf16.mxu1 %v12968_v31  ;;  %v5984_v31 = vld [vmem:[#allocation2] sm:$0xf]  ;;  %v11100_v33 = vcombine.low %v492_v28, %v492_v28  ;;  %v11101_v34 = vcombine.high %v492_v28, %v492_v28  ;;  %v3252_v43 = vld [vmem:[#allocation3] sm:$0xff]  ;;  %v363_v54 = vshll.u32 %v237_v41, 16  ;;  %v370_v58 = vshll.u32 %v239_v42, 16  ;;  %v13004_v19 = vld [vmem:[%s16853_s1 + $0x128] sm:$0xff]  }
  0x29   : > { %11904 = vmatpush3.bf16.msra.mxu0 %v12967_v30  ;;  %v6642_v30 = vrot.slane %v13728_v18, 5  ;;  %v3257_v47 = vld [vmem:[#allocation3 + $0x24] sm:$0xff]  ;;  %6016 = vst [vmem:[#allocation3] sm:$0xf] %v5984_v31  ;;  %v358_v62 = vor.u32 %v356_v46, %v355_v51  ;;  %v509_v0 = vsel %vm13724_vm8, %v355_v51, 0  ;;  %v362_v1 = vrot.slane %v360_v53, 7 }
  0x2a   : > { %12113 = vmatprep.subr.bf16.mxu0 %v12975_v56  ;;  %701 = vst [vmem:[#allocation2 + $0xc] sm:$0xf] %v11100_v33  ;;  %702 = vst [vmem:[#allocation2 + $0x10] sm:$0xf] %v11101_v34  ;;  %v12969_v48 = vld [vmem:[#allocation3 + $0x4] ss:$36 sps:$4 sm:$0xff]   ;;  %v11197_v50 = vcombine.low %v3252_v43, %v3257_v47  ;;  %v11105_v4 = vcombine.low %v509_v0, %v509_v0 }
  0x2b   : > { %12016 = vmatpush3.bf16.msra.mxu1 %v12971_v40  ;;  %v12976_v40 = vld [vmem:[%s16853_s1 + $0x138] sm:$0xff]   ;;  %v6644_v44 = vrot.slane %v6642_v30, 4  ;;  %6017 = vst [vmem:[#allocation3 + $0x24] sm:$0xf] %v5985_v32  ;;  %6512 = vst [vmem:[#allocation3 + $0x4] sm:$0xf] %v6109_v37  ;;  %4763 = vmatprep.mubr.bf16.mxu0 %v12969_v48  ;;  %v6643_v9 = vsel %vm13717_vm7, %v11461_v39, %v6642_v30  ;;  %v365_v11 = vor.u32 %v363_v54, %v362_v1 }
  0x2c   : > { %6513 = vst [vmem:[#allocation3 + $0x28] sm:$0xf] %v6119_v38  ;;  %v367_v56 = vshrl.u32 %v239_v42, 16  ;;  %4764 = vmatmul.mubr.bf16.vlgmr.msra.gmra.mxu0 %v11197_v50  ;;  %706 = vst [vmem:[#allocation2 + $0x20] sm:$0x1] %v11105_v4  ;;  %v13018_v25 = vld [vmem:[%s16853_s1 + $0x160] sm:$0xff]  }
  0x2d   : > { %v818_v61 = vld [vmem:[#allocation2 + $0x14] sm:$0x1]  ;;  %12114 = vmatpush3.bf16.msra.mxu0 %v12976_v40  ;;  %v6646_v13 = vsel %vm13717_vm7, %v6644_v44, %v6645_v49  ;;  %v493_v27 = vsel %vm13724_vm8, 0, %v358_v62  ;;  %v494_v30 = vsel %vm13724_vm8, 0, %v365_v11  ;;  %v510_v42 = vsel %vm13724_vm8, %v362_v1, 0  ;;  %v13020_v47 = vld [vmem:[%s16853_s1 + $0x120] sm:$0xff]  }
  0x2e   : > { %v13761_v63 = vld [vmem:[#allocation2 + $0x14] sm:$0x1]  ;;  %v908_v2 = vshll.u32 %v818_v61, 16  ;;  %v13766_v5 = vrot.slane %v367_v56, 7  ;;  %12115 = vmatprep.subr.bf16.mxu0 %v12986_v52  ;;  %v11103_v35 = vcombine.low %v493_v27, %v493_v27  ;;  %v11104_v36 = vcombine.high %v493_v27, %v493_v27  ;;  %v13034_v48 = vld [vmem:[%s16853_s1 + $0x158] sm:$0xff]  }
  0x2f   : > { %v1423_v3 = vrot.slane %v13761_v63, 5  ;;  %v11106_v38 = vcombine.low %v494_v30, %v494_v30  ;;  %v11107_v41 = vcombine.high %v494_v30, %v494_v30  ;;  %v11108_v45 = vcombine.low %v510_v42, %v510_v42  ;;  %v13050_v11 = vld [vmem:[%s16853_s1 + $0x150] sm:$0xff]  }
  0x30   : > { %v372_v18 = vor.u32 %v370_v58, %v13766_v5  ;;  %v910_v26 = vrot.slane %v908_v2, 5  ;;  %704 = vst [vmem:[#allocation2 + $0x18] sm:$0xf] %v11103_v35  ;;  %705 = vst [vmem:[#allocation2 + $0x1c] sm:$0xf] %v11104_v36  ;;  %v511_v0 = vsel %vm13724_vm8, %v13766_v5, 0 }
  0x31   : > { %v1587_v7 = vld [vmem:[#allocation2 + $0xc] sm:$0xf]  ;;  %v1588_v8 = vld [vmem:[#allocation2 + $0x10] sm:$0xf]  ;;  %12116 = vmatpush3.bf16.msra.mxu0 %v12988_v55  ;;  %707 = vst [vmem:[#allocation2 + $0x24] sm:$0xf] %v11106_v38 }
  0x32   : > { %v751_v10 = vld [vmem:[#allocation2 + $0xc] sm:$0xf]  ;;  %1619 = vst [vmem:[#allocation3 + $0xc] sm:$0xf] %v1587_v7  ;;  %1620 = vst [vmem:[#allocation3 + $0x30] sm:$0xf] %v1588_v8  ;;  %12117 = vmatprep.subr.bf16.mxu0 %v13002_v6  ;;  %v11111_v6 = vcombine.low %v511_v0, %v511_v0 }
  0x33   : > { %v752_v14 = vld [vmem:[#allocation2 + $0x10] sm:$0xf]  ;;  %783 = vst [vmem:[#allocation3 + $0x48] sm:$0xf] %v751_v10  ;;  %v816_v16 = vld [vmem:[#allocation2 + $0xc] sm:$0xf] }
  0x34   : > { %v817_v17 = vld [vmem:[#allocation2 + $0x10] sm:$0xf]  ;;  %784 = vst [vmem:[#allocation3 + $0x6c] sm:$0xf] %v752_v14  ;;  %v889_v20 = vshrl.u32 %v816_v16, 16  ;;  %v892_v21 = vshll.u32 %v816_v16, 16 }
  0x35   : > { %v898_v22 = vshll.u32 %v817_v17, 16  ;;  %v902_v23 = vshrl.u32 %v817_v17, 16  ;;  %v1315_v24 = vld [vmem:[#allocation2 + $0xc] sm:$0xe]  ;;  %v1316_v28 = vld [vmem:[#allocation2 + $0x10] sm:$0xf]  ;;  %12118 = vmatpush3.bf16.msra.mxu0 %v13004_v19 }
  0x36   : > { %v11149_v29 = vrot.slane %v1315_v24, 9  ;;  %v891_v31 = vrot.slane %v889_v20, 4  ;;  %v894_v32 = vrot.slane %v892_v21, 5  ;;  %v1420_v37 = vrot.slane %v1316_v28, 5  ;;  %708 = vst [vmem:[#allocation2 + $0x28] sm:$0xf] %v11107_v41  ;;  %12119 = vmatprep.subr.bf16.mxu0 %v13018_v25 }
  0x37   : > { %v900_v33 = vrot.slane %v898_v22, 5  ;;  %v904_v34 = vrot.slane %v902_v23, 4  ;;  %v495_v46 = vsel %vm13724_vm8, 0, %v372_v18  ;;  %v821_v61 = vld [vmem:[#allocation2 + $0x20] sm:$0x1]  ;;  %v374_v1 = vshrl.u32 %v13756_v59, 16 }
  0x38   : > { %v895_v39 = vor.u32 %v894_v32, %v891_v31  ;;  %v1421_v43 = vsel %vm13717_vm7, %v11149_v29, %v1420_v37  ;;  %v1422_v44 = vrot.slane %v1420_v37, 4  ;;  %v11109_v54 = vcombine.low %v495_v46, %v495_v46  ;;  %v13802_v62 = vld [vmem:[#allocation2 + $0x20] sm:$0x1]  ;;  %709 = vst [vmem:[#allocation2 + $0x2c] sm:$0x1] %v11108_v45  ;;  %v13052_v17 = vld [vmem:[%s16853_s1 + $0x110] sm:$0xff]  }
  0x39   : > { %v905_v40 = vor.u32 %v904_v34, %v900_v33  ;;  %v3253_v49 = vld [vmem:[#allocation3 + $0x8] sm:$0xff]  ;;  %1557 = vst [vmem:[#allocation3 + $0x50] sm:$0xf] %v1421_v43  ;;  %v11110_v55 = vcombine.high %v495_v46, %v495_v46  ;;  %v932_v4 = vshll.u32 %v821_v61, 16  ;;  %v376_v5 = vrot.slane %v374_v1, 7  ;;  %12120 = vmatpush3.bf16.msra.mxu0 %v13020_v47 }
  0x3a   : > { %v3258_v50 = vld [vmem:[#allocation3 + $0x2c] sm:$0xff]  ;;  %v896_v52 = vrot.slane %v895_v39, 4  ;;  %6784 = vst [vmem:[#allocation3 + $0x8] sm:$0xf] %v6643_v9  ;;  %v1424_v58 = vsel %vm13717_vm7, %v1422_v44, %v1423_v3  ;;  %v1430_v3 = vrot.slane %v13802_v62, 5  ;;  %v377_v7 = vshll.u32 %v13756_v59, 16  ;;  %12121 = vmatprep.subr.bf16.mxu0 %v13034_v48 }
  0x3b   : > { %v12973_v51 = vld [vmem:[#allocation3 + $0xc] ss:$36 sps:$4 sm:$0xff]   ;;  %v906_v53 = vrot.slane %v905_v40, 4  ;;  %6785 = vst [vmem:[#allocation3 + $0x2c] sm:$0xf] %v6646_v13  ;;  %v11199_v56 = vcombine.low %v3253_v49, %v3258_v50  ;;  %v381_v8 = vshrl.u32 %v13759_v60, 16 }
  0x3c   : > { %4924 = vmatprep.mubr.bf16.mxu1 %v12973_v51  ;;  %v901_v2 = vsel %vm13709_vm5, %v896_v52, %v900_v33  ;;  %1558 = vst [vmem:[#allocation3 + $0x74] sm:$0xf] %v1424_v58  ;;  %710 = vst [vmem:[#allocation2 + $0x30] sm:$0xf] %v11109_v54  ;;  %v13036_v9 = vld [vmem:[%s16853_s1 + $0x118] sm:$0xff]   ;;  %v384_v10 = vshll.u32 %v13759_v60, 16  ;;  %v379_v14 = vor.u32 %v377_v7, %v376_v5 }
  0x3d   : > { %v911_v63 = vsel %vm13709_vm5, %v906_v53, %v910_v26  ;;  %711 = vst [vmem:[#allocation2 + $0x34] sm:$0xf] %v11110_v55  ;;  %4925 = vmatmul.mubr.bf16.vlgmr.msra.gmra.mxu1 %v11199_v56  ;;  %1282 = vst [vmem:[#allocation3 + $0x4c] sm:$0xf] %v901_v2  ;;  %v13822_v13 = vrot.slane %v932_v4, 5  ;;  %v512_v59 = vsel %vm13724_vm8, %v376_v5, 0  ;;  %12122 = vmatpush3.bf16.msra.mxu0 %v13036_v9 }
  0x3e   : > { %1283 = vst [vmem:[#allocation3 + $0x70] sm:$0xf] %v911_v63  ;;  %712 = vst [vmem:[#allocation2 + $0x38] sm:$0x1] %v11111_v6  ;;  %v383_v16 = vrot.slane %v381_v8, 7  ;;  %v11114_v20 = vcombine.low %v512_v59, %v512_v59  ;;  %12123 = vmatprep.subr.bf16.mxu0 %v13050_v11  ;;  %v496_v33 = vsel %vm13724_vm8, 0, %v379_v14 }
  0x3f   : > { %v1589_v18 = vld [vmem:[#allocation2 + $0x18] sm:$0xf]  ;;  %v1590_v19 = vld [vmem:[#allocation2 + $0x1c] sm:$0xf]  ;;  %v1591_v32 = vld [vmem:[#allocation2 + $0x24] sm:$0xf]  ;;  %v11112_v37 = vcombine.low %v496_v33, %v496_v33  ;;  %v11113_v38 = vcombine.high %v496_v33, %v496_v33 }
  0x40   : > { %v753_v60 = vld [vmem:[#allocation2 + $0x18] sm:$0xf]  ;;  %1621 = vst [vmem:[#allocation3 + $0x54] sm:$0xf] %v1589_v18  ;;  %1622 = vst [vmem:[#allocation3 + $0x78] sm:$0xf] %v1590_v19  ;;  %v386_v24 = vor.u32 %v384_v10, %v383_v16 }
  0x41   : > { %v754_v21 = vld [vmem:[#allocation2 + $0x1c] sm:$0xf]  ;;  %785 = vst [vmem:[#allocation3 + $0x90] sm:$0xf] %v753_v60  ;;  %v819_v22 = vld [vmem:[#allocation2 + $0x18] sm:$0xf]  ;;  %12124 = vmatpush3.bf16.msra.mxu0 %v13052_v17 }
  0x42   : > { %v820_v23 = vld [vmem:[#allocation2 + $0x1c] sm:$0xf]  ;;  %786 = vst [vmem:[#allocation3 + $0xb4] sm:$0xf] %v754_v21  ;;  %v913_v25 = vshrl.u32 %v819_v22, 16  ;;  %v916_v26 = vshll.u32 %v819_v22, 16 }
  0x43   : > { %v922_v27 = vshll.u32 %v820_v23, 16  ;;  %v926_v28 = vshrl.u32 %v820_v23, 16  ;;  %v1318_v29 = vld [vmem:[#allocation2 + $0x18] sm:$0xe]  ;;  %715 = vst [vmem:[#allocation2 + $0x44] sm:$0x1] %v11114_v20 }
  0x44   : > { %v1319_v30 = vld [vmem:[#allocation2 + $0x1c] sm:$0xf]  ;;  %v11150_v31 = vrot.slane %v1318_v29, 9  ;;  %v915_v35 = vrot.slane %v913_v25, 4  ;;  %v918_v36 = vrot.slane %v916_v26, 5  ;;  %v13832_v39 = vld [vmem:[%s13698_s14 + $0x30] sm:$0xff]  }
  0x45   : > { %v12977_v34 = vld [vmem:[#allocation3 + $0x4c] ss:$36 sps:$4 sm:$0xff]   ;;  %1623 = vst [vmem:[#allocation3 + $0x9c] sm:$0xf] %v1591_v32  ;;  %v924_v41 = vrot.slane %v922_v27, 5  ;;  %v928_v42 = vrot.slane %v926_v28, 4 }
  0x46   : > { %v12979_v40 = vld [vmem:[#allocation3 + $0x48] ss:$36 sps:$4 sm:$0xff]   ;;  %v1427_v43 = vrot.slane %v1319_v30, 5  ;;  %v497_v44 = vsel %vm13724_vm8, 0, %v386_v24  ;;  %4771 = vmatprep.mubr.bf16.mxu0 %v12977_v34  ;;  %v919_v45 = vor.u32 %v918_v36, %v915_v35  ;;  %v1592_v46 = vld [vmem:[#allocation2 + $0x28] sm:$0xf] }
  0x47   : > { %v755_v47 = vld [vmem:[#allocation2 + $0x24] sm:$0xf]  ;;  %v756_v48 = vld [vmem:[#allocation2 + $0x28] sm:$0xf]  ;;  %713 = vst [vmem:[#allocation2 + $0x3c] sm:$0xf] %v11112_v37  ;;  %v11115_v49 = vcombine.low %v497_v44, %v497_v44  ;;  %v11116_v50 = vcombine.high %v497_v44, %v497_v44  ;;  %4772 = vmatmul.mubr.bf16.gmra.mxu0 %v12979_v40  ;;  %v929_v51 = vor.u32 %v928_v42, %v924_v41 }
  0x48   : > { %714 = vst [vmem:[#allocation2 + $0x40] sm:$0xf] %v11113_v38  ;;  %v1428_v52 = vsel %vm13717_vm7, %v11150_v31, %v1427_v43  ;;  %v1429_v53 = vrot.slane %v1427_v43, 4  ;;  %1624 = vst [vmem:[#allocation3 + $0xc0] sm:$0xf] %v1592_v46  ;;  %v513_v56 = vsel %vm13724_vm8, %v383_v16, 0 }
  0x49   : > { %787 = vst [vmem:[#allocation3 + $0xd8] sm:$0xf] %v755_v47  ;;  %788 = vst [vmem:[#allocation3 + $0xfc] sm:$0xf] %v756_v48  ;;  %v822_v54 = vld [vmem:[#allocation2 + $0x24] sm:$0xf]  ;;  %v11117_v1 = vcombine.low %v513_v56, %v513_v56 }
  0x4a   : > { %v823_v55 = vld [vmem:[#allocation2 + $0x28] sm:$0xf]  ;;  %v12981_v58 = vld [vmem:[#allocation3 + $0x54] ss:$36 sps:$4 sm:$0xff]   ;;  %v920_v61 = vrot.slane %v919_v45, 4  ;;  %v937_v0 = vshrl.u32 %v822_v54, 16  ;;  %v1431_v4 = vsel %vm13717_vm7, %v1429_v53, %v1430_v3 }
  0x4b   : > { %1559 = vst [vmem:[#allocation3 + $0x98] sm:$0xf] %v1428_v52  ;;  %716 = vst [vmem:[#allocation2 + $0x48] sm:$0xf] %v11115_v49  ;;  %v12983_v2 = vld [vmem:[#allocation3 + $0x50] ss:$36 sps:$4 sm:$0xff]   ;;  %4932 = vmatprep.mubr.bf16.mxu1 %v12981_v58 }
  0x4c   : > { %717 = vst [vmem:[#allocation2 + $0x4c] sm:$0xf] %v11116_v50  ;;  %v930_v63 = vrot.slane %v929_v51, 4  ;;  %v824_v6 = vld [vmem:[#allocation2 + $0x2c] sm:$0x1]  ;;  %v940_v5 = vshll.u32 %v822_v54, 16  ;;  %v925_v7 = vsel %vm13709_vm5, %v920_v61, %v924_v41  ;;  %4933 = vmatmul.mubr.bf16.gmra.mxu1 %v12983_v2 }
  0x4d   : > { %1560 = vst [vmem:[#allocation3 + $0xbc] sm:$0xf] %v1431_v4  ;;  %v939_v8 = vrot.slane %v937_v0, 4  ;;  %v946_v9 = vshll.u32 %v823_v55, 16  ;;  %v950_v10 = vshrl.u32 %v823_v55, 16  ;;  %v956_v3 = vshll.u32 %v824_v6, 16 }
  0x4e   : > { %v1321_v11 = vld [vmem:[#allocation2 + $0x24] sm:$0xe]  ;;  %718 = vst [vmem:[#allocation2 + $0x50] sm:$0x1] %v11117_v1  ;;  %v935_v62 = vsel %vm13709_vm5, %v930_v63, %v13822_v13  ;;  %1284 = vst [vmem:[#allocation3 + $0x94] sm:$0xf] %v925_v7 }
  0x4f   : > { %v942_v14 = vrot.slane %v940_v5, 5  ;;  %v1322_v59 = vld [vmem:[#allocation2 + $0x28] sm:$0xf]  ;;  %v1323_v16 = vld [vmem:[#allocation2 + $0x2c] sm:$0x1]  ;;  %v948_v17 = vrot.slane %v946_v9, 5 }
  0x50   : > { %1285 = vst [vmem:[#allocation3 + $0xb8] sm:$0xf] %v935_v62  ;;  %v952_v18 = vrot.slane %v950_v10, 4  ;;  %v11151_v19 = vrot.slane %v1321_v11, 9  ;;  %v1434_v60 = vrot.slane %v1322_v59, 5  ;;  %v958_v22 = vrot.slane %v956_v3, 5 }
  0x51   : > { %v1593_v20 = vld [vmem:[#allocation2 + $0x30] sm:$0xf]  ;;  %v943_v21 = vor.u32 %v942_v14, %v939_v8  ;;  %v1437_v23 = vrot.slane %v1323_v16, 5  ;;  %v1594_v24 = vld [vmem:[#allocation2 + $0x34] sm:$0xf]  ;;  %v388_v30 = vshrl.u32 %v13832_v39, 16 }
  0x52   : > { %1625 = vst [vmem:[#allocation3 + $0xe4] sm:$0xf] %v1593_v20  ;;  %v757_v25 = vld [vmem:[#allocation2 + $0x30] sm:$0xf]  ;;  %v953_v26 = vor.u32 %v952_v18, %v948_v17  ;;  %v1435_v13 = vsel %vm13717_vm7, %v11151_v19, %v1434_v60  ;;  %v1436_v27 = vrot.slane %v1434_v60, 4  ;;  %v13066_v40 = vld [vmem:[%s16853_s1 + $0x148] sm:$0xff]  }
  0x53   : > { %1626 = vst [vmem:[#allocation3 + $0x108] sm:$0xf] %v1594_v24  ;;  %v758_v28 = vld [vmem:[#allocation2 + $0x34] sm:$0xf]  ;;  %789 = vst [vmem:[#allocation3 + $0x120] sm:$0xf] %v757_v25  ;;  %12125 = vmatprep.subr.bf16.mxu0 %v13066_v40 }
  0x54   : > { %v825_v29 = vld [vmem:[#allocation2 + $0x30] sm:$0xf]  ;;  %v944_v31 = vrot.slane %v943_v21, 4  ;;  %1561 = vst [vmem:[#allocation3 + $0xe0] sm:$0xf] %v1435_v13  ;;  %v954_v34 = vrot.slane %v953_v26, 4  ;;  %v1438_v35 = vsel %vm13717_vm7, %v1436_v27, %v1437_v23 }
  0x55   : > { %790 = vst [vmem:[#allocation3 + $0x144] sm:$0xf] %v758_v28  ;;  %v826_v32 = vld [vmem:[#allocation2 + $0x34] sm:$0xf]  ;;  %v827_v33 = vld [vmem:[#allocation2 + $0x38] sm:$0x1] }
  0x56   : > { %v961_v36 = vshrl.u32 %v825_v29, 16  ;;  %v964_v37 = vshll.u32 %v825_v29, 16  ;;  %v1324_v38 = vld [vmem:[#allocation2 + $0x30] sm:$0xe]  ;;  %v12990_v41 = vld [vmem:[#allocation3 + $0x9c] ss:$36 sps:$4 sm:$0xff]   ;;  %v949_v43 = vsel %vm13709_vm5, %v944_v31, %v948_v17  ;;  %v959_v45 = vsel %vm13709_vm5, %v954_v34, %v958_v22 }
  0x57   : > { %v12992_v42 = vld [vmem:[#allocation3 + $0x98] ss:$36 sps:$4 sm:$0xff]   ;;  %1562 = vst [vmem:[#allocation3 + $0x104] sm:$0xf] %v1438_v35  ;;  %v970_v44 = vshll.u32 %v826_v32, 16  ;;  %v974_v48 = vshrl.u32 %v826_v32, 16  ;;  %4940 = vmatprep.mubr.bf16.mxu1 %v12990_v41 }
  0x58   : > { %1286 = vst [vmem:[#allocation3 + $0xdc] sm:$0xf] %v949_v43  ;;  %v963_v46 = vrot.slane %v961_v36, 4  ;;  %v966_v47 = vrot.slane %v964_v37, 5  ;;  %v1325_v49 = vld [vmem:[#allocation2 + $0x34] sm:$0xf]  ;;  %4941 = vmatmul.mubr.bf16.gmra.mxu1 %v12992_v42 }
  0x59   : > { %v12984_v50 = vld [vmem:[#allocation3 + $0x94] ss:$36 sps:$4 sm:$0xff]   ;;  %1287 = vst [vmem:[#allocation3 + $0x100] sm:$0xf] %v959_v45  ;;  %v972_v52 = vrot.slane %v970_v44, 5  ;;  %v976_v54 = vrot.slane %v974_v48, 4 }
  0x5a   : > { %v12987_v51 = vld [vmem:[#allocation3 + $0x90] ss:$36 sps:$4 sm:$0xff]   ;;  %v967_v53 = vor.u32 %v966_v47, %v963_v46  ;;  %v980_v55 = vshll.u32 %v827_v33, 16  ;;  %v1326_v56 = vld [vmem:[#allocation2 + $0x38] sm:$0x1]  ;;  %v11152_v58 = vrot.slane %v1324_v38, 9  ;;  %4779 = vmatprep.mubr.bf16.mxu0 %v12984_v50 }
  0x5b   : > { %v13068_v61 = vld [vmem:[%s16853_s1 + $0x108] sm:$0xff]   ;;  %v1441_v0 = vrot.slane %v1325_v49, 5  ;;  %v1444_v1 = vrot.slane %v1326_v56, 5  ;;  %v1595_v2 = vld [vmem:[#allocation2 + $0x3c] sm:$0xf]  ;;  %4780 = vmatmul.mubr.bf16.gmra.mxu0 %v12987_v51  ;;  %v977_v6 = vor.u32 %v976_v54, %v972_v52  ;;  %v13864_v8 = vrot.slane %v388_v30, 7 }
  0x5c   : > { %v1596_v63 = vld [vmem:[#allocation2 + $0x40] sm:$0xf]  ;;  %v968_v4 = vrot.slane %v967_v53, 4  ;;  %v982_v5 = vrot.slane %v980_v55, 5  ;;  %1627 = vst [vmem:[#allocation3 + $0x12c] sm:$0xf] %v1595_v2  ;;  %12126 = vmatpush3.bf16.msra.mxu0 %v13068_v61 }
  0x5d   : > { %1628 = vst [vmem:[#allocation3 + $0x150] sm:$0xf] %v1596_v63  ;;  %v759_v7 = vld [vmem:[#allocation2 + $0x3c] sm:$0xf]  ;;  %v1442_v9 = vsel %vm13717_vm7, %v11152_v58, %v1441_v0  ;;  %v1443_v10 = vrot.slane %v1441_v0, 4  ;;  %v391_v14 = vshll.u32 %v13832_v39, 16 }
  0x5e   : > { %v760_v11 = vld [vmem:[#allocation2 + $0x40] sm:$0xf]  ;;  %791 = vst [vmem:[#allocation3 + $0x168] sm:$0xf] %v759_v7  ;;  %v828_v62 = vld [vmem:[#allocation2 + $0x3c] sm:$0xf]  ;;  %v973_v16 = vsel %vm13709_vm5, %v968_v4, %v972_v52 }
  0x5f   : > { %v12997_v3 = vld [vmem:[#allocation3 + $0xe4] ss:$36 sps:$4 sm:$0xff]   ;;  %v978_v17 = vrot.slane %v977_v6, 4  ;;  %1563 = vst [vmem:[#allocation3 + $0x128] sm:$0xf] %v1442_v9  ;;  %v1445_v18 = vsel %vm13717_vm7, %v1443_v10, %v1444_v1  ;;  %v985_v20 = vshrl.u32 %v828_v62, 16  ;;  %v393_v24 = vor.u32 %v391_v14, %v13864_v8 }
  0x60   : > { %v12999_v59 = vld [vmem:[#allocation3 + $0xe0] ss:$36 sps:$4 sm:$0xff]   ;;  %792 = vst [vmem:[#allocation3 + $0x18c] sm:$0xf] %v760_v11  ;;  %1288 = vst [vmem:[#allocation3 + $0x124] sm:$0xf] %v973_v16  ;;  %4948 = vmatprep.mubr.bf16.mxu1 %v12997_v3 }
  0x61   : > { %v829_v19 = vld [vmem:[#allocation2 + $0x40] sm:$0xf]  ;;  %v830_v60 = vld [vmem:[#allocation2 + $0x44] sm:$0x1]  ;;  %v12993_v21 = vld [vmem:[#allocation3 + $0xdc] ss:$36 sps:$4 sm:$0xff]   ;;  %v983_v39 = vsel %vm13709_vm5, %v978_v17, %v982_v5  ;;  %4949 = vmatmul.mubr.bf16.gmra.mxu1 %v12999_v59 }
  0x62   : > { %v12995_v22 = vld [vmem:[#allocation3 + $0xd8] ss:$36 sps:$4 sm:$0xff]   ;;  %1564 = vst [vmem:[#allocation3 + $0x14c] sm:$0xf] %v1445_v18  ;;  %v988_v23 = vshll.u32 %v828_v62, 16  ;;  %v987_v25 = vrot.slane %v985_v20, 4  ;;  %4787 = vmatprep.mubr.bf16.mxu0 %v12993_v21 }
  0x63   : > { %1289 = vst [vmem:[#allocation3 + $0x148] sm:$0xf] %v983_v39  ;;  %v994_v26 = vshll.u32 %v829_v19, 16  ;;  %v998_v13 = vshrl.u32 %v829_v19, 16  ;;  %v1004_v27 = vshll.u32 %v830_v60, 16  ;;  %v13877_v38 = vld [vmem:[%s13698_s14 + $0x38] sm:$0xff]   ;;  %4788 = vmatmul.mubr.bf16.gmra.mxu0 %v12995_v22 }
  0x64   : > { %v1327_v28 = vld [vmem:[#allocation2 + $0x3c] sm:$0xe]  ;;  %v990_v29 = vrot.slane %v988_v23, 5  ;;  %v1328_v30 = vld [vmem:[#allocation2 + $0x40] sm:$0xf]  ;;  %v498_v44 = vsel %vm13724_vm8, 0, %v393_v24 }
  0x65   : > { %v1329_v31 = vld [vmem:[#allocation2 + $0x44] sm:$0x1]  ;;  %v11153_v32 = vrot.slane %v1327_v28, 9  ;;  %v996_v33 = vrot.slane %v994_v26, 5  ;;  %v1000_v34 = vrot.slane %v998_v13, 4  ;;  %v1006_v35 = vrot.slane %v1004_v27, 5 }
  0x66   : > { %v1448_v36 = vrot.slane %v1328_v30, 5  ;;  %v1597_v37 = vld [vmem:[#allocation2 + $0x48] sm:$0xf]  ;;  %v991_v40 = vor.u32 %v990_v29, %v987_v25  ;;  %v1451_v41 = vrot.slane %v1329_v31, 5  ;;  %v1598_v42 = vld [vmem:[#allocation2 + $0x4c] sm:$0xf]  ;;  %v11118_v50 = vcombine.low %v498_v44, %v498_v44 }
  0x67   : > { %1629 = vst [vmem:[#allocation3 + $0x174] sm:$0xf] %v1597_v37  ;;  %v761_v43 = vld [vmem:[#allocation2 + $0x48] sm:$0xf]  ;;  %v1001_v45 = vor.u32 %v1000_v34, %v996_v33  ;;  %1630 = vst [vmem:[#allocation3 + $0x198] sm:$0xf] %v1598_v42  ;;  %v11119_v54 = vcombine.high %v498_v44, %v498_v44 }
  0x68   : > { %v1449_v46 = vsel %vm13717_vm7, %v11153_v32, %v1448_v36  ;;  %v1450_v47 = vrot.slane %v1448_v36, 4  ;;  %v762_v48 = vld [vmem:[#allocation2 + $0x4c] sm:$0xf]  ;;  %793 = vst [vmem:[#allocation3 + $0x1b0] sm:$0xf] %v761_v43  ;;  %v992_v51 = vrot.slane %v991_v40, 4 }
  0x69   : > { %v831_v49 = vld [vmem:[#allocation2 + $0x48] sm:$0xf]  ;;  %1565 = vst [vmem:[#allocation3 + $0x170] sm:$0xf] %v1449_v46  ;;  %794 = vst [vmem:[#allocation3 + $0x1d4] sm:$0xf] %v762_v48 }
  0x6a   : > { %v832_v52 = vld [vmem:[#allocation2 + $0x4c] sm:$0xf]  ;;  %v833_v53 = vld [vmem:[#allocation2 + $0x50] sm:$0x1]  ;;  %v13006_v55 = vld [vmem:[#allocation3 + $0x12c] ss:$36 sps:$4 sm:$0xff]   ;;  %v1452_v61 = vsel %vm13717_vm7, %v1450_v47, %v1451_v41  ;;  %v997_v2 = vsel %vm13709_vm5, %v992_v51, %v996_v33 }
  0x6b   : > { %v13008_v56 = vld [vmem:[#allocation3 + $0x128] ss:$36 sps:$4 sm:$0xff]   ;;  %v1002_v58 = vrot.slane %v1001_v45, 4  ;;  %719 = vst [vmem:[#allocation2 + $0x54] sm:$0xf] %v11118_v50  ;;  %v1009_v63 = vshrl.u32 %v831_v49, 16  ;;  %4956 = vmatprep.mubr.bf16.mxu1 %v13006_v55 }
  0x6c   : > { %v13000_v0 = vld [vmem:[#allocation3 + $0x124] ss:$36 sps:$4 sm:$0xff]   ;;  %1566 = vst [vmem:[#allocation3 + $0x194] sm:$0xf] %v1452_v61  ;;  %720 = vst [vmem:[#allocation2 + $0x58] sm:$0xf] %v11119_v54  ;;  %4957 = vmatmul.mubr.bf16.gmra.mxu1 %v13008_v56 }
  0x6d   : > { %v13003_v1 = vld [vmem:[#allocation3 + $0x120] ss:$36 sps:$4 sm:$0xff]   ;;  %v1007_v4 = vsel %vm13709_vm5, %v1002_v58, %v1006_v35  ;;  %1290 = vst [vmem:[#allocation3 + $0x16c] sm:$0xf] %v997_v2  ;;  %v1012_v6 = vshll.u32 %v831_v49, 16  ;;  %v1018_v5 = vshll.u32 %v832_v52, 16  ;;  %4795 = vmatprep.mubr.bf16.mxu0 %v13000_v0 }
  0x6e   : > { %v1022_v7 = vshrl.u32 %v832_v52, 16  ;;  %v1330_v9 = vld [vmem:[#allocation2 + $0x48] sm:$0xe]  ;;  %1291 = vst [vmem:[#allocation3 + $0x190] sm:$0xf] %v1007_v4  ;;  %v1011_v10 = vrot.slane %v1009_v63, 4  ;;  %4796 = vmatmul.mubr.bf16.gmra.mxu0 %v13003_v1 }
  0x6f   : > { %v1028_v11 = vshll.u32 %v833_v53, 16  ;;  %v1331_v62 = vld [vmem:[#allocation2 + $0x4c] sm:$0xf]  ;;  %v1332_v14 = vld [vmem:[#allocation2 + $0x50] sm:$0x1]  ;;  %v1014_v3 = vrot.slane %v1012_v6, 5 }
  0x70   : > { %v1020_v59 = vrot.slane %v1018_v5, 5  ;;  %v1024_v16 = vrot.slane %v1022_v7, 4  ;;  %v11154_v17 = vrot.slane %v1330_v9, 9  ;;  %v1455_v19 = vrot.slane %v1331_v62, 5  ;;  %v13894_v24 = vld [vmem:[%s13698_s14 + $0x40] sm:$0xff]   ;;  %v13897_v25 = vld [vmem:[%s13698_s14 + $0x48] sm:$0xff]  }
  0x71   : > { %v1030_v18 = vrot.slane %v1028_v11, 5  ;;  %v1458_v60 = vrot.slane %v1332_v14, 5  ;;  %v514_v20 = vsel %vm13724_vm8, %v13864_v8, 0  ;;  %v1015_v21 = vor.u32 %v1014_v3, %v1011_v10  ;;  %v13013_v30 = vld [vmem:[#allocation3 + $0x174] ss:$36 sps:$4 sm:$0xff]   ;;  %v13912_v51 = vld [vmem:[%s13698_s14 + $0x58] sm:$0xff]  }
  0x72   : > { %v1025_v22 = vor.u32 %v1024_v16, %v1020_v59  ;;  %v11120_v39 = vcombine.low %v514_v20, %v514_v20  ;;  %v395_v23 = vshrl.u32 %v13877_v38, 16  ;;  %v1456_v26 = vsel %vm13717_vm7, %v11154_v17, %v1455_v19  ;;  %v1599_v27 = vld [vmem:[#allocation2 + $0x54] sm:$0xf]  ;;  %v13011_v37 = vld [vmem:[#allocation3 + $0x168] ss:$36 sps:$4 sm:$0xff]   ;;  %4964 = vmatprep.mubr.bf16.mxu1 %v13013_v30  ;;  %v13073_v58 = vld [vmem:[%s16853_s1 + $0x1f8] sm:$0xff]  }
  0x73   : > { %v1457_v13 = vrot.slane %v1455_v19, 4  ;;  %v763_v28 = vld [vmem:[#allocation2 + $0x54] sm:$0xf]  ;;  %v398_v29 = vshll.u32 %v13877_v38, 16  ;;  %v13015_v31 = vld [vmem:[#allocation3 + $0x170] ss:$36 sps:$4 sm:$0xff]   ;;  %12225 = vmatprep.subr.bf16.mxu1 %v13073_v58 }
  0x74   : > { %v1016_v8 = vrot.slane %v1015_v21, 4  ;;  %1567 = vst [vmem:[#allocation3 + $0x1b8] sm:$0xf] %v1456_v26  ;;  %1631 = vst [vmem:[#allocation3 + $0x1bc] sm:$0xf] %v1599_v27  ;;  %v1026_v32 = vrot.slane %v1025_v22, 4  ;;  %4965 = vmatmul.mubr.bf16.gmra.mxu1 %v13015_v31 }
  0x75   : > { %721 = vst [vmem:[#allocation2 + $0x5c] sm:$0x1] %v11120_v39  ;;  %795 = vst [vmem:[#allocation3 + $0x1f8] sm:$0xf] %v763_v28  ;;  %v1459_v33 = vsel %vm13717_vm7, %v1457_v13, %v1458_v60  ;;  %v1600_v34 = vld [vmem:[#allocation2 + $0x58] sm:$0xf] }
  0x76   : > { %v764_v35 = vld [vmem:[#allocation2 + $0x58] sm:$0xf]  ;;  %v13009_v36 = vld [vmem:[#allocation3 + $0x16c] ss:$36 sps:$4 sm:$0xff]   ;;  %v1021_v38 = vsel %vm13709_vm5, %v1016_v8, %v1020_v59  ;;  %1568 = vst [vmem:[#allocation3 + $0x1dc] sm:$0xf] %v1459_v33  ;;  %v1031_v42 = vsel %vm13709_vm5, %v1026_v32, %v1030_v18 }
  0x77   : > { %1632 = vst [vmem:[#allocation3 + $0x1e0] sm:$0xf] %v1600_v34  ;;  %796 = vst [vmem:[#allocation3 + $0x21c] sm:$0xf] %v764_v35  ;;  %v397_v40 = vrot.slane %v395_v23, 7  ;;  %v13907_v41 = vld [vmem:[%s13698_s14 + $0x50] sm:$0xff]   ;;  %4803 = vmatprep.mubr.bf16.mxu0 %v13009_v36 }
  0x78   : > { %1292 = vst [vmem:[#allocation3 + $0x1b4] sm:$0xf] %v1021_v38  ;;  %v834_v43 = vld [vmem:[#allocation2 + $0x54] sm:$0xf]  ;;  %v835_v44 = vld [vmem:[#allocation2 + $0x58] sm:$0xf]  ;;  %4804 = vmatmul.mubr.bf16.gmra.mxu0 %v13011_v37 }
  0x79   : > { %v1333_v45 = vld [vmem:[#allocation2 + $0x54] sm:$0xe]  ;;  %1293 = vst [vmem:[#allocation3 + $0x1d8] sm:$0xf] %v1031_v42  ;;  %v1033_v46 = vshrl.u32 %v834_v43, 16  ;;  %v1036_v47 = vshll.u32 %v834_v43, 16  ;;  %v400_v53 = vor.u32 %v398_v29, %v397_v40 }
  0x7a   : > { %v1042_v48 = vshll.u32 %v835_v44, 16  ;;  %v1046_v49 = vshrl.u32 %v835_v44, 16  ;;  %v1334_v50 = vld [vmem:[#allocation2 + $0x58] sm:$0xf]  ;;  %v13915_v52 = vld [vmem:[%s13698_s14 + $0x60] sm:$0xff]   ;;  %v11155_v54 = vrot.slane %v1333_v45, 9 }
  0x7b   : > { %v1462_v55 = vrot.slane %v1334_v50, 5  ;;  %v515_v56 = vsel %vm13724_vm8, %v397_v40, 0  ;;  %v1035_v61 = vrot.slane %v1033_v46, 4  ;;  %v1038_v0 = vrot.slane %v1036_v47, 5  ;;  %v13074_v14 = vld [vmem:[%s16853_s1 + $0x1b8] sm:$0xff]   ;;  %v13075_v21 = vld [vmem:[%s16853_s1 + $0x1f0] sm:$0xff]  }
  0x7c   : > { %v1044_v1 = vrot.slane %v1042_v48, 5  ;;  %v1048_v2 = vrot.slane %v1046_v49, 4  ;;  %v836_v63 = vld [vmem:[#allocation2 + $0x5c] sm:$0x1]  ;;  %v499_v4 = vsel %vm13724_vm8, 0, %v400_v53  ;;  %v11123_v7 = vcombine.low %v515_v56, %v515_v56  ;;  %12226 = vmatpush3.bf16.msra.mxu1 %v13074_v14  ;;  %v13078_v29 = vld [vmem:[%s16853_s1 + $0x1b0] sm:$0xff]  }
  0x7d   : > { %v1335_v6 = vld [vmem:[#allocation2 + $0x5c] sm:$0x1]  ;;  %v1463_v5 = vsel %vm13717_vm7, %v11155_v54, %v1462_v55  ;;  %v1039_v9 = vor.u32 %v1038_v0, %v1035_v61  ;;  %v1052_v11 = vshll.u32 %v836_v63, 16  ;;  %v11121_v62 = vcombine.low %v499_v4, %v499_v4  ;;  %v13024_v59 = vld [vmem:[#allocation3 + $0x1b8] ss:$36 sps:$4 sm:$0xff]   ;;  %12227 = vmatprep.subr.bf16.mxu1 %v13075_v21  ;;  %v13953_v40 = vld [vmem:[%s13698_s14 + $0x68] sm:$0xff]  }
  0x7e   : > { %v1049_v10 = vor.u32 %v1048_v2, %v1044_v1  ;;  %1569 = vst [vmem:[#allocation3 + $0x200] sm:$0xf] %v1463_v5  ;;  %v13022_v3 = vld [vmem:[#allocation3 + $0x1bc] ss:$36 sps:$4 sm:$0xff]   ;;  %v11122_v16 = vcombine.high %v499_v4, %v499_v4  ;;  %v1464_v17 = vrot.slane %v1462_v55, 4  ;;  %v1465_v20 = vrot.slane %v1335_v6, 5 }
  0x7f   : > { %724 = vst [vmem:[#allocation2 + $0x68] sm:$0x1] %v11123_v7  ;;  %v1040_v18 = vrot.slane %v1039_v9, 4  ;;  %v1054_v60 = vrot.slane %v1052_v11, 5  ;;  %722 = vst [vmem:[#allocation2 + $0x60] sm:$0xf] %v11121_v62  ;;  %4972 = vmatprep.mubr.bf16.mxu1 %v13022_v3 }
  0x80   : > { %v1050_v19 = vrot.slane %v1049_v10, 4  ;;  %v13016_v22 = vld [vmem:[#allocation3 + $0x1b4] ss:$36 sps:$4 sm:$0xff]   ;;  %723 = vst [vmem:[#allocation2 + $0x64] sm:$0xf] %v11122_v16  ;;  %v402_v23 = vshrl.u32 %v13894_v24, 16  ;;  %4973 = vmatmul.mubr.bf16.gmra.mxu1 %v13024_v59  ;;  %v1466_v27 = vsel %vm13717_vm7, %v1464_v17, %v1465_v20 }
  0x81   : > { %v13019_v39 = vld [vmem:[#allocation3 + $0x1b0] ss:$36 sps:$4 sm:$0xff]   ;;  %v1045_v26 = vsel %vm13709_vm5, %v1040_v18, %v1044_v1  ;;  %v405_v28 = vshll.u32 %v13894_v24, 16  ;;  %4811 = vmatprep.mubr.bf16.mxu0 %v13016_v22  ;;  %1570 = vst [vmem:[#allocation3 + $0x224] sm:$0xf] %v1466_v27  ;;  %v409_v31 = vshrl.u32 %v13897_v25, 16  ;;  %12228 = vmatpush3.bf16.msra.mxu1 %v13078_v29 }
  0x82   : > { %v1055_v13 = vsel %vm13709_vm5, %v1050_v19, %v1054_v60  ;;  %1294 = vst [vmem:[#allocation3 + $0x1fc] sm:$0xf] %v1045_v26  ;;  %v404_v30 = vrot.slane %v402_v23, 7  ;;  %v416_v8 = vshrl.u32 %v13907_v41, 16  ;;  %4812 = vmatmul.mubr.bf16.gmra.mxu0 %v13019_v39  ;;  %v412_v32 = vshll.u32 %v13897_v25, 16  ;;  %v13084_v60 = vld [vmem:[%s16853_s1 + $0x1e8] sm:$0xff]  }
  0x83   : > { %1295 = vst [vmem:[#allocation3 + $0x220] sm:$0xf] %v1055_v13  ;;  %v419_v24 = vshll.u32 %v13907_v41, 16  ;;  %v423_v33 = vshrl.u32 %v13912_v51, 16  ;;  %v430_v34 = vshrl.u32 %v13915_v52, 16  ;;  %v411_v37 = vrot.slane %v409_v31, 7  ;;  %12229 = vmatprep.subr.bf16.mxu1 %v13084_v60 }
  0x84   : > { %v407_v35 = vor.u32 %v405_v28, %v404_v30  ;;  %v516_v36 = vsel %vm13724_vm8, %v404_v30, 0  ;;  %v426_v38 = vshll.u32 %v13912_v51, 16  ;;  %v418_v44 = vrot.slane %v416_v8, 7  ;;  %v13027_v6 = vld [vmem:[#allocation3 + $0x1f8] ss:$36 sps:$4 sm:$0xff]   ;;  %v13085_v20 = vld [vmem:[%s16853_s1 + $0x1a8] sm:$0xff]  }
  0x85   : > { %v11126_v43 = vcombine.low %v516_v36, %v516_v36  ;;  %v13955_v25 = vrot.slane %v423_v33, 7  ;;  %v13957_v41 = vrot.slane %v430_v34, 7  ;;  %v414_v51 = vor.u32 %v412_v32, %v411_v37  ;;  %12230 = vmatpush3.bf16.msra.mxu1 %v13085_v20 }
  0x86   : > { %v839_v42 = vld [vmem:[#allocation2 + $0x68] sm:$0x1]  ;;  %v1601_v45 = vld [vmem:[#allocation2 + $0x60] sm:$0xf]  ;;  %v500_v2 = vsel %vm13724_vm8, 0, %v407_v35  ;;  %v421_v63 = vor.u32 %v419_v24, %v418_v44  ;;  %v517_v22 = vsel %vm13724_vm8, %v411_v37, 0 }
  0x87   : > { %v765_v46 = vld [vmem:[#allocation2 + $0x60] sm:$0xf]  ;;  %v1602_v48 = vld [vmem:[#allocation2 + $0x64] sm:$0xf]  ;;  %1633 = vst [vmem:[#allocation3 + $0x204] sm:$0xf] %v1601_v45  ;;  %v428_v4 = vor.u32 %v426_v38, %v13955_v25  ;;  %v11124_v62 = vcombine.low %v500_v2, %v500_v2  ;;  %v11125_v14 = vcombine.high %v500_v2, %v500_v2  ;;  %v11129_v33 = vcombine.low %v517_v22, %v517_v22 }
  0x88   : > { %v837_v47 = vld [vmem:[#allocation2 + $0x60] sm:$0xf]  ;;  %v766_v49 = vld [vmem:[#allocation2 + $0x64] sm:$0xf]  ;;  %797 = vst [vmem:[#allocation3 + $0x240] sm:$0xf] %v765_v46 }
  0x89   : > { %v838_v50 = vld [vmem:[#allocation2 + $0x64] sm:$0xf]  ;;  %v1338_v53 = vld [vmem:[#allocation2 + $0x68] sm:$0x1]  ;;  %727 = vst [vmem:[#allocation2 + $0x74] sm:$0x1] %v11126_v43 }
  0x8a   : > { %1634 = vst [vmem:[#allocation3 + $0x228] sm:$0xf] %v1602_v48  ;;  %798 = vst [vmem:[#allocation3 + $0x264] sm:$0xf] %v766_v49  ;;  %v1057_v54 = vshrl.u32 %v837_v47, 16  ;;  %v1060_v55 = vshll.u32 %v837_v47, 16 }
  0x8b   : > { %v1066_v56 = vshll.u32 %v838_v50, 16  ;;  %v1070_v58 = vshrl.u32 %v838_v50, 16  ;;  %v1336_v61 = vld [vmem:[#allocation2 + $0x60] sm:$0xe]  ;;  %v13025_v0 = vld [vmem:[#allocation3 + $0x1fc] ss:$36 sps:$4 sm:$0xff]  }
  0x8c   : > { %v1076_v1 = vshll.u32 %v839_v42, 16  ;;  %v1059_v5 = vrot.slane %v1057_v54, 4  ;;  %v1062_v7 = vrot.slane %v1060_v55, 5  ;;  %4819 = vmatprep.mubr.bf16.mxu0 %v13025_v0  ;;  %v1337_v3 = vld [vmem:[#allocation2 + $0x64] sm:$0xf]  ;;  %v11156_v59 = vrot.slane %v1336_v61, 9 }
  0x8d   : > { %v1068_v9 = vrot.slane %v1066_v56, 5  ;;  %v1072_v10 = vrot.slane %v1070_v58, 4  ;;  %4820 = vmatmul.mubr.bf16.gmra.mxu0 %v13027_v6  ;;  %v1469_v18 = vrot.slane %v1337_v3, 5  ;;  %v1472_v19 = vrot.slane %v1338_v53, 5  ;;  %725 = vst [vmem:[#allocation2 + $0x6c] sm:$0xf] %v11124_v62 }
  0x8e   : > { %v1078_v11 = vrot.slane %v1076_v1, 5  ;;  %v1063_v16 = vor.u32 %v1062_v7, %v1059_v5  ;;  %726 = vst [vmem:[#allocation2 + $0x70] sm:$0xf] %v11125_v14  ;;  %v501_v21 = vsel %vm13724_vm8, 0, %v414_v51  ;;  %v502_v39 = vsel %vm13724_vm8, 0, %v421_v63  ;;  %v13086_v46 = vld [vmem:[%s16853_s1 + $0x1e0] sm:$0xff]  }
  0x8f   : > { %v1073_v17 = vor.u32 %v1072_v10, %v1068_v9  ;;  %v518_v23 = vsel %vm13724_vm8, %v418_v44, 0  ;;  %v1470_v27 = vsel %vm13717_vm7, %v11156_v59, %v1469_v18  ;;  %v1471_v28 = vrot.slane %v1469_v18, 4  ;;  %v13031_v31 = vld [vmem:[#allocation3 + $0x200] ss:$36 sps:$4 sm:$0xff]   ;;  %730 = vst [vmem:[#allocation2 + $0x80] sm:$0x1] %v11129_v33  ;;  %12231 = vmatprep.subr.bf16.mxu1 %v13086_v46 }
  0x90   : > { %v1064_v26 = vrot.slane %v1063_v16, 4  ;;  %v842_v29 = vld [vmem:[#allocation2 + $0x74] sm:$0x1]  ;;  %1571 = vst [vmem:[#allocation3 + $0x248] sm:$0xf] %v1470_v27  ;;  %v11127_v32 = vcombine.low %v501_v21, %v501_v21  ;;  %v11128_v24 = vcombine.high %v501_v21, %v501_v21  ;;  %v11130_v38 = vcombine.low %v502_v39, %v502_v39  ;;  %v13089_v47 = vld [vmem:[%s16853_s1 + $0x140] sm:$0xff]  }
  0x91   : > { %v1074_v13 = vrot.slane %v1073_v17, 4  ;;  %v13029_v30 = vld [vmem:[#allocation3 + $0x204] ss:$36 sps:$4 sm:$0xff]   ;;  %v1100_v8 = vshll.u32 %v842_v29, 16  ;;  %v1473_v36 = vsel %vm13717_vm7, %v1471_v28, %v1472_v19  ;;  %v13984_v37 = vld [vmem:[#allocation2 + $0x74] sm:$0x1]  ;;  %v11131_v44 = vcombine.high %v502_v39, %v502_v39  ;;  %12127 = vmatprep.subr.bf16.mxu0 %v13089_v47 }
  0x92   : > { %v1069_v34 = vsel %vm13709_vm5, %v1064_v26, %v1068_v9  ;;  %4980 = vmatprep.mubr.bf16.mxu1 %v13029_v30  ;;  %1572 = vst [vmem:[#allocation3 + $0x26c] sm:$0xf] %v1473_v36  ;;  %728 = vst [vmem:[#allocation2 + $0x78] sm:$0xf] %v11127_v32  ;;  %v1479_v43 = vrot.slane %v13984_v37, 5  ;;  %v11132_v45 = vcombine.low %v518_v23, %v518_v23  ;;  %v503_v48 = vsel %vm13724_vm8, 0, %v428_v4 }
  0x93   : > { %v1079_v35 = vsel %vm13709_vm5, %v1074_v13, %v1078_v11  ;;  %1296 = vst [vmem:[#allocation3 + $0x244] sm:$0xf] %v1069_v34  ;;  %v13986_v42 = vrot.slane %v1100_v8, 5  ;;  %729 = vst [vmem:[#allocation2 + $0x7c] sm:$0xf] %v11128_v24  ;;  %4981 = vmatmul.mubr.bf16.gmra.mxu1 %v13031_v31  ;;  %v519_v49 = vsel %vm13724_vm8, %v13955_v25, 0  ;;  %v11133_v51 = vcombine.low %v503_v48, %v503_v48 }
  0x94   : > { %1297 = vst [vmem:[#allocation3 + $0x268] sm:$0xf] %v1079_v35  ;;  %731 = vst [vmem:[#allocation2 + $0x84] sm:$0xf] %v11130_v38  ;;  %v433_v50 = vshll.u32 %v13915_v52, 16  ;;  %v520_v53 = vsel %vm13724_vm8, %v13957_v41, 0  ;;  %v11134_v54 = vcombine.high %v503_v48, %v503_v48  ;;  %v11135_v55 = vcombine.low %v519_v49, %v519_v49 }
  0x95   : > { %732 = vst [vmem:[#allocation2 + $0x88] sm:$0xf] %v11131_v44  ;;  %733 = vst [vmem:[#allocation2 + $0x8c] sm:$0x1] %v11132_v45  ;;  %v11138_v56 = vcombine.low %v520_v53, %v520_v53  ;;  %v13090_v58 = vld [vmem:[%s16853_s1 + $0x1a0] sm:$0xff]   ;;  %v437_v62 = vshrl.u32 %v13953_v40, 16 }
  0x96   : > { %v1603_v61 = vld [vmem:[#allocation2 + $0x6c] sm:$0xf]  ;;  %v1604_v0 = vld [vmem:[#allocation2 + $0x70] sm:$0xf]  ;;  %v435_v52 = vor.u32 %v433_v50, %v13957_v41  ;;  %734 = vst [vmem:[#allocation2 + $0x90] sm:$0xf] %v11133_v51  ;;  %12232 = vmatpush3.bf16.msra.mxu1 %v13090_v58 }
  0x97   : > { %v767_v25 = vld [vmem:[#allocation2 + $0x6c] sm:$0xf]  ;;  %1635 = vst [vmem:[#allocation3 + $0x24c] sm:$0xf] %v1603_v61  ;;  %1636 = vst [vmem:[#allocation3 + $0x270] sm:$0xf] %v1604_v0 }
  0x98   : > { %v768_v1 = vld [vmem:[#allocation2 + $0x70] sm:$0xf]  ;;  %799 = vst [vmem:[#allocation3 + $0x288] sm:$0xf] %v767_v25  ;;  %v840_v2 = vld [vmem:[#allocation2 + $0x6c] sm:$0xf] }
  0x99   : > { %v841_v63 = vld [vmem:[#allocation2 + $0x70] sm:$0xf]  ;;  %735 = vst [vmem:[#allocation2 + $0x94] sm:$0xf] %v11134_v54  ;;  %736 = vst [vmem:[#allocation2 + $0x98] sm:$0x1] %v11135_v55 }
  0x9a   : > { %739 = vst [vmem:[#allocation2 + $0xa4] sm:$0x1] %v11138_v56  ;;  %800 = vst [vmem:[#allocation3 + $0x2ac] sm:$0xf] %v768_v1  ;;  %v1081_v4 = vshrl.u32 %v840_v2, 16  ;;  %v1084_v6 = vshll.u32 %v840_v2, 16 }
  0x9b   : > { %v1090_v5 = vshll.u32 %v841_v63, 16  ;;  %v1094_v7 = vshrl.u32 %v841_v63, 16  ;;  %v1339_v9 = vld [vmem:[#allocation2 + $0x6c] sm:$0xe]  ;;  %v1340_v10 = vld [vmem:[#allocation2 + $0x70] sm:$0xf] }
  0x9c   : > { %v11157_v41 = vrot.slane %v1339_v9, 9  ;;  %v504_v11 = vsel %vm13724_vm8, 0, %v435_v52  ;;  %v440_v14 = vshll.u32 %v13953_v40, 16  ;;  %v13032_v3 = vld [vmem:[#allocation3 + $0x244] ss:$36 sps:$4 sm:$0xff]   ;;  %v1083_v59 = vrot.slane %v1081_v4, 4 }
  0x9d   : > { %v1086_v16 = vrot.slane %v1084_v6, 5  ;;  %v11136_v17 = vcombine.low %v504_v11, %v504_v11  ;;  %v11137_v18 = vcombine.high %v504_v11, %v504_v11  ;;  %v13035_v19 = vld [vmem:[#allocation3 + $0x240] ss:$36 sps:$4 sm:$0xff]   ;;  %v1092_v60 = vrot.slane %v1090_v5, 5  ;;  %4827 = vmatprep.mubr.bf16.mxu0 %v13032_v3  ;;  %v13092_v31 = vld [vmem:[%s16853_s1 + $0x100] sm:$0xff]   ;;  %v14034_v9 = vld [vmem:[%s13698_s14 + $0x70] sm:$0xff]  }
  0x9e   : > { %v1096_v20 = vrot.slane %v1094_v7, 4  ;;  %v1476_v21 = vrot.slane %v1340_v10, 5  ;;  %v14012_v22 = vrot.slane %v437_v62, 7  ;;  %v1605_v23 = vld [vmem:[#allocation2 + $0x78] sm:$0xf]  ;;  %4828 = vmatmul.mubr.bf16.gmra.mxu0 %v13035_v19 }
  0x9f   : > { %v1087_v39 = vor.u32 %v1086_v16, %v1083_v59  ;;  %v1606_v26 = vld [vmem:[#allocation2 + $0x7c] sm:$0xf]  ;;  %v769_v13 = vld [vmem:[#allocation2 + $0x78] sm:$0xf]  ;;  %737 = vst [vmem:[#allocation2 + $0x9c] sm:$0xf] %v11136_v17  ;;  %12128 = vmatpush3.bf16.msra.mxu0 %v13092_v31 }
  0xa0   : > { %738 = vst [vmem:[#allocation2 + $0xa0] sm:$0xf] %v11137_v18  ;;  %v1097_v40 = vor.u32 %v1096_v20, %v1092_v60  ;;  %v1477_v27 = vsel %vm13717_vm7, %v11157_v41, %v1476_v21  ;;  %v1478_v28 = vrot.slane %v1476_v21, 4  ;;  %1637 = vst [vmem:[#allocation3 + $0x294] sm:$0xf] %v1605_v23  ;;  %v442_v44 = vor.u32 %v440_v14, %v14012_v22  ;;  %v13097_v19 = vld [vmem:[%s16853_s1 + $0x1d8] sm:$0xff]  }
  0xa1   : > { %1638 = vst [vmem:[#allocation3 + $0x2b8] sm:$0xf] %v1606_v26  ;;  %v770_v29 = vld [vmem:[#allocation2 + $0x7c] sm:$0xf]  ;;  %801 = vst [vmem:[#allocation3 + $0x2d0] sm:$0xf] %v769_v13  ;;  %12233 = vmatprep.subr.bf16.mxu1 %v13097_v19 }
  0xa2   : > { %v843_v30 = vld [vmem:[#allocation2 + $0x78] sm:$0xf]  ;;  %v13038_v8 = vld [vmem:[#allocation3 + $0x24c] ss:$36 sps:$4 sm:$0xff]   ;;  %v1088_v32 = vrot.slane %v1087_v39, 4  ;;  %v1098_v34 = vrot.slane %v1097_v40, 4  ;;  %v1480_v35 = vsel %vm13717_vm7, %v1478_v28, %v1479_v43 }
  0xa3   : > { %1573 = vst [vmem:[#allocation3 + $0x290] sm:$0xf] %v1477_v27  ;;  %802 = vst [vmem:[#allocation3 + $0x2f4] sm:$0xf] %v770_v29  ;;  %v1105_v24 = vshrl.u32 %v843_v30, 16  ;;  %v1108_v38 = vshll.u32 %v843_v30, 16  ;;  %4988 = vmatprep.mubr.bf16.mxu1 %v13038_v8 }
  0xa4   : > { %v13040_v33 = vld [vmem:[#allocation3 + $0x248] ss:$36 sps:$4 sm:$0xff]   ;;  %v844_v36 = vld [vmem:[#allocation2 + $0x7c] sm:$0xf]  ;;  %v1093_v45 = vsel %vm13709_vm5, %v1088_v32, %v1092_v60  ;;  %1574 = vst [vmem:[#allocation3 + $0x2b4] sm:$0xf] %v1480_v35  ;;  %v1103_v37 = vsel %vm13709_vm5, %v1098_v34, %v13986_v42 }
  0xa5   : > { %v845_v46 = vld [vmem:[#allocation2 + $0x80] sm:$0x1]  ;;  %v1107_v47 = vrot.slane %v1105_v24, 4  ;;  %v1114_v48 = vshll.u32 %v844_v36, 16  ;;  %v1118_v49 = vshrl.u32 %v844_v36, 16  ;;  %4989 = vmatmul.mubr.bf16.gmra.mxu1 %v13040_v33  ;;  %v1110_v43 = vrot.slane %v1108_v38, 5 }
  0xa6   : > { %1298 = vst [vmem:[#allocation3 + $0x28c] sm:$0xf] %v1093_v45  ;;  %v1124_v50 = vshll.u32 %v845_v46, 16  ;;  %v1342_v53 = vld [vmem:[#allocation2 + $0x78] sm:$0xe]  ;;  %v505_v7 = vsel %vm13724_vm8, 0, %v442_v44 }
  0xa7   : > { %v1343_v51 = vld [vmem:[#allocation2 + $0x7c] sm:$0xf]  ;;  %1299 = vst [vmem:[#allocation3 + $0x2b0] sm:$0xf] %v1103_v37  ;;  %v1116_v54 = vrot.slane %v1114_v48, 5  ;;  %v1120_v55 = vrot.slane %v1118_v49, 4  ;;  %v1111_v0 = vor.u32 %v1110_v43, %v1107_v47  ;;  %v11139_v62 = vcombine.low %v505_v7, %v505_v7 }
  0xa8   : > { %v1344_v56 = vld [vmem:[#allocation2 + $0x80] sm:$0x1]  ;;  %v11158_v58 = vrot.slane %v1342_v53, 9  ;;  %v1483_v61 = vrot.slane %v1343_v51, 5  ;;  %v1126_v25 = vrot.slane %v1124_v50, 5  ;;  %v11140_v14 = vcombine.high %v505_v7, %v505_v7  ;;  %v13098_v37 = vld [vmem:[%s16853_s1 + $0x198] sm:$0xff]  }
  0xa9   : > { %v1486_v52 = vrot.slane %v1344_v56, 5  ;;  %v1607_v1 = vld [vmem:[#allocation2 + $0x84] sm:$0xf]  ;;  %v1608_v2 = vld [vmem:[#allocation2 + $0x88] sm:$0xf]  ;;  %v1121_v63 = vor.u32 %v1120_v55, %v1116_v54  ;;  %v1112_v10 = vrot.slane %v1111_v0, 4  ;;  %12234 = vmatpush3.bf16.msra.mxu1 %v13098_v37 }
  0xaa   : > { %v1484_v42 = vsel %vm13717_vm7, %v11158_v58, %v1483_v61  ;;  %v1485_v4 = vrot.slane %v1483_v61, 4  ;;  %1639 = vst [vmem:[#allocation3 + $0x2dc] sm:$0xf] %v1607_v1  ;;  %1640 = vst [vmem:[#allocation3 + $0x300] sm:$0xf] %v1608_v2  ;;  %v521_v44 = vsel %vm13724_vm8, %v14012_v22, 0 }
  0xab   : > { %v771_v6 = vld [vmem:[#allocation2 + $0x84] sm:$0xf]  ;;  %v772_v5 = vld [vmem:[#allocation2 + $0x88] sm:$0xf]  ;;  %1575 = vst [vmem:[#allocation3 + $0x2d8] sm:$0xf] %v1484_v42  ;;  %v1117_v21 = vsel %vm13709_vm5, %v1112_v10, %v1116_v54  ;;  %v11141_v49 = vcombine.low %v521_v44, %v521_v44 }
  0xac   : > { %803 = vst [vmem:[#allocation3 + $0x318] sm:$0xf] %v771_v6  ;;  %804 = vst [vmem:[#allocation3 + $0x33c] sm:$0xf] %v772_v5  ;;  %v846_v41 = vld [vmem:[#allocation2 + $0x84] sm:$0xf]  ;;  %v1487_v59 = vsel %vm13717_vm7, %v1485_v4, %v1486_v52 }
  0xad   : > { %v847_v11 = vld [vmem:[#allocation2 + $0x88] sm:$0xf]  ;;  %v1122_v3 = vrot.slane %v1121_v63, 4  ;;  %v848_v16 = vld [vmem:[#allocation2 + $0x8c] sm:$0x1]  ;;  %v1129_v17 = vshrl.u32 %v846_v41, 16 }
  0xae   : > { %v1132_v18 = vshll.u32 %v846_v41, 16  ;;  %v13045_v60 = vld [vmem:[#allocation3 + $0x294] ss:$36 sps:$4 sm:$0xff]   ;;  %1576 = vst [vmem:[#allocation3 + $0x2fc] sm:$0xf] %v1487_v59  ;;  %v1138_v39 = vshll.u32 %v847_v11, 16 }
  0xaf   : > { %v13047_v20 = vld [vmem:[#allocation3 + $0x290] ss:$36 sps:$4 sm:$0xff]   ;;  %740 = vst [vmem:[#allocation2 + $0xa8] sm:$0xf] %v11139_v62  ;;  %741 = vst [vmem:[#allocation2 + $0xac] sm:$0xf] %v11140_v14  ;;  %v1127_v23 = vsel %vm13709_vm5, %v1122_v3, %v1126_v25  ;;  %4996 = vmatprep.mubr.bf16.mxu1 %v13045_v60 }
  0xb0   : > { %1300 = vst [vmem:[#allocation3 + $0x2d4] sm:$0xf] %v1117_v21  ;;  %v1131_v26 = vrot.slane %v1129_v17, 4  ;;  %v1134_v13 = vrot.slane %v1132_v18, 5  ;;  %v1142_v40 = vshrl.u32 %v847_v11, 16  ;;  %v1140_v30 = vrot.slane %v1138_v39, 5  ;;  %4997 = vmatmul.mubr.bf16.gmra.mxu1 %v13047_v20 }
  0xb1   : > { %v1345_v27 = vld [vmem:[#allocation2 + $0x84] sm:$0xe]  ;;  %1301 = vst [vmem:[#allocation3 + $0x2f8] sm:$0xf] %v1127_v23  ;;  %v1148_v32 = vshll.u32 %v848_v16, 16  ;;  %v444_v22 = vshrl.u32 %v14034_v9, 16 }
  0xb2   : > { %v13041_v28 = vld [vmem:[#allocation3 + $0x28c] ss:$36 sps:$4 sm:$0xff]   ;;  %v1135_v31 = vor.u32 %v1134_v13, %v1131_v26  ;;  %v1144_v8 = vrot.slane %v1142_v40, 4  ;;  %v1347_v33 = vld [vmem:[#allocation2 + $0x8c] sm:$0x1]  ;;  %v11159_v34 = vrot.slane %v1345_v27, 9 }
  0xb3   : > { %v13043_v29 = vld [vmem:[#allocation3 + $0x288] ss:$36 sps:$4 sm:$0xff]   ;;  %v1346_v24 = vld [vmem:[#allocation2 + $0x88] sm:$0xf]  ;;  %4835 = vmatprep.mubr.bf16.mxu0 %v13041_v28  ;;  %v1493_v36 = vrot.slane %v1347_v33, 5  ;;  %v1150_v47 = vrot.slane %v1148_v32, 5 }
  0xb4   : > { %v1490_v35 = vrot.slane %v1346_v24, 5  ;;  %v1609_v38 = vld [vmem:[#allocation2 + $0x90] sm:$0xf]  ;;  %4836 = vmatmul.mubr.bf16.gmra.mxu0 %v13043_v29  ;;  %v1136_v45 = vrot.slane %v1135_v31, 4  ;;  %v1145_v46 = vor.u32 %v1144_v8, %v1140_v30  ;;  %v1610_v48 = vld [vmem:[#allocation2 + $0x94] sm:$0xf] }
  0xb5   : > { %1641 = vst [vmem:[#allocation3 + $0x324] sm:$0xf] %v1609_v38  ;;  %1642 = vst [vmem:[#allocation3 + $0x348] sm:$0xf] %v1610_v48  ;;  %v773_v53 = vld [vmem:[#allocation2 + $0x90] sm:$0xf] }
  0xb6   : > { %v1491_v43 = vsel %vm13717_vm7, %v11159_v34, %v1490_v35  ;;  %v1492_v50 = vrot.slane %v1490_v35, 4  ;;  %v774_v51 = vld [vmem:[#allocation2 + $0x94] sm:$0xf]  ;;  %v1141_v56 = vsel %vm13709_vm5, %v1136_v45, %v1140_v30  ;;  %v1146_v58 = vrot.slane %v1145_v46, 4  ;;  %805 = vst [vmem:[#allocation3 + $0x360] sm:$0xf] %v773_v53 }
  0xb7   : > { %v13054_v54 = vld [vmem:[#allocation3 + $0x2dc] ss:$36 sps:$4 sm:$0xff]   ;;  %1577 = vst [vmem:[#allocation3 + $0x320] sm:$0xf] %v1491_v43  ;;  %806 = vst [vmem:[#allocation3 + $0x384] sm:$0xf] %v774_v51 }
  0xb8   : > { %v13056_v55 = vld [vmem:[#allocation3 + $0x2d8] ss:$36 sps:$4 sm:$0xff]   ;;  %742 = vst [vmem:[#allocation2 + $0xb0] sm:$0x1] %v11141_v49  ;;  %1302 = vst [vmem:[#allocation3 + $0x31c] sm:$0xf] %v1141_v56  ;;  %v1494_v61 = vsel %vm13717_vm7, %v1492_v50, %v1493_v36  ;;  %5004 = vmatprep.mubr.bf16.mxu1 %v13054_v54  ;;  %v1151_v63 = vsel %vm13709_vm5, %v1146_v58, %v1150_v47 }
  0xb9   : > { %v849_v0 = vld [vmem:[#allocation2 + $0x90] sm:$0xf]  ;;  %v850_v25 = vld [vmem:[#allocation2 + $0x94] sm:$0xf]  ;;  %v446_v52 = vrot.slane %v444_v22, 7  ;;  %v447_v10 = vshll.u32 %v14034_v9, 16  ;;  %5005 = vmatmul.mubr.bf16.gmra.mxu1 %v13056_v55 }
  0xba   : > { %v13048_v1 = vld [vmem:[#allocation3 + $0x2d4] ss:$36 sps:$4 sm:$0xff]   ;;  %1578 = vst [vmem:[#allocation3 + $0x344] sm:$0xf] %v1494_v61  ;;  %v1153_v42 = vshrl.u32 %v849_v0, 16  ;;  %v1156_v6 = vshll.u32 %v849_v0, 16 }
  0xbb   : > { %v13051_v2 = vld [vmem:[#allocation3 + $0x2d0] ss:$36 sps:$4 sm:$0xff]   ;;  %1303 = vst [vmem:[#allocation3 + $0x340] sm:$0xf] %v1151_v63  ;;  %v851_v4 = vld [vmem:[#allocation2 + $0x98] sm:$0x1]  ;;  %4843 = vmatprep.mubr.bf16.mxu0 %v13048_v1  ;;  %v449_v48 = vor.u32 %v447_v10, %v446_v52 }
  0xbc   : > { %v1162_v5 = vshll.u32 %v850_v25, 16  ;;  %v1166_v7 = vshrl.u32 %v850_v25, 16  ;;  %v1155_v41 = vrot.slane %v1153_v42, 4  ;;  %v1172_v11 = vshll.u32 %v851_v4, 16  ;;  %v1348_v62 = vld [vmem:[#allocation2 + $0x90] sm:$0xe]  ;;  %4844 = vmatmul.mubr.bf16.gmra.mxu0 %v13051_v2 }
  0xbd   : > { %v1349_v14 = vld [vmem:[#allocation2 + $0x94] sm:$0xf]  ;;  %v1158_v3 = vrot.slane %v1156_v6, 5  ;;  %v1350_v17 = vld [vmem:[#allocation2 + $0x98] sm:$0x1]  ;;  %v11160_v18 = vrot.slane %v1348_v62, 9 }
  0xbe   : > { %v1164_v59 = vrot.slane %v1162_v5, 5  ;;  %v1168_v16 = vrot.slane %v1166_v7, 4  ;;  %v1174_v19 = vrot.slane %v1172_v11, 5  ;;  %v1497_v60 = vrot.slane %v1349_v14, 5  ;;  %v1611_v21 = vld [vmem:[#allocation2 + $0x9c] sm:$0xf] }
  0xbf   : > { %v1500_v20 = vrot.slane %v1350_v17, 5  ;;  %v13099_v9 = vld [vmem:[%s16853_s1 + $0x1d0] sm:$0xff]   ;;  %v1159_v39 = vor.u32 %v1158_v3, %v1155_v41  ;;  %v1612_v26 = vld [vmem:[#allocation2 + $0xa0] sm:$0xf]  ;;  %1643 = vst [vmem:[#allocation3 + $0x36c] sm:$0xf] %v1611_v21 }
  0xc0   : > { %v1169_v23 = vor.u32 %v1168_v16, %v1164_v59  ;;  %v775_v13 = vld [vmem:[#allocation2 + $0x9c] sm:$0xf]  ;;  %v522_v40 = vsel %vm13724_vm8, %v446_v52, 0  ;;  %v1498_v27 = vsel %vm13717_vm7, %v11160_v18, %v1497_v60  ;;  %v1499_v28 = vrot.slane %v1497_v60, 4  ;;  %1644 = vst [vmem:[#allocation3 + $0x390] sm:$0xf] %v1612_v26  ;;  %12235 = vmatprep.subr.bf16.mxu1 %v13099_v9 }
  0xc1   : > { %v776_v29 = vld [vmem:[#allocation2 + $0xa0] sm:$0xf]  ;;  %807 = vst [vmem:[#allocation3 + $0x3a8] sm:$0xf] %v775_v13  ;;  %v852_v30 = vld [vmem:[#allocation2 + $0x9c] sm:$0xf]  ;;  %v11144_v31 = vcombine.low %v522_v40, %v522_v40 }
  0xc2   : > { %v13061_v8 = vld [vmem:[#allocation3 + $0x324] ss:$36 sps:$4 sm:$0xff]   ;;  %v1160_v24 = vrot.slane %v1159_v39, 4  ;;  %1579 = vst [vmem:[#allocation3 + $0x368] sm:$0xf] %v1498_v27  ;;  %v1170_v35 = vrot.slane %v1169_v23, 4  ;;  %v1501_v36 = vsel %vm13717_vm7, %v1499_v28, %v1500_v20 }
  0xc3   : > { %v13063_v32 = vld [vmem:[#allocation3 + $0x320] ss:$36 sps:$4 sm:$0xff]   ;;  %808 = vst [vmem:[#allocation3 + $0x3cc] sm:$0xf] %v776_v29  ;;  %v13059_v34 = vld [vmem:[#allocation3 + $0x318] ss:$36 sps:$4 sm:$0xff]   ;;  %5012 = vmatprep.mubr.bf16.mxu1 %v13061_v8 }
  0xc4   : > { %v13057_v33 = vld [vmem:[#allocation3 + $0x31c] ss:$36 sps:$4 sm:$0xff]   ;;  %745 = vst [vmem:[#allocation2 + $0xbc] sm:$0x1] %v11144_v31  ;;  %v1165_v38 = vsel %vm13709_vm5, %v1160_v24, %v1164_v59  ;;  %1580 = vst [vmem:[#allocation3 + $0x38c] sm:$0xf] %v1501_v36  ;;  %5013 = vmatmul.mubr.bf16.gmra.mxu1 %v13063_v32  ;;  %v1175_v49 = vsel %vm13709_vm5, %v1170_v35, %v1174_v19 }
  0xc5   : > { %v853_v44 = vld [vmem:[#allocation2 + $0xa0] sm:$0xf]  ;;  %v854_v45 = vld [vmem:[#allocation2 + $0xa4] sm:$0x1]  ;;  %v1177_v46 = vshrl.u32 %v852_v30, 16  ;;  %v1180_v47 = vshll.u32 %v852_v30, 16  ;;  %4851 = vmatprep.mubr.bf16.mxu0 %v13057_v33 }
  0xc6   : > { %1304 = vst [vmem:[#allocation3 + $0x364] sm:$0xf] %v1165_v38  ;;  %v1186_v37 = vshll.u32 %v853_v44, 16  ;;  %v1190_v43 = vshrl.u32 %v853_v44, 16  ;;  %v1196_v50 = vshll.u32 %v854_v45, 16  ;;  %v13102_v51 = vld [vmem:[%s16853_s1 + $0x190] sm:$0xff]   ;;  %4852 = vmatmul.mubr.bf16.gmra.mxu0 %v13059_v34 }
  0xc7   : > { %v1351_v53 = vld [vmem:[#allocation2 + $0x9c] sm:$0xe]  ;;  %1305 = vst [vmem:[#allocation3 + $0x388] sm:$0xf] %v1175_v49  ;;  %v1179_v22 = vrot.slane %v1177_v46, 4  ;;  %v1182_v54 = vrot.slane %v1180_v47, 5  ;;  %12236 = vmatpush3.bf16.msra.mxu1 %v13102_v51 }
  0xc8   : > { %v1352_v55 = vld [vmem:[#allocation2 + $0xa0] sm:$0xf]  ;;  %v1353_v56 = vld [vmem:[#allocation2 + $0xa4] sm:$0x1]  ;;  %v1188_v58 = vrot.slane %v1186_v37, 5  ;;  %v1192_v61 = vrot.slane %v1190_v43, 4 }
  0xc9   : > { %v1198_v0 = vrot.slane %v1196_v50, 5  ;;  %v11161_v25 = vrot.slane %v1351_v53, 9  ;;  %v1613_v52 = vld [vmem:[#allocation2 + $0xa8] sm:$0xf]  ;;  %v1183_v1 = vor.u32 %v1182_v54, %v1179_v22  ;;  %v1504_v2 = vrot.slane %v1352_v55, 5  ;;  %v263_v39 = vld [vmem:[%s13698_s14 + $0x78] sm:$0xff]  }
  0xca   : > { %v1507_v63 = vrot.slane %v1353_v56, 5  ;;  %v1614_v42 = vld [vmem:[#allocation2 + $0xac] sm:$0xf]  ;;  %1645 = vst [vmem:[#allocation3 + $0x3b4] sm:$0xf] %v1613_v52  ;;  %v1193_v6 = vor.u32 %v1192_v61, %v1188_v58  ;;  %v506_v10 = vsel %vm13724_vm8, 0, %v449_v48 }
  0xcb   : > { %v777_v4 = vld [vmem:[#allocation2 + $0xa8] sm:$0xf]  ;;  %1646 = vst [vmem:[#allocation3 + $0x3d8] sm:$0xf] %v1614_v42  ;;  %v778_v5 = vld [vmem:[#allocation2 + $0xac] sm:$0xf]  ;;  %v1505_v11 = vsel %vm13717_vm7, %v11161_v25, %v1504_v2  ;;  %v11142_v59 = vcombine.low %v506_v10, %v506_v10  ;;  %v11143_v19 = vcombine.high %v506_v10, %v506_v10 }
  0xcc   : > { %809 = vst [vmem:[#allocation3 + $0x3f0] sm:$0xf] %v777_v4  ;;  %v855_v7 = vld [vmem:[#allocation2 + $0xa8] sm:$0xf]  ;;  %v1184_v41 = vrot.slane %v1183_v1, 4  ;;  %v1506_v62 = vrot.slane %v1504_v2, 4 }
  0xcd   : > { %810 = vst [vmem:[#allocation3 + $0x414] sm:$0xf] %v778_v5  ;;  %v856_v14 = vld [vmem:[#allocation2 + $0xac] sm:$0xf]  ;;  %v857_v3 = vld [vmem:[#allocation2 + $0xb0] sm:$0x1] }
  0xce   : > { %v13070_v16 = vld [vmem:[#allocation3 + $0x36c] ss:$36 sps:$4 sm:$0xff]   ;;  %v1194_v18 = vrot.slane %v1193_v6, 4  ;;  %1581 = vst [vmem:[#allocation3 + $0x3b0] sm:$0xf] %v1505_v11  ;;  %v1189_v60 = vsel %vm13709_vm5, %v1184_v41, %v1188_v58  ;;  %v1508_v20 = vsel %vm13717_vm7, %v1506_v62, %v1507_v63  ;;  %v1201_v21 = vshrl.u32 %v855_v7, 16 }
  0xcf   : > { %v13072_v17 = vld [vmem:[#allocation3 + $0x368] ss:$36 sps:$4 sm:$0xff]   ;;  %v1204_v9 = vshll.u32 %v855_v7, 16  ;;  %743 = vst [vmem:[#allocation2 + $0xb4] sm:$0xf] %v11142_v59  ;;  %5020 = vmatprep.mubr.bf16.mxu1 %v13070_v16  ;;  %v1210_v40 = vshll.u32 %v856_v14, 16 }
  0xd0   : > { %v13064_v23 = vld [vmem:[#allocation3 + $0x364] ss:$36 sps:$4 sm:$0xff]   ;;  %v1199_v13 = vsel %vm13709_vm5, %v1194_v18, %v1198_v0  ;;  %1306 = vst [vmem:[#allocation3 + $0x3ac] sm:$0xf] %v1189_v60  ;;  %1582 = vst [vmem:[#allocation3 + $0x3d4] sm:$0xf] %v1508_v20  ;;  %5021 = vmatmul.mubr.bf16.gmra.mxu1 %v13072_v17 }
  0xd1   : > { %v13067_v26 = vld [vmem:[#allocation3 + $0x360] ss:$36 sps:$4 sm:$0xff]   ;;  %744 = vst [vmem:[#allocation2 + $0xb8] sm:$0xf] %v11143_v19  ;;  %1307 = vst [vmem:[#allocation3 + $0x3d0] sm:$0xf] %v1199_v13  ;;  %4859 = vmatprep.mubr.bf16.mxu0 %v13064_v23 }
  0xd2   : > { %v1203_v27 = vrot.slane %v1201_v21, 4  ;;  %v1206_v28 = vrot.slane %v1204_v9, 5  ;;  %v1214_v29 = vshrl.u32 %v856_v14, 16  ;;  %v1220_v30 = vshll.u32 %v857_v3, 16  ;;  %v1354_v8 = vld [vmem:[#allocation2 + $0xa8] sm:$0xe]  ;;  %4860 = vmatmul.mubr.bf16.gmra.mxu0 %v13067_v26 }
  0xd3   : > { %v1212_v31 = vrot.slane %v1210_v40, 5  ;;  %v1355_v32 = vld [vmem:[#allocation2 + $0xac] sm:$0xf]  ;;  %v451_v24 = vshrl.u32 %v263_v39, 16  ;;  %v1356_v36 = vld [vmem:[#allocation2 + $0xb0] sm:$0x1] }
  0xd4   : > { %v1207_v33 = vor.u32 %v1206_v28, %v1203_v27  ;;  %v1216_v34 = vrot.slane %v1214_v29, 4  ;;  %v1222_v35 = vrot.slane %v1220_v30, 5  ;;  %v11162_v38 = vrot.slane %v1354_v8, 9  ;;  %v13108_v44 = vld [vmem:[%s16853_s1 + $0x1c8] sm:$0xff]   ;;  %v13079_v56 = vld [vmem:[#allocation3 + $0x3a8] ss:$36 sps:$4 sm:$0xff]  }
  0xd5   : > { %v1511_v45 = vrot.slane %v1355_v32, 5  ;;  %v1514_v46 = vrot.slane %v1356_v36, 5  ;;  %12237 = vmatprep.subr.bf16.mxu1 %v13108_v44  ;;  %v14093_v50 = vrot.slane %v451_v24, 7  ;;  %v13081_v53 = vld [vmem:[#allocation3 + $0x3b4] ss:$36 sps:$4 sm:$0xff]   ;;  %v454_v54 = vshll.u32 %v263_v39, 16 }
  0xd6   : > { %v1208_v47 = vrot.slane %v1207_v33, 4  ;;  %v1217_v48 = vor.u32 %v1216_v34, %v1212_v31  ;;  %v1615_v43 = vld [vmem:[#allocation2 + $0xb4] sm:$0xf]  ;;  %5028 = vmatprep.mubr.bf16.mxu1 %v13081_v53  ;;  %v860_v4 = vld [vmem:[#allocation2 + $0xbc] sm:$0x1]  ;;  %v13109_v23 = vld [vmem:[%s16853_s1 + $0x188] sm:$0xff]  }
  0xd7   : > { %v1512_v49 = vsel %vm13717_vm7, %v11162_v38, %v1511_v45  ;;  %v1513_v37 = vrot.slane %v1511_v45, 4  ;;  %1647 = vst [vmem:[#allocation3 + $0x3fc] sm:$0xf] %v1615_v43  ;;  %v13083_v61 = vld [vmem:[#allocation3 + $0x3b0] ss:$36 sps:$4 sm:$0xff]   ;;  %v456_v52 = vor.u32 %v454_v54, %v14093_v50  ;;  %v1244_v41 = vshll.u32 %v860_v4, 16  ;;  %12238 = vmatpush3.bf16.msra.mxu1 %v13109_v23 }
  0xd8   : > { %v1213_v51 = vsel %vm13709_vm5, %v1208_v47, %v1212_v31  ;;  %v1218_v22 = vrot.slane %v1217_v48, 4  ;;  %1583 = vst [vmem:[#allocation3 + $0x3f8] sm:$0xf] %v1512_v49  ;;  %v13076_v55 = vld [vmem:[#allocation3 + $0x3ac] ss:$36 sps:$4 sm:$0xff]   ;;  %5029 = vmatmul.mubr.bf16.gmra.mxu1 %v13083_v61 }
  0xd9   : > { %1308 = vst [vmem:[#allocation3 + $0x3f4] sm:$0xf] %v1213_v51  ;;  %v1515_v58 = vsel %vm13717_vm7, %v1513_v37, %v1514_v46  ;;  %v1616_v25 = vld [vmem:[#allocation2 + $0xb8] sm:$0xf]  ;;  %4867 = vmatprep.mubr.bf16.mxu0 %v13076_v55  ;;  %v779_v1 = vld [vmem:[#allocation2 + $0xb4] sm:$0xf] }
  0xda   : > { %v1223_v0 = vsel %vm13709_vm5, %v1218_v22, %v1222_v35  ;;  %1584 = vst [vmem:[#allocation3 + $0x41c] sm:$0xf] %v1515_v58  ;;  %1648 = vst [vmem:[#allocation3 + $0x420] sm:$0xf] %v1616_v25  ;;  %v780_v2 = vld [vmem:[#allocation2 + $0xb8] sm:$0xf]  ;;  %4868 = vmatmul.mubr.bf16.gmra.mxu0 %v13079_v56 }
  0xdb   : > { %1309 = vst [vmem:[#allocation3 + $0x418] sm:$0xf] %v1223_v0  ;;  %v858_v63 = vld [vmem:[#allocation2 + $0xb4] sm:$0xf]  ;;  %811 = vst [vmem:[#allocation3 + $0x438] sm:$0xf] %v779_v1 }
  0xdc   : > { %812 = vst [vmem:[#allocation3 + $0x45c] sm:$0xf] %v780_v2  ;;  %v859_v42 = vld [vmem:[#allocation2 + $0xb8] sm:$0xf]  ;;  %v1225_v6 = vshrl.u32 %v858_v63, 16  ;;  %v1228_v5 = vshll.u32 %v858_v63, 16 }
  0xdd   : > { %v1234_v7 = vshll.u32 %v859_v42, 16  ;;  %v1238_v10 = vshrl.u32 %v859_v42, 16  ;;  %v507_v11 = vsel %vm13724_vm8, 0, %v456_v52  ;;  %v1357_v16 = vld [vmem:[#allocation2 + $0xb4] sm:$0xe]  ;;  %v1246_v19 = vrot.slane %v1244_v41, 5 }
  0xde   : > { %v1227_v62 = vrot.slane %v1225_v6, 4  ;;  %v1230_v14 = vrot.slane %v1228_v5, 5  ;;  %v11145_v3 = vcombine.low %v507_v11, %v507_v11  ;;  %v11146_v59 = vcombine.high %v507_v11, %v507_v11  ;;  %v1358_v60 = vld [vmem:[#allocation2 + $0xb8] sm:$0xf]  ;;  %v1359_v21 = vld [vmem:[#allocation2 + $0xbc] sm:$0x1] }
  0xdf   : > { %v1236_v17 = vrot.slane %v1234_v7, 5  ;;  %v1240_v18 = vrot.slane %v1238_v10, 4  ;;  %v11163_v9 = vrot.slane %v1357_v16, 9  ;;  %v1518_v39 = vrot.slane %v1358_v60, 5  ;;  %v13110_v40 = vld [vmem:[%s16853_s1 + $0x1c0] sm:$0xff]   ;;  %v14124_v55 = vld [vmem:[%s16853_s1 + $0x238] sm:$0xff]  }
  0xe0   : > { %v1231_v20 = vor.u32 %v1230_v14, %v1227_v62  ;;  %746 = vst [vmem:[#allocation2 + $0xc0] sm:$0xf] %v11145_v3  ;;  %747 = vst [vmem:[#allocation2 + $0xc4] sm:$0xf] %v11146_v59  ;;  %v1521_v13 = vrot.slane %v1359_v21, 5  ;;  %12239 = vmatprep.subr.bf16.mxu1 %v13110_v40  ;;  %v13113_v34 = vld [vmem:[%s16853_s1 + $0x180] sm:$0xff]   ;;  %12833 = vmatprep.subr.bf16.mxu0 %v14124_v55 }
  0xe1   : > { %v1241_v26 = vor.u32 %v1240_v18, %v1236_v17  ;;  %v13091_v28 = vld [vmem:[#allocation3 + $0x3f0] ss:$36 sps:$4 sm:$0xff]   ;;  %v1519_v30 = vsel %vm13717_vm7, %v11163_v9, %v1518_v39  ;;  %v13094_v31 = vld [vmem:[#allocation3 + $0x3fc] ss:$36 sps:$4 sm:$0xff]   ;;  %v1520_v33 = vrot.slane %v1518_v39, 4  ;;  %12240 = vmatpush3.bf16.msra.mxu1 %v13113_v34 }
  0xe2   : > { %v13087_v27 = vld [vmem:[#allocation3 + $0x3f4] ss:$36 sps:$4 sm:$0xff]   ;;  %v1232_v29 = vrot.slane %v1231_v20, 4  ;;  %1585 = vst [vmem:[#allocation3 + $0x440] sm:$0xf] %v1519_v30  ;;  %5036 = vmatprep.mubr.bf16.mxu1 %v13094_v31 }
  0xe3   : > { %v13096_v8 = vld [vmem:[#allocation3 + $0x3f8] ss:$36 sps:$4 sm:$0xff]   ;;  %v1242_v32 = vrot.slane %v1241_v26, 4  ;;  %4875 = vmatprep.mubr.bf16.mxu0 %v13087_v27  ;;  %v1651_v36 = vld [vmem:[#allocation2 + $0xc] sm:$0xf]  ;;  %v1522_v38 = vsel %vm13717_vm7, %v1520_v33, %v1521_v13 }
  0xe4   : > { %v1237_v24 = vsel %vm13709_vm5, %v1232_v29, %v1236_v17  ;;  %4876 = vmatmul.mubr.bf16.gmra.mxu0 %v13091_v28  ;;  %5037 = vmatmul.mubr.bf16.gmra.mxu1 %v13096_v8  ;;  %v1652_v44 = vld [vmem:[#allocation2 + $0x10] sm:$0xf]  ;;  %v1653_v45 = vld [vmem:[#allocation2 + $0x14] sm:$0x1]  ;;  %v1700_v46 = vshrl.u32 %v1651_v36, 16  ;;  %v1703_v47 = vshll.u32 %v1651_v36, 16 }
  0xe5   : > { %v1247_v35 = vsel %vm13709_vm5, %v1242_v32, %v1246_v19  ;;  %1310 = vst [vmem:[#allocation3 + $0x43c] sm:$0xf] %v1237_v24  ;;  %1586 = vst [vmem:[#allocation3 + $0x464] sm:$0xf] %v1522_v38  ;;  %v1709_v37 = vshll.u32 %v1652_v44, 16  ;;  %v1713_v43 = vshrl.u32 %v1652_v44, 16 }
  0xe6   : > { %1311 = vst [vmem:[#allocation3 + $0x460] sm:$0xf] %v1247_v35  ;;  %v1702_v53 = vrot.slane %v1700_v46, 4  ;;  %v1705_v51 = vrot.slane %v1703_v47, 5  ;;  %v1719_v22 = vshll.u32 %v1653_v45, 16 }
  0xe7   : > { %v1617_v48 = vld [vmem:[#allocation2 + $0xc0] sm:$0xf]  ;;  %v1618_v49 = vld [vmem:[#allocation2 + $0xc4] sm:$0xf]  ;;  %v2147_v54 = vld [vmem:[#allocation2 + $0xc] sm:$0xe] }
  0xe8   : > { %1649 = vst [vmem:[#allocation3 + $0x444] sm:$0xf] %v1617_v48  ;;  %1650 = vst [vmem:[#allocation3 + $0x468] sm:$0xf] %v1618_v49  ;;  %v1711_v56 = vrot.slane %v1709_v37, 5  ;;  %v1715_v58 = vrot.slane %v1713_v43, 4  ;;  %v1706_v25 = vor.u32 %v1705_v51, %v1702_v53 }
  0xe9   : > { %v2148_v61 = vld [vmem:[#allocation2 + $0x10] sm:$0xf]  ;;  %v2149_v0 = vld [vmem:[#allocation2 + $0x14] sm:$0x1]  ;;  %v11164_v52 = vrot.slane %v2147_v54, 9  ;;  %v1721_v63 = vrot.slane %v1719_v22, 5 }
  0xea   : > { %v2245_v1 = vrot.slane %v2148_v61, 5  ;;  %v1716_v2 = vor.u32 %v1715_v58, %v1711_v56  ;;  %v2248_v42 = vrot.slane %v2149_v0, 5  ;;  %v1707_v4 = vrot.slane %v1706_v25, 4  ;;  %v13103_v10 = vld [vmem:[#allocation3 + $0x438] ss:$36 sps:$4 sm:$0xff]  }
  0xeb   : > { %v2420_v14 = vld [vmem:[#allocation2 + $0x18] sm:$0xf]  ;;  %v2421_v3 = vld [vmem:[#allocation2 + $0x1c] sm:$0xf]  ;;  %v2486_v21 = vld [vmem:[#allocation2 + $0x20] sm:$0x1] }
  0xec   : > { %v2246_v6 = vsel %vm13717_vm7, %v11164_v52, %v2245_v1  ;;  %v2247_v5 = vrot.slane %v2245_v1, 4  ;;  %v1717_v41 = vrot.slane %v1716_v2, 4  ;;  %v1712_v11 = vsel %vm13709_vm5, %v1707_v4, %v1711_v56  ;;  %v2484_v59 = vld [vmem:[#allocation2 + $0x18] sm:$0xf]  ;;  %2452 = vst [vmem:[#allocation3 + $0x18] sm:$0xf] %v2420_v14 }
  0xed   : > { %v13100_v7 = vld [vmem:[#allocation3 + $0x43c] ss:$36 sps:$4 sm:$0xff]   ;;  %2387 = vst [vmem:[#allocation3 + $0x14] sm:$0xf] %v2246_v6  ;;  %2115 = vst [vmem:[#allocation3 + $0x10] sm:$0xf] %v1712_v11 }
  0xee   : > { %v2249_v62 = vsel %vm13717_vm7, %v2247_v5, %v2248_v42  ;;  %4883 = vmatprep.mubr.bf16.mxu0 %v13100_v7  ;;  %v1722_v17 = vsel %vm13709_vm5, %v1717_v41, %v1721_v63  ;;  %2453 = vst [vmem:[#allocation3 + $0x3c] sm:$0xf] %v2421_v3  ;;  %v2533_v18 = vshrl.u32 %v2484_v59, 16  ;;  %v2536_v19 = vshll.u32 %v2484_v59, 16  ;;  %v13107_v60 = vld [vmem:[#allocation3 + $0x440] ss:$36 sps:$4 sm:$0xff]  }
  0xef   : > { %v13105_v16 = vld [vmem:[#allocation3 + $0x444] ss:$36 sps:$4 sm:$0xff]   ;;  %2388 = vst [vmem:[#allocation3 + $0x38] sm:$0xf] %v2249_v62  ;;  %4884 = vmatmul.mubr.bf16.gmra.mxu0 %v13103_v10  ;;  %2116 = vst [vmem:[#allocation3 + $0x34] sm:$0xf] %v1722_v17 }
  0xf0   : > { %v2485_v20 = vld [vmem:[#allocation2 + $0x1c] sm:$0xf]  ;;  %5044 = vmatprep.mubr.bf16.mxu1 %v13105_v16  ;;  %v2535_v9 = vrot.slane %v2533_v18, 4  ;;  %v2538_v39 = vrot.slane %v2536_v19, 5  ;;  %v1654_v13 = vld [vmem:[#allocation2 + $0x18] sm:$0xf] }
  0xf1   : > { %v2542_v23 = vshll.u32 %v2485_v20, 16  ;;  %v2546_v26 = vshrl.u32 %v2485_v20, 16  ;;  %5045 = vmatmul.mubr.bf16.gmra.mxu1 %v13107_v60  ;;  %v2552_v40 = vshll.u32 %v2486_v21, 16  ;;  %v1655_v27 = vld [vmem:[#allocation2 + $0x1c] sm:$0xf]  ;;  %v1724_v29 = vshrl.u32 %v1654_v13, 16 }
  0xf2   : > { %v1656_v28 = vld [vmem:[#allocation2 + $0x20] sm:$0x1]  ;;  %v2539_v30 = vor.u32 %v2538_v39, %v2535_v9  ;;  %v1727_v32 = vshll.u32 %v1654_v13, 16  ;;  %v2150_v24 = vld [vmem:[#allocation2 + $0x18] sm:$0xe]  ;;  %v1733_v35 = vshll.u32 %v1655_v27, 16 }
  0xf3   : > { %v2544_v31 = vrot.slane %v2542_v23, 5  ;;  %v2548_v8 = vrot.slane %v2546_v26, 4  ;;  %v2554_v33 = vrot.slane %v2552_v40, 5  ;;  %v1726_v34 = vrot.slane %v1724_v29, 4  ;;  %v2151_v38 = vld [vmem:[#allocation2 + $0x1c] sm:$0xf] }
  0xf4   : > { %v1737_v36 = vshrl.u32 %v1655_v27, 16  ;;  %v2540_v44 = vrot.slane %v2539_v30, 4  ;;  %v1729_v46 = vrot.slane %v1727_v32, 5  ;;  %v1743_v47 = vshll.u32 %v1656_v28, 16  ;;  %v2152_v48 = vld [vmem:[#allocation2 + $0x20] sm:$0x1] }
  0xf5   : > { %v2549_v45 = vor.u32 %v2548_v8, %v2544_v31  ;;  %v1735_v49 = vrot.slane %v1733_v35, 5  ;;  %v11165_v43 = vrot.slane %v2150_v24, 9  ;;  %v2252_v53 = vrot.slane %v2151_v38, 5  ;;  %v13127_v51 = vld [vmem:[%s16853_s1 + $0x230] sm:$0xff]   ;;  %v2422_v2 = vld [vmem:[#allocation2 + $0x24] sm:$0xf] }
  0xf6   : > { %v1739_v37 = vrot.slane %v1737_v36, 4  ;;  %v13111_v22 = vld [vmem:[#allocation3 + $0x14] ss:$36 sps:$4 sm:$0xff]   ;;  %v2545_v56 = vsel %vm13709_vm5, %v2540_v44, %v2544_v31  ;;  %v1730_v61 = vor.u32 %v1729_v46, %v1726_v34  ;;  %v1745_v25 = vrot.slane %v1743_v47, 5  ;;  %v2423_v63 = vld [vmem:[#allocation2 + $0x28] sm:$0xf] }
  0xf7   : > { %v13115_v54 = vld [vmem:[#allocation3 + $0x10] ss:$36 sps:$4 sm:$0xff]   ;;  %v2550_v58 = vrot.slane %v2549_v45, 4  ;;  %2948 = vst [vmem:[#allocation3 + $0x1c] sm:$0xf] %v2545_v56  ;;  %v2253_v52 = vsel %vm13717_vm7, %v11165_v43, %v2252_v53  ;;  %v2254_v1 = vrot.slane %v2252_v53, 4  ;;  %5085 = vmatprep.mubr.bf16.mxu0 %v13111_v22 }
  0xf8   : > { %v1740_v0 = vor.u32 %v1739_v37, %v1735_v49  ;;  %v1731_v4 = vrot.slane %v1730_v61, 4  ;;  %v2255_v6 = vrot.slane %v2152_v48, 5  ;;  %2389 = vst [vmem:[#allocation3 + $0x5c] sm:$0xf] %v2253_v52  ;;  %2454 = vst [vmem:[#allocation3 + $0x60] sm:$0xf] %v2422_v2  ;;  %5086 = vmatmul.mubr.bf16.vlgmr.msra.gmra.mxu0 %v13115_v54 }
  0xf9   : > { %v2555_v42 = vsel %vm13709_vm5, %v2550_v58, %v2554_v33  ;;  %2455 = vst [vmem:[#allocation3 + $0x84] sm:$0xf] %v2423_v63  ;;  %v2487_v5 = vld [vmem:[#allocation2 + $0x24] sm:$0xf]  ;;  %v2488_v7 = vld [vmem:[#allocation2 + $0x28] sm:$0xf]  ;;  %12834 = vmatpush3.bf16.msra.mxu0 %v14124_v55 }
  0xfa   : > { %2949 = vst [vmem:[#allocation3 + $0x40] sm:$0xf] %v2555_v42  ;;  %v1741_v10 = vrot.slane %v1740_v0, 4  ;;  %v2489_v41 = vld [vmem:[#allocation2 + $0x2c] sm:$0x1]  ;;  %v2557_v11 = vshrl.u32 %v2487_v5, 16  ;;  %v1736_v59 = vsel %vm13709_vm5, %v1731_v4, %v1735_v49  ;;  %v2256_v16 = vsel %vm13717_vm7, %v2254_v1, %v2255_v6  ;;  %12835 = vmatprep.subr.bf16.mxu0 %v13127_v51 }
  0xfb   : > { %v2560_v62 = vshll.u32 %v2487_v5, 16  ;;  %v2566_v14 = vshll.u32 %v2488_v7, 16  ;;  %v13140_v3 = vld [vmem:[%s16853_s1 + $0x228] sm:$0xff]   ;;  %v2570_v17 = vshrl.u32 %v2488_v7, 16  ;;  %v2576_v18 = vshll.u32 %v2489_v41, 16  ;;  %v14157_v32 = vld [vmem:[%s16853_s1 + $0x220] sm:$0xff]  }
  0xfc   : > { %v1657_v19 = vld [vmem:[#allocation2 + $0x24] sm:$0xf]  ;;  %v1658_v60 = vld [vmem:[#allocation2 + $0x28] sm:$0xf]  ;;  %v1746_v20 = vsel %vm13709_vm5, %v1741_v10, %v1745_v25  ;;  %2117 = vst [vmem:[#allocation3 + $0x58] sm:$0xf] %v1736_v59 }
  0xfd   : > { %2390 = vst [vmem:[#allocation3 + $0x80] sm:$0xf] %v2256_v16  ;;  %v2559_v21 = vrot.slane %v2557_v11, 4  ;;  %v2562_v9 = vrot.slane %v2560_v62, 5  ;;  %v2568_v39 = vrot.slane %v2566_v14, 5  ;;  %v2572_v55 = vrot.slane %v2570_v17, 4  ;;  %12836 = vmatpush3.bf16.msra.mxu0 %v13127_v51 }
  0xfe   : > { %v1659_v23 = vld [vmem:[#allocation2 + $0x2c] sm:$0x1]  ;;  %2118 = vst [vmem:[#allocation3 + $0x7c] sm:$0xf] %v1746_v20  ;;  %v2578_v26 = vrot.slane %v2576_v18, 5  ;;  %v1748_v13 = vshrl.u32 %v1657_v19, 16  ;;  %12837 = vmatprep.subr.bf16.mxu0 %v13140_v3 }
  0xff   : > { %v1751_v40 = vshll.u32 %v1657_v19, 16  ;;  %v2153_v27 = vld [vmem:[#allocation2 + $0x24] sm:$0xe]  ;;  %v2563_v28 = vor.u32 %v2562_v9, %v2559_v21  ;;  %v1757_v29 = vshll.u32 %v1658_v60, 16  ;;  %v1761_v30 = vshrl.u32 %v1658_v60, 16  ;;  %v13166_v25 = vld [vmem:[%s16853_s1 + $0x218] sm:$0xff]  }
 0x100   : > { %v1767_v31 = vshll.u32 %v1659_v23, 16  ;;  %v2154_v8 = vld [vmem:[#allocation2 + $0x28] sm:$0xf]  ;;  %v2573_v24 = vor.u32 %v2572_v55, %v2568_v39  ;;  %v1750_v33 = vrot.slane %v1748_v13, 4  ;;  %v2155_v35 = vld [vmem:[#allocation2 + $0x2c] sm:$0x1] }
 0x101   : > { %v1753_v34 = vrot.slane %v1751_v40, 5  ;;  %v11166_v36 = vrot.slane %v2153_v27, 9  ;;  %v2564_v38 = vrot.slane %v2563_v28, 4  ;;  %v1759_v44 = vrot.slane %v1757_v29, 5  ;;  %v13116_v47 = vld [vmem:[#allocation3 + $0x1c] ss:$36 sps:$4 sm:$0xff]   ;;  %12838 = vmatpush3.bf16.msra.mxu0 %v13140_v3 }
 0x102   : > { %v1763_v45 = vrot.slane %v1761_v30, 4  ;;  %v1769_v46 = vrot.slane %v1767_v31, 5  ;;  %v13118_v48 = vld [vmem:[#allocation3 + $0x18] ss:$36 sps:$4 sm:$0xff]   ;;  %v2574_v49 = vrot.slane %v2573_v24, 4  ;;  %v2259_v22 = vrot.slane %v2154_v8, 5  ;;  %5246 = vmatprep.mubr.bf16.mxu1 %v13116_v47  ;;  %12839 = vmatprep.subr.bf16.mxu0 %v14157_v32 }
 0x103   : > { %v1754_v37 = vor.u32 %v1753_v34, %v1750_v33  ;;  %v2569_v43 = vsel %vm13709_vm5, %v2564_v38, %v2568_v39  ;;  %v2262_v54 = vrot.slane %v2155_v35, 5  ;;  %v2424_v56 = vld [vmem:[#allocation2 + $0x30] sm:$0xf]  ;;  %v2425_v61 = vld [vmem:[#allocation2 + $0x34] sm:$0xf]  ;;  %5247 = vmatmul.mubr.bf16.vlgmr.msra.gmra.mxu1 %v13118_v48  ;;  %v14182_v34 = vld [vmem:[%s16853_s1 + $0x208] sm:$0xff]  }
 0x104   : > { %v1764_v53 = vor.u32 %v1763_v45, %v1759_v44  ;;  %v2579_v51 = vsel %vm13709_vm5, %v2574_v49, %v2578_v26  ;;  %2950 = vst [vmem:[#allocation3 + $0x64] sm:$0xf] %v2569_v43  ;;  %2456 = vst [vmem:[#allocation3 + $0xa8] sm:$0xf] %v2424_v56  ;;  %v2490_v0 = vld [vmem:[#allocation2 + $0x30] sm:$0xf]  ;;  %v2260_v63 = vsel %vm13717_vm7, %v11166_v36, %v2259_v22 }
 0x105   : > { %v1755_v58 = vrot.slane %v1754_v37, 4  ;;  %v13119_v52 = vld [vmem:[#allocation3 + $0x5c] ss:$36 sps:$4 sm:$0xff]   ;;  %2951 = vst [vmem:[#allocation3 + $0x88] sm:$0xf] %v2579_v51  ;;  %v2261_v4 = vrot.slane %v2259_v22, 4  ;;  %12840 = vmatpush3.bf16.msra.mxu0 %v14157_v32 }
 0x106   : > { %v13121_v1 = vld [vmem:[#allocation3 + $0x58] ss:$36 sps:$4 sm:$0xff]   ;;  %v1765_v2 = vrot.slane %v1764_v53, 4  ;;  %2457 = vst [vmem:[#allocation3 + $0xcc] sm:$0xf] %v2425_v61  ;;  %v2581_v7 = vshrl.u32 %v2490_v0, 16  ;;  %5093 = vmatprep.mubr.bf16.mxu0 %v13119_v52  ;;  %12841 = vmatprep.subr.bf16.mxu0 %v13166_v25 }
 0x107   : > { %v1760_v42 = vsel %vm13709_vm5, %v1755_v58, %v1759_v44  ;;  %2391 = vst [vmem:[#allocation3 + $0xa4] sm:$0xf] %v2260_v63  ;;  %v2491_v6 = vld [vmem:[#allocation2 + $0x34] sm:$0xf]  ;;  %v2492_v5 = vld [vmem:[#allocation2 + $0x38] sm:$0x1]  ;;  %5094 = vmatmul.mubr.bf16.gmra.mxu0 %v13121_v1  ;;  %v2263_v3 = vsel %vm13717_vm7, %v2261_v4, %v2262_v54 }
 0x108   : > { %v1770_v10 = vsel %vm13709_vm5, %v1765_v2, %v1769_v46  ;;  %2119 = vst [vmem:[#allocation3 + $0xa0] sm:$0xf] %v1760_v42  ;;  %v2584_v41 = vshll.u32 %v2490_v0, 16  ;;  %v2590_v11 = vshll.u32 %v2491_v6, 16  ;;  %v2594_v62 = vshrl.u32 %v2491_v6, 16  ;;  %v13179_v19 = vld [vmem:[%s16853_s1 + $0x210] sm:$0xff]  }
 0x109   : > { %v1660_v14 = vld [vmem:[#allocation2 + $0x30] sm:$0xf]  ;;  %2120 = vst [vmem:[#allocation3 + $0xc4] sm:$0xf] %v1770_v10  ;;  %v2583_v59 = vrot.slane %v2581_v7, 4  ;;  %v2600_v16 = vshll.u32 %v2492_v5, 16  ;;  %12842 = vmatpush3.bf16.msra.mxu0 %v13166_v25  ;;  %v11905_v25 = vpop.f32.mrf.mxu0 }
 0x10a   : > { %v1661_v17 = vld [vmem:[#allocation2 + $0x34] sm:$0xf]  ;;  %v1662_v18 = vld [vmem:[#allocation2 + $0x38] sm:$0x1]  ;;  %2392 = vst [vmem:[#allocation3 + $0xc8] sm:$0xf] %v2263_v3  ;;  %12843 = vmatprep.subr.bf16.mxu0 %v13179_v19 }
 0x10b   : > { %v2586_v60 = vrot.slane %v2584_v41, 5  ;;  %v2592_v20 = vrot.slane %v2590_v11, 5  ;;  %v2596_v21 = vrot.slane %v2594_v62, 4  ;;  %v1772_v9 = vshrl.u32 %v1660_v14, 16  ;;  %v2156_v39 = vld [vmem:[#allocation2 + $0x30] sm:$0xe] }
 0x10c   : > { %v2602_v23 = vrot.slane %v2600_v16, 5  ;;  %v1775_v55 = vshll.u32 %v1660_v14, 16  ;;  %v1781_v26 = vshll.u32 %v1661_v17, 16  ;;  %v1785_v13 = vshrl.u32 %v1661_v17, 16  ;;  %v2157_v40 = vld [vmem:[#allocation2 + $0x34] sm:$0xf] }
 0x10d   : > { %v2587_v27 = vor.u32 %v2586_v60, %v2583_v59  ;;  %v2597_v28 = vor.u32 %v2596_v21, %v2592_v20  ;;  %v1774_v29 = vrot.slane %v1772_v9, 4  ;;  %v1791_v30 = vshll.u32 %v1662_v18, 16  ;;  %v2158_v31 = vld [vmem:[#allocation2 + $0x38] sm:$0x1]  ;;  %v13122_v8 = vld [vmem:[#allocation3 + $0x64] ss:$36 sps:$4 sm:$0xff]   ;;  %12844 = vmatpush3.bf16.msra.mxu0 %v13179_v19 }
 0x10e   : > { %v13124_v24 = vld [vmem:[#allocation3 + $0x60] ss:$36 sps:$4 sm:$0xff]   ;;  %v1777_v33 = vrot.slane %v1775_v55, 5  ;;  %v1783_v36 = vrot.slane %v1781_v26, 5  ;;  %v1787_v38 = vrot.slane %v1785_v13, 4  ;;  %5254 = vmatprep.mubr.bf16.mxu1 %v13122_v8  ;;  %v11167_v47 = vrot.slane %v2156_v39, 9  ;;  %12845 = vmatprep.subr.bf16.mxu0 %v14182_v34 }
 0x10f   : > { %v2588_v32 = vrot.slane %v2587_v27, 4  ;;  %v2598_v35 = vrot.slane %v2597_v28, 4  ;;  %v2426_v44 = vld [vmem:[#allocation2 + $0x3c] sm:$0xf]  ;;  %v1793_v46 = vrot.slane %v1791_v30, 5  ;;  %v2266_v48 = vrot.slane %v2157_v40, 5  ;;  %5255 = vmatmul.mubr.bf16.gmra.mxu1 %v13124_v24 }
 0x110   : > { %v1778_v45 = vor.u32 %v1777_v33, %v1774_v29  ;;  %v2427_v49 = vld [vmem:[#allocation2 + $0x40] sm:$0xf]  ;;  %2458 = vst [vmem:[#allocation3 + $0xf0] sm:$0xf] %v2426_v44  ;;  %v1788_v53 = vor.u32 %v1787_v38, %v1783_v36  ;;  %v2269_v22 = vrot.slane %v2158_v31, 5 }
 0x111   : > { %v2593_v37 = vsel %vm13709_vm5, %v2588_v32, %v2592_v20  ;;  %v2603_v43 = vsel %vm13709_vm5, %v2598_v35, %v2602_v23  ;;  %2459 = vst [vmem:[#allocation3 + $0x114] sm:$0xf] %v2427_v49  ;;  %v2493_v54 = vld [vmem:[#allocation2 + $0x3c] sm:$0xf]  ;;  %v2494_v56 = vld [vmem:[#allocation2 + $0x40] sm:$0xf]  ;;  %v2267_v0 = vsel %vm13717_vm7, %v11167_v47, %v2266_v48  ;;  %v11906_v20 = vpop.f32.mrf.mxu0  ;;  %12846 = vmatpush3.bf16.msra.mxu0 %v14182_v34 }
 0x112   : > { %v13125_v51 = vld [vmem:[#allocation3 + $0xa4] ss:$36 sps:$4 sm:$0xff]   ;;  %2952 = vst [vmem:[#allocation3 + $0xac] sm:$0xf] %v2593_v37  ;;  %2953 = vst [vmem:[#allocation3 + $0xd0] sm:$0xf] %v2603_v43  ;;  %v14198_v8 = vadd.f32 %v11906_v20, %v11905_v25 }
 0x113   : > { %v13128_v58 = vld [vmem:[#allocation3 + $0xa0] ss:$36 sps:$4 sm:$0xff]   ;;  %v1779_v61 = vrot.slane %v1778_v45, 4  ;;  %v1789_v52 = vrot.slane %v1788_v53, 4  ;;  %v2268_v1 = vrot.slane %v2266_v48, 4  ;;  %v2605_v63 = vshrl.u32 %v2493_v54, 16  ;;  %5101 = vmatprep.mubr.bf16.mxu0 %v13125_v51 }
 0x114   : > { %2393 = vst [vmem:[#allocation3 + $0xec] sm:$0xf] %v2267_v0  ;;  %v2495_v2 = vld [vmem:[#allocation2 + $0x44] sm:$0x1]  ;;  %v2608_v42 = vshll.u32 %v2493_v54, 16  ;;  %v2614_v6 = vshll.u32 %v2494_v56, 16  ;;  %5102 = vmatmul.mubr.bf16.gmra.mxu0 %v13128_v58 }
 0x115   : > { %v1784_v4 = vsel %vm13709_vm5, %v1779_v61, %v1783_v36  ;;  %v2618_v5 = vshrl.u32 %v2494_v56, 16  ;;  %v2624_v7 = vshll.u32 %v2495_v2, 16  ;;  %v1663_v10 = vld [vmem:[#allocation2 + $0x3c] sm:$0xf]  ;;  %v1794_v41 = vsel %vm13709_vm5, %v1789_v52, %v1793_v46  ;;  %v1664_v3 = vld [vmem:[#allocation2 + $0x40] sm:$0xf]  ;;  %v12017_v56 = vpop.f32.mrf.mxu1 }
 0x116   : > { %2121 = vst [vmem:[#allocation3 + $0xe8] sm:$0xf] %v1784_v4  ;;  %v2270_v11 = vsel %vm13717_vm7, %v2268_v1, %v2269_v22  ;;  %v2607_v62 = vrot.slane %v2605_v63, 4  ;;  %v2610_v14 = vrot.slane %v2608_v42, 5  ;;  %v1665_v59 = vld [vmem:[#allocation2 + $0x44] sm:$0x1] }
 0x117   : > { %2122 = vst [vmem:[#allocation3 + $0x10c] sm:$0xf] %v1794_v41  ;;  %2394 = vst [vmem:[#allocation3 + $0x110] sm:$0xf] %v2270_v11  ;;  %v2616_v16 = vrot.slane %v2614_v6, 5  ;;  %v2620_v17 = vrot.slane %v2618_v5, 4 }
 0x118   : > { %v2626_v18 = vrot.slane %v2624_v7, 5  ;;  %v1796_v19 = vshrl.u32 %v1663_v10, 16  ;;  %v2159_v60 = vld [vmem:[#allocation2 + $0x3c] sm:$0xe]  ;;  %v2611_v21 = vor.u32 %v2610_v14, %v2607_v62  ;;  %v1799_v9 = vshll.u32 %v1663_v10, 16  ;;  %v13205_v42 = vld [vmem:[%s16853_s1 + $0x200] sm:$0xff]  }
 0x119   : > { %v1805_v39 = vshll.u32 %v1664_v3, 16  ;;  %v1809_v23 = vshrl.u32 %v1664_v3, 16  ;;  %v2160_v55 = vld [vmem:[#allocation2 + $0x40] sm:$0xf]  ;;  %v2621_v26 = vor.u32 %v2620_v17, %v2616_v16  ;;  %v1815_v40 = vshll.u32 %v1665_v59, 16  ;;  %v12018_v17 = vpop.f32.mrf.mxu1  ;;  %12847 = vmatprep.subr.bf16.mxu0 %v13205_v42 }
 0x11a   : > { %v1798_v13 = vrot.slane %v1796_v19, 4  ;;  %v2161_v27 = vld [vmem:[#allocation2 + $0x44] sm:$0x1]  ;;  %v11168_v28 = vrot.slane %v2159_v60, 9  ;;  %v2612_v30 = vrot.slane %v2611_v21, 4  ;;  %v1801_v31 = vrot.slane %v1799_v9, 5  ;;  %12848 = vmatpush3.bf16.msra.mxu0 %v13205_v42 }
 0x11b   : > { %v13129_v29 = vld [vmem:[#allocation3 + $0xac] ss:$36 sps:$4 sm:$0xff]   ;;  %v2622_v33 = vrot.slane %v2621_v26, 4  ;;  %v1807_v32 = vrot.slane %v1805_v39, 5  ;;  %v1811_v35 = vrot.slane %v1809_v23, 4  ;;  %v1817_v36 = vrot.slane %v1815_v40, 5 }
 0x11c   : > { %v13131_v24 = vld [vmem:[#allocation3 + $0xa8] ss:$36 sps:$4 sm:$0xff]   ;;  %5262 = vmatprep.mubr.bf16.mxu1 %v13129_v29  ;;  %v2617_v38 = vsel %vm13709_vm5, %v2612_v30, %v2616_v16  ;;  %v1802_v34 = vor.u32 %v1801_v31, %v1798_v13  ;;  %v2273_v44 = vrot.slane %v2160_v55, 5  ;;  %v2276_v45 = vrot.slane %v2161_v27, 5  ;;  %v2428_v48 = vld [vmem:[#allocation2 + $0x48] sm:$0xf]  ;;  %v14218_v16 = vpop.f32.mrf.mxu0 }
 0x11d   : > { %5263 = vmatmul.mubr.bf16.gmra.mxu1 %v13131_v24  ;;  %v2627_v46 = vsel %vm13709_vm5, %v2622_v33, %v2626_v18  ;;  %2954 = vst [vmem:[#allocation3 + $0xf4] sm:$0xf] %v2617_v38  ;;  %v1812_v47 = vor.u32 %v1811_v35, %v1807_v32  ;;  %v2429_v49 = vld [vmem:[#allocation2 + $0x4c] sm:$0xf]  ;;  %v523_v37 = vsel %vm13724_vm8, %v14093_v50, 0  ;;  %v14220_v29 = vadd.f32 %v12018_v17, %v12017_v56 }
 0x11e   : > { %v13132_v43 = vld [vmem:[#allocation3 + $0xec] ss:$36 sps:$4 sm:$0xff]   ;;  %2955 = vst [vmem:[#allocation3 + $0x118] sm:$0xf] %v2627_v46  ;;  %v1803_v22 = vrot.slane %v1802_v34, 4  ;;  %v2274_v54 = vsel %vm13717_vm7, %v11168_v28, %v2273_v44  ;;  %v11147_v51 = vcombine.low %v523_v37, %v523_v37  ;;  %v2275_v61 = vrot.slane %v2273_v44, 4  ;;  %v14222_v35 = vpop.f32.mrf.mxu0 }
 0x11f   : > { %v13134_v53 = vld [vmem:[#allocation3 + $0xe8] ss:$36 sps:$4 sm:$0xff]   ;;  %2460 = vst [vmem:[#allocation3 + $0x138] sm:$0xf] %v2428_v48  ;;  %2461 = vst [vmem:[#allocation3 + $0x15c] sm:$0xf] %v2429_v49  ;;  %5109 = vmatprep.mubr.bf16.mxu0 %v13132_v43 }
 0x120   : > { %v1813_v58 = vrot.slane %v1812_v47, 4  ;;  %2395 = vst [vmem:[#allocation3 + $0x134] sm:$0xf] %v2274_v54  ;;  %v2496_v0 = vld [vmem:[#allocation2 + $0x48] sm:$0xf]  ;;  %v1808_v50 = vsel %vm13709_vm5, %v1803_v22, %v1807_v32  ;;  %5110 = vmatmul.mubr.bf16.gmra.mxu0 %v13134_v53  ;;  %v2277_v6 = vsel %vm13717_vm7, %v2275_v61, %v2276_v45  ;;  %v11911_v53 = vpop.f32.mrf.mxu0 }
 0x121   : > { %v2497_v25 = vld [vmem:[#allocation2 + $0x4c] sm:$0xf]  ;;  %v2498_v52 = vld [vmem:[#allocation2 + $0x50] sm:$0x1]  ;;  %v2629_v1 = vshrl.u32 %v2496_v0, 16  ;;  %v2632_v2 = vshll.u32 %v2496_v0, 16 }
 0x122   : > { %v2638_v63 = vshll.u32 %v2497_v25, 16  ;;  %748 = vst [vmem:[#allocation2 + $0xc8] sm:$0x1] %v11147_v51  ;;  %v1818_v4 = vsel %vm13709_vm5, %v1813_v58, %v1817_v36  ;;  %2123 = vst [vmem:[#allocation3 + $0x130] sm:$0xf] %v1808_v50  ;;  %v2642_v5 = vshrl.u32 %v2497_v25, 16  ;;  %v14224_v36 = vpop.f32.mrf.mxu1 }
 0x123   : > { %v2648_v7 = vshll.u32 %v2498_v52, 16  ;;  %v1666_v10 = vld [vmem:[#allocation2 + $0x48] sm:$0xf]  ;;  %v1667_v41 = vld [vmem:[#allocation2 + $0x4c] sm:$0xf]  ;;  %v2631_v11 = vrot.slane %v2629_v1, 4 }
 0x124   : > { %2124 = vst [vmem:[#allocation3 + $0x154] sm:$0xf] %v1818_v4  ;;  %2396 = vst [vmem:[#allocation3 + $0x158] sm:$0xf] %v2277_v6  ;;  %v2634_v62 = vrot.slane %v2632_v2, 5  ;;  %v2640_v14 = vrot.slane %v2638_v63, 5  ;;  %v14232_v52 = vpop.f32.mrf.mxu1  ;;  %v11912_v6 = vpop.f32.mrf.mxu0 }
 0x125   : > { %v1668_v3 = vld [vmem:[#allocation2 + $0x50] sm:$0x1]  ;;  %v1820_v59 = vshrl.u32 %v1666_v10, 16  ;;  %v2644_v18 = vrot.slane %v2642_v5, 4  ;;  %v2650_v19 = vrot.slane %v2648_v7, 5  ;;  %v1823_v60 = vshll.u32 %v1666_v10, 16 }
 0x126   : > { %v1829_v20 = vshll.u32 %v1667_v41, 16  ;;  %v2162_v21 = vld [vmem:[#allocation2 + $0x48] sm:$0xe]  ;;  %v2635_v9 = vor.u32 %v2634_v62, %v2631_v11  ;;  %v1833_v23 = vshrl.u32 %v1667_v41, 16  ;;  %v1839_v55 = vshll.u32 %v1668_v3, 16 }
 0x127   : > { %v1822_v39 = vrot.slane %v1820_v59, 4  ;;  %v2163_v26 = vld [vmem:[#allocation2 + $0x4c] sm:$0xf]  ;;  %v2645_v27 = vor.u32 %v2644_v18, %v2640_v14  ;;  %v1825_v28 = vrot.slane %v1823_v60, 5  ;;  %v2164_v32 = vld [vmem:[#allocation2 + $0x50] sm:$0x1] }
 0x128   : > { %v13135_v13 = vld [vmem:[#allocation3 + $0xf4] ss:$36 sps:$4 sm:$0xff]   ;;  %v2636_v30 = vrot.slane %v2635_v9, 4  ;;  %v1831_v31 = vrot.slane %v1829_v20, 5  ;;  %v1835_v24 = vrot.slane %v1833_v23, 4  ;;  %v1841_v33 = vrot.slane %v1839_v55, 5 }
 0x129   : > { %v13137_v40 = vld [vmem:[#allocation3 + $0xf0] ss:$36 sps:$4 sm:$0xff]   ;;  %5270 = vmatprep.mubr.bf16.mxu1 %v13135_v13  ;;  %v2646_v38 = vrot.slane %v2645_v27, 4  ;;  %v1826_v34 = vor.u32 %v1825_v28, %v1822_v39  ;;  %v11169_v44 = vrot.slane %v2162_v21, 9  ;;  %v2280_v45 = vrot.slane %v2163_v26, 5  ;;  %v11914_v28 = vpop.f32.mrf.mxu0 }
 0x12a   : > { %v2430_v46 = vld [vmem:[#allocation2 + $0x54] sm:$0xf]  ;;  %5271 = vmatmul.mubr.bf16.gmra.mxu1 %v13137_v40  ;;  %v2641_v47 = vsel %vm13709_vm5, %v2636_v30, %v2640_v14  ;;  %v1836_v48 = vor.u32 %v1835_v24, %v1831_v31  ;;  %v2283_v49 = vrot.slane %v2164_v32, 5  ;;  %v2431_v37 = vld [vmem:[#allocation2 + $0x58] sm:$0xf]  ;;  %v12023_v14 = vpop.f32.mrf.mxu1 }
 0x12b   : > { %2462 = vst [vmem:[#allocation3 + $0x180] sm:$0xf] %v2430_v46  ;;  %v2499_v43 = vld [vmem:[#allocation2 + $0x54] sm:$0xf]  ;;  %v13138_v22 = vld [vmem:[#allocation3 + $0x134] ss:$36 sps:$4 sm:$0xff]   ;;  %v2651_v56 = vsel %vm13709_vm5, %v2646_v38, %v2650_v19  ;;  %v2281_v58 = vsel %vm13717_vm7, %v11169_v44, %v2280_v45 }
 0x12c   : > { %v13141_v54 = vld [vmem:[#allocation3 + $0x130] ss:$36 sps:$4 sm:$0xff]   ;;  %2956 = vst [vmem:[#allocation3 + $0x13c] sm:$0xf] %v2641_v47  ;;  %v1827_v51 = vrot.slane %v1826_v34, 4  ;;  %v1837_v61 = vrot.slane %v1836_v48, 4  ;;  %5117 = vmatprep.mubr.bf16.mxu0 %v13138_v22  ;;  %v12024_v23 = vpop.f32.mrf.mxu1 }
 0x12d   : > { %2463 = vst [vmem:[#allocation3 + $0x1a4] sm:$0xf] %v2431_v37  ;;  %2957 = vst [vmem:[#allocation3 + $0x160] sm:$0xf] %v2651_v56  ;;  %v2282_v0 = vrot.slane %v2280_v45, 4  ;;  %v2653_v2 = vshrl.u32 %v2499_v43, 16  ;;  %5118 = vmatmul.mubr.bf16.gmra.mxu0 %v13141_v54  ;;  %v14242_v45 = vadd.f32 %v11912_v6, %v11911_v53  ;;  %v14244_v46 = vadd.f32 %v12024_v23, %v12023_v14 }
 0x12e   : > { %2397 = vst [vmem:[#allocation3 + $0x17c] sm:$0xf] %v2281_v58  ;;  %v2500_v25 = vld [vmem:[#allocation2 + $0x58] sm:$0xf]  ;;  %v2501_v50 = vld [vmem:[#allocation2 + $0x5c] sm:$0x1]  ;;  %v1832_v1 = vsel %vm13709_vm5, %v1827_v51, %v1831_v31  ;;  %v1842_v5 = vsel %vm13709_vm5, %v1837_v61, %v1841_v33  ;;  %v14240_v32 = vpop.f32.mrf.mxu1  ;;  %v11915_v58 = vpop.f32.mrf.mxu0  ;;  %v14260_v6 = vadd.f32 %v14232_v52, %v14224_v36 }
 0x12f   : > { %v2656_v63 = vshll.u32 %v2499_v43, 16  ;;  %v2662_v42 = vshll.u32 %v2500_v25, 16  ;;  %v1669_v4 = vld [vmem:[#allocation2 + $0x54] sm:$0xf]  ;;  %2125 = vst [vmem:[#allocation3 + $0x178] sm:$0xf] %v1832_v1  ;;  %v2284_v7 = vsel %vm13717_vm7, %v2282_v0, %v2283_v49  ;;  %v14264_v14 = vadd.f32 %v11915_v58, %v11914_v28 }
 0x130   : > { %v2666_v10 = vshrl.u32 %v2500_v25, 16  ;;  %v2672_v41 = vshll.u32 %v2501_v50, 16  ;;  %v1670_v11 = vld [vmem:[#allocation2 + $0x58] sm:$0xf]  ;;  %v1671_v62 = vld [vmem:[#allocation2 + $0x5c] sm:$0x1]  ;;  %v14246_v37 = vpop.f32.mrf.mxu1 }
 0x131   : > { %2126 = vst [vmem:[#allocation3 + $0x19c] sm:$0xf] %v1842_v5  ;;  %2398 = vst [vmem:[#allocation3 + $0x1a0] sm:$0xf] %v2284_v7  ;;  %v2655_v3 = vrot.slane %v2653_v2, 4  ;;  %v2658_v59 = vrot.slane %v2656_v63, 5 }
 0x132   : > { %v2664_v17 = vrot.slane %v2662_v42, 5  ;;  %v1844_v18 = vshrl.u32 %v1669_v4, 16  ;;  %v2165_v19 = vld [vmem:[#allocation2 + $0x54] sm:$0xe]  ;;  %v2668_v60 = vrot.slane %v2666_v10, 4  ;;  %v2674_v20 = vrot.slane %v2672_v41, 5  ;;  %v12029_v5 = vpop.f32.mrf.mxu1 }
 0x133   : > { %v1847_v21 = vshll.u32 %v1669_v4, 16  ;;  %v1853_v9 = vshll.u32 %v1670_v11, 16  ;;  %v2166_v39 = vld [vmem:[#allocation2 + $0x58] sm:$0xf]  ;;  %v2659_v55 = vor.u32 %v2658_v59, %v2655_v3  ;;  %v1857_v13 = vshrl.u32 %v1670_v11, 16  ;;  %v11917_v59 = vpop.f32.mrf.mxu0 }
 0x134   : > { %v1846_v26 = vrot.slane %v1844_v18, 4  ;;  %v1863_v40 = vshll.u32 %v1671_v62, 16  ;;  %v2167_v27 = vld [vmem:[#allocation2 + $0x5c] sm:$0x1]  ;;  %v2669_v30 = vor.u32 %v2668_v60, %v2664_v17  ;;  %v11170_v33 = vrot.slane %v2165_v19, 9 }
 0x135   : > { %v1849_v31 = vrot.slane %v1847_v21, 5  ;;  %v1855_v24 = vrot.slane %v1853_v9, 5  ;;  %v13142_v38 = vld [vmem:[#allocation3 + $0x13c] ss:$36 sps:$4 sm:$0xff]   ;;  %v2660_v44 = vrot.slane %v2659_v55, 4  ;;  %v1859_v49 = vrot.slane %v1857_v13, 4 }
 0x136   : > { %v13144_v34 = vld [vmem:[#allocation3 + $0x138] ss:$36 sps:$4 sm:$0xff]   ;;  %v2670_v47 = vrot.slane %v2669_v30, 4  ;;  %5278 = vmatprep.mubr.bf16.mxu1 %v13142_v38  ;;  %v1865_v22 = vrot.slane %v1863_v40, 5  ;;  %v2287_v54 = vrot.slane %v2166_v39, 5  ;;  %v2290_v56 = vrot.slane %v2167_v27, 5  ;;  %v11918_v40 = vpop.f32.mrf.mxu0 }
 0x137   : > { %v1850_v48 = vor.u32 %v1849_v31, %v1846_v26  ;;  %v2665_v43 = vsel %vm13709_vm5, %v2660_v44, %v2664_v17  ;;  %v2432_v51 = vld [vmem:[#allocation2 + $0x60] sm:$0xf]  ;;  %5279 = vmatmul.mubr.bf16.gmra.mxu1 %v13144_v34  ;;  %v1860_v50 = vor.u32 %v1859_v49, %v1855_v24  ;;  %v2433_v63 = vld [vmem:[#allocation2 + $0x64] sm:$0xf]  ;;  %v14256_v4 = vadd.f32 %v14222_v35, %v14218_v16  ;;  %v2504_v11 = vld [vmem:[#allocation2 + $0x68] sm:$0x1]  ;;  %v12030_v17 = vpop.f32.mrf.mxu1 }
 0x138   : > { %v13145_v61 = vld [vmem:[#allocation3 + $0x17c] ss:$36 sps:$4 sm:$0xff]   ;;  %v2675_v0 = vsel %vm13709_vm5, %v2670_v47, %v2674_v20  ;;  %2958 = vst [vmem:[#allocation3 + $0x184] sm:$0xf] %v2665_v43  ;;  %2464 = vst [vmem:[#allocation3 + $0x1c8] sm:$0xf] %v2432_v51  ;;  %v2288_v1 = vsel %vm13717_vm7, %v11170_v33, %v2287_v54  ;;  %v14270_v9 = vadd.f32 %v12030_v17, %v12029_v5  ;;  %v11920_v49 = vpop.f32.mrf.mxu0 }
 0x139   : > { %v13147_v53 = vld [vmem:[#allocation3 + $0x178] ss:$36 sps:$4 sm:$0xff]   ;;  %v1851_v25 = vrot.slane %v1850_v48, 4  ;;  %2959 = vst [vmem:[#allocation3 + $0x1a8] sm:$0xf] %v2675_v0  ;;  %v2289_v2 = vrot.slane %v2287_v54, 4  ;;  %5125 = vmatprep.mubr.bf16.mxu0 %v13145_v61  ;;  %v12032_v27 = vpop.f32.mrf.mxu1  ;;  %v14274_v51 = vadd.f32 %v14246_v37, %v14240_v32  ;;  %v14276_v58 = vadd.f32 %v11918_v40, %v11917_v59 }
 0x13a   : > { %v2502_v42 = vld [vmem:[#allocation2 + $0x60] sm:$0xf]  ;;  %v1861_v10 = vrot.slane %v1860_v50, 4  ;;  %2399 = vst [vmem:[#allocation3 + $0x1c4] sm:$0xf] %v2288_v1  ;;  %5126 = vmatmul.mubr.bf16.gmra.mxu0 %v13147_v53  ;;  %v2696_v60 = vshll.u32 %v2504_v11, 16 }
 0x13b   : > { %v1856_v7 = vsel %vm13709_vm5, %v1851_v25, %v1855_v24  ;;  %2465 = vst [vmem:[#allocation3 + $0x1ec] sm:$0xf] %v2433_v63  ;;  %v2503_v41 = vld [vmem:[#allocation2 + $0x64] sm:$0xf]  ;;  %v2677_v62 = vshrl.u32 %v2502_v42, 16  ;;  %v2291_v16 = vsel %vm13717_vm7, %v2289_v2, %v2290_v56  ;;  %v2680_v35 = vshll.u32 %v2502_v42, 16  ;;  %v12033_v43 = vpop.f32.mrf.mxu1  ;;  %v11921_v2 = vpop.f32.mrf.mxu0 }
 0x13c   : > { %2127 = vst [vmem:[#allocation3 + $0x1c0] sm:$0xf] %v1856_v7  ;;  %v2686_v36 = vshll.u32 %v2503_v41, 16  ;;  %v2690_v52 = vshrl.u32 %v2503_v41, 16  ;;  %v1672_v3 = vld [vmem:[#allocation2 + $0x60] sm:$0xf]  ;;  %v1866_v18 = vsel %vm13709_vm5, %v1861_v10, %v1865_v22  ;;  %v14278_v61 = vadd.f32 %v12033_v43, %v12032_v27 }
 0x13d   : > { %2400 = vst [vmem:[#allocation3 + $0x1e8] sm:$0xf] %v2291_v16  ;;  %v2679_v19 = vrot.slane %v2677_v62, 4  ;;  %v1673_v20 = vld [vmem:[#allocation2 + $0x64] sm:$0xf]  ;;  %v2682_v39 = vrot.slane %v2680_v35, 5  ;;  %v12035_v63 = vpop.f32.mrf.mxu1 }
 0x13e   : > { %v1674_v21 = vld [vmem:[#allocation2 + $0x68] sm:$0x1]  ;;  %2128 = vst [vmem:[#allocation3 + $0x1e4] sm:$0xf] %v1866_v18  ;;  %v2688_v23 = vrot.slane %v2686_v36, 5  ;;  %v2692_v55 = vrot.slane %v2690_v52, 4  ;;  %v14284_v36 = vpop.f32.mrf.mxu0 }
 0x13f   : > { %v1868_v26 = vshrl.u32 %v1672_v3, 16  ;;  %v2168_v13 = vld [vmem:[#allocation2 + $0x60] sm:$0xe]  ;;  %v2698_v28 = vrot.slane %v2696_v60, 5  ;;  %v1871_v30 = vshll.u32 %v1672_v3, 16  ;;  %v1877_v31 = vshll.u32 %v1673_v20, 16  ;;  %v12036_v52 = vpop.f32.mrf.mxu1 }
 0x140   : > { %v1881_v24 = vshrl.u32 %v1673_v20, 16  ;;  %v2169_v33 = vld [vmem:[#allocation2 + $0x64] sm:$0xf]  ;;  %v2683_v38 = vor.u32 %v2682_v39, %v2679_v19  ;;  %v2693_v34 = vor.u32 %v2692_v55, %v2688_v23  ;;  %v1887_v47 = vshll.u32 %v1674_v21, 16  ;;  %v2170_v48 = vld [vmem:[#allocation2 + $0x68] sm:$0x1] }
 0x141   : > { %v1870_v44 = vrot.slane %v1868_v26, 4  ;;  %v13148_v22 = vld [vmem:[#allocation3 + $0x184] ss:$36 sps:$4 sm:$0xff]   ;;  %v1873_v56 = vrot.slane %v1871_v30, 5  ;;  %v1879_v25 = vrot.slane %v1877_v31, 5  ;;  %v11171_v7 = vrot.slane %v2168_v13, 9  ;;  %v14292_v26 = vpop.f32.mrf.mxu0  ;;  %v14294_v13 = vpop.f32.mrf.mxu1 }
 0x142   : > { %v13150_v54 = vld [vmem:[#allocation3 + $0x180] ss:$36 sps:$4 sm:$0xff]   ;;  %v2684_v53 = vrot.slane %v2683_v38, 4  ;;  %v2694_v0 = vrot.slane %v2693_v34, 4  ;;  %v1883_v50 = vrot.slane %v1881_v24, 4  ;;  %5286 = vmatprep.mubr.bf16.mxu1 %v13148_v22  ;;  %v1889_v5 = vrot.slane %v1887_v47, 5 }
 0x143   : > { %v2434_v1 = vld [vmem:[#allocation2 + $0x6c] sm:$0xf]  ;;  %v1874_v42 = vor.u32 %v1873_v56, %v1870_v44  ;;  %v2294_v10 = vrot.slane %v2169_v33, 5  ;;  %v2435_v41 = vld [vmem:[#allocation2 + $0x70] sm:$0xf]  ;;  %5287 = vmatmul.mubr.bf16.gmra.mxu1 %v13150_v54  ;;  %v2297_v62 = vrot.slane %v2170_v48, 5  ;;  %v14288_v19 = vadd.f32 %v11921_v2, %v11920_v49  ;;  %v14307_v48 = vpop.f32.mrf.mxu0  ;;  %v14309_v49 = vpop.f32.mrf.mxu1 }
 0x144   : > { %2466 = vst [vmem:[#allocation3 + $0x210] sm:$0xf] %v2434_v1  ;;  %v2689_v32 = vsel %vm13709_vm5, %v2684_v53, %v2688_v23  ;;  %v2699_v37 = vsel %vm13709_vm5, %v2694_v0, %v2698_v28  ;;  %v1884_v11 = vor.u32 %v1883_v50, %v1879_v25  ;;  %2467 = vst [vmem:[#allocation3 + $0x234] sm:$0xf] %v2435_v41  ;;  %v2505_v16 = vld [vmem:[#allocation2 + $0x6c] sm:$0xf] }
 0x145   : > { %v2506_v35 = vld [vmem:[#allocation2 + $0x70] sm:$0xf]  ;;  %v13151_v3 = vld [vmem:[#allocation3 + $0x1c4] ss:$36 sps:$4 sm:$0xff]   ;;  %2960 = vst [vmem:[#allocation3 + $0x1cc] sm:$0xf] %v2689_v32  ;;  %v2295_v18 = vsel %vm13717_vm7, %v11171_v7, %v2294_v10  ;;  %v14290_v60 = vadd.f32 %v12036_v52, %v12035_v63  ;;  %v14313_v63 = vpop.f32.mrf.mxu0 }
 0x146   : > { %v13154_v59 = vld [vmem:[#allocation3 + $0x1c0] ss:$36 sps:$4 sm:$0xff]   ;;  %2961 = vst [vmem:[#allocation3 + $0x1f0] sm:$0xf] %v2699_v37  ;;  %v1875_v17 = vrot.slane %v1874_v42, 4  ;;  %v1885_v20 = vrot.slane %v1884_v11, 4  ;;  %5133 = vmatprep.mubr.bf16.mxu0 %v13151_v3  ;;  %v14315_v42 = vpop.f32.mrf.mxu1 }
 0x147   : > { %v2296_v21 = vrot.slane %v2294_v10, 4  ;;  %2401 = vst [vmem:[#allocation3 + $0x20c] sm:$0xf] %v2295_v18  ;;  %v2507_v39 = vld [vmem:[#allocation2 + $0x74] sm:$0x1]  ;;  %v2701_v23 = vshrl.u32 %v2505_v16, 16  ;;  %5134 = vmatmul.mubr.bf16.gmra.mxu0 %v13154_v59  ;;  %v14324_v52 = vpop.f32.mrf.mxu0 }
 0x148   : > { %v2704_v55 = vshll.u32 %v2505_v16, 16  ;;  %v1880_v40 = vsel %vm13709_vm5, %v1875_v17, %v1879_v25  ;;  %v2710_v27 = vshll.u32 %v2506_v35, 16  ;;  %v2714_v28 = vshrl.u32 %v2506_v35, 16  ;;  %v14301_v31 = vld [vmem:[%s16854_s2] ss:$0 sm:$0xff]  ;;  %v14326_v3 = vpop.f32.mrf.mxu1 }
 0x149   : > { %v2720_v30 = vshll.u32 %v2507_v39, 16  ;;  %v1890_v24 = vsel %vm13709_vm5, %v1885_v20, %v1889_v5  ;;  %2129 = vst [vmem:[#allocation3 + $0x208] sm:$0xf] %v1880_v40  ;;  %v2298_v33 = vsel %vm13717_vm7, %v2296_v21, %v2297_v62  ;;  %v2703_v38 = vrot.slane %v2701_v23, 4  ;;  %v1675_v44 = vld [vmem:[#allocation2 + $0x6c] sm:$0xf] }
 0x14a   : > { %v2706_v34 = vrot.slane %v2704_v55, 5  ;;  %v1676_v47 = vld [vmem:[#allocation2 + $0x70] sm:$0xf]  ;;  %2130 = vst [vmem:[#allocation3 + $0x22c] sm:$0xf] %v1890_v24  ;;  %v2712_v43 = vrot.slane %v2710_v27, 5  ;;  %v4766_v56 = vadd.f32 %v14198_v8, %v14301_v31  ;;  %v4769_v16 = vadd.f32 %v14256_v4, %v14301_v31  ;;  %v14330_v4 = vpop.f32.mrf.mxu0  ;;  %v14332_v40 = vpop.f32.mrf.mxu1 }
 0x14b   : > { %2402 = vst [vmem:[#allocation3 + $0x230] sm:$0xf] %v2298_v33  ;;  %v2716_v22 = vrot.slane %v2714_v28, 4  ;;  %v2722_v54 = vrot.slane %v2720_v30, 5  ;;  %v1677_v53 = vld [vmem:[#allocation2 + $0x74] sm:$0x1]  ;;  %v4774_v35 = vadd.f32 %v14242_v45, %v14301_v31 }
 0x14c   : > { %v2707_v0 = vor.u32 %v2706_v34, %v2703_v38  ;;  %v1892_v25 = vshrl.u32 %v1675_v44, 16  ;;  %v1895_v50 = vshll.u32 %v1675_v44, 16  ;;  %v1901_v1 = vshll.u32 %v1676_v47, 16  ;;  %v2171_v2 = vld [vmem:[#allocation2 + $0x6c] sm:$0xe] }
 0x14d   : > { %v2717_v5 = vor.u32 %v2716_v22, %v2712_v43  ;;  %v1905_v7 = vshrl.u32 %v1676_v47, 16  ;;  %v1911_v10 = vshll.u32 %v1677_v53, 16  ;;  %v2172_v41 = vld [vmem:[#allocation2 + $0x70] sm:$0xf]  ;;  %v2173_v32 = vld [vmem:[#allocation2 + $0x74] sm:$0x1]  ;;  %v14318_v37 = vadd.f32 %v14220_v29, %v4766_v56  ;;  %v14344_v22 = vpop.f32.mrf.mxu0 }
 0x14e   : > { %v13155_v11 = vld [vmem:[#allocation3 + $0x1cc] ss:$36 sps:$4 sm:$0xff]   ;;  %v2708_v8 = vrot.slane %v2707_v0, 4  ;;  %v1894_v62 = vrot.slane %v1892_v25, 4  ;;  %v1897_v18 = vrot.slane %v1895_v50, 5  ;;  %v1903_v20 = vrot.slane %v1901_v1, 5 }
 0x14f   : > { %v13157_v59 = vld [vmem:[#allocation3 + $0x1c8] ss:$36 sps:$4 sm:$0xff]   ;;  %v2718_v17 = vrot.slane %v2717_v5, 4  ;;  %v1907_v21 = vrot.slane %v1905_v7, 4  ;;  %5294 = vmatprep.mubr.bf16.mxu1 %v13155_v11  ;;  %v1913_v39 = vrot.slane %v1911_v10, 5  ;;  %v11172_v23 = vrot.slane %v2171_v2, 9 }
 0x150   : > { %v2713_v29 = vsel %vm13709_vm5, %v2708_v8, %v2712_v43  ;;  %v2301_v55 = vrot.slane %v2172_v41, 5  ;;  %5295 = vmatmul.mubr.bf16.gmra.mxu1 %v13157_v59  ;;  %v1898_v27 = vor.u32 %v1897_v18, %v1894_v62  ;;  %v2304_v30 = vrot.slane %v2173_v32, 5  ;;  %v2436_v24 = vld [vmem:[#allocation2 + $0x78] sm:$0xf]  ;;  %v2437_v0 = vld [vmem:[#allocation2 + $0x7c] sm:$0xf]  ;;  %v14358_v41 = vpop.f32.mrf.mxu0 }
 0x151   : > { %v2723_v45 = vsel %vm13709_vm5, %v2718_v17, %v2722_v54  ;;  %2962 = vst [vmem:[#allocation3 + $0x214] sm:$0xf] %v2713_v29  ;;  %v1908_v28 = vor.u32 %v1907_v21, %v1903_v20  ;;  %v13160_v38 = vld [vmem:[#allocation3 + $0x208] ss:$36 sps:$4 sm:$0xff]   ;;  %2468 = vst [vmem:[#allocation3 + $0x258] sm:$0xf] %v2436_v24  ;;  %v14339_v47 = vadd.f32 %v14260_v6, %v4769_v16  ;;  %v14346_v54 = vpop.f32.mrf.mxu1 }
 0x152   : > { %v13158_v33 = vld [vmem:[#allocation3 + $0x20c] ss:$36 sps:$4 sm:$0xff]   ;;  %2963 = vst [vmem:[#allocation3 + $0x238] sm:$0xf] %v2723_v45  ;;  %v2302_v34 = vsel %vm13717_vm7, %v11172_v23, %v2301_v55  ;;  %v2303_v44 = vrot.slane %v2301_v55, 4  ;;  %v14342_v43 = vadd.f32 %v14244_v46, %v4774_v35  ;;  %v1899_v56 = vrot.slane %v1898_v27, 4  ;;  %v14366_v21 = vpop.f32.mrf.mxu0 }
 0x153   : > { %v1909_v53 = vrot.slane %v1908_v28, 4  ;;  %2403 = vst [vmem:[#allocation3 + $0x254] sm:$0xf] %v2302_v34  ;;  %v2508_v25 = vld [vmem:[#allocation2 + $0x78] sm:$0xf]  ;;  %v4777_v50 = vadd.f32 %v14264_v14, %v14301_v31  ;;  %v4782_v1 = vadd.f32 %v14276_v58, %v14301_v31  ;;  %5141 = vmatprep.mubr.bf16.mxu0 %v13158_v33  ;;  %v14356_v10 = vadd.f32 %v14288_v19, %v14301_v31  ;;  %v14360_v32 = vpop.f32.mrf.mxu1 }
 0x154   : > { %v2305_v46 = vsel %vm13717_vm7, %v2303_v44, %v2304_v30  ;;  %2469 = vst [vmem:[#allocation3 + $0x27c] sm:$0xf] %v2437_v0  ;;  %v2509_v6 = vld [vmem:[#allocation2 + $0x7c] sm:$0xf]  ;;  %v2510_v2 = vld [vmem:[#allocation2 + $0x80] sm:$0x1]  ;;  %5142 = vmatmul.mubr.bf16.gmra.mxu0 %v13160_v38  ;;  %v1904_v14 = vsel %vm13709_vm5, %v1899_v56, %v1903_v20  ;;  %v14370_v38 = vpop.f32.mrf.mxu0 }
 0x155   : > { %v2725_v5 = vshrl.u32 %v2508_v25, 16  ;;  %v2728_v7 = vshll.u32 %v2508_v25, 16  ;;  %v1914_v58 = vsel %vm13709_vm5, %v1909_v53, %v1913_v39  ;;  %2404 = vst [vmem:[#allocation3 + $0x278] sm:$0xf] %v2305_v46  ;;  %v2734_v11 = vshll.u32 %v2509_v6, 16  ;;  %v14368_v29 = vpop.f32.mrf.mxu1 }
 0x156   : > { %v2738_v8 = vshrl.u32 %v2509_v6, 16  ;;  %v1678_v62 = vld [vmem:[#allocation2 + $0x78] sm:$0xf]  ;;  %v1679_v16 = vld [vmem:[#allocation2 + $0x7c] sm:$0xf]  ;;  %v2744_v59 = vshll.u32 %v2510_v2, 16  ;;  %v14375_v25 = vadd.f32 %v14274_v51, %v4777_v50  ;;  %v14378_v46 = vadd.f32 %v14270_v9, %v4782_v1 }
 0x157   : > { %2131 = vst [vmem:[#allocation3 + $0x250] sm:$0xf] %v1904_v14  ;;  %2132 = vst [vmem:[#allocation3 + $0x274] sm:$0xf] %v1914_v58  ;;  %v2727_v19 = vrot.slane %v2725_v5, 4  ;;  %v2730_v35 = vrot.slane %v2728_v7, 5  ;;  %v14372_v34 = vpop.f32.mrf.mxu1  ;;  %v14380_v58 = vpop.f32.mrf.mxu0 }
 0x158   : > { %v1680_v17 = vld [vmem:[#allocation2 + $0x80] sm:$0x1]  ;;  %v1916_v18 = vshrl.u32 %v1678_v62, 16  ;;  %v2736_v20 = vrot.slane %v2734_v11, 5  ;;  %v2740_v23 = vrot.slane %v2738_v8, 4  ;;  %v1919_v55 = vshll.u32 %v1678_v62, 16 }
 0x159   : > { %v1925_v39 = vshll.u32 %v1679_v16, 16  ;;  %v2174_v45 = vld [vmem:[#allocation2 + $0x78] sm:$0xe]  ;;  %v2731_v27 = vor.u32 %v2730_v35, %v2727_v19  ;;  %v2746_v28 = vrot.slane %v2744_v59, 5  ;;  %v1929_v24 = vshrl.u32 %v1679_v16, 16  ;;  %16873 = vst [vmem:[#allocation7_spill] sm:$0xff] %v14378_v46  ;;  %v14382_v11 = vpop.f32.mrf.mxu1 }
 0x15a   : > { %v1918_v30 = vrot.slane %v1916_v18, 4  ;;  %v2175_v33 = vld [vmem:[#allocation2 + $0x7c] sm:$0xf]  ;;  %v13161_v44 = vld [vmem:[#allocation3 + $0x214] ss:$36 sps:$4 sm:$0xff]   ;;  %v2741_v53 = vor.u32 %v2740_v23, %v2736_v20  ;;  %v1921_v0 = vrot.slane %v1919_v55, 5  ;;  %v14386_v18 = vpop.f32.mrf.mxu0 }
 0x15b   : > { %v13163_v56 = vld [vmem:[#allocation3 + $0x210] ss:$36 sps:$4 sm:$0xff]   ;;  %v2732_v6 = vrot.slane %v2731_v27, 4  ;;  %v1927_v2 = vrot.slane %v1925_v39, 5  ;;  %v1931_v5 = vrot.slane %v1929_v24, 4  ;;  %v1935_v7 = vshll.u32 %v1680_v17, 16  ;;  %5302 = vmatprep.mubr.bf16.mxu1 %v13161_v44 }
 0x15c   : > { %v2176_v14 = vld [vmem:[#allocation2 + $0x80] sm:$0x1]  ;;  %v2742_v8 = vrot.slane %v2741_v53, 4  ;;  %v1922_v62 = vor.u32 %v1921_v0, %v1918_v30  ;;  %v11173_v16 = vrot.slane %v2174_v45, 9  ;;  %v2308_v19 = vrot.slane %v2175_v33, 5  ;;  %5303 = vmatmul.mubr.bf16.gmra.mxu1 %v13163_v56  ;;  %v14398_v56 = vpop.f32.mrf.mxu1 }
 0x15d   : > { %v2438_v35 = vld [vmem:[#allocation2 + $0x84] sm:$0xf]  ;;  %v2737_v9 = vsel %vm13709_vm5, %v2732_v6, %v2736_v20  ;;  %v1932_v51 = vor.u32 %v1931_v5, %v1927_v2  ;;  %v1937_v50 = vrot.slane %v1935_v7, 5  ;;  %v2311_v1 = vrot.slane %v2176_v14, 5  ;;  %v2439_v59 = vld [vmem:[#allocation2 + $0x88] sm:$0xf] }
 0x15e   : > { %2470 = vst [vmem:[#allocation3 + $0x2a0] sm:$0xf] %v2438_v35  ;;  %v2511_v17 = vld [vmem:[#allocation2 + $0x84] sm:$0xf]  ;;  %v13164_v23 = vld [vmem:[#allocation3 + $0x254] ss:$36 sps:$4 sm:$0xff]   ;;  %v2747_v55 = vsel %vm13709_vm5, %v2742_v8, %v2746_v28  ;;  %v2309_v45 = vsel %vm13717_vm7, %v11173_v16, %v2308_v19  ;;  %v14394_v44 = vadd.f32 %v14278_v61, %v14356_v10  ;;  %v11925_v28 = vadd.f32 %v14292_v26, %v14284_v36  ;;  %v14404_v8 = vpop.f32.mrf.mxu0 }
 0x15f   : > { %2964 = vst [vmem:[#allocation3 + $0x25c] sm:$0xf] %v2737_v9  ;;  %v1923_v39 = vrot.slane %v1922_v62, 4  ;;  %v2310_v27 = vrot.slane %v2308_v19, 4  ;;  %2471 = vst [vmem:[#allocation3 + $0x2c4] sm:$0xf] %v2439_v59  ;;  %5149 = vmatprep.mubr.bf16.mxu0 %v13164_v23 }
 0x160   : > { %v13167_v20 = vld [vmem:[#allocation3 + $0x250] ss:$36 sps:$4 sm:$0xff]   ;;  %2965 = vst [vmem:[#allocation3 + $0x280] sm:$0xf] %v2747_v55  ;;  %v1933_v30 = vrot.slane %v1932_v51, 4  ;;  %v2749_v33 = vshrl.u32 %v2511_v17, 16  ;;  %v14408_v51 = vpop.f32.mrf.mxu0 }
 0x161   : > { %2405 = vst [vmem:[#allocation3 + $0x29c] sm:$0xf] %v2309_v45  ;;  %v2512_v24 = vld [vmem:[#allocation2 + $0x88] sm:$0xf]  ;;  %16874 = vst [vmem:[#allocation8_spill] sm:$0xff] %v14394_v44  ;;  %v1928_v53 = vsel %vm13709_vm5, %v1923_v39, %v1927_v2  ;;  %v2312_v0 = vsel %vm13717_vm7, %v2310_v27, %v2311_v1  ;;  %v2752_v5 = vshll.u32 %v2511_v17, 16  ;;  %5150 = vmatmul.mubr.bf16.gmra.mxu0 %v13167_v20 }
 0x162   : > { %v2513_v6 = vld [vmem:[#allocation2 + $0x8c] sm:$0x1]  ;;  %v2758_v7 = vshll.u32 %v2512_v24, 16  ;;  %v1681_v14 = vld [vmem:[#allocation2 + $0x84] sm:$0xf]  ;;  %v1938_v61 = vsel %vm13709_vm5, %v1933_v30, %v1937_v50  ;;  %v2751_v36 = vrot.slane %v2749_v33, 4  ;;  %v14410_v50 = vpop.f32.mrf.mxu1 }
 0x163   : > { %2133 = vst [vmem:[#allocation3 + $0x298] sm:$0xf] %v1928_v53  ;;  %2406 = vst [vmem:[#allocation3 + $0x2c0] sm:$0xf] %v2312_v0  ;;  %v2762_v26 = vshrl.u32 %v2512_v24, 16  ;;  %v2768_v10 = vshll.u32 %v2513_v6, 16  ;;  %v14412_v24 = vpop.f32.mrf.mxu0 }
 0x164   : > { %v1682_v62 = vld [vmem:[#allocation2 + $0x88] sm:$0xf]  ;;  %2134 = vst [vmem:[#allocation3 + $0x2bc] sm:$0xf] %v1938_v61  ;;  %v2754_v2 = vrot.slane %v2752_v5, 5  ;;  %v2760_v16 = vrot.slane %v2758_v7, 5 }
 0x165   : > { %v1683_v19 = vld [vmem:[#allocation2 + $0x8c] sm:$0x1]  ;;  %v1940_v35 = vshrl.u32 %v1681_v14, 16  ;;  %v1943_v9 = vshll.u32 %v1681_v14, 16  ;;  %v2764_v1 = vrot.slane %v2762_v26, 4  ;;  %v2770_v59 = vrot.slane %v2768_v10, 5 }
 0x166   : > { %v1949_v17 = vshll.u32 %v1682_v62, 16  ;;  %v1953_v23 = vshrl.u32 %v1682_v62, 16  ;;  %v2177_v55 = vld [vmem:[#allocation2 + $0x84] sm:$0xe]  ;;  %v2755_v39 = vor.u32 %v2754_v2, %v2751_v36  ;;  %v1959_v20 = vshll.u32 %v1683_v19, 16  ;;  %v14417_v62 = vpop.f32.mrf.mxu0 }
 0x167   : > { %v1942_v45 = vrot.slane %v1940_v35, 4  ;;  %v1945_v27 = vrot.slane %v1943_v9, 5  ;;  %v2178_v30 = vld [vmem:[#allocation2 + $0x88] sm:$0xf]  ;;  %v2765_v33 = vor.u32 %v2764_v1, %v2760_v16  ;;  %v2179_v6 = vld [vmem:[#allocation2 + $0x8c] sm:$0x1]  ;;  %v4790_v10 = vadd.f32 %v11925_v28, %v14301_v31  ;;  %v14419_v1 = vpop.f32.mrf.mxu1 }
 0x168   : > { %v1951_v53 = vrot.slane %v1949_v17, 5  ;;  %v1955_v0 = vrot.slane %v1953_v23, 4  ;;  %v11174_v5 = vrot.slane %v2177_v55, 9  ;;  %v13168_v7 = vld [vmem:[#allocation3 + $0x25c] ss:$36 sps:$4 sm:$0xff]   ;;  %v2756_v61 = vrot.slane %v2755_v39, 4 }
 0x169   : > { %v13170_v14 = vld [vmem:[#allocation3 + $0x258] ss:$36 sps:$4 sm:$0xff]   ;;  %v1946_v26 = vor.u32 %v1945_v27, %v1942_v45  ;;  %v11928_v36 = vadd.f32 %v14313_v63, %v14307_v48  ;;  %v2766_v2 = vrot.slane %v2765_v33, 4  ;;  %v1961_v35 = vrot.slane %v1959_v20, 5  ;;  %5310 = vmatprep.mubr.bf16.mxu1 %v13168_v7  ;;  %v2448_v44 = vld [vmem:[#allocation2 + $0xc0] sm:$0xf] }
 0x16a   : > { %v1956_v19 = vor.u32 %v1955_v0, %v1951_v53  ;;  %v2315_v9 = vrot.slane %v2178_v30, 5  ;;  %v2761_v17 = vsel %vm13709_vm5, %v2756_v61, %v2760_v16  ;;  %v2318_v55 = vrot.slane %v2179_v6, 5  ;;  %5311 = vmatmul.mubr.bf16.gmra.mxu1 %v13170_v14  ;;  %v13171_v28 = vld [vmem:[#allocation3 + $0x29c] ss:$36 sps:$4 sm:$0xff]   ;;  %v14431_v30 = vpop.f32.mrf.mxu0  ;;  %v2440_v33 = vld [vmem:[#allocation2 + $0x90] sm:$0xf] }
 0x16b   : > { %v1947_v23 = vrot.slane %v1946_v26, 4  ;;  %v14424_v39 = vadd.f32 %v14290_v60, %v4790_v10  ;;  %v13173_v48 = vld [vmem:[#allocation3 + $0x298] ss:$36 sps:$4 sm:$0xff]   ;;  %v2771_v63 = vsel %vm13709_vm5, %v2766_v2, %v2770_v59  ;;  %2966 = vst [vmem:[#allocation3 + $0x2a4] sm:$0xf] %v2761_v17  ;;  %v4793_v20 = vadd.f32 %v11928_v36, %v14301_v31  ;;  %5157 = vmatprep.mubr.bf16.mxu0 %v13171_v28 }
 0x16c   : > { %v1957_v45 = vrot.slane %v1956_v19, 4  ;;  %v2316_v27 = vsel %vm13717_vm7, %v11174_v5, %v2315_v9  ;;  %2967 = vst [vmem:[#allocation3 + $0x2c8] sm:$0xf] %v2771_v63  ;;  %v2317_v16 = vrot.slane %v2315_v9, 4  ;;  %v2441_v0 = vld [vmem:[#allocation2 + $0x94] sm:$0xf]  ;;  %v12040_v59 = vadd.f32 %v14309_v49, %v14294_v13  ;;  %v14447_v49 = vpop.f32.mrf.mxu1  ;;  %5158 = vmatmul.mubr.bf16.gmra.mxu0 %v13173_v48  ;;  %v14451_v19 = vpop.f32.mrf.mxu0 }
 0x16d   : > { %16875 = vst [vmem:[#allocation9_spill] sm:$0xff] %v14424_v39  ;;  %v1952_v60 = vsel %vm13709_vm5, %v1947_v23, %v1951_v53  ;;  %2407 = vst [vmem:[#allocation3 + $0x2e4] sm:$0xf] %v2316_v27  ;;  %v11931_v6 = vadd.f32 %v14330_v4, %v14324_v52  ;;  %v2514_v7 = vld [vmem:[#allocation2 + $0x90] sm:$0xf]  ;;  %v12043_v61 = vadd.f32 %v14326_v3, %v14315_v42 }
 0x16e   : > { %v1962_v5 = vsel %vm13709_vm5, %v1957_v45, %v1961_v35  ;;  %2135 = vst [vmem:[#allocation3 + $0x2e0] sm:$0xf] %v1952_v60  ;;  %2472 = vst [vmem:[#allocation3 + $0x2e8] sm:$0xf] %v2440_v33  ;;  %v2515_v14 = vld [vmem:[#allocation2 + $0x94] sm:$0xf]  ;;  %v11934_v26 = vadd.f32 %v14358_v41, %v14344_v22  ;;  %v12046_v13 = vadd.f32 %v14346_v54, %v14332_v40  ;;  %v14456_v60 = vpop.f32.mrf.mxu1 }
 0x16f   : > { %2473 = vst [vmem:[#allocation3 + $0x30c] sm:$0xf] %v2441_v0  ;;  %v2516_v53 = vld [vmem:[#allocation2 + $0x98] sm:$0x1]  ;;  %2136 = vst [vmem:[#allocation3 + $0x304] sm:$0xf] %v1962_v5  ;;  %v2319_v52 = vsel %vm13717_vm7, %v2317_v16, %v2318_v55  ;;  %v14453_v35 = vadd.f32 %v12040_v59, %v4793_v20  ;;  %v4798_v40 = vadd.f32 %v11931_v6, %v14301_v31  ;;  %v14458_v59 = vpop.f32.mrf.mxu0 }
 0x170   : > { %v2773_v4 = vshrl.u32 %v2514_v7, 16  ;;  %v2776_v10 = vshll.u32 %v2514_v7, 16  ;;  %v2782_v36 = vshll.u32 %v2515_v14, 16  ;;  %v1684_v2 = vld [vmem:[#allocation2 + $0x90] sm:$0xf]  ;;  %v2786_v42 = vshrl.u32 %v2515_v14, 16 }
 0x171   : > { %2408 = vst [vmem:[#allocation3 + $0x308] sm:$0xf] %v2319_v52  ;;  %v2792_v3 = vshll.u32 %v2516_v53, 16  ;;  %v1685_v22 = vld [vmem:[#allocation2 + $0x94] sm:$0xf]  ;;  %16876 = vst [vmem:[#allocation10_spill] sm:$0xff] %v14453_v35  ;;  %v14460_v52 = vadd.f32 %v12043_v61, %v4798_v40 }
 0x172   : > { %v1686_v41 = vld [vmem:[#allocation2 + $0x98] sm:$0x1]  ;;  %v2775_v54 = vrot.slane %v2773_v4, 4  ;;  %v2778_v9 = vrot.slane %v2776_v10, 5  ;;  %v2784_v17 = vrot.slane %v2782_v36, 5  ;;  %v1964_v23 = vshrl.u32 %v1684_v2, 16  ;;  %v14463_v10 = vpop.f32.mrf.mxu1 }
 0x173   : > { %v2180_v55 = vld [vmem:[#allocation2 + $0x90] sm:$0xe]  ;;  %v2788_v28 = vrot.slane %v2786_v42, 4  ;;  %v2794_v48 = vrot.slane %v2792_v3, 5  ;;  %v1967_v63 = vshll.u32 %v1684_v2, 16  ;;  %v1973_v45 = vshll.u32 %v1685_v22, 16 }
 0x174   : > { %v2181_v27 = vld [vmem:[#allocation2 + $0x94] sm:$0xf]  ;;  %v2779_v16 = vor.u32 %v2778_v9, %v2775_v54  ;;  %v1966_v33 = vrot.slane %v1964_v23, 4  ;;  %v1977_v0 = vshrl.u32 %v1685_v22, 16  ;;  %v1983_v5 = vshll.u32 %v1686_v41, 16  ;;  %16877 = vst [vmem:[#allocation11_spill] sm:$0xff] %v14460_v52 }
 0x175   : > { %v2182_v20 = vld [vmem:[#allocation2 + $0x98] sm:$0x1]  ;;  %v13174_v6 = vld [vmem:[#allocation3 + $0x2a4] ss:$36 sps:$4 sm:$0xff]   ;;  %v2789_v14 = vor.u32 %v2788_v28, %v2784_v17  ;;  %v1969_v53 = vrot.slane %v1967_v63, 5  ;;  %v4801_v4 = vadd.f32 %v11934_v26, %v14301_v31  ;;  %v1975_v2 = vrot.slane %v1973_v45, 5  ;;  %v14469_v45 = vpop.f32.mrf.mxu0 }
 0x176   : > { %v13176_v7 = vld [vmem:[#allocation3 + $0x2a0] ss:$36 sps:$4 sm:$0xff]   ;;  %v2780_v36 = vrot.slane %v2779_v16, 4  ;;  %v1979_v42 = vrot.slane %v1977_v0, 4  ;;  %v1985_v3 = vrot.slane %v1983_v5, 5  ;;  %5318 = vmatprep.mubr.bf16.mxu1 %v13174_v6  ;;  %v11175_v54 = vrot.slane %v2180_v55, 9  ;;  %v14471_v16 = vpop.f32.mrf.mxu1 }
 0x177   : > { %v2790_v22 = vrot.slane %v2789_v14, 4  ;;  %v1970_v41 = vor.u32 %v1969_v53, %v1966_v33  ;;  %v2322_v9 = vrot.slane %v2181_v27, 5  ;;  %v2442_v23 = vld [vmem:[#allocation2 + $0x9c] sm:$0xf]  ;;  %5319 = vmatmul.mubr.bf16.gmra.mxu1 %v13176_v7  ;;  %v2325_v26 = vrot.slane %v2182_v20, 5 }
 0x178   : > { %v13177_v15 = vld [vmem:[#allocation3 + $0x2e4] ss:$36 sps:$4 sm:$0xff]   ;;  %v2785_v61 = vsel %vm13709_vm5, %v2780_v36, %v2784_v17  ;;  %v1980_v40 = vor.u32 %v1979_v42, %v1975_v2  ;;  %2474 = vst [vmem:[#allocation3 + $0x330] sm:$0xf] %v2442_v23  ;;  %v14467_v63 = vadd.f32 %v12046_v13, %v4801_v4  ;;  %v2519_v6 = vld [vmem:[#allocation2 + $0xa4] sm:$0x1]  ;;  %v11937_v14 = vadd.f32 %v14370_v38, %v14366_v21 }
 0x179   : > { %v13180_v28 = vld [vmem:[#allocation3 + $0x2e0] ss:$36 sps:$4 sm:$0xff]   ;;  %v2795_v55 = vsel %vm13709_vm5, %v2790_v22, %v2794_v48  ;;  %2968 = vst [vmem:[#allocation3 + $0x2ec] sm:$0xf] %v2785_v61  ;;  %v1971_v27 = vrot.slane %v1970_v41, 4  ;;  %v2323_v33 = vsel %vm13717_vm7, %v11175_v54, %v2322_v9  ;;  %v2324_v0 = vrot.slane %v2322_v9, 4  ;;  %5165 = vmatprep.mubr.bf16.mxu0 %v13177_v15  ;;  %v14489_v9 = vpop.f32.mrf.mxu1 }
 0x17a   : > { %16878 = vst [vmem:[#allocation12_spill] sm:$0xff] %v14467_v63  ;;  %v2443_v5 = vld [vmem:[#allocation2 + $0xa0] sm:$0xf]  ;;  %v2517_v17 = vld [vmem:[#allocation2 + $0x9c] sm:$0xf]  ;;  %v1981_v20 = vrot.slane %v1980_v40, 4  ;;  %v12049_v48 = vadd.f32 %v14368_v29, %v14360_v32  ;;  %5166 = vmatmul.mubr.bf16.gmra.mxu0 %v13180_v28  ;;  %v14487_v29 = vpop.f32.mrf.mxu0 }
 0x17b   : > { %2969 = vst [vmem:[#allocation3 + $0x310] sm:$0xf] %v2795_v55  ;;  %2409 = vst [vmem:[#allocation3 + $0x32c] sm:$0xf] %v2323_v33  ;;  %v2518_v13 = vld [vmem:[#allocation2 + $0xa0] sm:$0xf]  ;;  %v1976_v53 = vsel %vm13709_vm5, %v1971_v27, %v1975_v2  ;;  %v2326_v15 = vsel %vm13717_vm7, %v2324_v0, %v2325_v26 }
 0x17c   : > { %2475 = vst [vmem:[#allocation3 + $0x354] sm:$0xf] %v2443_v5  ;;  %v2797_v7 = vshrl.u32 %v2517_v17, 16  ;;  %v2800_v4 = vshll.u32 %v2517_v17, 16  ;;  %v2806_v36 = vshll.u32 %v2518_v13, 16  ;;  %v1986_v41 = vsel %vm13709_vm5, %v1981_v20, %v1985_v3 }
 0x17d   : > { %v1687_v42 = vld [vmem:[#allocation2 + $0x9c] sm:$0xf]  ;;  %v1688_v22 = vld [vmem:[#allocation2 + $0xa0] sm:$0xf]  ;;  %2137 = vst [vmem:[#allocation3 + $0x328] sm:$0xf] %v1976_v53 }
 0x17e   : > { %2410 = vst [vmem:[#allocation3 + $0x350] sm:$0xf] %v2326_v15  ;;  %v2799_v21 = vrot.slane %v2797_v7, 4  ;;  %v2810_v38 = vshrl.u32 %v2518_v13, 16  ;;  %v2816_v54 = vshll.u32 %v2519_v6, 16  ;;  %v2802_v2 = vrot.slane %v2800_v4, 5  ;;  %v14491_v6 = vpop.f32.mrf.mxu0 }
 0x17f   : > { %v1689_v32 = vld [vmem:[#allocation2 + $0xa4] sm:$0x1]  ;;  %2138 = vst [vmem:[#allocation3 + $0x34c] sm:$0xf] %v1986_v41  ;;  %v2808_v23 = vrot.slane %v2806_v36, 5  ;;  %v1988_v28 = vshrl.u32 %v1687_v42, 16  ;;  %v14493_v36 = vpop.f32.mrf.mxu1 }
 0x180   : > { %v1991_v61 = vshll.u32 %v1687_v42, 16  ;;  %v2183_v40 = vld [vmem:[#allocation2 + $0x9c] sm:$0xe]  ;;  %v2812_v26 = vrot.slane %v2810_v38, 4  ;;  %v2818_v55 = vrot.slane %v2816_v54, 5  ;;  %v1997_v27 = vshll.u32 %v1688_v22, 16 }
 0x181   : > { %v2001_v3 = vshrl.u32 %v1688_v22, 16  ;;  %v2184_v33 = vld [vmem:[#allocation2 + $0xa0] sm:$0xf]  ;;  %v2803_v0 = vor.u32 %v2802_v2, %v2799_v21  ;;  %v1990_v5 = vrot.slane %v1988_v28, 4  ;;  %v2007_v20 = vshll.u32 %v1689_v32, 16  ;;  %v14498_v63 = vpop.f32.mrf.mxu1 }
 0x182   : > { %v1993_v17 = vrot.slane %v1991_v61, 5  ;;  %v2185_v13 = vld [vmem:[#allocation2 + $0xa4] sm:$0x1]  ;;  %v2813_v7 = vor.u32 %v2812_v26, %v2808_v23  ;;  %v1999_v53 = vrot.slane %v1997_v27, 5  ;;  %v11176_v4 = vrot.slane %v2183_v40, 9 }
 0x183   : > { %v2003_v15 = vrot.slane %v2001_v3, 4  ;;  %v13181_v42 = vld [vmem:[#allocation3 + $0x2ec] ss:$36 sps:$4 sm:$0xff]   ;;  %v2804_v38 = vrot.slane %v2803_v0, 4  ;;  %v4806_v22 = vadd.f32 %v11937_v14, %v14301_v31  ;;  %v11940_v21 = vadd.f32 %v14386_v18, %v14380_v58  ;;  %2480 = vst [vmem:[#allocation3 + $0x408] sm:$0xf] %v2448_v44 }
 0x184   : > { %v13183_v41 = vld [vmem:[#allocation3 + $0x2e8] ss:$36 sps:$4 sm:$0xff]   ;;  %v1994_v54 = vor.u32 %v1993_v17, %v1990_v5  ;;  %v2814_v2 = vrot.slane %v2813_v7, 4  ;;  %v2009_v28 = vrot.slane %v2007_v20, 5  ;;  %v2329_v61 = vrot.slane %v2184_v33, 5  ;;  %5326 = vmatprep.mubr.bf16.mxu1 %v13181_v42  ;;  %v14504_v5 = vpop.f32.mrf.mxu0  ;;  %v14511_v20 = vpop.f32.mrf.mxu1 }
 0x185   : > { %v2004_v32 = vor.u32 %v2003_v15, %v1999_v53  ;;  %v2809_v40 = vsel %vm13709_vm5, %v2804_v38, %v2808_v23  ;;  %v2332_v27 = vrot.slane %v2185_v13, 5  ;;  %v2444_v3 = vld [vmem:[#allocation2 + $0xa8] sm:$0xf]  ;;  %v14502_v0 = vadd.f32 %v12049_v48, %v4806_v22  ;;  %5327 = vmatmul.mubr.bf16.gmra.mxu1 %v13183_v41  ;;  %v2445_v7 = vld [vmem:[#allocation2 + $0xac] sm:$0xf] }
 0x186   : > { %v1995_v26 = vrot.slane %v1994_v54, 4  ;;  %v13184_v14 = vld [vmem:[#allocation3 + $0x32c] ss:$36 sps:$4 sm:$0xff]   ;;  %v2819_v18 = vsel %vm13709_vm5, %v2814_v2, %v2818_v55  ;;  %2970 = vst [vmem:[#allocation3 + $0x334] sm:$0xf] %v2809_v40  ;;  %v2330_v17 = vsel %vm13717_vm7, %v11176_v4, %v2329_v61  ;;  %v4809_v23 = vadd.f32 %v11940_v21, %v14301_v31  ;;  %v14523_v21 = vpop.f32.mrf.mxu1 }
 0x187   : > { %16879 = vst [vmem:[#allocation13_spill] sm:$0xff] %v14502_v0  ;;  %v13186_v58 = vld [vmem:[#allocation3 + $0x328] ss:$36 sps:$4 sm:$0xff]   ;;  %v2005_v33 = vrot.slane %v2004_v32, 4  ;;  %2476 = vst [vmem:[#allocation3 + $0x378] sm:$0xf] %v2444_v3  ;;  %v12052_v55 = vadd.f32 %v14382_v11, %v14372_v34  ;;  %v11943_v42 = vadd.f32 %v14408_v51, %v14404_v8  ;;  %5173 = vmatprep.mubr.bf16.mxu0 %v13184_v14  ;;  %v14527_v32 = vpop.f32.mrf.mxu0 }
 0x188   : > { %2971 = vst [vmem:[#allocation3 + $0x358] sm:$0xf] %v2819_v18  ;;  %v2000_v48 = vsel %vm13709_vm5, %v1995_v26, %v1999_v53  ;;  %v2331_v13 = vrot.slane %v2329_v61, 4  ;;  %2411 = vst [vmem:[#allocation3 + $0x374] sm:$0xf] %v2330_v17  ;;  %v12055_v22 = vadd.f32 %v14410_v50, %v14398_v56  ;;  %5174 = vmatmul.mubr.bf16.gmra.mxu0 %v13186_v58  ;;  %v14535_v17 = vpop.f32.mrf.mxu1 }
 0x189   : > { %v2520_v15 = vld [vmem:[#allocation2 + $0xa8] sm:$0xf]  ;;  %v2010_v4 = vsel %vm13709_vm5, %v2005_v33, %v2009_v28  ;;  %2139 = vst [vmem:[#allocation3 + $0x370] sm:$0xf] %v2000_v48  ;;  %2477 = vst [vmem:[#allocation3 + $0x39c] sm:$0xf] %v2445_v7  ;;  %v14532_v26 = vadd.f32 %v12052_v55, %v4809_v23  ;;  %v4814_v3 = vadd.f32 %v11943_v42, %v14301_v31 }
 0x18a   : > { %v2521_v41 = vld [vmem:[#allocation2 + $0xac] sm:$0xf]  ;;  %v2522_v38 = vld [vmem:[#allocation2 + $0xb0] sm:$0x1]  ;;  %v2821_v54 = vshrl.u32 %v2520_v15, 16  ;;  %v2824_v53 = vshll.u32 %v2520_v15, 16  ;;  %v2333_v34 = vsel %vm13717_vm7, %v2331_v13, %v2332_v27  ;;  %v14539_v42 = vpop.f32.mrf.mxu1 }
 0x18b   : > { %2140 = vst [vmem:[#allocation3 + $0x394] sm:$0xf] %v2010_v4  ;;  %v2830_v11 = vshll.u32 %v2521_v41, 16  ;;  %v2834_v8 = vshrl.u32 %v2521_v41, 16  ;;  %v2840_v51 = vshll.u32 %v2522_v38, 16  ;;  %v13231_v28 = vld [vmem:[%s16855_s3 + $0x78] sm:$0xff]  }
 0x18c   : > { %v1690_v2 = vld [vmem:[#allocation2 + $0xa8] sm:$0xf]  ;;  %2412 = vst [vmem:[#allocation3 + $0x398] sm:$0xf] %v2333_v34  ;;  %v2823_v61 = vrot.slane %v2821_v54, 4  ;;  %v2826_v56 = vrot.slane %v2824_v53, 5  ;;  %12361 = vmatprep.subr.bf16.mxu1 %v13231_v28  ;;  %v14537_v53 = vpop.f32.mrf.mxu0  ;;  %v12058_v28 = vadd.f32 %v14447_v49, %v14419_v1 }
 0x18d   : > { %v1691_v50 = vld [vmem:[#allocation2 + $0xac] sm:$0xf]  ;;  %v1692_v40 = vld [vmem:[#allocation2 + $0xb0] sm:$0x1]  ;;  %16880 = vst [vmem:[#allocation14_spill] sm:$0xff] %v14532_v26  ;;  %v2832_v27 = vrot.slane %v2830_v11, 5 }
 0x18e   : > { %v2836_v14 = vrot.slane %v2834_v8, 4  ;;  %v2842_v58 = vrot.slane %v2840_v51, 5  ;;  %v2012_v18 = vshrl.u32 %v1690_v2, 16  ;;  %v2186_v33 = vld [vmem:[#allocation2 + $0xa8] sm:$0xe]  ;;  %v2827_v48 = vor.u32 %v2826_v56, %v2823_v61 }
 0x18f   : > { %v2015_v13 = vshll.u32 %v1690_v2, 16  ;;  %v2021_v7 = vshll.u32 %v1691_v50, 16  ;;  %v2025_v15 = vshrl.u32 %v1691_v50, 16  ;;  %v2187_v4 = vld [vmem:[#allocation2 + $0xac] sm:$0xf]  ;;  %v2031_v54 = vshll.u32 %v1692_v40, 16 }
 0x190   : > { %v2837_v41 = vor.u32 %v2836_v14, %v2832_v27  ;;  %v2014_v38 = vrot.slane %v2012_v18, 4  ;;  %v2188_v23 = vld [vmem:[#allocation2 + $0xb0] sm:$0x1]  ;;  %v11177_v55 = vrot.slane %v2186_v33, 9  ;;  %v13189_v11 = vld [vmem:[#allocation3 + $0x330] ss:$36 sps:$4 sm:$0xff]   ;;  %v14541_v51 = vadd.f32 %v12055_v22, %v4814_v3  ;;  %v14547_v14 = vpop.f32.mrf.mxu0  ;;  %v14549_v18 = vpop.f32.mrf.mxu1 }
 0x191   : > { %v13187_v34 = vld [vmem:[#allocation3 + $0x334] ss:$36 sps:$4 sm:$0xff]   ;;  %v2828_v8 = vrot.slane %v2827_v48, 4  ;;  %v11946_v2 = vadd.f32 %v14417_v62, %v14412_v24  ;;  %v2017_v56 = vrot.slane %v2015_v13, 5  ;;  %v2023_v50 = vrot.slane %v2021_v7, 5  ;;  %v13232_v33 = vld [vmem:[%s16855_s3 + $0x38] sm:$0xff]  }
 0x192   : > { %16881 = vst [vmem:[#allocation15_spill] sm:$0xff] %v14541_v51  ;;  %v2838_v61 = vrot.slane %v2837_v41, 4  ;;  %v2027_v40 = vrot.slane %v2025_v15, 4  ;;  %5334 = vmatprep.mubr.bf16.mxu1 %v13187_v34  ;;  %v2033_v24 = vrot.slane %v2031_v54, 5  ;;  %v2336_v62 = vrot.slane %v2187_v4, 5  ;;  %v14559_v34 = vpop.f32.mrf.mxu0  ;;  %v14561_v51 = vpop.f32.mrf.mxu1  ;;  %12362 = vmatpush3.bf16.msra.mxu1 %v13232_v33 }
 0x193   : > { %v2833_v22 = vsel %vm13709_vm5, %v2828_v8, %v2832_v27  ;;  %v2339_v3 = vrot.slane %v2188_v23, 5  ;;  %v2446_v1 = vld [vmem:[#allocation2 + $0xb4] sm:$0xf]  ;;  %5335 = vmatmul.mubr.bf16.gmra.mxu1 %v13189_v11  ;;  %v13190_v49 = vld [vmem:[#allocation3 + $0x374] ss:$36 sps:$4 sm:$0xff]   ;;  %v2018_v7 = vor.u32 %v2017_v56, %v2014_v38  ;;  %v4817_v41 = vadd.f32 %v11946_v2, %v14301_v31 }
 0x194   : > { %v13193_v48 = vld [vmem:[#allocation3 + $0x370] ss:$36 sps:$4 sm:$0xff]   ;;  %v2843_v13 = vsel %vm13709_vm5, %v2838_v61, %v2842_v58  ;;  %2972 = vst [vmem:[#allocation3 + $0x37c] sm:$0xf] %v2833_v22  ;;  %v2028_v15 = vor.u32 %v2027_v40, %v2023_v50  ;;  %2478 = vst [vmem:[#allocation3 + $0x3c0] sm:$0xf] %v2446_v1  ;;  %v2337_v27 = vsel %vm13717_vm7, %v11177_v55, %v2336_v62  ;;  %5181 = vmatprep.mubr.bf16.mxu0 %v13190_v49  ;;  %v14575_v56 = vpop.f32.mrf.mxu0 }
 0x195   : > { %2973 = vst [vmem:[#allocation3 + $0x3a0] sm:$0xf] %v2843_v13  ;;  %v2338_v4 = vrot.slane %v2336_v62, 4  ;;  %v2447_v54 = vld [vmem:[#allocation2 + $0xb8] sm:$0xf]  ;;  %v11949_v58 = vadd.f32 %v14451_v19, %v14431_v30  ;;  %v14569_v38 = vadd.f32 %v14463_v10, %v14456_v60  ;;  %v2019_v31 = vrot.slane %v2018_v7, 4  ;;  %v14577_v30 = vpop.f32.mrf.mxu1  ;;  %5182 = vmatmul.mubr.bf16.gmra.mxu0 %v13193_v48 }
 0x196   : > { %v2523_v23 = vld [vmem:[#allocation2 + $0xb4] sm:$0xf]  ;;  %v2029_v11 = vrot.slane %v2028_v15, 4  ;;  %2413 = vst [vmem:[#allocation3 + $0x3bc] sm:$0xf] %v2337_v27  ;;  %v14571_v61 = vadd.f32 %v12058_v28, %v4817_v41  ;;  %v11952_v55 = vadd.f32 %v14469_v45, %v14458_v59  ;;  %v14585_v49 = vpop.f32.mrf.mxu0 }
 0x197   : > { %2479 = vst [vmem:[#allocation3 + $0x3e4] sm:$0xf] %v2447_v54  ;;  %v2524_v8 = vld [vmem:[#allocation2 + $0xb8] sm:$0xf]  ;;  %v2525_v2 = vld [vmem:[#allocation2 + $0xbc] sm:$0x1]  ;;  %v2340_v19 = vsel %vm13717_vm7, %v2338_v4, %v2339_v3  ;;  %v2024_v22 = vsel %vm13709_vm5, %v2019_v31, %v2023_v50  ;;  %v14587_v48 = vpop.f32.mrf.mxu1 }
 0x198   : > { %16882 = vst [vmem:[#allocation16_spill] sm:$0xff] %v14571_v61  ;;  %v2845_v60 = vshrl.u32 %v2523_v23, 16  ;;  %v2848_v10 = vshll.u32 %v2523_v23, 16  ;;  %v2854_v40 = vshll.u32 %v2524_v8, 16  ;;  %v1693_v33 = vld [vmem:[#allocation2 + $0xb4] sm:$0xf]  ;;  %v2034_v28 = vsel %vm13709_vm5, %v2029_v11, %v2033_v24  ;;  %v14589_v23 = vpop.f32.mrf.mxu0 }
 0x199   : > { %2414 = vst [vmem:[#allocation3 + $0x3e0] sm:$0xf] %v2340_v19  ;;  %v2858_v59 = vshrl.u32 %v2524_v8, 16  ;;  %v2864_v45 = vshll.u32 %v2525_v2, 16  ;;  %v1694_v62 = vld [vmem:[#allocation2 + $0xb8] sm:$0xf]  ;;  %v14591_v31 = vpop.f32.mrf.mxu1 }
 0x19a   : > { %v1695_v1 = vld [vmem:[#allocation2 + $0xbc] sm:$0x1]  ;;  %2141 = vst [vmem:[#allocation3 + $0x3b8] sm:$0xf] %v2024_v22  ;;  %2142 = vst [vmem:[#allocation3 + $0x3dc] sm:$0xf] %v2034_v28  ;;  %v14600_v61 = vpop.f32.mrf.mxu0 }
 0x19b   : > { %v2847_v3 = vrot.slane %v2845_v60, 4  ;;  %v2850_v13 = vrot.slane %v2848_v10, 5  ;;  %v2856_v7 = vrot.slane %v2854_v40, 5  ;;  %v2036_v15 = vshrl.u32 %v1693_v33, 16  ;;  %v2189_v41 = vld [vmem:[#allocation2 + $0xb4] sm:$0xe] }
 0x19c   : > { %v2860_v50 = vrot.slane %v2858_v59, 4  ;;  %v2866_v27 = vrot.slane %v2864_v45, 5  ;;  %v2039_v4 = vshll.u32 %v1693_v33, 16  ;;  %v2045_v24 = vshll.u32 %v1694_v62, 16  ;;  %v2190_v54 = vld [vmem:[#allocation2 + $0xb8] sm:$0xf]  ;;  %v14604_v52 = vpop.f32.mrf.mxu0 }
 0x19d   : > { %v2851_v11 = vor.u32 %v2850_v13, %v2847_v3  ;;  %v2038_v8 = vrot.slane %v2036_v15, 4  ;;  %v2049_v2 = vshrl.u32 %v1694_v62, 16  ;;  %v2055_v19 = vshll.u32 %v1695_v1, 16  ;;  %v2191_v22 = vld [vmem:[#allocation2 + $0xbc] sm:$0x1]  ;;  %v14602_v3 = vpop.f32.mrf.mxu1 }
 0x19e   : > { %v13194_v28 = vld [vmem:[#allocation3 + $0x37c] ss:$36 sps:$4 sm:$0xff]   ;;  %v2861_v10 = vor.u32 %v2860_v50, %v2856_v7  ;;  %v2041_v40 = vrot.slane %v2039_v4, 5  ;;  %v14596_v59 = vld [vmem:[%s16854_s2] ss:$0 sm:$0xff]  ;;  %v2047_v1 = vrot.slane %v2045_v24, 5 }
 0x19f   : > { %v13196_v60 = vld [vmem:[#allocation3 + $0x378] ss:$36 sps:$4 sm:$0xff]   ;;  %v4822_v33 = vadd.f32 %v14596_v59, %v11949_v58  ;;  %v4825_v45 = vadd.f32 %v14596_v59, %v11952_v55  ;;  %v2852_v62 = vrot.slane %v2851_v11, 4  ;;  %v2051_v13 = vrot.slane %v2049_v2, 4  ;;  %5342 = vmatprep.mubr.bf16.mxu1 %v13194_v28  ;;  %v14606_v35 = vpop.f32.mrf.mxu1  ;;  %v2449_v11 = vld [vmem:[#allocation2 + $0xc4] sm:$0xf] }
 0x1a0   : > { %v2057_v15 = vrot.slane %v2055_v19, 5  ;;  %v2862_v50 = vrot.slane %v2861_v10, 4  ;;  %v2042_v4 = vor.u32 %v2041_v40, %v2038_v8  ;;  %v11178_v26 = vrot.slane %v2189_v41, 9  ;;  %5343 = vmatmul.mubr.bf16.gmra.mxu1 %v13196_v60  ;;  %v13197_v2 = vld [vmem:[#allocation3 + $0x3bc] ss:$36 sps:$4 sm:$0xff]  }
 0x1a1   : > { %v2343_v0 = vrot.slane %v2190_v54, 5  ;;  %v2857_v58 = vsel %vm13709_vm5, %v2852_v62, %v2856_v7  ;;  %v2052_v55 = vor.u32 %v2051_v13, %v2047_v1  ;;  %v2346_v39 = vrot.slane %v2191_v22, 5  ;;  %2481 = vst [vmem:[#allocation3 + $0x42c] sm:$0xf] %v2449_v11  ;;  %v14617_v7 = vpop.f32.mrf.mxu0  ;;  %v14619_v22 = vpop.f32.mrf.mxu1  ;;  %v13199_v28 = vld [vmem:[#allocation3 + $0x3b8] ss:$36 sps:$4 sm:$0xff]   ;;  %5189 = vmatprep.mubr.bf16.mxu0 %v13197_v2 }
 0x1a2   : > { %v14611_v24 = vadd.f32 %v14569_v38, %v4822_v33  ;;  %v2867_v41 = vsel %vm13709_vm5, %v2862_v50, %v2866_v27  ;;  %2974 = vst [vmem:[#allocation3 + $0x3c4] sm:$0xf] %v2857_v58  ;;  %v2043_v54 = vrot.slane %v2042_v4, 4  ;;  %v2526_v60 = vld [vmem:[#allocation2 + $0xc0] sm:$0xf]  ;;  %v12064_v27 = vadd.f32 %v14489_v9, %v14471_v16  ;;  %5190 = vmatmul.mubr.bf16.gmra.mxu0 %v13199_v28 }
 0x1a3   : > { %v2344_v8 = vsel %vm13717_vm7, %v11178_v26, %v2343_v0  ;;  %v2345_v19 = vrot.slane %v2343_v0, 4  ;;  %2975 = vst [vmem:[#allocation3 + $0x3e8] sm:$0xf] %v2867_v41  ;;  %v2053_v38 = vrot.slane %v2052_v55, 4  ;;  %v11955_v10 = vadd.f32 %v14491_v6, %v14487_v29  ;;  %v2527_v40 = vld [vmem:[#allocation2 + $0xc4] sm:$0xf]  ;;  %v14631_v50 = vpop.f32.mrf.mxu0  ;;  %v14633_v16 = vpop.f32.mrf.mxu1 }
 0x1a4   : > { %16883 = vst [vmem:[#allocation17_spill] sm:$0xff] %v14611_v24  ;;  %2415 = vst [vmem:[#allocation3 + $0x404] sm:$0xf] %v2344_v8  ;;  %v12067_v0 = vadd.f32 %v14498_v63, %v14493_v36  ;;  %v2048_v44 = vsel %vm13709_vm5, %v2043_v54, %v2047_v1  ;;  %v2528_v33 = vld [vmem:[#allocation2 + $0xc8] sm:$0x1]  ;;  %v2869_v62 = vshrl.u32 %v2526_v60, 16  ;;  %v14640_v11 = vadd.f32 %v12064_v27, %v4825_v45 }
 0x1a5   : > { %v2347_v26 = vsel %vm13717_vm7, %v2345_v19, %v2346_v39  ;;  %v2872_v13 = vshll.u32 %v2526_v60, 16  ;;  %v2058_v29 = vsel %vm13709_vm5, %v2053_v38, %v2057_v15  ;;  %2143 = vst [vmem:[#allocation3 + $0x400] sm:$0xf] %v2048_v44  ;;  %v2878_v63 = vshll.u32 %v2527_v40, 16  ;;  %v1696_v36 = vld [vmem:[#allocation2 + $0xc0] sm:$0xf]  ;;  %v14643_v15 = vpop.f32.mrf.mxu0  ;;  %v14645_v41 = vpop.f32.mrf.mxu1 }
 0x1a6   : > { %2416 = vst [vmem:[#allocation3 + $0x428] sm:$0xf] %v2347_v26  ;;  %v2882_v9 = vshrl.u32 %v2527_v40, 16  ;;  %v2888_v6 = vshll.u32 %v2528_v33, 16  ;;  %v13233_v39 = vld [vmem:[%s16855_s3 + $0x70] sm:$0xff]   ;;  %v2871_v1 = vrot.slane %v2869_v62, 4  ;;  %v4830_v2 = vadd.f32 %v14596_v59, %v11955_v10 }
 0x1a7   : > { %2144 = vst [vmem:[#allocation3 + $0x424] sm:$0xf] %v2058_v29  ;;  %v2874_v4 = vrot.slane %v2872_v13, 5  ;;  %v1697_v58 = vld [vmem:[#allocation2 + $0xc4] sm:$0xf]  ;;  %16884 = vst [vmem:[#allocation18_spill] sm:$0xff] %v14640_v11  ;;  %12363 = vmatprep.subr.bf16.mxu1 %v13233_v39  ;;  %v14647_v62 = vpop.f32.mrf.mxu0 }
 0x1a8   : > { %v1698_v55 = vld [vmem:[#allocation2 + $0xc8] sm:$0x1]  ;;  %v2880_v54 = vrot.slane %v2878_v63, 5  ;;  %v2884_v8 = vrot.slane %v2882_v9, 4  ;;  %v2890_v19 = vrot.slane %v2888_v6, 5  ;;  %v2060_v28 = vshrl.u32 %v1696_v36, 16  ;;  %v14652_v9 = vpop.f32.mrf.mxu1 }
 0x1a9   : > { %v2192_v38 = vld [vmem:[#allocation2 + $0xc0] sm:$0xe]  ;;  %v2875_v60 = vor.u32 %v2874_v4, %v2871_v1  ;;  %v2063_v44 = vshll.u32 %v1696_v36, 16  ;;  %v2069_v26 = vshll.u32 %v1697_v58, 16  ;;  %v2073_v40 = vshrl.u32 %v1697_v58, 16  ;;  %v13234_v45 = vld [vmem:[%s16855_s3 + $0x30] sm:$0xff]   ;;  %v14662_v24 = vpop.f32.mrf.mxu0 }
 0x1aa   : > { %v2193_v33 = vld [vmem:[#allocation2 + $0xc4] sm:$0xf]  ;;  %v2885_v27 = vor.u32 %v2884_v8, %v2880_v54  ;;  %v2062_v10 = vrot.slane %v2060_v28, 4  ;;  %v2079_v13 = vshll.u32 %v1698_v55, 16  ;;  %v2194_v29 = vld [vmem:[#allocation2 + $0xc8] sm:$0x1]  ;;  %v14654_v36 = vadd.f32 %v12067_v0, %v4830_v2  ;;  %12364 = vmatpush3.bf16.msra.mxu1 %v13234_v45  ;;  %v14664_v46 = vpop.f32.mrf.mxu1 }
 0x1ab   : > { %v11179_v63 = vrot.slane %v2192_v38, 9  ;;  %v13200_v6 = vld [vmem:[#allocation3 + $0x3c4] ss:$36 sps:$4 sm:$0xff]   ;;  %v2876_v1 = vrot.slane %v2875_v60, 4  ;;  %v11958_v4 = vadd.f32 %v14527_v32, %v14504_v5  ;;  %v14660_v58 = vadd.f32 %v14523_v21, %v14511_v20  ;;  %v2450_v38 = vld [vmem:[#allocation2 + $0xcc] sm:$0xf] }
 0x1ac   : > { %v13202_v39 = vld [vmem:[#allocation3 + $0x3c0] ss:$36 sps:$4 sm:$0xff]   ;;  %16885 = vst [vmem:[#allocation19_spill] sm:$0xff] %v14654_v36  ;;  %v2886_v8 = vrot.slane %v2885_v27, 4  ;;  %v2065_v28 = vrot.slane %v2063_v44, 5  ;;  %v2071_v55 = vrot.slane %v2069_v26, 5  ;;  %5350 = vmatprep.mubr.bf16.mxu1 %v13200_v6  ;;  %v14671_v27 = vpop.f32.mrf.mxu0 }
 0x1ad   : > { %v2075_v11 = vrot.slane %v2073_v40, 4  ;;  %v2881_v0 = vsel %vm13709_vm5, %v2876_v1, %v2880_v54  ;;  %v2081_v2 = vrot.slane %v2079_v13, 5  ;;  %v2350_v5 = vrot.slane %v2193_v33, 5  ;;  %v2451_v60 = vld [vmem:[#allocation2 + $0xd0] sm:$0xf]  ;;  %5351 = vmatmul.mubr.bf16.gmra.mxu1 %v13202_v39  ;;  %v14673_v54 = vpop.f32.mrf.mxu1 }
 0x1ae   : > { %v2353_v32 = vrot.slane %v2194_v29, 5  ;;  %2482 = vst [vmem:[#allocation3 + $0x450] sm:$0xf] %v2450_v38  ;;  %v13203_v20 = vld [vmem:[#allocation3 + $0x404] ss:$36 sps:$4 sm:$0xff]   ;;  %v2891_v44 = vsel %vm13709_vm5, %v2886_v8, %v2890_v19  ;;  %v2066_v26 = vor.u32 %v2065_v28, %v2062_v10  ;;  %v4833_v45 = vadd.f32 %v14596_v59, %v11958_v4  ;;  %v14683_v28 = vpop.f32.mrf.mxu0 }
 0x1af   : > { %v13206_v21 = vld [vmem:[#allocation3 + $0x400] ss:$36 sps:$4 sm:$0xff]   ;;  %2976 = vst [vmem:[#allocation3 + $0x40c] sm:$0xf] %v2881_v0  ;;  %v2076_v40 = vor.u32 %v2075_v11, %v2071_v55  ;;  %2483 = vst [vmem:[#allocation3 + $0x474] sm:$0xf] %v2451_v60  ;;  %v2351_v33 = vsel %vm13717_vm7, %v11179_v63, %v2350_v5  ;;  %v11961_v19 = vadd.f32 %v14547_v14, %v14537_v53  ;;  %5197 = vmatprep.mubr.bf16.mxu0 %v13203_v20  ;;  %v14685_v63 = vpop.f32.mrf.mxu1 }
 0x1b0   : > { %2977 = vst [vmem:[#allocation3 + $0x430] sm:$0xf] %v2891_v44  ;;  %v2352_v13 = vrot.slane %v2350_v5, 4  ;;  %v2529_v29 = vld [vmem:[#allocation2 + $0xcc] sm:$0xf]  ;;  %v14681_v11 = vadd.f32 %v14539_v42, %v14535_v17  ;;  %v2067_v10 = vrot.slane %v2066_v26, 4  ;;  %5198 = vmatmul.mubr.bf16.gmra.mxu0 %v13206_v21  ;;  %v14693_v44 = vpop.f32.mrf.mxu0 }
 0x1b1   : > { %v2530_v6 = vld [vmem:[#allocation2 + $0xd0] sm:$0xf]  ;;  %v2077_v39 = vrot.slane %v2076_v40, 4  ;;  %2417 = vst [vmem:[#allocation3 + $0x44c] sm:$0xf] %v2351_v33  ;;  %v2893_v4 = vshrl.u32 %v2529_v29, 16 }
 0x1b2   : > { %v2531_v1 = vld [vmem:[#allocation2 + $0xd4] sm:$0x1]  ;;  %v2896_v8 = vshll.u32 %v2529_v29, 16  ;;  %v2354_v38 = vsel %vm13717_vm7, %v2352_v13, %v2353_v32  ;;  %v2902_v53 = vshll.u32 %v2530_v6, 16  ;;  %v2906_v14 = vshrl.u32 %v2530_v6, 16 }
 0x1b3   : > { %v2912_v0 = vshll.u32 %v2531_v1, 16  ;;  %v2072_v17 = vsel %vm13709_vm5, %v2067_v10, %v2071_v55  ;;  %v2082_v42 = vsel %vm13709_vm5, %v2077_v39, %v2081_v2  ;;  %2418 = vst [vmem:[#allocation3 + $0x470] sm:$0xf] %v2354_v38  ;;  %v2895_v5 = vrot.slane %v2893_v4, 4  ;;  %v7757_v20 = vld [vmem:[#allocation2 + $0xcc] sm:$0xf]  ;;  %v14695_v1 = vpop.f32.mrf.mxu0  ;;  %v14697_v2 = vpop.f32.mrf.mxu1 }
 0x1b4   : > { %v2898_v60 = vrot.slane %v2896_v8, 5  ;;  %2145 = vst [vmem:[#allocation3 + $0x448] sm:$0xf] %v2072_v17  ;;  %2146 = vst [vmem:[#allocation3 + $0x46c] sm:$0xf] %v2082_v42  ;;  %v2904_v21 = vrot.slane %v2902_v53, 5  ;;  %v14700_v17 = vadd.f32 %v14660_v58, %v4833_v45  ;;  %v4838_v42 = vadd.f32 %v14596_v59, %v11961_v19 }
 0x1b5   : > { %v2908_v26 = vrot.slane %v2906_v14, 4  ;;  %v2914_v32 = vrot.slane %v2912_v0, 5  ;;  %v7758_v40 = vld [vmem:[#allocation2 + $0xd0] sm:$0xf]  ;;  %v8121_v33 = vshrl.u32 %v7757_v20, 16  ;;  %v8124_v6 = vshll.u32 %v7757_v20, 16  ;;  %v14707_v20 = vpop.f32.mrf.mxu0 }
 0x1b6   : > { %v2899_v13 = vor.u32 %v2898_v60, %v2895_v5  ;;  %v7759_v29 = vld [vmem:[#allocation2 + $0xd4] sm:$0x1]  ;;  %v8130_v55 = vshll.u32 %v7758_v40, 16  ;;  %v8134_v10 = vshrl.u32 %v7758_v40, 16  ;;  %v2980_v38 = vld [vmem:[#allocation2 + $0x18] sm:$0xe]  ;;  %v11964_v5 = vadd.f32 %v14575_v56, %v14559_v34 }
 0x1b7   : > { %v2909_v39 = vor.u32 %v2908_v26, %v2904_v21  ;;  %v8123_v4 = vrot.slane %v8121_v33, 4  ;;  %v8140_v8 = vshll.u32 %v7759_v29, 16  ;;  %16886 = vst [vmem:[#allocation20_spill] sm:$0xff] %v14700_v17  ;;  %v13207_v53 = vld [vmem:[#allocation3 + $0x40c] ss:$36 sps:$4 sm:$0xff]   ;;  %v12076_v60 = vadd.f32 %v14561_v51, %v14549_v18  ;;  %v14709_v26 = vpop.f32.mrf.mxu1  ;;  %v14717_v51 = vpop.f32.mrf.mxu0 }
 0x1b8   : > { %v13209_v14 = vld [vmem:[#allocation3 + $0x408] ss:$36 sps:$4 sm:$0xff]   ;;  %v2900_v0 = vrot.slane %v2899_v13, 4  ;;  %v8126_v33 = vrot.slane %v8124_v6, 5  ;;  %v14711_v29 = vrot.slane %v8130_v55, 5  ;;  %v8136_v58 = vrot.slane %v8134_v10, 4  ;;  %5358 = vmatprep.mubr.bf16.mxu1 %v13207_v53 }
 0x1b9   : > { %v2910_v40 = vrot.slane %v2909_v39, 4  ;;  %v2981_v45 = vld [vmem:[#allocation2 + $0x1c] sm:$0xf]  ;;  %v14715_v13 = vrot.slane %v8140_v8, 5  ;;  %v2982_v34 = vld [vmem:[#allocation2 + $0x20] sm:$0x1]  ;;  %v14719_v18 = vpop.f32.mrf.mxu1  ;;  %5359 = vmatmul.mubr.bf16.gmra.mxu1 %v13209_v14  ;;  %v14727_v36 = vadd.f32 %v14681_v11, %v4838_v42  ;;  %v14729_v14 = vpop.f32.mrf.mxu0 }
 0x1ba   : > { %v2905_v19 = vsel %vm13709_vm5, %v2900_v0, %v2904_v21  ;;  %v11180_v56 = vrot.slane %v2980_v38, 9  ;;  %v3078_v17 = vrot.slane %v2981_v45, 5  ;;  %v8127_v55 = vor.u32 %v8126_v33, %v8123_v4  ;;  %v2983_v53 = vld [vmem:[#allocation2 + $0x24] sm:$0xe]  ;;  %v2984_v21 = vld [vmem:[#allocation2 + $0x28] sm:$0xf] }
 0x1bb   : > { %v2915_v6 = vsel %vm13709_vm5, %v2910_v40, %v2914_v32  ;;  %2978 = vst [vmem:[#allocation3 + $0x454] sm:$0xf] %v2905_v19  ;;  %v8137_v10 = vor.u32 %v8136_v58, %v14711_v29  ;;  %v3081_v39 = vrot.slane %v2982_v34, 5  ;;  %v13210_v8 = vld [vmem:[#allocation3 + $0x44c] ss:$36 sps:$4 sm:$0xff]   ;;  %v11181_v45 = vrot.slane %v2983_v53, 9  ;;  %v14731_v32 = vpop.f32.mrf.mxu1 }
 0x1bc   : > { %2979 = vst [vmem:[#allocation3 + $0x478] sm:$0xf] %v2915_v6  ;;  %v3079_v38 = vsel %vm13717_vm7, %v11180_v56, %v3078_v17  ;;  %v3080_v0 = vrot.slane %v3078_v17, 4  ;;  %16887 = vst [vmem:[#allocation21_spill] sm:$0xff] %v14727_v36  ;;  %v13212_v4 = vld [vmem:[#allocation3 + $0x448] ss:$36 sps:$4 sm:$0xff]   ;;  %v4841_v19 = vadd.f32 %v14596_v59, %v11964_v5  ;;  %v11967_v34 = vadd.f32 %v14589_v23, %v14585_v49 }
 0x1bd   : > { %v8128_v40 = vrot.slane %v8127_v55, 4  ;;  %v8138_v33 = vrot.slane %v8137_v10, 4  ;;  %3220 = vst [vmem:[#allocation3 + $0x20] sm:$0xf] %v3079_v38  ;;  %v2985_v58 = vld [vmem:[#allocation2 + $0x2c] sm:$0x1]  ;;  %5205 = vmatprep.mubr.bf16.mxu0 %v13210_v8  ;;  %v12079_v53 = vadd.f32 %v14587_v48, %v14577_v30  ;;  %v14746_v38 = vpop.f32.mrf.mxu0 }
 0x1be   : > { %v3082_v17 = vsel %vm13717_vm7, %v3080_v0, %v3081_v39  ;;  %v3085_v11 = vrot.slane %v2984_v21, 5  ;;  %v3088_v42 = vrot.slane %v2985_v58, 5  ;;  %v2986_v56 = vld [vmem:[#allocation2 + $0x30] sm:$0xe]  ;;  %v2987_v6 = vld [vmem:[#allocation2 + $0x34] sm:$0xf]  ;;  %5206 = vmatmul.mubr.bf16.gmra.mxu0 %v13212_v4  ;;  %v14750_v36 = vadd.f32 %v12076_v60, %v4841_v19 }
 0x1bf   : > { %v7678_v55 = vld [vmem:[#allocation2 + $0xcc] sm:$0xf]  ;;  %v7679_v10 = vld [vmem:[#allocation2 + $0xd0] sm:$0xf]  ;;  %v8133_v5 = vsel %vm13709_vm5, %v8128_v40, %v14711_v29  ;;  %v8143_v49 = vsel %vm13709_vm5, %v8138_v33, %v14715_v13  ;;  %3221 = vst [vmem:[#allocation3 + $0x44] sm:$0xf] %v3082_v17  ;;  %v14752_v29 = vpop.f32.mrf.mxu1 }
 0x1c0   : > { %v2988_v23 = vld [vmem:[#allocation2 + $0x38] sm:$0x1]  ;;  %v11182_v39 = vrot.slane %v2986_v56, 9  ;;  %v3092_v21 = vrot.slane %v2987_v6, 5  ;;  %v2989_v8 = vld [vmem:[#allocation2 + $0x3c] sm:$0xe]  ;;  %v3086_v30 = vsel %vm13717_vm7, %v11181_v45, %v3085_v11  ;;  %v14756_v6 = vpop.f32.mrf.mxu0 }
 0x1c1   : > { %v3087_v48 = vrot.slane %v3085_v11, 4  ;;  %v3095_v0 = vrot.slane %v2988_v23, 5  ;;  %v2990_v4 = vld [vmem:[#allocation2 + $0x40] sm:$0xf]  ;;  %v2991_v58 = vld [vmem:[#allocation2 + $0x44] sm:$0x1] }
 0x1c2   : > { %16888 = vst [vmem:[#allocation22_spill] sm:$0xff] %v14750_v36  ;;  %3222 = vst [vmem:[#allocation3 + $0x68] sm:$0xf] %v3086_v30  ;;  %v3093_v13 = vsel %vm13717_vm7, %v11182_v39, %v3092_v21  ;;  %v3094_v40 = vrot.slane %v3092_v21, 4  ;;  %v11183_v33 = vrot.slane %v2989_v8, 9  ;;  %v3099_v17 = vrot.slane %v2990_v4, 5  ;;  %v14766_v8 = vpop.f32.mrf.mxu1 }
 0x1c3   : > { %v2992_v56 = vld [vmem:[#allocation2 + $0x48] sm:$0xe]  ;;  %v3089_v60 = vsel %vm13717_vm7, %v3087_v48, %v3088_v42  ;;  %3224 = vst [vmem:[#allocation3 + $0xb0] sm:$0xf] %v3093_v13  ;;  %v3102_v19 = vrot.slane %v2991_v58, 5  ;;  %v4846_v39 = vadd.f32 %v14596_v59, %v11967_v34  ;;  %v11970_v21 = vadd.f32 %v14604_v52, %v14600_v61  ;;  %v3410_v4 = vld [vmem:[#allocation3 + $0x474] sm:$0xff]  ;;  %v14772_v13 = vpop.f32.mrf.mxu0 }
 0x1c4   : > { %v13235_v45 = vld [vmem:[%s16855_s3 + $0x68] sm:$0xff]   ;;  %v2994_v30 = vld [vmem:[#allocation2 + $0x50] sm:$0x1]  ;;  %3223 = vst [vmem:[#allocation3 + $0x8c] sm:$0xf] %v3089_v60  ;;  %v3096_v36 = vsel %vm13717_vm7, %v3094_v40, %v3095_v0  ;;  %v3100_v42 = vsel %vm13717_vm7, %v11183_v33, %v3099_v17  ;;  %v3101_v48 = vrot.slane %v3099_v17, 4  ;;  %v14779_v17 = vpop.f32.mrf.mxu1 }
 0x1c5   : > { %v3405_v11 = vld [vmem:[#allocation3 + $0x450] sm:$0xff]  ;;  %v11184_v58 = vrot.slane %v2992_v56, 9  ;;  %12365 = vmatprep.subr.bf16.mxu1 %v13235_v45  ;;  %7711 = vst [vmem:[#allocation3 + $0x474] sm:$0xf] %v7679_v10  ;;  %3225 = vst [vmem:[#allocation3 + $0xd4] sm:$0xf] %v3096_v36  ;;  %v14777_v33 = vadd.f32 %v12079_v53, %v4846_v39  ;;  %v4849_v10 = vadd.f32 %v14596_v59, %v11970_v21 }
 0x1c6   : > { %v2993_v23 = vld [vmem:[#allocation2 + $0x4c] sm:$0xf]  ;;  %7710 = vst [vmem:[#allocation3 + $0x450] sm:$0xf] %v7678_v55  ;;  %v11338_v61 = vcombine.low %v3405_v11, %v3410_v4  ;;  %3226 = vst [vmem:[#allocation3 + $0xf8] sm:$0xf] %v3100_v42  ;;  %v3103_v56 = vsel %vm13717_vm7, %v3101_v48, %v3102_v19  ;;  %v12082_v36 = vadd.f32 %v14602_v3, %v14591_v31  ;;  %v14790_v19 = vpop.f32.mrf.mxu0 }
 0x1c7   : > { %v13213_v57 = vld [vmem:[#allocation3 + $0x454] ss:$36 sps:$4 sm:$0xff]   ;;  %v3106_v34 = vrot.slane %v2993_v23, 5  ;;  %v3109_v0 = vrot.slane %v2994_v30, 5  ;;  %v2995_v40 = vld [vmem:[#allocation2 + $0x54] sm:$0xe]  ;;  %v11973_v11 = vadd.f32 %v14631_v50, %v14617_v7  ;;  %v12085_v31 = vadd.f32 %v14619_v22, %v14606_v35 }
 0x1c8   : > { %v13236_v52 = vld [vmem:[%s16855_s3 + $0x28] sm:$0xff]   ;;  %8206 = vst [vmem:[#allocation3 + $0x454] sm:$0xf] %v8133_v5  ;;  %8207 = vst [vmem:[#allocation3 + $0x478] sm:$0xf] %v8143_v49  ;;  %5366 = vmatprep.mubr.bf16.mxu1 %v13213_v57  ;;  %v11185_v55 = vrot.slane %v2995_v40, 9  ;;  %v14792_v21 = vadd.f32 %v12082_v36, %v4849_v10  ;;  %v11976_v3 = vadd.f32 %v14647_v62, %v14643_v15 }
 0x1c9   : > { %v2996_v45 = vld [vmem:[#allocation2 + $0x58] sm:$0xf]  ;;  %v2997_v60 = vld [vmem:[#allocation2 + $0x5c] sm:$0x1]  ;;  %12366 = vmatpush3.bf16.msra.mxu1 %v13236_v52  ;;  %3227 = vst [vmem:[#allocation3 + $0x11c] sm:$0xf] %v3103_v56  ;;  %v3107_v53 = vsel %vm13717_vm7, %v11184_v58, %v3106_v34  ;;  %v14802_v58 = vpop.f32.mrf.mxu1  ;;  %v4854_v22 = vadd.f32 %v14596_v59, %v11973_v11  ;;  %v12088_v40 = vadd.f32 %v14645_v41, %v14633_v16 }
 0x1ca   : > { %5367 = vmatmul.mubr.bf16.gmra.mxu1 %v11338_v61  ;;  %v13215_v5 = vld [vmem:[#allocation3 + $0x20] ss:$36 sps:$4 sm:$0xff]   ;;  %v3108_v49 = vrot.slane %v3106_v34, 4  ;;  %v3113_v57 = vrot.slane %v2996_v45, 5  ;;  %3228 = vst [vmem:[#allocation3 + $0x140] sm:$0xf] %v3107_v53  ;;  %v4857_v15 = vadd.f32 %v14596_v59, %v11976_v3  ;;  %v11979_v56 = vadd.f32 %v14671_v27, %v14662_v24 }
 0x1cb   : > { %v3116_v23 = vrot.slane %v2997_v60, 5  ;;  %v2998_v30 = vld [vmem:[#allocation2 + $0x60] sm:$0xe]  ;;  %v2999_v39 = vld [vmem:[#allocation2 + $0x64] sm:$0xf]  ;;  %12849 = vmatprep.mubr.bf16.mxu0 %v13215_v5  ;;  %v12091_v45 = vadd.f32 %v14664_v46, %v14652_v9  ;;  %v14814_v60 = vpop.f32.mrf.mxu0  ;;  %v14818_v36 = vadd.f32 %v12085_v31, %v4854_v22  ;;  %v11982_v5 = vadd.f32 %v14693_v44, %v14683_v28 }
 0x1cc   : > { %v3110_v4 = vsel %vm13717_vm7, %v3108_v49, %v3109_v0  ;;  %v3114_v7 = vsel %vm13717_vm7, %v11185_v55, %v3113_v57  ;;  %v3115_v50 = vrot.slane %v3113_v57, 4  ;;  %v3000_v42 = vld [vmem:[#allocation2 + $0x68] sm:$0x1]  ;;  %v11186_v48 = vrot.slane %v2998_v30, 9  ;;  %v3001_v35 = vld [vmem:[#allocation2 + $0x6c] sm:$0xe]  ;;  %v14828_v49 = vpop.f32.mrf.mxu1 }
 0x1cd   : > { %3229 = vst [vmem:[#allocation3 + $0x164] sm:$0xf] %v3110_v4  ;;  %3230 = vst [vmem:[#allocation3 + $0x188] sm:$0xf] %v3114_v7  ;;  %v3120_v52 = vrot.slane %v2999_v39, 5  ;;  %v3123_v61 = vrot.slane %v3000_v42, 5  ;;  %v12094_v16 = vadd.f32 %v14685_v63, %v14673_v54  ;;  %v14824_v27 = vadd.f32 %v12088_v40, %v4857_v15  ;;  %v14826_v53 = vpop.f32.mrf.mxu0 }
 0x1ce   : > { %v13216_v62 = vld [vmem:[#allocation3 + $0x68] ss:$36 sps:$4 sm:$0xff]   ;;  %v3117_v34 = vsel %vm13717_vm7, %v3115_v50, %v3116_v23  ;;  %v3002_v0 = vld [vmem:[#allocation2 + $0x70] sm:$0xf]  ;;  %v13217_v55 = vld [vmem:[#allocation3 + $0xb0] ss:$36 sps:$4 sm:$0xff]   ;;  %v4862_v11 = vadd.f32 %v14596_v59, %v11979_v56  ;;  %v4865_v28 = vadd.f32 %v14596_v59, %v11982_v5  ;;  %v11985_v54 = vadd.f32 %v14707_v20, %v14695_v1  ;;  %v12108_v4 = vpop.f32.mrf.mxu1 }
 0x1cf   : > { %3231 = vst [vmem:[#allocation3 + $0x1ac] sm:$0xf] %v3117_v34  ;;  %v3121_v10 = vsel %vm13717_vm7, %v11186_v48, %v3120_v52  ;;  %12850 = vmatmul.mubr.bf16.vlgmr.msra.gmra.mxu0 %v13216_v62  ;;  %v3122_v24 = vrot.slane %v3120_v52, 4  ;;  %v3003_v41 = vld [vmem:[#allocation2 + $0x74] sm:$0x1]  ;;  %v11187_v46 = vrot.slane %v3001_v35, 9  ;;  %v12097_v31 = vadd.f32 %v14709_v26, %v14697_v2  ;;  %v11998_v3 = vpop.f32.mrf.mxu0 }
 0x1d0   : > { %3232 = vst [vmem:[#allocation3 + $0x1d0] sm:$0xf] %v3121_v10  ;;  %v3127_v9 = vrot.slane %v3002_v0, 5  ;;  %12853 = vmatprep.mubr.bf16.mxu0 %v13217_v55  ;;  %v3130_v57 = vrot.slane %v3003_v41, 5  ;;  %v13218_v63 = vld [vmem:[#allocation3 + $0xf8] ss:$36 sps:$4 sm:$0xff]   ;;  %v14840_v1 = vadd.f32 %v12091_v45, %v4862_v11  ;;  %v14842_v20 = vadd.f32 %v12094_v16, %v4865_v28  ;;  %v12110_v15 = vpop.f32.mrf.mxu1 }
 0x1d1   : > { %v3124_v44 = vsel %vm13717_vm7, %v3122_v24, %v3123_v61  ;;  %v3004_v39 = vld [vmem:[#allocation2 + $0x78] sm:$0xe]  ;;  %v3005_v7 = vld [vmem:[#allocation2 + $0x7c] sm:$0xf]  ;;  %v3006_v50 = vld [vmem:[#allocation2 + $0x80] sm:$0x1]  ;;  %v4870_v48 = vadd.f32 %v14596_v59, %v11985_v54  ;;  %v11988_v2 = vadd.f32 %v14729_v14, %v14717_v51  ;;  %v12100_v26 = vadd.f32 %v14731_v32, %v14719_v18  ;;  %v11999_v22 = vpop.f32.mrf.mxu0 }
 0x1d2   : > { %v3128_v23 = vsel %vm13717_vm7, %v11187_v46, %v3127_v9  ;;  %v3129_v30 = vrot.slane %v3127_v9, 4  ;;  %3233 = vst [vmem:[#allocation3 + $0x1f4] sm:$0xf] %v3124_v44  ;;  %v11188_v42 = vrot.slane %v3004_v39, 9  ;;  %v11991_v35 = vadd.f32 %v14756_v6, %v14746_v38  ;;  %v3007_v0 = vld [vmem:[#allocation2 + $0x84] sm:$0xe] }
 0x1d3   : > { %3234 = vst [vmem:[#allocation3 + $0x218] sm:$0xf] %v3128_v23  ;;  %v3134_v62 = vrot.slane %v3005_v7, 5  ;;  %v3137_v34 = vrot.slane %v3006_v50, 5  ;;  %v3008_v40 = vld [vmem:[#allocation2 + $0x88] sm:$0xf]  ;;  %v14853_v56 = vadd.f32 %v12097_v31, %v4870_v48  ;;  %v12103_v45 = vadd.f32 %v14766_v8, %v14752_v29  ;;  %v12129_v46 = vpop.f32.mrf.mxu0 }
 0x1d4   : > { %v13219_v52 = vld [vmem:[#allocation3 + $0x140] ss:$36 sps:$4 sm:$0xff]   ;;  %v3131_v61 = vsel %vm13717_vm7, %v3129_v30, %v3130_v57  ;;  %v3009_v55 = vld [vmem:[#allocation2 + $0x8c] sm:$0x1]  ;;  %v4873_v51 = vadd.f32 %v14596_v59, %v11988_v2  ;;  %v4878_v18 = vadd.f32 %v14596_v59, %v11991_v35  ;;  %v11994_v14 = vadd.f32 %v14790_v19, %v14772_v13  ;;  %v3010_v8 = vld [vmem:[#allocation2 + $0x90] sm:$0xe]  ;;  %v12111_v19 = vpop.f32.mrf.mxu1 }
 0x1d5   : > { %3235 = vst [vmem:[#allocation3 + $0x23c] sm:$0xf] %v3131_v61  ;;  %v12106_v32 = vadd.f32 %v14802_v58, %v14779_v17  ;;  %v3135_v38 = vsel %vm13717_vm7, %v11188_v42, %v3134_v62  ;;  %v3136_v6 = vrot.slane %v3134_v62, 4  ;;  %v11189_v10 = vrot.slane %v3007_v0, 9  ;;  %v3011_v16 = vld [vmem:[#allocation2 + $0x94] sm:$0xf]  ;;  %v12130_v39 = vpop.f32.mrf.mxu0 }
 0x1d6   : > { %v3141_v5 = vrot.slane %v3008_v40, 5  ;;  %3236 = vst [vmem:[#allocation3 + $0x260] sm:$0xf] %v3135_v38  ;;  %v3144_v29 = vrot.slane %v3009_v55, 5  ;;  %v14865_v24 = vadd.f32 %v12100_v26, %v4873_v51  ;;  %v14867_v41 = vadd.f32 %v12103_v45, %v4878_v18  ;;  %v3012_v57 = vld [vmem:[#allocation2 + $0x98] sm:$0x1] }
 0x1d7   : > { %12854 = vmatmul.mubr.bf16.gmra.mxu0 %v13218_v63  ;;  %v4881_v13 = vadd.f32 %v14596_v59, %v11994_v14  ;;  %v3138_v17 = vsel %vm13717_vm7, %v3136_v6, %v3137_v34  ;;  %v11190_v11 = vrot.slane %v3010_v8, 9  ;;  %v3013_v28 = vld [vmem:[#allocation2 + $0x9c] sm:$0xe]  ;;  %v13220_v54 = vld [vmem:[#allocation3 + $0x188] ss:$36 sps:$4 sm:$0xff]   ;;  %v11997_v44 = vadd.f32 %v14826_v53, %v14814_v60  ;;  %v12132_v53 = vpop.f32.mrf.mxu0 }
 0x1d8   : > { %12857 = vmatprep.mubr.bf16.mxu0 %v13219_v52  ;;  %v3142_v58 = vsel %vm13717_vm7, %v11189_v10, %v3141_v5  ;;  %v3143_v9 = vrot.slane %v3141_v5, 4  ;;  %3237 = vst [vmem:[#allocation3 + $0x284] sm:$0xf] %v3138_v17  ;;  %v12109_v23 = vadd.f32 %v12108_v4, %v14828_v49  ;;  %v12000_v30 = vadd.f32 %v11999_v22, %v11998_v3  ;;  %v3014_v42 = vld [vmem:[#allocation2 + $0xa0] sm:$0xf] }
 0x1d9   : > { %3238 = vst [vmem:[#allocation3 + $0x2a8] sm:$0xf] %v3142_v58  ;;  %v14874_v63 = vadd.f32 %v12106_v32, %v4881_v13  ;;  %v3148_v7 = vrot.slane %v3011_v16, 5  ;;  %v3151_v50 = vrot.slane %v3012_v57, 5  ;;  %v3015_v48 = vld [vmem:[#allocation2 + $0xa4] sm:$0x1]  ;;  %v12112_v52 = vadd.f32 %v12111_v19, %v12110_v15  ;;  %v12133_v51 = vpop.f32.mrf.mxu0 }
 0x1da   : > { %v3145_v31 = vsel %vm13717_vm7, %v3143_v9, %v3144_v29  ;;  %v13221_v61 = vld [vmem:[#allocation3 + $0x1d0] ss:$36 sps:$4 sm:$0xff]   ;;  %v11191_v2 = vrot.slane %v3013_v28, 9  ;;  %v3155_v26 = vrot.slane %v3014_v42, 5  ;;  %v4886_v35 = vadd.f32 %v14596_v59, %v11997_v44  ;;  %v3018_v40 = vld [vmem:[#allocation2 + $0xb0] sm:$0x1]  ;;  %v14908_v44 = vpop.f32.mrf.mxu1 }
 0x1db   : > { %3239 = vst [vmem:[#allocation3 + $0x2cc] sm:$0xf] %v3145_v31  ;;  %v4889_v60 = vadd.f32 %v14596_v59, %v12000_v30  ;;  %v3149_v49 = vsel %vm13717_vm7, %v11190_v11, %v3148_v7  ;;  %v3150_v3 = vrot.slane %v3148_v7, 4  ;;  %v3158_v4 = vrot.slane %v3015_v48, 5  ;;  %v3016_v22 = vld [vmem:[#allocation2 + $0xa8] sm:$0xe] }
 0x1dc   : > { %v3017_v62 = vld [vmem:[#allocation2 + $0xac] sm:$0xf]  ;;  %v12131_v34 = vadd.f32 %v12130_v39, %v12129_v46  ;;  %3240 = vst [vmem:[#allocation3 + $0x2f0] sm:$0xf] %v3149_v49  ;;  %v3156_v15 = vsel %vm13717_vm7, %v11191_v2, %v3155_v26  ;;  %v3157_v0 = vrot.slane %v3155_v26, 4  ;;  %v11192_v45 = vrot.slane %v3016_v22, 9  ;;  %v14915_v48 = vpop.f32.mrf.mxu1  ;;  %v12135_v26 = vpop.f32.mrf.mxu0 }
 0x1dd   : > { %v3162_v55 = vrot.slane %v3017_v62, 5  ;;  %v13237_v59 = vld [vmem:[%s16855_s3 + $0x60] sm:$0xff]   ;;  %v3152_v18 = vsel %vm13717_vm7, %v3150_v3, %v3151_v50  ;;  %3242 = vst [vmem:[#allocation3 + $0x338] sm:$0xf] %v3156_v15  ;;  %v3165_v14 = vrot.slane %v3018_v40, 5  ;;  %v14892_v38 = vadd.f32 %v12109_v23, %v4886_v35 }
 0x1de   : > { %v3019_v32 = vld [vmem:[#allocation2 + $0xb4] sm:$0xe]  ;;  %v14894_v6 = vadd.f32 %v12112_v52, %v4889_v60  ;;  %v13238_v10 = vld [vmem:[%s16855_s3 + $0x20] sm:$0xff]   ;;  %3241 = vst [vmem:[#allocation3 + $0x314] sm:$0xf] %v3152_v18  ;;  %v3159_v5 = vsel %vm13717_vm7, %v3157_v0, %v3158_v4  ;;  %12367 = vmatprep.subr.bf16.mxu1 %v13237_v59  ;;  %v14904_v46 = vadd.f32 %v12131_v34, %v14318_v37  ;;  %v14921_v3 = vpop.f32.mrf.mxu1  ;;  %v12136_v22 = vpop.f32.mrf.mxu0 }
 0x1df   : > { %12858 = vmatmul.mubr.bf16.gmra.mxu0 %v13220_v54  ;;  %v3163_v29 = vsel %vm13717_vm7, %v11192_v45, %v3162_v55  ;;  %v3164_v8 = vrot.slane %v3162_v55, 4  ;;  %v3020_v16 = vld [vmem:[#allocation2 + $0xb8] sm:$0xf]  ;;  %v3021_v13 = vld [vmem:[#allocation2 + $0xbc] sm:$0x1]  ;;  %v11193_v19 = vrot.slane %v3019_v32, 9  ;;  %v12134_v17 = vadd.f32 %v12133_v51, %v12132_v53  ;;  %12368 = vmatpush3.bf16.msra.mxu1 %v13238_v10 }
 0x1e0   : > { %12861 = vmatprep.mubr.bf16.mxu0 %v13221_v61  ;;  %3243 = vst [vmem:[#allocation3 + $0x35c] sm:$0xf] %v3159_v5  ;;  %3244 = vst [vmem:[#allocation3 + $0x380] sm:$0xf] %v3163_v29  ;;  %v13222_v58 = vld [vmem:[#allocation3 + $0x218] ss:$36 sps:$4 sm:$0xff]   ;;  %v14927_v15 = vpop.f32.mrf.mxu1  ;;  %v12137_v0 = vadd.f32 %v12136_v22, %v12135_v26  ;;  %v12138_v51 = vpop.f32.mrf.mxu0 }
 0x1e1   : > { %v3166_v9 = vsel %vm13717_vm7, %v3164_v8, %v3165_v14  ;;  %v3169_v57 = vrot.slane %v3020_v16, 5  ;;  %v3172_v11 = vrot.slane %v3021_v13, 5  ;;  %v3022_v28 = vld [vmem:[#allocation2 + $0xc0] sm:$0xe]  ;;  %v3023_v54 = vld [vmem:[#allocation2 + $0xc4] sm:$0xf]  ;;  %v14911_v39 = vadd.f32 %v12134_v17, %v14339_v47 }
 0x1e2   : > { %v13223_v23 = vld [vmem:[#allocation3 + $0x260] ss:$36 sps:$4 sm:$0xff]   ;;  %3245 = vst [vmem:[#allocation3 + $0x3a4] sm:$0xf] %v3166_v9  ;;  %v3024_v30 = vld [vmem:[#allocation2 + $0xc8] sm:$0x1]  ;;  %v14930_v14 = vadd.f32 %v12137_v0, %v14342_v43  ;;  %v12139_v8 = vpop.f32.mrf.mxu0  ;;  %v14934_v16 = vpop.f32.mrf.mxu1 }
 0x1e3   : > { %v3170_v37 = vsel %vm13717_vm7, %v11193_v19, %v3169_v57  ;;  %v3171_v31 = vrot.slane %v3169_v57, 4  ;;  %v11194_v7 = vrot.slane %v3022_v28, 9  ;;  %v3176_v50 = vrot.slane %v3023_v54, 5  ;;  %v3025_v42 = vld [vmem:[#allocation2 + $0xcc] sm:$0xe] }
 0x1e4   : > { %3246 = vst [vmem:[#allocation3 + $0x3c8] sm:$0xf] %v3170_v37  ;;  %v3179_v52 = vrot.slane %v3024_v30, 5  ;;  %v3026_v61 = vld [vmem:[#allocation2 + $0xd0] sm:$0xf]  ;;  %v11195_v2 = vrot.slane %v3025_v42, 9  ;;  %v12140_v13 = vadd.f32 %v12139_v8, %v12138_v51  ;;  %v12141_v57 = vpop.f32.mrf.mxu0 }
 0x1e5   : > { %v3173_v35 = vsel %vm13717_vm7, %v3171_v31, %v3172_v11  ;;  %v3177_v47 = vsel %vm13717_vm7, %v11194_v7, %v3176_v50  ;;  %v3178_v60 = vrot.slane %v3176_v50, 4  ;;  %v3027_v53 = vld [vmem:[#allocation2 + $0xd4] sm:$0x1]  ;;  %v3183_v49 = vrot.slane %v3026_v61, 5  ;;  %v8253_v45 = vld [vmem:[#allocation2 + $0xcc] sm:$0xe] }
 0x1e6   : > { %3247 = vst [vmem:[#allocation3 + $0x3ec] sm:$0xf] %v3173_v35  ;;  %3248 = vst [vmem:[#allocation3 + $0x410] sm:$0xf] %v3177_v47  ;;  %v3186_v4 = vrot.slane %v3027_v53, 5  ;;  %v11508_v5 = vrot.slane %v8253_v45, 9  ;;  %v14939_v9 = vadd.f32 %v12140_v13, %v14375_v25 }
 0x1e7   : > { %12862 = vmatmul.mubr.bf16.gmra.mxu0 %v13222_v58  ;;  %v3180_v62 = vsel %vm13717_vm7, %v3178_v60, %v3179_v52  ;;  %v3184_v34 = vsel %vm13717_vm7, %v11195_v2, %v3183_v49  ;;  %v3185_v40 = vrot.slane %v3183_v49, 4  ;;  %v8254_v55 = vld [vmem:[#allocation2 + $0xd0] sm:$0xf]  ;;  %v13224_v59 = vld [vmem:[#allocation3 + $0x2a8] ss:$36 sps:$4 sm:$0xff]   ;;  %v14936_v58 = vpop.f32.mrf.mxu1  ;;  %v13239_v52 = vld [vmem:[%s16855_s3 + $0x58] sm:$0xff]  }
 0x1e8   : > { %12865 = vmatprep.mubr.bf16.mxu0 %v13223_v23  ;;  %3249 = vst [vmem:[#allocation3 + $0x434] sm:$0xf] %v3180_v62  ;;  %3250 = vst [vmem:[#allocation3 + $0x458] sm:$0xf] %v3184_v34  ;;  %v8255_v18 = vld [vmem:[#allocation2 + $0xd4] sm:$0x1]  ;;  %v12142_v23 = vpop.f32.mrf.mxu0  ;;  %12369 = vmatprep.subr.bf16.mxu1 %v13239_v52 }
 0x1e9   : > { %v13225_v32 = vld [vmem:[#allocation3 + $0x2f0] ss:$36 sps:$4 sm:$0xff]   ;;  %v3187_v10 = vsel %vm13717_vm7, %v3185_v40, %v3186_v4  ;;  %v8411_v29 = vrot.slane %v8254_v55, 5  ;;  %v8414_v17 = vrot.slane %v8255_v18, 5  ;;  %16889 = vst [vmem:[#allocation23_spill] sm:$0xff] %v14939_v9  ;;  %v14941_v43 = vpop.f32.mrf.mxu1  ;;  %v12143_v7 = vadd.f32 %v12142_v23, %v12141_v57  ;;  %v16890_v50 = vld [vmem:[#allocation7_spill] sm:$0xff] }
 0x1ea   : > { %3251 = vst [vmem:[#allocation3 + $0x47c] sm:$0xf] %v3187_v10  ;;  %v13226_v54 = vld [vmem:[#allocation3 + $0x338] ss:$36 sps:$4 sm:$0xff]   ;;  %v13227_v30 = vld [vmem:[#allocation3 + $0x380] ss:$36 sps:$4 sm:$0xff]   ;;  %v12144_v25 = vpop.f32.mrf.mxu0 }
 0x1eb   : > { %v8413_v19 = vrot.slane %v8411_v29, 4  ;;  %v8412_v11 = vsel %vm13717_vm7, %v11508_v5, %v8411_v29  ;;  %v14947_v31 = vpop.f32.mrf.mxu1  ;;  %v14950_v42 = vadd.f32 %v12143_v7, %v16890_v50  ;;  %v13240_v2 = vld [vmem:[%s16855_s3 + $0x18] sm:$0xff]   ;;  %v16894_v55 = vld [vmem:[#allocation9_spill] sm:$0xff]  ;;  %v16896_v5 = vld [vmem:[#allocation10_spill] sm:$0xff] }
 0x1ec   : > { %v12145_v61 = vpop.f32.mrf.mxu0  ;;  %12370 = vmatpush3.bf16.msra.mxu1 %v13240_v2  ;;  %v16892_v60 = vld [vmem:[#allocation8_spill] sm:$0xff]  ;;  %v16898_v23 = vld [vmem:[#allocation11_spill] sm:$0xff]  ;;  %v16921_v9 = vld [vmem:[#allocation21_spill] sm:$0xff] }
 0x1ed   : > { %v8415_v28 = vsel %vm13717_vm7, %v8413_v19, %v8414_v17  ;;  %16891 = vst [vmem:[#allocation7_spill] sm:$0xff] %v14950_v42  ;;  %v14958_v26 = vpop.f32.mrf.mxu1  ;;  %v12146_v35 = vadd.f32 %v12145_v61, %v12144_v25  ;;  %v13228_v49 = vld [vmem:[#allocation3 + $0x3c8] ss:$36 sps:$4 sm:$0xff]   ;;  %v13241_v19 = vld [vmem:[%s16855_s3 + $0x50] sm:$0xff]   ;;  %v16900_v52 = vld [vmem:[#allocation12_spill] sm:$0xff] }
 0x1ee   : > { %v12147_v62 = vpop.f32.mrf.mxu0  ;;  %12371 = vmatprep.subr.bf16.mxu1 %v13241_v19 }
 0x1ef   : > { %12866 = vmatmul.mubr.bf16.gmra.mxu0 %v13224_v59  ;;  %v14960_v47 = vpop.f32.mrf.mxu1  ;;  %v14963_v53 = vadd.f32 %v12146_v35, %v16892_v60  ;;  %v13229_v4 = vld [vmem:[#allocation3 + $0x410] ss:$36 sps:$4 sm:$0xff]  }
 0x1f0   : > { %12869 = vmatprep.mubr.bf16.mxu0 %v13225_v32  ;;  %v12148_v34 = vpop.f32.mrf.mxu0 }
 0x1f1   : > { %v13230_v37 = vld [vmem:[#allocation3 + $0x458] ss:$36 sps:$4 sm:$0xff]   ;;  %16893 = vst [vmem:[#allocation8_spill] sm:$0xff] %v14963_v53  ;;  %v14965_v22 = vpop.f32.mrf.mxu1  ;;  %v12149_v40 = vadd.f32 %v12148_v34, %v12147_v62  ;;  %v16902_v34 = vld [vmem:[#allocation13_spill] sm:$0xff]  ;;  %v16916_v53 = vld [vmem:[#allocation20_spill] sm:$0xff] }
 0x1f2   : > { %8478 = vst [vmem:[#allocation3 + $0x458] sm:$0xf] %v8412_v11  ;;  %8479 = vst [vmem:[#allocation3 + $0x47c] sm:$0xf] %v8415_v28  ;;  %v12150_v45 = vpop.f32.mrf.mxu0 }
 0x1f3   : > { %v14967_v0 = vpop.f32.mrf.mxu1  ;;  %v14970_v51 = vadd.f32 %v12149_v40, %v16894_v55 }
 0x1f4   : > { %v12151_v59 = vpop.f32.mrf.mxu0 }
 0x1f5   : > { %16895 = vst [vmem:[#allocation9_spill] sm:$0xff] %v14970_v51  ;;  %v14972_v18 = vpop.f32.mrf.mxu1  ;;  %v12152_v32 = vadd.f32 %v12151_v59, %v12150_v45  ;;  %v13244_v45 = vld [vmem:[%s16855_s3 + $0xf8] sm:$0xff]  }
 0x1f6   : > { %v12153_v13 = vpop.f32.mrf.mxu0  ;;  %12473 = vmatprep.subr.bf16.mxu0 %v13244_v45 }
 0x1f7   : > { %12870 = vmatmul.mubr.bf16.gmra.mxu0 %v13226_v54  ;;  %v14974_v10 = vpop.f32.mrf.mxu1  ;;  %v14977_v29 = vadd.f32 %v12152_v32, %v16896_v5  ;;  %v13242_v54 = vld [vmem:[%s16855_s3 + $0x10] sm:$0xff]   ;;  %v13246_v32 = vld [vmem:[%s16855_s3 + $0xb8] sm:$0xff]  }
 0x1f8   : > { %12873 = vmatprep.mubr.bf16.mxu0 %v13227_v30  ;;  %v12154_v17 = vpop.f32.mrf.mxu0  ;;  %12372 = vmatpush3.bf16.msra.mxu1 %v13242_v54 }
 0x1f9   : > { %16897 = vst [vmem:[#allocation10_spill] sm:$0xff] %v14977_v29  ;;  %v14979_v8 = vpop.f32.mrf.mxu1  ;;  %v12155_v57 = vadd.f32 %v12154_v17, %v12153_v13  ;;  %v16904_v13 = vld [vmem:[#allocation14_spill] sm:$0xff]  ;;  %12474 = vmatpush3.bf16.msra.mxu0 %v13246_v32  ;;  %v13251_v32 = vld [vmem:[%s16855_s3 + $0xe0] sm:$0xff]  }
 0x1fa   : > { %v12156_v28 = vpop.f32.mrf.mxu0 }
 0x1fb   : > { %v14984_v11 = vpop.f32.mrf.mxu1  ;;  %v14990_v30 = vadd.f32 %v12155_v57, %v16898_v23  ;;  %v13247_v57 = vld [vmem:[%s16855_s3 + $0xf0] sm:$0xff]  }
 0x1fc   : > { %v12157_v7 = vpop.f32.mrf.mxu0  ;;  %12475 = vmatprep.subr.bf16.mxu0 %v13247_v57 }
 0x1fd   : > { %16899 = vst [vmem:[#allocation11_spill] sm:$0xff] %v14990_v30  ;;  %v12158_v25 = vadd.f32 %v12157_v7, %v12156_v28  ;;  %v14992_v50 = vpop.f32.mrf.mxu1  ;;  %v13248_v28 = vld [vmem:[%s16855_s3 + $0xb0] sm:$0xff]  }
 0x1fe   : > { %v12159_v2 = vpop.f32.mrf.mxu0  ;;  %12476 = vmatpush3.bf16.msra.mxu0 %v13248_v28  ;;  %v16908_v28 = vld [vmem:[#allocation16_spill] sm:$0xff] }
 0x1ff   : > { %12874 = vmatmul.mubr.bf16.gmra.mxu0 %v13228_v49  ;;  %v14997_v61 = vpop.f32.mrf.mxu1 }
 0x200   : > { %12877 = vmatprep.mubr.bf16.mxu0 %v13229_v4  ;;  %v12160_v60 = vpop.f32.mrf.mxu0 }
 0x201   : > { %v14999_v35 = vpop.f32.mrf.mxu1  ;;  %v12161_v49 = vadd.f32 %v12160_v60, %v12159_v2  ;;  %v13249_v2 = vld [vmem:[%s16855_s3 + $0xe8] sm:$0xff]  }
 0x202   : > { %v12162_v62 = vpop.f32.mrf.mxu0  ;;  %12477 = vmatprep.subr.bf16.mxu0 %v13249_v2 }
 0x203   : > { %v15001_v4 = vpop.f32.mrf.mxu1  ;;  %v15004_v40 = vadd.f32 %v12161_v49, %v16902_v34  ;;  %v13250_v49 = vld [vmem:[%s16855_s3 + $0xa8] sm:$0xff]  }
 0x204   : > { %v12163_v55 = vpop.f32.mrf.mxu0  ;;  %12478 = vmatpush3.bf16.msra.mxu0 %v13250_v49  ;;  %v13254_v49 = vld [vmem:[%s16855_s3 + $0xd8] sm:$0xff]  }
 0x205   : > { %16903 = vst [vmem:[#allocation13_spill] sm:$0xff] %v15004_v40  ;;  %v12164_v59 = vadd.f32 %v12163_v55, %v12162_v62  ;;  %v15012_v5 = vpop.f32.mrf.mxu1  ;;  %v16906_v62 = vld [vmem:[#allocation15_spill] sm:$0xff]  ;;  %12479 = vmatprep.subr.bf16.mxu0 %v13251_v32 }
 0x207   : > { %12878 = vmatmul.mubr.bf16.gmra.mxu0 %v13230_v37  ;;  %v14995_v37 = vadd.f32 %v12158_v25, %v16900_v52  ;;  %v15015_v19 = vadd.f32 %v12164_v59, %v16904_v13  ;;  %v15017_v17 = vpop.f32.mrf.mxu1  ;;  %v12165_v23 = vpop.f32.mrf.mxu0  ;;  %v13252_v13 = vld [vmem:[%s16855_s3 + $0xa0] sm:$0xff]  }
 0x208   : > { %12480 = vmatpush3.bf16.msra.mxu0 %v13252_v13  ;;  %v13257_v13 = vld [vmem:[%s16855_s3 + $0xd0] sm:$0xff]  }
 0x209   : > { %16901 = vst [vmem:[#allocation12_spill] sm:$0xff] %v14995_v37  ;;  %16905 = vst [vmem:[#allocation14_spill] sm:$0xff] %v15015_v19  ;;  %v15025_v54 = vpop.f32.mrf.mxu1  ;;  %v12166_v7 = vpop.f32.mrf.mxu0  ;;  %12481 = vmatprep.subr.bf16.mxu0 %v13254_v49  ;;  %v13261_v37 = vld [vmem:[#allocation3] ss:$36 sps:$4 sm:$0xff]   ;;  %v13264_v19 = vld [vmem:[%s16855_s3 + $0xc0] sm:$0xff]  }
 0x20a   : > { %v12167_v52 = vadd.f32 %v12166_v7, %v12165_v23  ;;  %v13243_v7 = vld [vmem:[%s16855_s3 + $0x48] sm:$0xff]  }
 0x20b   : > { %v15027_v25 = vpop.f32.mrf.mxu1  ;;  %v12168_v60 = vpop.f32.mrf.mxu0  ;;  %12373 = vmatprep.subr.bf16.mxu1 %v13243_v7  ;;  %v16910_v7 = vld [vmem:[#allocation17_spill] sm:$0xff] }
 0x20c   : > { %v15036_v34 = vadd.f32 %v12167_v52, %v16906_v62  ;;  %v13245_v52 = vld [vmem:[%s16855_s3 + $0x8] sm:$0xff]   ;;  %v13256_v62 = vld [vmem:[%s16855_s3 + $0x98] sm:$0xff]  }
 0x20d   : > { %v12169_v45 = vpop.f32.mrf.mxu0  ;;  %12374 = vmatpush3.bf16.msra.mxu1 %v13245_v52  ;;  %12482 = vmatpush3.bf16.msra.mxu0 %v13256_v62  ;;  %v13258_v52 = vld [vmem:[%s16855_s3 + $0x90] sm:$0xff]   ;;  %v13255_v62 = vld [vmem:[%s16855_s3] sm:$0xff]  }
 0x20e   : > { %16907 = vst [vmem:[#allocation15_spill] sm:$0xff] %v15036_v34  ;;  %v12170_v59 = vadd.f32 %v12169_v45, %v12168_v60  ;;  %12483 = vmatprep.subr.bf16.mxu0 %v13257_v13 }
 0x210   : > { %v15038_v55 = vpop.f32.mrf.mxu1  ;;  %v15049_v23 = vadd.f32 %v12170_v59, %v16908_v28 }
 0x211   : > { %12484 = vmatpush3.bf16.msra.mxu0 %v13258_v52 }
 0x212   : > { %v15046_v57 = vpop.f32.mrf.mxu1  ;;  %16909 = vst [vmem:[#allocation16_spill] sm:$0xff] %v15049_v23 }
 0x214   : > { %v15057_v2 = vpop.f32.mrf.mxu1  ;;  %v12171_v60 = vpop.f32.mrf.mxu0 }
 0x216   : > { %v12172_v45 = vpop.f32.mrf.mxu0  ;;  %v15065_v59 = vpop.f32.mrf.mxu1 }
 0x217   : > { %v12173_v28 = vadd.f32 %v12172_v45, %v12171_v60  ;;  %v13253_v60 = vld [vmem:[%s16855_s3 + $0x40] sm:$0xff]   ;;  %v13259_v45 = vld [vmem:[%s16855_s3 + $0xc8] sm:$0xff]  }
 0x218   : > { %v12174_v32 = vpop.f32.mrf.mxu0  ;;  %12375 = vmatprep.subr.bf16.mxu1 %v13253_v60  ;;  %12485 = vmatprep.subr.bf16.mxu0 %v13259_v45  ;;  %v13265_v60 = vld [vmem:[%s16855_s3 + $0x80] sm:$0xff]  }
 0x219   : > { %v15071_v12 = vadd.f32 %v12173_v28, %v16910_v7  ;;  %v16912_v7 = vld [vmem:[#allocation18_spill] sm:$0xff]  ;;  %12376 = vmatpush3.bf16.msra.mxu1 %v13255_v62 }
 0x21a   : > { %v12175_v23 = vpop.f32.mrf.mxu0 }
 0x21b   : > { %16911 = vst [vmem:[#allocation17_spill] sm:$0xff] %v15071_v12  ;;  %v12176_v49 = vadd.f32 %v12175_v23, %v12174_v32  ;;  %v13260_v23 = vld [vmem:[%s16855_s3 + $0x88] sm:$0xff]   ;;  %v13263_v32 = vld [vmem:[#allocation3 + $0x4] ss:$36 sps:$4 sm:$0xff]  }
 0x21c   : > { %v15076_v34 = vpop.f32.mrf.mxu1  ;;  %12486 = vmatpush3.bf16.msra.mxu0 %v13260_v23  ;;  %9991 = vmatprep.mubr.bf16.mxu1 %v13263_v32 }
 0x21d   : > { %v15090_v13 = vadd.f32 %v12176_v49, %v16912_v7  ;;  %9992 = vmatmul.mubr.bf16.vlgmr.msra.gmra.mxu1 %v13261_v37  ;;  %12487 = vmatprep.subr.bf16.mxu0 %v13264_v19 }
 0x21e   : > { %v15087_v28 = vpop.f32.mrf.mxu1 }
 0x21f   : > { %16913 = vst [vmem:[#allocation18_spill] sm:$0xff] %v15090_v13  ;;  %v16914_v13 = vld [vmem:[#allocation19_spill] sm:$0xff] }
 0x220   : > { %v15095_v52 = vpop.f32.mrf.mxu1  ;;  %12488 = vmatpush3.bf16.msra.mxu0 %v13265_v60 }
 0x221   : > { %v12177_v12 = vpop.f32.mrf.mxu0 }
 0x222   : > { %v15103_v62 = vpop.f32.mrf.mxu1 }
 0x223   : > { %v12178_v49 = vpop.f32.mrf.mxu0 }
 0x224   : > { %v12179_v7 = vadd.f32 %v12178_v49, %v12177_v12 }
 0x225   : > { %v12180_v45 = vpop.f32.mrf.mxu0 }
 0x226   : > { %v15106_v23 = vadd.f32 %v12179_v7, %v16914_v13 }
 0x227   : > { %v12181_v32 = vpop.f32.mrf.mxu0 }
 0x228   : > { %16915 = vst [vmem:[#allocation19_spill] sm:$0xff] %v15106_v23  ;;  %v12182_v30 = vadd.f32 %v12181_v32, %v12180_v45 }
 0x22a   : > { %v15108_v40 = vpop.f32.mrf.mxu1  ;;  %v15111_v29 = vadd.f32 %v12182_v30, %v16916_v53  ;;  %v13269_v53 = vld [vmem:[%s16855_s3 + $0x178] sm:$0xff]  }
 0x22b   : > { %v13270_v30 = vld [vmem:[%s16855_s3 + $0x138] sm:$0xff]   ;;  %12585 = vmatprep.subr.bf16.mxu1 %v13269_v53 }
 0x22c   : > { %16917 = vst [vmem:[#allocation20_spill] sm:$0xff] %v15111_v29  ;;  %v15113_v37 = vpop.f32.mrf.mxu1  ;;  %v12183_v42 = vpop.f32.mrf.mxu0  ;;  %v16924_v29 = vld [vmem:[#allocation22_spill] sm:$0xff]  ;;  %12586 = vmatpush3.bf16.msra.mxu1 %v13270_v30 }
 0x22d   : > { %16918 = vst [vmem:[#allocation24_spill] sm:$0xff] %v15113_v37 }
 0x22e   : > { %v15115_v51 = vpop.f32.mrf.mxu1  ;;  %v12184_v12 = vpop.f32.mrf.mxu0 }
 0x22f   : > { %16919 = vst [vmem:[#allocation25_spill] sm:$0xff] %v15115_v51  ;;  %v12185_v19 = vadd.f32 %v12184_v12, %v12183_v42 }
 0x230   : > { %v15117_v49 = vpop.f32.mrf.mxu1  ;;  %v12186_v60 = vpop.f32.mrf.mxu0 }
 0x231   : > { %16920 = vst [vmem:[#allocation26_spill] sm:$0xff] %v15117_v49  ;;  %v15120_v13 = vadd.f32 %v12185_v19, %v16921_v9 }
 0x232   : > { %v12187_v7 = vpop.f32.mrf.mxu0 }
 0x233   : > { %16922 = vst [vmem:[#allocation21_spill] sm:$0xff] %v15120_v13  ;;  %v12188_v45 = vadd.f32 %v12187_v7, %v12186_v60 }
 0x235   : > { %v15131_v42 = vadd.f32 %v12188_v45, %v16924_v29 }
 0x237   : > { %v15122_v32 = vpop.f32.mrf.mxu1  ;;  %16925 = vst [vmem:[#allocation22_spill] sm:$0xff] %v15131_v42 }
 0x238   : > { %16923 = vst [vmem:[#allocation27_spill] sm:$0xff] %v15122_v32 }
 0x239   : > { %v15133_v12 = vpop.f32.mrf.mxu1 }
 0x23a   : > { %v12189_v9 = vpop.f32.mrf.mxu0 }
 0x23b   : > { %v15135_v19 = vpop.f32.mrf.mxu1 }
 0x23c   : > { %v12190_v60 = vpop.f32.mrf.mxu0 }
 0x23d   : > { %v12191_v7 = vadd.f32 %v12190_v60, %v12189_v9  ;;  %v15137_v23 = vpop.f32.mrf.mxu1 }
 0x23e   : > { %v12192_v13 = vpop.f32.mrf.mxu0  ;;  %16926 = vst [vmem:[#allocation28_spill] sm:$0xff] %v15137_v23 }
 0x23f   : > { %v15140_v32 = vadd.f32 %v12191_v7, %v14777_v33 }
 0x240   : > { %v12193_v49 = vpop.f32.mrf.mxu0 }
 0x241   : > { %16927 = vst [vmem:[#allocation29_spill] sm:$0xff] %v15140_v32  ;;  %v12194_v51 = vadd.f32 %v12193_v49, %v12192_v13 }
 0x243   : > { %v15145_v29 = vadd.f32 %v12194_v51, %v14792_v21 }
 0x245   : > { %v15142_v37 = vpop.f32.mrf.mxu1  ;;  %16928 = vst [vmem:[#allocation30_spill] sm:$0xff] %v15145_v29 }
 0x247   : > { %v15147_v45 = vpop.f32.mrf.mxu1 }
 0x248   : > { %v12195_v53 = vpop.f32.mrf.mxu0 }
 0x249   : > { %v15149_v30 = vpop.f32.mrf.mxu1 }
 0x24a   : > { %v12196_v42 = vpop.f32.mrf.mxu0 }
 0x24b   : > { %v12197_v9 = vadd.f32 %v12196_v42, %v12195_v53  ;;  %v15151_v60 = vpop.f32.mrf.mxu1  ;;  %v13283_v42 = vld [vmem:[%s16855_s3 + $0x170] sm:$0xff]  }
 0x24c   : > { %16929 = vst [vmem:[#allocation31_spill] sm:$0xff] %v15151_v60  ;;  %v12198_v23 = vpop.f32.mrf.mxu0  ;;  %12587 = vmatprep.subr.bf16.mxu1 %v13283_v42 }
 0x24d   : > { %v15154_v33 = vadd.f32 %v12197_v9, %v14818_v36  ;;  %v13287_v36 = vld [vmem:[%s16855_s3 + $0x130] sm:$0xff]  }
 0x24e   : > { %v12199_v7 = vpop.f32.mrf.mxu0  ;;  %12588 = vmatpush3.bf16.msra.mxu1 %v13287_v36 }
 0x24f   : > { %16930 = vst [vmem:[#allocation32_spill] sm:$0xff] %v15154_v33  ;;  %v12200_v49 = vadd.f32 %v12199_v7, %v12198_v23 }
 0x251   : > { %v15159_v21 = vadd.f32 %v12200_v49, %v14824_v27 }
 0x253   : > { %v15156_v13 = vpop.f32.mrf.mxu1  ;;  %16932 = vst [vmem:[#allocation34_spill] sm:$0xff] %v15159_v21 }
 0x254   : > { %16931 = vst [vmem:[#allocation33_spill] sm:$0xff] %v15156_v13 }
 0x255   : > { %v15161_v51 = vpop.f32.mrf.mxu1  ;;  %v12201_v29 = vpop.f32.mrf.mxu0 }
 0x256   : > { %16933 = vst [vmem:[#allocation35_spill] sm:$0xff] %v15161_v51 }
 0x257   : > { %v15166_v53 = vpop.f32.mrf.mxu1  ;;  %v12202_v9 = vpop.f32.mrf.mxu0 }
 0x258   : > { %16934 = vst [vmem:[#allocation36_spill] sm:$0xff] %v15166_v53  ;;  %v12203_v23 = vadd.f32 %v12202_v9, %v12201_v29 }
 0x259   : > { %v15171_v7 = vpop.f32.mrf.mxu1  ;;  %v12204_v27 = vpop.f32.mrf.mxu0 }
 0x25a   : > { %v15174_v49 = vadd.f32 %v12203_v23, %v14840_v1 }
 0x25b   : > { %v12205_v21 = vpop.f32.mrf.mxu0 }
 0x25c   : > { %16935 = vst [vmem:[#allocation37_spill] sm:$0xff] %v15174_v49  ;;  %v12206_v32 = vadd.f32 %v12205_v21, %v12204_v27  ;;  %v13297_v49 = vld [vmem:[%s16855_s3 + $0x168] sm:$0xff]  }
 0x25d   : > { %12589 = vmatprep.subr.bf16.mxu1 %v13297_v49 }
 0x25e   : > { %v15179_v53 = vadd.f32 %v12206_v32, %v14842_v20 }
 0x260   : > { %v15176_v33 = vpop.f32.mrf.mxu1  ;;  %16936 = vst [vmem:[#allocation38_spill] sm:$0xff] %v15179_v53 }
 0x262   : > { %v15181_v51 = vpop.f32.mrf.mxu1  ;;  %v12207_v13 = vpop.f32.mrf.mxu0 }
 0x264   : > { %v12208_v60 = vpop.f32.mrf.mxu0  ;;  %v15183_v42 = vpop.f32.mrf.mxu1 }
 0x265   : > { %v12209_v29 = vadd.f32 %v12208_v60, %v12207_v13 }
 0x266   : > { %v12210_v36 = vpop.f32.mrf.mxu0  ;;  %v15188_v23 = vpop.f32.mrf.mxu1 }
 0x267   : > { %v15186_v9 = vadd.f32 %v12209_v29, %v14853_v56  ;;  %v13301_v56 = vld [vmem:[%s16855_s3 + $0x128] sm:$0xff]  }
 0x268   : > { %v12211_v1 = vpop.f32.mrf.mxu0  ;;  %12590 = vmatpush3.bf16.msra.mxu1 %v13301_v56  ;;  %v12243_v56 = vadd.f32 %v14915_v48, %v14908_v44  ;;  %v12252_v44 = vadd.f32 %v14947_v31, %v14941_v43  ;;  %v12276_v43 = vadd.f32 %v15027_v25, %v15025_v54  ;;  %v12279_v31 = vadd.f32 %v15046_v57, %v15038_v55  ;;  %v16946_v25 = vld [vmem:[#allocation7_spill] sm:$0xff]  ;;  %v16947_v55 = vld [vmem:[#allocation10_spill] sm:$0xff] }
 0x269   : > { %16937 = vst [vmem:[#allocation39_spill] sm:$0xff] %v15186_v9  ;;  %v12212_v21 = vadd.f32 %v12211_v1, %v12210_v36  ;;  %v13311_v9 = vld [vmem:[%s16855_s3 + $0x160] sm:$0xff]  }
 0x26a   : > { %12591 = vmatprep.subr.bf16.mxu1 %v13311_v9  ;;  %v12249_v9 = vadd.f32 %v14936_v58, %v14934_v16  ;;  %v12261_v16 = vadd.f32 %v14974_v10, %v14972_v18  ;;  %v12264_v58 = vadd.f32 %v14984_v11, %v14979_v8  ;;  %v12288_v18 = vadd.f32 %v15103_v62, %v15095_v52  ;;  %v16941_v10 = vld [vmem:[#allocation24_spill] sm:$0xff]  ;;  %v16942_v11 = vld [vmem:[#allocation25_spill] sm:$0xff] }
 0x26b   : > { %v15191_v27 = vadd.f32 %v12212_v21, %v14865_v24  ;;  %v12291_v8 = vadd.f32 %v16941_v10, %v15108_v40  ;;  %v16950_v40 = vld [vmem:[#allocation11_spill] sm:$0xff] }
 0x26c   : > { %v15274_v57 = vadd.f32 %v12264_v58, %v16947_v55  ;;  %v13325_v58 = vld [vmem:[%s16855_s3 + $0x1f8] sm:$0xff]   ;;  %v16962_v55 = vld [vmem:[#allocation33_spill] sm:$0xff] }
 0x26d   : > { %16938 = vst [vmem:[#allocation40_spill] sm:$0xff] %v15191_v27  ;;  %v15193_v20 = vpop.f32.mrf.mxu1  ;;  %12697 = vmatprep.subr.bf16.mxu0 %v13325_v58 }
 0x26f   : > { %v15201_v13 = vpop.f32.mrf.mxu1 }
 0x270   : > { %v12213_v32 = vpop.f32.mrf.mxu0  ;;  %16939 = vst [vmem:[#allocation41_spill] sm:$0xff] %v15201_v13 }
 0x271   : > { %v15206_v21 = vpop.f32.mrf.mxu1 }
 0x272   : > { %v12214_v53 = vpop.f32.mrf.mxu0 }
 0x273   : > { %v12215_v60 = vadd.f32 %v12214_v53, %v12213_v32  ;;  %v15211_v53 = vpop.f32.mrf.mxu1 }
 0x274   : > { %v12216_v29 = vpop.f32.mrf.mxu0 }
 0x275   : > { %v15204_v24 = vadd.f32 %v12215_v60, %v14867_v41 }
 0x276   : > { %v12217_v36 = vpop.f32.mrf.mxu0 }
 0x277   : > { %v12218_v1 = vadd.f32 %v12217_v36, %v12216_v29 }
 0x279   : > { %v15209_v27 = vadd.f32 %v12218_v1, %v14874_v63  ;;  %v15216_v41 = vpop.f32.mrf.mxu1  ;;  %v12246_v63 = vadd.f32 %v14927_v15, %v14921_v3  ;;  %v12255_v15 = vadd.f32 %v14960_v47, %v14958_v26  ;;  %v12282_v26 = vadd.f32 %v15065_v59, %v15057_v2 }
 0x27a   : > { %v12285_v47 = vadd.f32 %v15087_v28, %v15076_v34  ;;  %v16949_v28 = vld [vmem:[#allocation13_spill] sm:$0xff] }
 0x27b   : > { %16940 = vst [vmem:[#allocation42_spill] sm:$0xff] %v15209_v27  ;;  %v13315_v27 = vld [vmem:[%s16855_s3 + $0x120] sm:$0xff]   ;;  %v5252_v3 = vadd.f32 %v12246_v63, %v14911_v39  ;;  %v12273_v39 = vadd.f32 %v15017_v17, %v15012_v5  ;;  %v5265_v34 = vadd.f32 %v12255_v15, %v16946_v25  ;;  %v16961_v25 = vld [vmem:[#allocation31_spill] sm:$0xff] }
 0x27c   : > { %12592 = vmatpush3.bf16.msra.mxu1 %v13315_v27  ;;  %v16945_v17 = vld [vmem:[#allocation9_spill] sm:$0xff]  ;;  %v16951_v27 = vld [vmem:[#allocation14_spill] sm:$0xff] }
 0x27d   : > { %v5273_v54 = vadd.f32 %v12261_v16, %v16945_v17  ;;  %v15280_v52 = vadd.f32 %v12273_v39, %v16949_v28  ;;  %v16964_v28 = vld [vmem:[#allocation36_spill] sm:$0xff] }
 0x27e   : > { %v12219_v32 = vpop.f32.mrf.mxu0 }
 0x280   : > { %v12220_v13 = vpop.f32.mrf.mxu0 }
 0x281   : > { %v12221_v49 = vadd.f32 %v12220_v13, %v12219_v32  ;;  %v15230_v13 = vpop.f32.mrf.mxu1  ;;  %v12258_v32 = vadd.f32 %v14967_v0, %v14965_v22  ;;  %v5257_v0 = vadd.f32 %v12249_v9, %v14930_v14  ;;  %v16948_v14 = vld [vmem:[#allocation8_spill] sm:$0xff] }
 0x282   : > { %v12222_v60 = vpop.f32.mrf.mxu0 }
 0x283   : > { %v15223_v29 = vadd.f32 %v12221_v49, %v14892_v38  ;;  %v5249_v38 = vadd.f32 %v12243_v56, %v14904_v46  ;;  %v12270_v46 = vadd.f32 %v15001_v4, %v14999_v35  ;;  %v15261_v22 = vpop.f32.mrf.mxu1  ;;  %v16944_v4 = vld [vmem:[#allocation23_spill] sm:$0xff]  ;;  %v15277_v2 = vadd.f32 %v12258_v32, %v16948_v14  ;;  %v16955_v32 = vld [vmem:[#allocation16_spill] sm:$0xff] }
 0x284   : > { %v12223_v36 = vpop.f32.mrf.mxu0  ;;  %v5260_v5 = vadd.f32 %v12252_v44, %v16944_v4  ;;  %v15286_v49 = vadd.f32 %v12276_v43, %v16951_v27  ;;  %v16954_v44 = vld [vmem:[#allocation15_spill] sm:$0xff]  ;;  %v15298_v16 = vadd.f32 %v12282_v26, %v16955_v32  ;;  %v16959_v26 = vld [vmem:[#allocation20_spill] sm:$0xff] }
 0x285   : > { %v12224_v1 = vadd.f32 %v12223_v36, %v12222_v60  ;;  %v16952_v60 = vld [vmem:[#allocation12_spill] sm:$0xff]  ;;  %v12329_v63 = vpop.f32.mrf.mxu1  ;;  %v15295_v15 = vadd.f32 %v12279_v31, %v16954_v44  ;;  %v16958_v31 = vld [vmem:[#allocation19_spill] sm:$0xff]  ;;  %v16966_v44 = vld [vmem:[#allocation21_spill] sm:$0xff] }
 0x286   : > { %v15289_v56 = vadd.f32 %v12270_v46, %v16952_v60  ;;  %v16956_v46 = vld [vmem:[#allocation27_spill] sm:$0xff]  ;;  %v15312_v10 = vadd.f32 %v12291_v8, %v16958_v31  ;;  %v12324_v60 = vadd.f32 %v15211_v53, %v15206_v21  ;;  %v13331_v53 = vld [vmem:[%s16855_s3 + $0x118] sm:$0xff]  }
 0x287   : > { %v15235_v48 = vadd.f32 %v12224_v1, %v14894_v6  ;;  %v12267_v6 = vadd.f32 %v14997_v61, %v14992_v50  ;;  %v16943_v50 = vld [vmem:[#allocation26_spill] sm:$0xff]  ;;  %v16953_v1 = vld [vmem:[#allocation17_spill] sm:$0xff]  ;;  %v12297_v39 = vadd.f32 %v15133_v12, %v16956_v46  ;;  %v12303_v12 = vadd.f32 %v15147_v45, %v15142_v37  ;;  %v16963_v14 = vld [vmem:[#allocation35_spill] sm:$0xff] }
 0x288   : > { %v12294_v61 = vadd.f32 %v16943_v50, %v16942_v11  ;;  %v15292_v9 = vadd.f32 %v12285_v47, %v16953_v1  ;;  %v16957_v47 = vld [vmem:[#allocation18_spill] sm:$0xff]  ;;  %v16960_v50 = vld [vmem:[#allocation28_spill] sm:$0xff]  ;;  %v12309_v8 = vadd.f32 %v16963_v14, %v16962_v55  ;;  %v12318_v37 = vadd.f32 %v15188_v23, %v15183_v42  ;;  %v16965_v45 = vld [vmem:[#allocation41_spill] sm:$0xff] }
 0x289   : > { %v15283_v62 = vadd.f32 %v12267_v6, %v16950_v40  ;;  %v13327_v6 = vld [vmem:[%s16855_s3 + $0x158] sm:$0xff]   ;;  %v16969_v23 = vld [vmem:[#allocation29_spill] sm:$0xff]  ;;  %v16975_v14 = vld [vmem:[#allocation38_spill] sm:$0xff] }
 0x28a   : > { %v15315_v11 = vadd.f32 %v12294_v61, %v16959_v26  ;;  %12593 = vmatprep.subr.bf16.mxu1 %v13327_v6  ;;  %v12312_v61 = vadd.f32 %v15171_v7, %v16964_v28  ;;  %v15336_v7 = vadd.f32 %v12297_v39, %v16966_v44  ;;  %v16968_v46 = vld [vmem:[#allocation32_spill] sm:$0xff]  ;;  %v16971_v26 = vld [vmem:[#allocation34_spill] sm:$0xff] }
 0x28b   : > { %v15342_v42 = vadd.f32 %v12309_v8, %v16968_v46  ;;  %v15366_v8 = vadd.f32 %v12318_v37, %v16975_v14  ;;  %12594 = vmatpush3.bf16.msra.mxu1 %v13331_v53 }
 0x28f   : > { %v12851_v35 = vpop.f32.mrf.mxu0 }
 0x290   : > { %v5418_v36 = vadd.f32 %v12851_v35, %v5257_v0  ;;  %v15309_v0 = vadd.f32 %v12288_v18, %v16957_v47  ;;  %v12300_v35 = vadd.f32 %v16960_v50, %v15135_v19  ;;  %v12306_v18 = vadd.f32 %v16961_v25, %v15149_v30 }
 0x291   : > { %v5409_v59 = vpop.f32.mrf.mxu0  ;;  %v12315_v19 = vadd.f32 %v15181_v51, %v15176_v33  ;;  %v12321_v30 = vadd.f32 %v16965_v45, %v15193_v20  ;;  %v16967_v51 = vld [vmem:[#allocation22_spill] sm:$0xff]  ;;  %v15345_v20 = vadd.f32 %v12303_v12, %v16969_v23  ;;  %v15354_v50 = vadd.f32 %v12312_v61, %v16971_v26  ;;  %v16973_v12 = vld [vmem:[#allocation39_spill] sm:$0xff] }
 0x292   : > { %v5410_v4 = vadd.f32 %v5409_v59, %v5249_v38  ;;  %v12331_v38 = vpop.f32.mrf.mxu1  ;;  %v13343_v26 = vld [vmem:[%s16855_s3 + $0x150] sm:$0xff]  }
 0x293   : > { %v12852_v43 = vpop.f32.mrf.mxu0  ;;  %v15360_v25 = vadd.f32 %v12321_v30, %v16973_v12  ;;  %12595 = vmatprep.subr.bf16.mxu1 %v13343_v26 }
 0x294   : > { %v5421_v17 = vadd.f32 %v12852_v43, %v5260_v5  ;;  %v5538_v5 = vmax.f32 %v5418_v36, 0.0  ;;  %v5536_v32 = vmax.f32 %v5410_v4, 0.0  ;;  %v15339_v36 = vadd.f32 %v12300_v35, %v16967_v51  ;;  %v16970_v43 = vld [vmem:[#allocation30_spill] sm:$0xff]  ;;  %v12332_v39 = vpop.f32.mrf.mxu1 }
 0x295   : > { %v5412_v40 = vpop.f32.mrf.mxu0  ;;  %v15348_v21 = vadd.f32 %v12306_v18, %v16970_v43  ;;  %v16974_v18 = vld [vmem:[#allocation40_spill] sm:$0xff] }
 0x296   : > { %v5539_v59 = vmax.f32 %v5421_v17, 0.0  ;;  %v5413_v27 = vadd.f32 %v5412_v40, %v5252_v3  ;;  %v15363_v55 = vadd.f32 %v12324_v60, %v16974_v18  ;;  %v12334_v30 = vpop.f32.mrf.mxu1 }
 0x297   : > { %v12855_v1 = vpop.f32.mrf.mxu0 }
 0x298   : > { %v5569_v58 = vpack.c.bf16 %v5539_v59, %v5538_v5  ;;  %v5537_v33 = vmax.f32 %v5413_v27, 0.0  ;;  %v5434_v3 = vadd.f32 %v12855_v1, %v5273_v54  ;;  %v16972_v54 = vld [vmem:[#allocation37_spill] sm:$0xff] }
 0x299   : > { %v5425_v6 = vpop.f32.mrf.mxu0  ;;  %v15357_v35 = vadd.f32 %v12315_v19, %v16972_v54  ;;  %v12327_v19 = vadd.f32 %v15230_v13, %v15216_v41 }
 0x29a   : > { %v5592_v47 = vshrl.u32 %v5569_v58, 16  ;;  %v5568_v31 = vpack.c.bf16 %v5537_v33, %v5536_v32  ;;  %v5426_v4 = vadd.f32 %v5425_v6, %v5265_v34  ;;  %v5595_v40 = vshll.u32 %v5569_v58, 16 }
 0x29b   : > { %v12856_v17 = vpop.f32.mrf.mxu0  ;;  %v12330_v34 = vadd.f32 %v12329_v63, %v15261_v22  ;;  %v5542_v27 = vmax.f32 %v5434_v3, 0.0  ;;  %v12333_v33 = vadd.f32 %v12332_v39, %v12331_v38  ;;  %v12335_v38 = vpop.f32.mrf.mxu1 }
 0x29c   : > { %v5594_v28 = vrot.slane %v5592_v47, 7  ;;  %v5585_v5 = vshrl.u32 %v5568_v31, 16  ;;  %v5437_v61 = vadd.f32 %v12856_v17, %v15274_v57  ;;  %v5588_v59 = vshll.u32 %v5568_v31, 16 }
 0x29d   : > { %v5428_v45 = vpop.f32.mrf.mxu0  ;;  %v5540_v51 = vmax.f32 %v5426_v4, 0.0  ;;  %v15383_v31 = vadd.f32 %v12327_v19, %v15204_v24 }
 0x29e   : > { %v5597_v60 = vor.u32 %v5595_v40, %v5594_v28  ;;  %v5745_v37 = vsel %vm13724_vm8, %v5594_v28, 0  ;;  %v5587_v44 = vrot.slane %v5585_v5, 7  ;;  %v5543_v32 = vmax.f32 %v5437_v61, 0.0  ;;  %v16977_v40 = vld [vmem:[#allocation42_spill] sm:$0xff] }
 0x29f   : > { %v11418_v58 = vcombine.low %v5745_v37, %v5745_v37  ;;  %v5429_v57 = vadd.f32 %v5428_v45, %v15277_v2  ;;  %v12859_v6 = vpop.f32.mrf.mxu0  ;;  %v15391_v24 = vadd.f32 %v12330_v34, %v16977_v40  ;;  %v12336_v5 = vadd.f32 %v12335_v38, %v12334_v30 }
 0x2a0   : > { %v5729_v41 = vsel %vm13724_vm8, 0, %v5597_v60  ;;  %v5590_v13 = vor.u32 %v5588_v59, %v5587_v44  ;;  %v5744_v22 = vsel %vm13724_vm8, %v5587_v44, 0  ;;  %v5571_v63 = vpack.c.bf16 %v5543_v32, %v5542_v27 }
 0x2a1   : > { %v11416_v3 = vcombine.low %v5729_v41, %v5729_v41  ;;  %v11417_v46 = vcombine.high %v5729_v41, %v5729_v41  ;;  %5941 = vst [vmem:[#allocation2 + $0x20] sm:$0x1] %v11418_v58  ;;  %v11415_v23 = vcombine.low %v5744_v22, %v5744_v22  ;;  %v5541_v43 = vmax.f32 %v5429_v57, 0.0  ;;  %v5441_v53 = vpop.f32.mrf.mxu0  ;;  %v13347_v22 = vld [vmem:[%s16855_s3 + $0x110] sm:$0xff]  }
 0x2a2   : > { %v5728_v39 = vsel %vm13724_vm8, 0, %v5590_v13  ;;  %v5606_v2 = vshrl.u32 %v5571_v63, 16  ;;  %v5450_v47 = vadd.f32 %v12859_v6, %v15280_v52  ;;  %v5442_v12 = vadd.f32 %v5441_v53, %v15283_v62  ;;  %12596 = vmatpush3.bf16.msra.mxu1 %v13347_v22 }
 0x2a3   : > { %5939 = vst [vmem:[#allocation2 + $0x18] sm:$0xf] %v11416_v3  ;;  %5940 = vst [vmem:[#allocation2 + $0x1c] sm:$0xf] %v11417_v46  ;;  %v11413_v54 = vcombine.low %v5728_v39, %v5728_v39  ;;  %v11414_v4 = vcombine.high %v5728_v39, %v5728_v39  ;;  %v5570_v17 = vpack.c.bf16 %v5541_v43, %v5540_v51  ;;  %v12860_v18 = vpop.f32.mrf.mxu0  ;;  %v5609_v28 = vshll.u32 %v5571_v63, 16 }
 0x2a4   : > { %5938 = vst [vmem:[#allocation2 + $0x14] sm:$0x1] %v11415_v23  ;;  %v5608_v14 = vrot.slane %v5606_v2, 7  ;;  %v5453_v52 = vadd.f32 %v12860_v18, %v15286_v49  ;;  %v5546_v19 = vmax.f32 %v5450_v47, 0.0  ;;  %v15394_v27 = vadd.f32 %v12333_v33, %v15223_v29 }
 0x2a5   : > { %5936 = vst [vmem:[#allocation2 + $0xc] sm:$0xf] %v11413_v54  ;;  %5937 = vst [vmem:[#allocation2 + $0x10] sm:$0xf] %v11414_v4  ;;  %v5599_v61 = vshrl.u32 %v5570_v17, 16  ;;  %v5444_v59 = vpop.f32.mrf.mxu0  ;;  %v5602_v44 = vshll.u32 %v5570_v17, 16 }
 0x2a6   : > { %v5611_v45 = vor.u32 %v5609_v28, %v5608_v14  ;;  %v5747_v62 = vsel %vm13724_vm8, %v5608_v14, 0  ;;  %v5547_v60 = vmax.f32 %v5453_v52, 0.0  ;;  %v5445_v49 = vadd.f32 %v5444_v59, %v15289_v56 }
 0x2a7   : > { %v11424_v37 = vcombine.low %v5747_v62, %v5747_v62  ;;  %v5601_v34 = vrot.slane %v5599_v61, 7  ;;  %v5544_v32 = vmax.f32 %v5442_v12, 0.0  ;;  %v12863_v30 = vpop.f32.mrf.mxu0  ;;  %v15418_v59 = vadd.f32 %v12336_v5, %v15235_v48 }
 0x2a8   : > { %v5731_v58 = vsel %vm13724_vm8, 0, %v5611_v45  ;;  %v5573_v51 = vpack.c.bf16 %v5547_v60, %v5546_v19  ;;  %v5545_v57 = vmax.f32 %v5445_v49, 0.0  ;;  %v15402_v29 = vadd.f32 %v12863_v30, %v15292_v9 }
 0x2a9   : > { %v11422_v33 = vcombine.low %v5731_v58, %v5731_v58  ;;  %v11423_v6 = vcombine.high %v5731_v58, %v5731_v58  ;;  %5947 = vst [vmem:[#allocation2 + $0x38] sm:$0x1] %v11424_v37  ;;  %v5604_v41 = vor.u32 %v5602_v44, %v5601_v34  ;;  %v5746_v56 = vsel %vm13724_vm8, %v5601_v34, 0  ;;  %v5457_v13 = vpop.f32.mrf.mxu0 }
 0x2aa   : > { %v11421_v63 = vcombine.low %v5746_v56, %v5746_v56  ;;  %v5620_v3 = vshrl.u32 %v5573_v51, 16  ;;  %v5623_v46 = vshll.u32 %v5573_v51, 16  ;;  %v5572_v23 = vpack.c.bf16 %v5545_v57, %v5544_v32  ;;  %v6818_v9 = vld [vmem:[#allocation2 + $0x18] sm:$0xf]  ;;  %v6819_v26 = vld [vmem:[#allocation2 + $0x1c] sm:$0xf] }
 0x2ab   : > { %v15409_v43 = vld [vmem:[#allocation2 + $0x14] sm:$0x1]  ;;  %5945 = vst [vmem:[#allocation2 + $0x30] sm:$0xf] %v11422_v33  ;;  %5946 = vst [vmem:[#allocation2 + $0x34] sm:$0xf] %v11423_v6  ;;  %v5458_v39 = vadd.f32 %v5457_v13, %v15295_v15  ;;  %v12864_v2 = vpop.f32.mrf.mxu0 }
 0x2ac   : > { %v5730_v53 = vsel %vm13724_vm8, 0, %v5604_v41  ;;  %v5550_v38 = vmax.f32 %v15402_v29, 0.0  ;;  %v6652_v47 = vrot.slane %v15409_v43, 5  ;;  %6850 = vst [vmem:[#allocation3 + $0x54] sm:$0xf] %v6818_v9  ;;  %v5622_v17 = vrot.slane %v5620_v3, 7 }
 0x2ad   : > { %v11419_v54 = vcombine.low %v5730_v53, %v5730_v53  ;;  %v11420_v4 = vcombine.high %v5730_v53, %v5730_v53  ;;  %5944 = vst [vmem:[#allocation2 + $0x2c] sm:$0x1] %v11421_v63  ;;  %v5613_v12 = vshrl.u32 %v5572_v23, 16  ;;  %v6816_v18 = vld [vmem:[#allocation2 + $0xc] sm:$0xf]  ;;  %v5616_v28 = vshll.u32 %v5572_v23, 16  ;;  %v5460_v61 = vpop.f32.mrf.mxu0 }
 0x2ae   : > { %v6817_v14 = vld [vmem:[#allocation2 + $0x10] sm:$0xf]  ;;  %6851 = vst [vmem:[#allocation3 + $0x78] sm:$0xf] %v6819_v26  ;;  %v5548_v52 = vmax.f32 %v5458_v39, 0.0  ;;  %v5469_v40 = vadd.f32 %v12864_v2, %v15309_v0  ;;  %v5625_v45 = vor.u32 %v5623_v46, %v5622_v17  ;;  %v5749_v62 = vsel %vm13724_vm8, %v5622_v17, 0 }
 0x2af   : > { %6848 = vst [vmem:[#allocation3 + $0xc] sm:$0xf] %v6816_v18  ;;  %6849 = vst [vmem:[#allocation3 + $0x30] sm:$0xf] %v6817_v14  ;;  %v6547_v15 = vld [vmem:[#allocation2 + $0xc] sm:$0xe]  ;;  %v5461_v49 = vadd.f32 %v5460_v61, %v15298_v16  ;;  %v11430_v0 = vcombine.low %v5749_v62, %v5749_v62  ;;  %v12867_v32 = vpop.f32.mrf.mxu0 }
 0x2b0   : > { %v6548_v19 = vld [vmem:[#allocation2 + $0x10] sm:$0xf]  ;;  %5942 = vst [vmem:[#allocation2 + $0x24] sm:$0xf] %v11419_v54  ;;  %5943 = vst [vmem:[#allocation2 + $0x28] sm:$0xf] %v11420_v4  ;;  %v5482_v22 = vadd.f32 %v12867_v32, %v15336_v7 }
 0x2b1   : > { %v5615_v60 = vrot.slane %v5613_v12, 7  ;;  %v5986_v37 = vld [vmem:[#allocation2 + $0xc] sm:$0xf]  ;;  %v5987_v34 = vld [vmem:[#allocation2 + $0x10] sm:$0xf]  ;;  %v5551_v44 = vmax.f32 %v5469_v40, 0.0  ;;  %v5473_v41 = vpop.f32.mrf.mxu0 }
 0x2b2   : > { %v11462_v30 = vrot.slane %v6547_v15, 9  ;;  %v6649_v58 = vrot.slane %v6548_v19, 5  ;;  %6018 = vst [vmem:[#allocation3 + $0x48] sm:$0xf] %v5986_v37  ;;  %6019 = vst [vmem:[#allocation3 + $0x6c] sm:$0xf] %v5987_v34  ;;  %v15431_v63 = vadd.f32 %v5473_v41, %v15312_v10 }
 0x2b3   : > { %v5733_v48 = vsel %vm13724_vm8, 0, %v5625_v45  ;;  %v5618_v5 = vor.u32 %v5616_v28, %v5615_v60  ;;  %v5748_v51 = vsel %vm13724_vm8, %v5615_v60, 0  ;;  %v5549_v57 = vmax.f32 %v5461_v49, 0.0  ;;  %5953 = vst [vmem:[#allocation2 + $0x50] sm:$0x1] %v11430_v0  ;;  %v13326_v7 = vld [vmem:[%s16855_s3 + $0x1b8] sm:$0xff]  }
 0x2b4   : > { %v11428_v29 = vcombine.low %v5733_v48, %v5733_v48  ;;  %v11429_v33 = vcombine.high %v5733_v48, %v5733_v48  ;;  %v11427_v16 = vcombine.low %v5748_v51, %v5748_v51  ;;  %v5575_v6 = vpack.c.bf16 %v5551_v44, %v5550_v38  ;;  %v5988_v3 = vld [vmem:[#allocation2 + $0x18] sm:$0xf]  ;;  %v5989_v46 = vld [vmem:[#allocation2 + $0x1c] sm:$0xf]  ;;  %v12868_v38 = vpop.f32.mrf.mxu0  ;;  %v15433_v2 = vld [vmem:[#allocation2 + $0xc] sm:$0xf] }
 0x2b5   : > { %v5732_v56 = vsel %vm13724_vm8, 0, %v5618_v5  ;;  %v5574_v13 = vpack.c.bf16 %v5549_v57, %v5548_v52  ;;  %6020 = vst [vmem:[#allocation3 + $0x90] sm:$0xf] %v5988_v3  ;;  %6021 = vst [vmem:[#allocation3 + $0xb4] sm:$0xf] %v5989_v46  ;;  %v5554_v54 = vmax.f32 %v5482_v22, 0.0  ;;  %v5485_v12 = vadd.f32 %v12868_v38, %v15339_v36 }
 0x2b6   : > { %5951 = vst [vmem:[#allocation2 + $0x48] sm:$0xf] %v11428_v29  ;;  %5952 = vst [vmem:[#allocation2 + $0x4c] sm:$0xf] %v11429_v33  ;;  %v11425_v23 = vcombine.low %v5732_v56, %v5732_v56  ;;  %v11426_v9 = vcombine.high %v5732_v56, %v5732_v56  ;;  %v5634_v53 = vshrl.u32 %v5575_v6, 16  ;;  %v5637_v39 = vshll.u32 %v5575_v6, 16  ;;  %v5476_v18 = vpop.f32.mrf.mxu0 }
 0x2b7   : > { %5950 = vst [vmem:[#allocation2 + $0x44] sm:$0x1] %v11427_v16  ;;  %v5627_v10 = vshrl.u32 %v5574_v13, 16  ;;  %v5630_v26 = vshll.u32 %v5574_v13, 16  ;;  %v5552_v4 = vmax.f32 %v15431_v63, 0.0  ;;  %v6650_v40 = vsel %vm13717_vm7, %v11462_v30, %v6649_v58  ;;  %v13341_v36 = vld [vmem:[%s16855_s3 + $0x1f0] sm:$0xff]  }
 0x2b8   : > { %5948 = vst [vmem:[#allocation2 + $0x3c] sm:$0xf] %v11425_v23  ;;  %5949 = vst [vmem:[#allocation2 + $0x40] sm:$0xf] %v11426_v9  ;;  %v5636_v17 = vrot.slane %v5634_v53, 7  ;;  %v6651_v61 = vrot.slane %v6649_v58, 4  ;;  %v5477_v19 = vadd.f32 %v5476_v18, %v15315_v11  ;;  %v12871_v0 = vpop.f32.mrf.mxu0 }
 0x2b9   : > { %v13266_v14 = vld [vmem:[#allocation3 + $0x8] ss:$36 sps:$4 sm:$0xff]   ;;  %v5629_v15 = vrot.slane %v5627_v10, 7  ;;  %6786 = vst [vmem:[#allocation3 + $0x50] sm:$0xf] %v6650_v40  ;;  %v6121_v45 = vshrl.u32 %v15433_v2, 16  ;;  %v15465_v29 = vadd.f32 %v12871_v0, %v15342_v42 }
 0x2ba   : > { %v13268_v28 = vld [vmem:[#allocation3 + $0xc] ss:$36 sps:$4 sm:$0xff]   ;;  %v6124_v62 = vshll.u32 %v15433_v2, 16  ;;  %v5639_v49 = vor.u32 %v5637_v39, %v5636_v17  ;;  %v5751_v37 = vsel %vm13724_vm8, %v5636_v17, 0  ;;  %v5555_v34 = vmax.f32 %v5485_v12, 0.0  ;;  %v13342_v5 = vld [vmem:[%s16855_s3 + $0x1b0] sm:$0xff]   ;;  %v5489_v33 = vpop.f32.mrf.mxu0 }
 0x2bb   : > { %v6820_v60 = vld [vmem:[#allocation2 + $0x24] sm:$0xf]  ;;  %10152 = vmatprep.mubr.bf16.mxu0 %v13268_v28  ;;  %v6653_v11 = vsel %vm13717_vm7, %v6651_v61, %v6652_v47  ;;  %v6821_v44 = vld [vmem:[#allocation2 + $0x28] sm:$0xf]  ;;  %v11436_v32 = vcombine.low %v5751_v37, %v5751_v37  ;;  %v5632_v30 = vor.u32 %v5630_v26, %v5629_v15  ;;  %v5750_v58 = vsel %vm13724_vm8, %v5629_v15, 0 }
 0x2bc   : > { %6852 = vst [vmem:[#allocation3 + $0x9c] sm:$0xf] %v6820_v60  ;;  %v5553_v48 = vmax.f32 %v5477_v19, 0.0  ;;  %10153 = vmatmul.mubr.bf16.vlgmr.msra.gmra.mxu0 %v13266_v14  ;;  %6787 = vst [vmem:[#allocation3 + $0x74] sm:$0xf] %v6653_v11  ;;  %v13357_v43 = vld [vmem:[%s16855_s3 + $0x1e8] sm:$0xff]   ;;  %v11433_v51 = vcombine.low %v5750_v58, %v5750_v58  ;;  %v5577_v57 = vpack.c.bf16 %v5555_v34, %v5554_v54  ;;  %v12872_v38 = vpop.f32.mrf.mxu0 }
 0x2bd   : > { %6853 = vst [vmem:[#allocation3 + $0xc0] sm:$0xf] %v6821_v44  ;;  %v5735_v47 = vsel %vm13724_vm8, 0, %v5639_v49  ;;  %v6822_v16 = vld [vmem:[#allocation2 + $0x30] sm:$0xf]  ;;  %12698 = vmatpush3.bf16.msra.mxu0 %v13326_v7  ;;  %v13359_v41 = vld [vmem:[%s16855_s3 + $0x148] sm:$0xff]   ;;  %v5490_v54 = vadd.f32 %v5489_v33, %v15345_v20  ;;  %v5501_v17 = vadd.f32 %v12872_v38, %v15354_v50 }
 0x2be   : > { %v6823_v6 = vld [vmem:[#allocation2 + $0x34] sm:$0xf]  ;;  %v11434_v56 = vcombine.low %v5735_v47, %v5735_v47  ;;  %v11435_v13 = vcombine.high %v5735_v47, %v5735_v47  ;;  %5959 = vst [vmem:[#allocation2 + $0x68] sm:$0x1] %v11436_v32  ;;  %v5734_v22 = vsel %vm13724_vm8, 0, %v5632_v30  ;;  %v5576_v63 = vpack.c.bf16 %v5553_v48, %v5552_v4  ;;  %12699 = vmatprep.subr.bf16.mxu0 %v13341_v36  ;;  %v13363_v46 = vld [vmem:[%s16855_s3 + $0x108] sm:$0xff]   ;;  %v5492_v12 = vpop.f32.mrf.mxu0 }
 0x2bf   : > { %6854 = vst [vmem:[#allocation3 + $0xe4] sm:$0xf] %v6822_v16  ;;  %6855 = vst [vmem:[#allocation3 + $0x108] sm:$0xf] %v6823_v6  ;;  %v5990_v3 = vld [vmem:[#allocation2 + $0x24] sm:$0xf]  ;;  %v11431_v23 = vcombine.low %v5734_v22, %v5734_v22  ;;  %v11432_v9 = vcombine.high %v5734_v22, %v5734_v22  ;;  %12597 = vmatprep.subr.bf16.mxu1 %v13359_v41  ;;  %v5493_v15 = vadd.f32 %v5492_v12, %v15348_v21 }
 0x2c0   : > { %v5991_v42 = vld [vmem:[#allocation2 + $0x28] sm:$0xf]  ;;  %5956 = vst [vmem:[#allocation2 + $0x5c] sm:$0x1] %v11433_v51  ;;  %v5648_v53 = vshrl.u32 %v5577_v57, 16  ;;  %v5651_v39 = vshll.u32 %v5577_v57, 16  ;;  %12598 = vmatpush3.bf16.msra.mxu1 %v13363_v46  ;;  %v12875_v36 = vpop.f32.mrf.mxu0 }
 0x2c1   : > { %v15475_v2 = vld [vmem:[#allocation2 + $0x10] sm:$0xf]  ;;  %6022 = vst [vmem:[#allocation3 + $0xd8] sm:$0xf] %v5990_v3  ;;  %6023 = vst [vmem:[#allocation3 + $0xfc] sm:$0xf] %v5991_v42  ;;  %12700 = vmatpush3.bf16.msra.mxu0 %v13342_v5  ;;  %v15492_v58 = vadd.f32 %v12875_v36, %v15360_v25 }
 0x2c2   : > { %5957 = vst [vmem:[#allocation2 + $0x60] sm:$0xf] %v11434_v56  ;;  %5958 = vst [vmem:[#allocation2 + $0x64] sm:$0xf] %v11435_v13  ;;  %v5641_v7 = vshrl.u32 %v5576_v63, 16  ;;  %v5644_v10 = vshll.u32 %v5576_v63, 16  ;;  %12701 = vmatprep.subr.bf16.mxu0 %v13357_v43  ;;  %v5505_v48 = vpop.f32.mrf.mxu0 }
 0x2c3   : > { %v5558_v26 = vmax.f32 %v15465_v29, 0.0  ;;  %5954 = vst [vmem:[#allocation2 + $0x54] sm:$0xf] %v11431_v23  ;;  %5955 = vst [vmem:[#allocation2 + $0x58] sm:$0xf] %v11432_v9  ;;  %v5650_v4 = vrot.slane %v5648_v53, 7 }
 0x2c4   : > { %v6123_v18 = vrot.slane %v6121_v45, 4  ;;  %v6126_v14 = vrot.slane %v6124_v62, 5  ;;  %v13358_v28 = vld [vmem:[%s16855_s3 + $0x1a8] sm:$0xff]   ;;  %v5643_v40 = vrot.slane %v5641_v7, 7  ;;  %v5556_v61 = vmax.f32 %v5490_v54, 0.0  ;;  %v13373_v25 = vld [vmem:[%s16855_s3 + $0x1e0] sm:$0xff]   ;;  %v15499_v3 = vpop.f32.mrf.mxu0 }
 0x2c5   : > { %v6130_v20 = vshll.u32 %v15475_v2, 16  ;;  %v5653_v19 = vor.u32 %v5651_v39, %v5650_v4  ;;  %v5753_v60 = vsel %vm13724_vm8, %v5650_v4, 0  ;;  %v5559_v50 = vmax.f32 %v5501_v17, 0.0  ;;  %v13271_v34 = vld [vmem:[#allocation3 + $0x50] ss:$36 sps:$4 sm:$0xff]   ;;  %12702 = vmatpush3.bf16.msra.mxu0 %v13358_v28  ;;  %v13374_v12 = vld [vmem:[%s16855_s3 + $0x1a0] sm:$0xff]  }
 0x2c6   : > { %v6127_v45 = vor.u32 %v6126_v14, %v6123_v18  ;;  %v11442_v62 = vcombine.low %v5753_v60, %v5753_v60  ;;  %v5646_v49 = vor.u32 %v5644_v10, %v5643_v40  ;;  %v5752_v37 = vsel %vm13724_vm8, %v5643_v40, 0  ;;  %v13273_v0 = vld [vmem:[#allocation3 + $0x54] ss:$36 sps:$4 sm:$0xff]   ;;  %v6053_v44 = vld [vmem:[#allocation2 + $0x14] sm:$0x1]  ;;  %12703 = vmatprep.subr.bf16.mxu0 %v13373_v25  ;;  %v15503_v10 = vpop.f32.mrf.mxu0 }
 0x2c7   : > { %v5557_v11 = vmax.f32 %v5493_v15, 0.0  ;;  %v5737_v21 = vsel %vm13724_vm8, 0, %v5653_v19  ;;  %v11439_v32 = vcombine.low %v5752_v37, %v5752_v37  ;;  %v5579_v30 = vpack.c.bf16 %v5559_v50, %v5558_v26  ;;  %v6824_v5 = vld [vmem:[#allocation2 + $0x3c] sm:$0xf]  ;;  %v6825_v43 = vld [vmem:[#allocation2 + $0x40] sm:$0xf]  ;;  %10160 = vmatprep.mubr.bf16.mxu0 %v13273_v0 }
 0x2c8   : > { %v11440_v47 = vcombine.low %v5737_v21, %v5737_v21  ;;  %v11441_v51 = vcombine.high %v5737_v21, %v5737_v21  ;;  %5965 = vst [vmem:[#allocation2 + $0x80] sm:$0x1] %v11442_v62  ;;  %v5736_v57 = vsel %vm13724_vm8, 0, %v5646_v49  ;;  %6856 = vst [vmem:[#allocation3 + $0x12c] sm:$0xf] %v6824_v5  ;;  %10161 = vmatmul.mubr.bf16.gmra.mxu0 %v13271_v34  ;;  %v5562_v23 = vmax.f32 %v15492_v58, 0.0 }
 0x2c9   : > { %v5578_v29 = vpack.c.bf16 %v5557_v11, %v5556_v61  ;;  %6857 = vst [vmem:[#allocation3 + $0x150] sm:$0xf] %v6825_v43  ;;  %v5992_v33 = vld [vmem:[#allocation2 + $0x30] sm:$0xf]  ;;  %v5993_v16 = vld [vmem:[#allocation2 + $0x34] sm:$0xf]  ;;  %v11437_v6 = vcombine.low %v5736_v57, %v5736_v57  ;;  %v11438_v41 = vcombine.high %v5736_v57, %v5736_v57  ;;  %v15506_v54 = vadd.f32 %v5505_v48, %v15357_v35 }
 0x2ca   : > { %5962 = vst [vmem:[#allocation2 + $0x74] sm:$0x1] %v11439_v32  ;;  %v5662_v56 = vshrl.u32 %v5579_v30, 16  ;;  %v5665_v13 = vshll.u32 %v5579_v30, 16  ;;  %v6550_v22 = vld [vmem:[#allocation2 + $0x18] sm:$0xe]  ;;  %12704 = vmatpush3.bf16.msra.mxu0 %v13374_v12 }
 0x2cb   : > { %v6551_v63 = vld [vmem:[#allocation2 + $0x1c] sm:$0xf]  ;;  %6024 = vst [vmem:[#allocation3 + $0x120] sm:$0xf] %v5992_v33  ;;  %6025 = vst [vmem:[#allocation3 + $0x144] sm:$0xf] %v5993_v16 }
 0x2cc   : > { %5963 = vst [vmem:[#allocation2 + $0x78] sm:$0xf] %v11440_v47  ;;  %5964 = vst [vmem:[#allocation2 + $0x7c] sm:$0xf] %v11441_v51  ;;  %v5655_v42 = vshrl.u32 %v5578_v29, 16  ;;  %v5658_v46 = vshll.u32 %v5578_v29, 16 }
 0x2cd   : > { %v6128_v9 = vrot.slane %v6127_v45, 4  ;;  %5960 = vst [vmem:[#allocation2 + $0x6c] sm:$0xf] %v11437_v6  ;;  %5961 = vst [vmem:[#allocation2 + $0x70] sm:$0xf] %v11438_v41  ;;  %v5664_v53 = vrot.slane %v5662_v56, 7 }
 0x2ce   : > { %v6132_v39 = vrot.slane %v6130_v20, 5  ;;  %v6134_v38 = vshrl.u32 %v15475_v2, 16  ;;  %v6140_v7 = vshll.u32 %v6053_v44, 16  ;;  %v5657_v26 = vrot.slane %v5655_v42, 7  ;;  %v6552_v61 = vld [vmem:[#allocation2 + $0x20] sm:$0x1]  ;;  %v15515_v20 = vpop.f32.mrf.mxu0 }
 0x2cf   : > { %v11463_v4 = vrot.slane %v6550_v22, 9  ;;  %v6656_v17 = vrot.slane %v6551_v63, 5  ;;  %v5667_v18 = vor.u32 %v5665_v13, %v5664_v53  ;;  %v5755_v14 = vsel %vm13724_vm8, %v5664_v53, 0  ;;  %v6054_v15 = vld [vmem:[#allocation2 + $0x18] sm:$0xf]  ;;  %v13375_v43 = vld [vmem:[%s16855_s3 + $0x140] sm:$0xff]  }
 0x2d0   : > { %v6133_v2 = vsel %vm13709_vm5, %v6128_v9, %v6132_v39  ;;  %v6136_v40 = vrot.slane %v6134_v38, 4  ;;  %v6826_v35 = vld [vmem:[#allocation2 + $0x48] sm:$0xf]  ;;  %v11448_v19 = vcombine.low %v5755_v14, %v5755_v14  ;;  %v5660_v60 = vor.u32 %v5658_v46, %v5657_v26  ;;  %v6827_v45 = vld [vmem:[#allocation2 + $0x4c] sm:$0xf]  ;;  %v5521_v33 = vpop.f32.mrf.mxu0  ;;  %12599 = vmatprep.subr.bf16.mxu1 %v13375_v43  ;;  %v13376_v12 = vld [vmem:[%s16855_s3 + $0x1d8] sm:$0xff]  }
 0x2d1   : > { %v5754_v50 = vsel %vm13724_vm8, %v5657_v26, 0  ;;  %v6142_v36 = vrot.slane %v6140_v7, 5  ;;  %6514 = vst [vmem:[#allocation3 + $0x4c] sm:$0xf] %v6133_v2  ;;  %6858 = vst [vmem:[#allocation3 + $0x174] sm:$0xf] %v6826_v35  ;;  %v6657_v48 = vsel %vm13717_vm7, %v11463_v4, %v6656_v17  ;;  %v5517_v46 = vadd.f32 %v15499_v3, %v15363_v55  ;;  %12705 = vmatprep.subr.bf16.mxu0 %v13376_v12 }
 0x2d2   : > { %v5994_v62 = vld [vmem:[#allocation2 + $0x3c] sm:$0xf]  ;;  %v5739_v49 = vsel %vm13724_vm8, 0, %v5667_v18  ;;  %v11445_v37 = vcombine.low %v5754_v50, %v5754_v50  ;;  %v6137_v34 = vor.u32 %v6136_v40, %v6132_v39  ;;  %v5560_v0 = vmax.f32 %v15506_v54, 0.0  ;;  %6859 = vst [vmem:[#allocation3 + $0x198] sm:$0xf] %v6827_v45  ;;  %v12880_v2 = vpop.f32.mrf.mxu0 }
 0x2d3   : > { %v6055_v11 = vld [vmem:[#allocation2 + $0x1c] sm:$0xf]  ;;  %v5995_v44 = vld [vmem:[#allocation2 + $0x40] sm:$0xf]  ;;  %6026 = vst [vmem:[#allocation3 + $0x168] sm:$0xf] %v5994_v62  ;;  %v11446_v21 = vcombine.low %v5739_v49, %v5739_v49  ;;  %v11447_v32 = vcombine.high %v5739_v49, %v5739_v49  ;;  %v5509_v14 = vadd.f32 %v15503_v10, %v15366_v8  ;;  %v15549_v35 = vadd.f32 %v5521_v33, %v15383_v31 }
 0x2d4   : > { %5971 = vst [vmem:[#allocation2 + $0x98] sm:$0x1] %v11448_v19  ;;  %v5738_v30 = vsel %vm13724_vm8, 0, %v5660_v60  ;;  %v6056_v5 = vld [vmem:[#allocation2 + $0x20] sm:$0x1]  ;;  %v6138_v57 = vrot.slane %v6137_v34, 4 }
 0x2d5   : > { %6027 = vst [vmem:[#allocation3 + $0x18c] sm:$0xf] %v5995_v44  ;;  %v11443_v47 = vcombine.low %v5738_v30, %v5738_v30  ;;  %v11444_v51 = vcombine.high %v5738_v30, %v5738_v30  ;;  %5968 = vst [vmem:[#allocation2 + $0x8c] sm:$0x1] %v11445_v37  ;;  %v6658_v29 = vrot.slane %v6656_v17, 4  ;;  %v6659_v25 = vrot.slane %v6552_v61, 5  ;;  %v5524_v44 = vpop.f32.mrf.mxu0 }
 0x2d6   : > { %6788 = vst [vmem:[#allocation3 + $0x98] sm:$0xf] %v6657_v48  ;;  %v15529_v16 = vld [vmem:[#allocation2 + $0x24] sm:$0xe]  ;;  %5969 = vst [vmem:[#allocation2 + $0x90] sm:$0xf] %v11446_v21  ;;  %v6143_v22 = vsel %vm13709_vm5, %v6138_v57, %v6142_v36 }
 0x2d7   : > { %5970 = vst [vmem:[#allocation2 + $0x94] sm:$0xf] %v11447_v32  ;;  %v6145_v6 = vshrl.u32 %v6054_v15, 16  ;;  %v6148_v41 = vshll.u32 %v6054_v15, 16  ;;  %v6154_v56 = vshll.u32 %v6055_v11, 16  ;;  %v6158_v63 = vshrl.u32 %v6055_v11, 16 }
 0x2d8   : > { %v6554_v13 = vld [vmem:[#allocation2 + $0x28] sm:$0xf]  ;;  %5966 = vst [vmem:[#allocation2 + $0x84] sm:$0xf] %v11443_v47  ;;  %5967 = vst [vmem:[#allocation2 + $0x88] sm:$0xf] %v11444_v51  ;;  %v6660_v38 = vsel %vm13717_vm7, %v6658_v29, %v6659_v25  ;;  %v15546_v15 = vadd.f32 %v15515_v20, %v15394_v27  ;;  %v5533_v29 = vadd.f32 %v12880_v2, %v15418_v59 }
 0x2d9   : > { %v6164_v42 = vshll.u32 %v6056_v5, 16  ;;  %v15535_v9 = vld [vmem:[#allocation2 + $0x2c] sm:$0x1]  ;;  %v6828_v53 = vld [vmem:[#allocation2 + $0x54] sm:$0xf]  ;;  %v6147_v7 = vrot.slane %v6145_v6, 4 }
 0x2da   : > { %v6829_v39 = vld [vmem:[#allocation2 + $0x58] sm:$0xf]  ;;  %6515 = vst [vmem:[#allocation3 + $0x70] sm:$0xf] %v6143_v22  ;;  %v6150_v26 = vrot.slane %v6148_v41, 5  ;;  %v6156_v4 = vrot.slane %v6154_v56, 5  ;;  %v5525_v41 = vadd.f32 %v5524_v44, %v15391_v24 }
 0x2db   : > { %6860 = vst [vmem:[#allocation3 + $0x1bc] sm:$0xf] %v6828_v53  ;;  %6861 = vst [vmem:[#allocation3 + $0x1e0] sm:$0xf] %v6829_v39  ;;  %v5996_v17 = vld [vmem:[#allocation2 + $0x48] sm:$0xf] }
 0x2dc   : > { %6789 = vst [vmem:[#allocation3 + $0xbc] sm:$0xf] %v6660_v38  ;;  %v6160_v55 = vrot.slane %v6158_v63, 4  ;;  %v6166_v3 = vrot.slane %v6164_v42, 5  ;;  %v5563_v18 = vmax.f32 %v5517_v46, 0.0  ;;  %v6151_v61 = vor.u32 %v6150_v26, %v6147_v7  ;;  %v13380_v60 = vld [vmem:[%s16855_s3 + $0x100] sm:$0xff]  }
 0x2dd   : > { %v5997_v40 = vld [vmem:[#allocation2 + $0x4c] sm:$0xf]  ;;  %6028 = vst [vmem:[#allocation3 + $0x1b0] sm:$0xf] %v5996_v17  ;;  %v11464_v19 = vrot.slane %v15529_v16, 9  ;;  %v5561_v50 = vmax.f32 %v5509_v14, 0.0  ;;  %12600 = vmatpush3.bf16.msra.mxu1 %v13380_v60 }
 0x2de   : > { %6029 = vst [vmem:[#allocation3 + $0x1d4] sm:$0xf] %v5997_v40  ;;  %v6161_v8 = vor.u32 %v6160_v55, %v6156_v4  ;;  %v5581_v10 = vpack.c.bf16 %v5563_v18, %v5562_v23  ;;  %v6663_v36 = vrot.slane %v6554_v13, 5  ;;  %v15557_v45 = vld [vmem:[#allocation2 + $0x24] sm:$0xf]  ;;  %v6152_v27 = vrot.slane %v6151_v61, 4 }
 0x2df   : > { %v5566_v31 = vmax.f32 %v15546_v15, 0.0  ;;  %v5564_v20 = vmax.f32 %v15549_v35, 0.0  ;;  %v6666_v62 = vrot.slane %v15535_v9, 5  ;;  %v13381_v49 = vld [vmem:[%s16855_s3 + $0x198] sm:$0xff]   ;;  %v5580_v23 = vpack.c.bf16 %v5561_v50, %v5560_v0  ;;  %v6058_v11 = vld [vmem:[#allocation2 + $0x28] sm:$0xf] }
 0x2e0   : > { %v6162_v37 = vrot.slane %v6161_v8, 4  ;;  %v5676_v34 = vshrl.u32 %v5581_v10, 16  ;;  %v5679_v58 = vshll.u32 %v5581_v10, 16  ;;  %v13385_v21 = vld [vmem:[%s16855_s3 + $0x1d0] sm:$0xff]   ;;  %v6157_v32 = vsel %vm13709_vm5, %v6152_v27, %v6156_v4  ;;  %v6059_v5 = vld [vmem:[#allocation2 + $0x2c] sm:$0x1]  ;;  %12706 = vmatpush3.bf16.msra.mxu0 %v13381_v49 }
 0x2e1   : > { %v6664_v30 = vsel %vm13717_vm7, %v11464_v19, %v6663_v36  ;;  %v6665_v48 = vrot.slane %v6663_v36, 4  ;;  %v6169_v43 = vshrl.u32 %v15557_v45, 16  ;;  %v6830_v47 = vld [vmem:[#allocation2 + $0x60] sm:$0xf]  ;;  %v13276_v0 = vld [vmem:[#allocation3 + $0x4c] ss:$36 sps:$4 sm:$0xff]   ;;  %12707 = vmatprep.subr.bf16.mxu0 %v13385_v21 }
 0x2e2   : > { %v13274_v54 = vld [vmem:[#allocation3 + $0x48] ss:$36 sps:$4 sm:$0xff]   ;;  %v6167_v51 = vsel %vm13709_vm5, %v6162_v37, %v6166_v3  ;;  %6516 = vst [vmem:[#allocation3 + $0x94] sm:$0xf] %v6157_v32  ;;  %v5678_v57 = vrot.slane %v5676_v34, 7  ;;  %v5669_v25 = vshrl.u32 %v5580_v23, 16  ;;  %9999 = vmatprep.mubr.bf16.mxu1 %v13276_v0 }
 0x2e3   : > { %6790 = vst [vmem:[#allocation3 + $0xe0] sm:$0xf] %v6664_v30  ;;  %6862 = vst [vmem:[#allocation3 + $0x204] sm:$0xf] %v6830_v47  ;;  %v13277_v33 = vld [vmem:[#allocation3 + $0x98] ss:$36 sps:$4 sm:$0xff]   ;;  %v6667_v6 = vsel %vm13717_vm7, %v6665_v48, %v6666_v62  ;;  %10000 = vmatmul.mubr.bf16.gmra.mxu1 %v13274_v54 }
 0x2e4   : > { %v13279_v16 = vld [vmem:[#allocation3 + $0x9c] ss:$36 sps:$4 sm:$0xff]   ;;  %6517 = vst [vmem:[#allocation3 + $0xb8] sm:$0xf] %v6167_v51  ;;  %v5681_v56 = vor.u32 %v5679_v58, %v5678_v57  ;;  %v5757_v13 = vsel %vm13724_vm8, %v5678_v57, 0  ;;  %v5672_v22 = vshll.u32 %v5580_v23, 16 }
 0x2e5   : > { %6791 = vst [vmem:[#allocation3 + $0x104] sm:$0xf] %v6667_v6  ;;  %v6171_v63 = vrot.slane %v6169_v43, 4  ;;  %v6831_v59 = vld [vmem:[#allocation2 + $0x64] sm:$0xf]  ;;  %v13386_v42 = vld [vmem:[%s16855_s3 + $0x190] sm:$0xff]   ;;  %10168 = vmatprep.mubr.bf16.mxu0 %v13279_v16  ;;  %v11454_v46 = vcombine.low %v5757_v13, %v5757_v13 }
 0x2e6   : > { %v5671_v9 = vrot.slane %v5669_v25, 7  ;;  %v6172_v53 = vshll.u32 %v15557_v45, 16  ;;  %v6178_v24 = vshll.u32 %v6058_v11, 16  ;;  %6863 = vst [vmem:[#allocation3 + $0x228] sm:$0xf] %v6831_v59  ;;  %v13387_v38 = vld [vmem:[%s16855_s3 + $0x1c8] sm:$0xff]   ;;  %10169 = vmatmul.mubr.bf16.gmra.mxu0 %v13277_v33 }
 0x2e7   : > { %v5998_v39 = vld [vmem:[#allocation2 + $0x54] sm:$0xf]  ;;  %v5741_v7 = vsel %vm13724_vm8, 0, %v5681_v56  ;;  %v6182_v26 = vshrl.u32 %v6058_v11, 16  ;;  %v6188_v4 = vshll.u32 %v6059_v5, 16  ;;  %v5567_v17 = vmax.f32 %v5533_v29, 0.0  ;;  %12708 = vmatpush3.bf16.msra.mxu0 %v13386_v42 }
 0x2e8   : > { %v5999_v12 = vld [vmem:[#allocation2 + $0x58] sm:$0xf]  ;;  %6030 = vst [vmem:[#allocation3 + $0x1f8] sm:$0xf] %v5998_v39  ;;  %v11452_v55 = vcombine.low %v5741_v7, %v5741_v7  ;;  %v11453_v3 = vcombine.high %v5741_v7, %v5741_v7  ;;  %5977 = vst [vmem:[#allocation2 + $0xb0] sm:$0x1] %v11454_v46  ;;  %v5674_v18 = vor.u32 %v5672_v22, %v5671_v9  ;;  %12709 = vmatprep.subr.bf16.mxu0 %v13387_v38 }
 0x2e9   : > { %v5756_v14 = vsel %vm13724_vm8, %v5671_v9, 0  ;;  %v6556_v2 = vld [vmem:[#allocation2 + $0x30] sm:$0xe]  ;;  %6031 = vst [vmem:[#allocation3 + $0x21c] sm:$0xf] %v5999_v12  ;;  %v13388_v40 = vld [vmem:[%s16855_s3 + $0x188] sm:$0xff]   ;;  %v5583_v27 = vpack.c.bf16 %v5567_v17, %v5566_v31 }
 0x2ea   : > { %v11451_v61 = vcombine.low %v5756_v14, %v5756_v14  ;;  %v6174_v19 = vrot.slane %v6172_v53, 5  ;;  %v6180_v60 = vrot.slane %v6178_v24, 5  ;;  %v6184_v8 = vrot.slane %v6182_v26, 4  ;;  %v6557_v10 = vld [vmem:[#allocation2 + $0x34] sm:$0xf]  ;;  %v13395_v50 = vld [vmem:[%s16855_s3 + $0x1c0] sm:$0xff]  }
 0x2eb   : > { %5975 = vst [vmem:[#allocation2 + $0xa8] sm:$0xf] %v11452_v55  ;;  %5976 = vst [vmem:[#allocation2 + $0xac] sm:$0xf] %v11453_v3  ;;  %v5740_v36 = vsel %vm13724_vm8, 0, %v5674_v18  ;;  %v6190_v45 = vrot.slane %v6188_v4, 5  ;;  %12710 = vmatpush3.bf16.msra.mxu0 %v13388_v40 }
 0x2ec   : > { %v5565_v62 = vmax.f32 %v5525_v41, 0.0  ;;  %v15604_v49 = vld [vmem:[#allocation2 + $0x38] sm:$0x1]  ;;  %v15606_v37 = vld [vmem:[#allocation2 + $0x30] sm:$0xf]  ;;  %v11449_v58 = vcombine.low %v5740_v36, %v5740_v36  ;;  %v11450_v23 = vcombine.high %v5740_v36, %v5740_v36  ;;  %v6175_v11 = vor.u32 %v6174_v19, %v6171_v63  ;;  %v13396_v21 = vld [vmem:[%s16855_s3 + $0x180] sm:$0xff]   ;;  %12711 = vmatprep.subr.bf16.mxu0 %v13395_v50 }
 0x2ed   : > { %v13282_v34 = vld [vmem:[#allocation3 + $0x94] ss:$36 sps:$4 sm:$0xff]   ;;  %5974 = vst [vmem:[#allocation2 + $0xa4] sm:$0x1] %v11451_v61  ;;  %v6185_v44 = vor.u32 %v6184_v8, %v6180_v60  ;;  %v13286_v30 = vld [vmem:[#allocation3 + $0xe4] ss:$36 sps:$4 sm:$0xff]  }
 0x2ee   : > { %v13280_v32 = vld [vmem:[#allocation3 + $0x90] ss:$36 sps:$4 sm:$0xff]   ;;  %v5690_v48 = vshrl.u32 %v5583_v27, 16  ;;  %v5582_v15 = vpack.c.bf16 %v5565_v62, %v5564_v20  ;;  %10007 = vmatprep.mubr.bf16.mxu1 %v13282_v34  ;;  %5972 = vst [vmem:[#allocation2 + $0x9c] sm:$0xf] %v11449_v58  ;;  %v6176_v5 = vrot.slane %v6175_v11, 4  ;;  %10176 = vmatprep.mubr.bf16.mxu0 %v13286_v30 }
 0x2ef   : > { %5973 = vst [vmem:[#allocation2 + $0xa0] sm:$0xf] %v11450_v23  ;;  %v13284_v31 = vld [vmem:[#allocation3 + $0xe0] ss:$36 sps:$4 sm:$0xff]   ;;  %v6186_v43 = vrot.slane %v6185_v44, 4  ;;  %v5693_v47 = vshll.u32 %v5583_v27, 16  ;;  %10008 = vmatmul.mubr.bf16.gmra.mxu1 %v13280_v32  ;;  %12712 = vmatpush3.bf16.msra.mxu0 %v13396_v21 }
 0x2f0   : > { %v11465_v54 = vrot.slane %v6556_v2, 9  ;;  %v5692_v0 = vrot.slane %v5690_v48, 7  ;;  %v5683_v51 = vshrl.u32 %v5582_v15, 16  ;;  %v5686_v57 = vshll.u32 %v5582_v15, 16  ;;  %10177 = vmatmul.mubr.bf16.gmra.mxu0 %v13284_v31  ;;  %v6061_v16 = vld [vmem:[#allocation2 + $0x34] sm:$0xf] }
 0x2f1   : > { %v6670_v29 = vrot.slane %v6557_v10, 5  ;;  %v6181_v35 = vsel %vm13709_vm5, %v6176_v5, %v6180_v60  ;;  %v6191_v20 = vsel %vm13709_vm5, %v6186_v43, %v6190_v45  ;;  %v6673_v33 = vrot.slane %v15604_v49, 5  ;;  %v6832_v6 = vld [vmem:[#allocation2 + $0x6c] sm:$0xf]  ;;  %v6062_v63 = vld [vmem:[#allocation2 + $0x38] sm:$0x1] }
 0x2f2   : > { %v6193_v25 = vshrl.u32 %v15606_v37, 16  ;;  %6518 = vst [vmem:[#allocation3 + $0xdc] sm:$0xf] %v6181_v35  ;;  %6519 = vst [vmem:[#allocation3 + $0x100] sm:$0xf] %v6191_v20  ;;  %v5695_v41 = vor.u32 %v5693_v47, %v5692_v0  ;;  %v5759_v56 = vsel %vm13724_vm8, %v5692_v0, 0 }
 0x2f3   : > { %v5685_v13 = vrot.slane %v5683_v51, 7  ;;  %v6671_v22 = vsel %vm13717_vm7, %v11465_v54, %v6670_v29  ;;  %v6833_v59 = vld [vmem:[#allocation2 + $0x70] sm:$0xf]  ;;  %6864 = vst [vmem:[#allocation3 + $0x24c] sm:$0xf] %v6832_v6  ;;  %v11460_v46 = vcombine.low %v5759_v56, %v5759_v56  ;;  %v6672_v9 = vrot.slane %v6670_v29, 4 }
 0x2f4   : > { %v6000_v42 = vld [vmem:[#allocation2 + $0x60] sm:$0xf]  ;;  %6792 = vst [vmem:[#allocation3 + $0x128] sm:$0xf] %v6671_v22  ;;  %v6195_v53 = vrot.slane %v6193_v25, 4  ;;  %v6196_v24 = vshll.u32 %v15606_v37, 16 }
 0x2f5   : > { %6865 = vst [vmem:[#allocation3 + $0x270] sm:$0xf] %v6833_v59  ;;  %v6001_v39 = vld [vmem:[#allocation2 + $0x64] sm:$0xf]  ;;  %6032 = vst [vmem:[#allocation3 + $0x240] sm:$0xf] %v6000_v42  ;;  %v5688_v26 = vor.u32 %v5686_v57, %v5685_v13  ;;  %v6674_v14 = vsel %vm13717_vm7, %v6672_v9, %v6673_v33 }
 0x2f6   : > { %v13397_v38 = vld [vmem:[%s16855_s3 + $0x238] sm:$0xff]   ;;  %v5743_v7 = vsel %vm13724_vm8, 0, %v5695_v41  ;;  %v5758_v4 = vsel %vm13724_vm8, %v5685_v13, 0  ;;  %v6202_v17 = vshll.u32 %v6061_v16, 16  ;;  %6033 = vst [vmem:[#allocation3 + $0x264] sm:$0xf] %v6001_v39 }
 0x2f7   : > { %v6559_v12 = vld [vmem:[#allocation2 + $0x3c] sm:$0xe]  ;;  %v11458_v55 = vcombine.low %v5743_v7, %v5743_v7  ;;  %v11459_v3 = vcombine.high %v5743_v7, %v5743_v7  ;;  %5983 = vst [vmem:[#allocation2 + $0xc8] sm:$0x1] %v11460_v46  ;;  %v11457_v18 = vcombine.low %v5758_v4, %v5758_v4  ;;  %v6560_v2 = vld [vmem:[#allocation2 + $0x40] sm:$0xf]  ;;  %12881 = vmatprep.subr.bf16.mxu1 %v13397_v38 }
 0x2f8   : > { %v6561_v40 = vld [vmem:[#allocation2 + $0x44] sm:$0x1]  ;;  %v6063_v61 = vld [vmem:[#allocation2 + $0x3c] sm:$0xf]  ;;  %v5742_v19 = vsel %vm13724_vm8, 0, %v5688_v26  ;;  %v6198_v60 = vrot.slane %v6196_v24, 5 }
 0x2f9   : > { %6793 = vst [vmem:[#allocation3 + $0x14c] sm:$0xf] %v6674_v14  ;;  %v6204_v8 = vrot.slane %v6202_v17, 5  ;;  %v6206_v10 = vshrl.u32 %v6061_v16, 16  ;;  %v6064_v50 = vld [vmem:[#allocation2 + $0x40] sm:$0xf]  ;;  %v11455_v36 = vcombine.low %v5742_v19, %v5742_v19  ;;  %v11456_v45 = vcombine.high %v5742_v19, %v5742_v19 }
 0x2fa   : > { %5981 = vst [vmem:[#allocation2 + $0xc0] sm:$0xf] %v11458_v55  ;;  %5982 = vst [vmem:[#allocation2 + $0xc4] sm:$0xf] %v11459_v3  ;;  %v6212_v27 = vshll.u32 %v6062_v63, 16  ;;  %v11466_v62 = vrot.slane %v6559_v12, 9  ;;  %v6199_v34 = vor.u32 %v6198_v60, %v6195_v53 }
 0x2fb   : > { %5980 = vst [vmem:[#allocation2 + $0xbc] sm:$0x1] %v11457_v18  ;;  %v6065_v49 = vld [vmem:[#allocation2 + $0x44] sm:$0x1]  ;;  %v6834_v37 = vld [vmem:[#allocation2 + $0x78] sm:$0xf] }
 0x2fc   : > { %v6208_v58 = vrot.slane %v6206_v10, 4  ;;  %v6677_v23 = vrot.slane %v6560_v2, 5  ;;  %v6680_v11 = vrot.slane %v6561_v40, 5  ;;  %v6835_v1 = vld [vmem:[#allocation2 + $0x7c] sm:$0xf]  ;;  %v6214_v21 = vrot.slane %v6212_v27, 5 }
 0x2fd   : > { %6866 = vst [vmem:[#allocation3 + $0x294] sm:$0xf] %v6834_v37  ;;  %v13288_v44 = vld [vmem:[#allocation3 + $0xd8] ss:$36 sps:$4 sm:$0xff]   ;;  %5978 = vst [vmem:[#allocation2 + $0xb4] sm:$0xf] %v11455_v36 }
 0x2fe   : > { %5979 = vst [vmem:[#allocation2 + $0xb8] sm:$0xf] %v11456_v45  ;;  %v6217_v32 = vshrl.u32 %v6063_v61, 16  ;;  %6867 = vst [vmem:[#allocation3 + $0x2b8] sm:$0xf] %v6835_v1  ;;  %v6200_v48 = vrot.slane %v6199_v34, 4  ;;  %v6209_v15 = vor.u32 %v6208_v58, %v6204_v8  ;;  %v6678_v31 = vsel %vm13717_vm7, %v11466_v62, %v6677_v23 }
 0x2ff   : > { %v13290_v30 = vld [vmem:[#allocation3 + $0xdc] ss:$36 sps:$4 sm:$0xff]   ;;  %v6679_v5 = vrot.slane %v6677_v23, 4  ;;  %v6562_v43 = vld [vmem:[#allocation2 + $0x48] sm:$0xe]  ;;  %v6220_v51 = vshll.u32 %v6063_v61, 16 }
 0x300   : > { %v6563_v47 = vld [vmem:[#allocation2 + $0x4c] sm:$0xf]  ;;  %v6564_v54 = vld [vmem:[#allocation2 + $0x50] sm:$0x1]  ;;  %6794 = vst [vmem:[#allocation3 + $0x170] sm:$0xf] %v6678_v31  ;;  %10015 = vmatprep.mubr.bf16.mxu1 %v13290_v30  ;;  %v6205_v20 = vsel %vm13709_vm5, %v6200_v48, %v6204_v8 }
 0x301   : > { %v6219_v0 = vrot.slane %v6217_v32, 4  ;;  %v6226_v57 = vshll.u32 %v6064_v50, 16  ;;  %v6230_v29 = vshrl.u32 %v6064_v50, 16  ;;  %v6002_v35 = vld [vmem:[#allocation2 + $0x6c] sm:$0xf]  ;;  %v6210_v33 = vrot.slane %v6209_v15, 4  ;;  %10016 = vmatmul.mubr.bf16.gmra.mxu1 %v13288_v44 }
 0x302   : > { %v6681_v16 = vsel %vm13717_vm7, %v6679_v5, %v6680_v11  ;;  %v6236_v25 = vshll.u32 %v6065_v49, 16  ;;  %v6066_v6 = vld [vmem:[#allocation2 + $0x48] sm:$0xf]  ;;  %v6003_v41 = vld [vmem:[#allocation2 + $0x70] sm:$0xf]  ;;  %v6222_v13 = vrot.slane %v6220_v51, 5 }
 0x303   : > { %6034 = vst [vmem:[#allocation3 + $0x288] sm:$0xf] %v6002_v35  ;;  %v13293_v56 = vld [vmem:[#allocation3 + $0x12c] ss:$36 sps:$4 sm:$0xff]   ;;  %6520 = vst [vmem:[#allocation3 + $0x124] sm:$0xf] %v6205_v20  ;;  %v6215_v59 = vsel %vm13709_vm5, %v6210_v33, %v6214_v21 }
 0x304   : > { %6795 = vst [vmem:[#allocation3 + $0x194] sm:$0xf] %v6681_v16  ;;  %v6067_v22 = vld [vmem:[#allocation2 + $0x4c] sm:$0xf]  ;;  %6035 = vst [vmem:[#allocation3 + $0x2ac] sm:$0xf] %v6003_v41  ;;  %10184 = vmatprep.mubr.bf16.mxu0 %v13293_v56  ;;  %v6223_v24 = vor.u32 %v6222_v13, %v6219_v0 }
 0x305   : > { %v13291_v63 = vld [vmem:[#allocation3 + $0x128] ss:$36 sps:$4 sm:$0xff]   ;;  %v6228_v42 = vrot.slane %v6226_v57, 5  ;;  %v6232_v46 = vrot.slane %v6230_v29, 4  ;;  %v6238_v9 = vrot.slane %v6236_v25, 5  ;;  %v11467_v39 = vrot.slane %v6562_v43, 9 }
 0x306   : > { %v6068_v53 = vld [vmem:[#allocation2 + $0x50] sm:$0x1]  ;;  %6521 = vst [vmem:[#allocation3 + $0x148] sm:$0xf] %v6215_v59  ;;  %v6684_v38 = vrot.slane %v6563_v47, 5  ;;  %v6687_v7 = vrot.slane %v6564_v54, 5  ;;  %10185 = vmatmul.mubr.bf16.gmra.mxu0 %v13291_v63 }
 0x307   : > { %v6565_v26 = vld [vmem:[#allocation2 + $0x54] sm:$0xe]  ;;  %v6566_v4 = vld [vmem:[#allocation2 + $0x58] sm:$0xf]  ;;  %v6233_v17 = vor.u32 %v6232_v46, %v6228_v42  ;;  %v6241_v12 = vshrl.u32 %v6066_v6, 16  ;;  %v6244_v55 = vshll.u32 %v6066_v6, 16 }
 0x308   : > { %v6250_v3 = vshll.u32 %v6067_v22, 16  ;;  %v6567_v18 = vld [vmem:[#allocation2 + $0x5c] sm:$0x1]  ;;  %v6224_v14 = vrot.slane %v6223_v24, 4  ;;  %v6685_v2 = vsel %vm13717_vm7, %v11467_v39, %v6684_v38  ;;  %v6686_v40 = vrot.slane %v6684_v38, 4 }
 0x309   : > { %v6254_v61 = vshrl.u32 %v6067_v22, 16  ;;  %v6069_v19 = vld [vmem:[#allocation2 + $0x54] sm:$0xf]  ;;  %v6234_v60 = vrot.slane %v6233_v17, 4  ;;  %6796 = vst [vmem:[#allocation3 + $0x1b8] sm:$0xf] %v6685_v2 }
 0x30a   : > { %v6243_v8 = vrot.slane %v6241_v12, 4  ;;  %v6246_v10 = vrot.slane %v6244_v55, 5  ;;  %v6252_v50 = vrot.slane %v6250_v3, 5  ;;  %v6229_v36 = vsel %vm13709_vm5, %v6224_v14, %v6228_v42  ;;  %v6070_v49 = vld [vmem:[#allocation2 + $0x58] sm:$0xf] }
 0x30b   : > { %v6688_v45 = vsel %vm13717_vm7, %v6686_v40, %v6687_v7  ;;  %v6256_v27 = vrot.slane %v6254_v61, 4  ;;  %v6260_v62 = vshll.u32 %v6068_v53, 16  ;;  %v6071_v37 = vld [vmem:[#allocation2 + $0x5c] sm:$0x1]  ;;  %v6836_v34 = vld [vmem:[#allocation2 + $0x84] sm:$0xf]  ;;  %v6239_v23 = vsel %vm13709_vm5, %v6234_v60, %v6238_v9 }
 0x30c   : > { %v13298_v58 = vld [vmem:[#allocation3 + $0x170] ss:$36 sps:$4 sm:$0xff]   ;;  %6522 = vst [vmem:[#allocation3 + $0x16c] sm:$0xf] %v6229_v36  ;;  %6797 = vst [vmem:[#allocation3 + $0x1dc] sm:$0xf] %v6688_v45  ;;  %v6247_v11 = vor.u32 %v6246_v10, %v6243_v8 }
 0x30d   : > { %v11468_v1 = vrot.slane %v6565_v26, 9  ;;  %v6691_v44 = vrot.slane %v6566_v4, 5  ;;  %v6568_v21 = vld [vmem:[#allocation2 + $0x60] sm:$0xe]  ;;  %6868 = vst [vmem:[#allocation3 + $0x2dc] sm:$0xf] %v6836_v34  ;;  %v6257_v30 = vor.u32 %v6256_v27, %v6252_v50 }
 0x30e   : > { %v13300_v32 = vld [vmem:[#allocation3 + $0x174] ss:$36 sps:$4 sm:$0xff]   ;;  %6523 = vst [vmem:[#allocation3 + $0x190] sm:$0xf] %v6239_v23  ;;  %v6262_v48 = vrot.slane %v6260_v62, 5  ;;  %v6694_v15 = vrot.slane %v6567_v18, 5 }
 0x30f   : > { %v6265_v31 = vshrl.u32 %v6069_v19, 16  ;;  %v6569_v5 = vld [vmem:[#allocation2 + $0x64] sm:$0xf]  ;;  %v13294_v43 = vld [vmem:[#allocation3 + $0x120] ss:$36 sps:$4 sm:$0xff]   ;;  %v6248_v54 = vrot.slane %v6247_v11, 4  ;;  %v6692_v0 = vsel %vm13717_vm7, %v11468_v1, %v6691_v44  ;;  %10192 = vmatprep.mubr.bf16.mxu0 %v13300_v32 }
 0x310   : > { %v13296_v47 = vld [vmem:[#allocation3 + $0x124] ss:$36 sps:$4 sm:$0xff]   ;;  %v6258_v57 = vrot.slane %v6257_v30, 4  ;;  %v6693_v29 = vrot.slane %v6691_v44, 4  ;;  %6798 = vst [vmem:[#allocation3 + $0x200] sm:$0xf] %v6692_v0  ;;  %10193 = vmatmul.mubr.bf16.gmra.mxu0 %v13298_v58 }
 0x311   : > { %v6072_v51 = vld [vmem:[#allocation2 + $0x60] sm:$0xf]  ;;  %v6267_v35 = vrot.slane %v6265_v31, 4  ;;  %v6268_v20 = vshll.u32 %v6069_v19, 16  ;;  %v6570_v33 = vld [vmem:[#allocation2 + $0x68] sm:$0x1]  ;;  %10023 = vmatprep.mubr.bf16.mxu1 %v13296_v47  ;;  %v6253_v25 = vsel %vm13709_vm5, %v6248_v54, %v6252_v50 }
 0x312   : > { %v6837_v16 = vld [vmem:[#allocation2 + $0x88] sm:$0xf]  ;;  %v6274_v6 = vshll.u32 %v6070_v49, 16  ;;  %v6278_v41 = vshrl.u32 %v6070_v49, 16  ;;  %v6284_v56 = vshll.u32 %v6071_v37, 16  ;;  %10024 = vmatmul.mubr.bf16.gmra.mxu1 %v13294_v43  ;;  %v6263_v63 = vsel %vm13709_vm5, %v6258_v57, %v6262_v48 }
 0x313   : > { %v6073_v13 = vld [vmem:[#allocation2 + $0x64] sm:$0xf]  ;;  %6869 = vst [vmem:[#allocation3 + $0x300] sm:$0xf] %v6837_v16  ;;  %v6004_v22 = vld [vmem:[#allocation2 + $0x78] sm:$0xf]  ;;  %v6695_v59 = vsel %vm13717_vm7, %v6693_v29, %v6694_v15 }
 0x314   : > { %6524 = vst [vmem:[#allocation3 + $0x1b4] sm:$0xf] %v6253_v25  ;;  %v6270_v42 = vrot.slane %v6268_v20, 5  ;;  %v11469_v46 = vrot.slane %v6568_v21, 9  ;;  %v6074_v9 = vld [vmem:[#allocation2 + $0x68] sm:$0x1] }
 0x315   : > { %v6005_v53 = vld [vmem:[#allocation2 + $0x7c] sm:$0xf]  ;;  %6036 = vst [vmem:[#allocation3 + $0x2d0] sm:$0xf] %v6004_v22  ;;  %6525 = vst [vmem:[#allocation3 + $0x1d8] sm:$0xf] %v6263_v63 }
 0x316   : > { %6799 = vst [vmem:[#allocation3 + $0x224] sm:$0xf] %v6695_v59  ;;  %v6276_v24 = vrot.slane %v6274_v6, 5  ;;  %v6280_v39 = vrot.slane %v6278_v41, 4  ;;  %v6698_v38 = vrot.slane %v6569_v5, 5  ;;  %v6271_v26 = vor.u32 %v6270_v42, %v6267_v35 }
 0x317   : > { %v6571_v7 = vld [vmem:[#allocation2 + $0x6c] sm:$0xe]  ;;  %6037 = vst [vmem:[#allocation3 + $0x2f4] sm:$0xf] %v6005_v53  ;;  %v6286_v4 = vrot.slane %v6284_v56, 5  ;;  %v6289_v17 = vshrl.u32 %v6072_v51, 16 }
 0x318   : > { %v6572_v12 = vld [vmem:[#allocation2 + $0x70] sm:$0xf]  ;;  %v13304_v55 = vld [vmem:[#allocation3 + $0x16c] ss:$36 sps:$4 sm:$0xff]   ;;  %v6281_v3 = vor.u32 %v6280_v39, %v6276_v24  ;;  %v6699_v18 = vsel %vm13717_vm7, %v11469_v46, %v6698_v38  ;;  %v6700_v14 = vrot.slane %v6698_v38, 4  ;;  %v6701_v2 = vrot.slane %v6570_v33, 5 }
 0x319   : > { %v13307_v40 = vld [vmem:[#allocation3 + $0x1bc] ss:$36 sps:$4 sm:$0xff]   ;;  %v6272_v61 = vrot.slane %v6271_v26, 4  ;;  %6800 = vst [vmem:[#allocation3 + $0x248] sm:$0xf] %v6699_v18  ;;  %v6291_v19 = vrot.slane %v6289_v17, 4  ;;  %10031 = vmatprep.mubr.bf16.mxu1 %v13304_v55 }
 0x31a   : > { %v6292_v60 = vshll.u32 %v6072_v51, 16  ;;  %v6298_v8 = vshll.u32 %v6073_v13, 16  ;;  %v6573_v10 = vld [vmem:[#allocation2 + $0x74] sm:$0x1]  ;;  %v6282_v36 = vrot.slane %v6281_v3, 4  ;;  %v6702_v45 = vsel %vm13717_vm7, %v6700_v14, %v6701_v2  ;;  %10200 = vmatprep.mubr.bf16.mxu0 %v13307_v40 }
 0x31b   : > { %v13305_v50 = vld [vmem:[#allocation3 + $0x1b8] ss:$36 sps:$4 sm:$0xff]   ;;  %v6302_v27 = vshrl.u32 %v6073_v13, 16  ;;  %v6308_v62 = vshll.u32 %v6074_v9, 16  ;;  %v6075_v49 = vld [vmem:[#allocation2 + $0x6c] sm:$0xf]  ;;  %v6277_v34 = vsel %vm13709_vm5, %v6272_v61, %v6276_v24 }
 0x31c   : > { %v13302_v37 = vld [vmem:[#allocation3 + $0x168] ss:$36 sps:$4 sm:$0xff]   ;;  %6801 = vst [vmem:[#allocation3 + $0x26c] sm:$0xf] %v6702_v45  ;;  %v6294_v58 = vrot.slane %v6292_v60, 5  ;;  %v6300_v23 = vrot.slane %v6298_v8, 5  ;;  %10201 = vmatmul.mubr.bf16.gmra.mxu0 %v13305_v50  ;;  %v6287_v1 = vsel %vm13709_vm5, %v6282_v36, %v6286_v4 }
 0x31d   : > { %v11470_v11 = vrot.slane %v6571_v7, 9  ;;  %6526 = vst [vmem:[#allocation3 + $0x1fc] sm:$0xf] %v6277_v34  ;;  %v6304_v44 = vrot.slane %v6302_v27, 4  ;;  %v6705_v21 = vrot.slane %v6572_v12, 5  ;;  %10032 = vmatmul.mubr.bf16.gmra.mxu1 %v13302_v37  ;;  %v6310_v15 = vrot.slane %v6308_v62, 5 }
 0x31e   : > { %v6076_v32 = vld [vmem:[#allocation2 + $0x70] sm:$0xf]  ;;  %6527 = vst [vmem:[#allocation3 + $0x220] sm:$0xf] %v6287_v1  ;;  %v6295_v48 = vor.u32 %v6294_v58, %v6291_v19  ;;  %v6077_v31 = vld [vmem:[#allocation2 + $0x74] sm:$0x1] }
 0x31f   : > { %v13310_v30 = vld [vmem:[#allocation3 + $0x1b4] ss:$36 sps:$4 sm:$0xff]   ;;  %v13314_v5 = vld [vmem:[#allocation3 + $0x204] ss:$36 sps:$4 sm:$0xff]   ;;  %v6305_v43 = vor.u32 %v6304_v44, %v6300_v23  ;;  %v6706_v47 = vsel %vm13717_vm7, %v11470_v11, %v6705_v21  ;;  %v6707_v54 = vrot.slane %v6705_v21, 4  ;;  %v6708_v0 = vrot.slane %v6573_v10, 5 }
 0x320   : > { %v6574_v51 = vld [vmem:[#allocation2 + $0x78] sm:$0xe]  ;;  %v6575_v57 = vld [vmem:[#allocation2 + $0x7c] sm:$0xf]  ;;  %10039 = vmatprep.mubr.bf16.mxu1 %v13310_v30  ;;  %v6296_v29 = vrot.slane %v6295_v48, 4  ;;  %v6313_v35 = vshrl.u32 %v6075_v49, 16  ;;  %10208 = vmatprep.mubr.bf16.mxu0 %v13314_v5 }
 0x321   : > { %6802 = vst [vmem:[#allocation3 + $0x290] sm:$0xf] %v6706_v47  ;;  %v6316_v20 = vshll.u32 %v6075_v49, 16  ;;  %v6322_v33 = vshll.u32 %v6076_v32, 16  ;;  %v6576_v16 = vld [vmem:[#allocation2 + $0x80] sm:$0x1]  ;;  %v6709_v6 = vsel %vm13717_vm7, %v6707_v54, %v6708_v0 }
 0x322   : > { %v6306_v25 = vrot.slane %v6305_v43, 4  ;;  %v6326_v41 = vshrl.u32 %v6076_v32, 16  ;;  %v6332_v56 = vshll.u32 %v6077_v31, 16  ;;  %v6078_v13 = vld [vmem:[#allocation2 + $0x78] sm:$0xf]  ;;  %v6301_v63 = vsel %vm13709_vm5, %v6296_v29, %v6300_v23 }
 0x323   : > { %v13308_v22 = vld [vmem:[#allocation3 + $0x1b0] ss:$36 sps:$4 sm:$0xff]   ;;  %6803 = vst [vmem:[#allocation3 + $0x2b4] sm:$0xf] %v6709_v6  ;;  %v6315_v59 = vrot.slane %v6313_v35, 4  ;;  %v6318_v42 = vrot.slane %v6316_v20, 5 }
 0x324   : > { %v6324_v46 = vrot.slane %v6322_v33, 5  ;;  %v6079_v9 = vld [vmem:[#allocation2 + $0x7c] sm:$0xf]  ;;  %v6838_v53 = vld [vmem:[#allocation2 + $0x90] sm:$0xf]  ;;  %v6311_v38 = vsel %vm13709_vm5, %v6306_v25, %v6310_v15  ;;  %v6328_v7 = vrot.slane %v6326_v41, 4 }
 0x325   : > { %v13312_v24 = vld [vmem:[#allocation3 + $0x200] ss:$36 sps:$4 sm:$0xff]   ;;  %v13321_v39 = vld [vmem:[#allocation3 + $0x24c] ss:$36 sps:$4 sm:$0xff]   ;;  %6528 = vst [vmem:[#allocation3 + $0x244] sm:$0xf] %v6301_v63  ;;  %v6319_v4 = vor.u32 %v6318_v42, %v6315_v59  ;;  %10040 = vmatmul.mubr.bf16.gmra.mxu1 %v13308_v22 }
 0x326   : > { %v6080_v26 = vld [vmem:[#allocation2 + $0x80] sm:$0x1]  ;;  %6870 = vst [vmem:[#allocation3 + $0x324] sm:$0xf] %v6838_v53  ;;  %6529 = vst [vmem:[#allocation3 + $0x268] sm:$0xf] %v6311_v38  ;;  %10209 = vmatmul.mubr.bf16.gmra.mxu0 %v13312_v24  ;;  %v6329_v18 = vor.u32 %v6328_v7, %v6324_v46 }
 0x327   : > { %v11471_v17 = vrot.slane %v6574_v51, 9  ;;  %v6712_v12 = vrot.slane %v6575_v57, 5  ;;  %v6839_v55 = vld [vmem:[#allocation2 + $0x94] sm:$0xf]  ;;  %v6334_v14 = vrot.slane %v6332_v56, 5  ;;  %v6715_v2 = vrot.slane %v6576_v16, 5  ;;  %10216 = vmatprep.mubr.bf16.mxu0 %v13321_v39 }
 0x328   : > { %v13318_v3 = vld [vmem:[#allocation3 + $0x1fc] ss:$36 sps:$4 sm:$0xff]   ;;  %v6577_v40 = vld [vmem:[#allocation2 + $0x84] sm:$0xe]  ;;  %6871 = vst [vmem:[#allocation3 + $0x348] sm:$0xf] %v6839_v55 }
 0x329   : > { %v6320_v61 = vrot.slane %v6319_v4, 4  ;;  %v6713_v19 = vsel %vm13717_vm7, %v11471_v17, %v6712_v12  ;;  %v6714_v60 = vrot.slane %v6712_v12, 4  ;;  %v6337_v8 = vshrl.u32 %v6078_v13, 16  ;;  %v6578_v10 = vld [vmem:[#allocation2 + $0x88] sm:$0xf]  ;;  %10047 = vmatprep.mubr.bf16.mxu1 %v13318_v3 }
 0x32a   : > { %v6006_v50 = vld [vmem:[#allocation2 + $0x84] sm:$0xf]  ;;  %v6330_v36 = vrot.slane %v6329_v18, 4  ;;  %6804 = vst [vmem:[#allocation3 + $0x2d8] sm:$0xf] %v6713_v19  ;;  %v6340_v45 = vshll.u32 %v6078_v13, 16 }
 0x32b   : > { %v6346_v27 = vshll.u32 %v6079_v9, 16  ;;  %v6350_v62 = vshrl.u32 %v6079_v9, 16  ;;  %6038 = vst [vmem:[#allocation3 + $0x318] sm:$0xf] %v6006_v50  ;;  %v6325_v49 = vsel %vm13709_vm5, %v6320_v61, %v6324_v46  ;;  %v6716_v37 = vsel %vm13717_vm7, %v6714_v60, %v6715_v2  ;;  %v6579_v23 = vld [vmem:[#allocation2 + $0x8c] sm:$0x1] }
 0x32c   : > { %v6339_v34 = vrot.slane %v6337_v8, 4  ;;  %v6356_v58 = vshll.u32 %v6080_v26, 16  ;;  %v6007_v11 = vld [vmem:[#allocation2 + $0x88] sm:$0xf]  ;;  %v13319_v1 = vld [vmem:[#allocation3 + $0x248] ss:$36 sps:$4 sm:$0xff]   ;;  %v6335_v44 = vsel %vm13709_vm5, %v6330_v36, %v6334_v14 }
 0x32d   : > { %6530 = vst [vmem:[#allocation3 + $0x28c] sm:$0xf] %v6325_v49  ;;  %6805 = vst [vmem:[#allocation3 + $0x2fc] sm:$0xf] %v6716_v37  ;;  %v6342_v21 = vrot.slane %v6340_v45, 5  ;;  %v6348_v48 = vrot.slane %v6346_v27, 5 }
 0x32e   : > { %6039 = vst [vmem:[#allocation3 + $0x33c] sm:$0xf] %v6007_v11  ;;  %v6081_v32 = vld [vmem:[#allocation2 + $0x84] sm:$0xf]  ;;  %v13316_v30 = vld [vmem:[#allocation3 + $0x1f8] ss:$36 sps:$4 sm:$0xff]   ;;  %10217 = vmatmul.mubr.bf16.gmra.mxu0 %v13319_v1 }
 0x32f   : > { %6531 = vst [vmem:[#allocation3 + $0x2b0] sm:$0xf] %v6335_v44  ;;  %v6352_v15 = vrot.slane %v6350_v62, 4  ;;  %v11472_v31 = vrot.slane %v6577_v40, 9  ;;  %v13330_v5 = vld [vmem:[#allocation3 + $0x294] ss:$36 sps:$4 sm:$0xff]   ;;  %v6343_v43 = vor.u32 %v6342_v21, %v6339_v34  ;;  %10048 = vmatmul.mubr.bf16.gmra.mxu1 %v13316_v30 }
 0x330   : > { %v6358_v47 = vrot.slane %v6356_v58, 5  ;;  %v6719_v54 = vrot.slane %v6578_v10, 5  ;;  %v6722_v51 = vrot.slane %v6579_v23, 5  ;;  %v6082_v57 = vld [vmem:[#allocation2 + $0x88] sm:$0xf]  ;;  %v6361_v35 = vshrl.u32 %v6081_v32, 16  ;;  %10224 = vmatprep.mubr.bf16.mxu0 %v13330_v5 }
 0x331   : > { %v6353_v0 = vor.u32 %v6352_v15, %v6348_v48  ;;  %v6083_v29 = vld [vmem:[#allocation2 + $0x8c] sm:$0x1]  ;;  %v13324_v20 = vld [vmem:[#allocation3 + $0x244] ss:$36 sps:$4 sm:$0xff]   ;;  %v6344_v33 = vrot.slane %v6343_v43, 4  ;;  %v6364_v6 = vshll.u32 %v6081_v32, 16 }
 0x332   : > { %v6720_v16 = vsel %vm13717_vm7, %v11472_v31, %v6719_v54  ;;  %v6721_v25 = vrot.slane %v6719_v54, 4  ;;  %v6363_v56 = vrot.slane %v6361_v35, 4  ;;  %v6370_v13 = vshll.u32 %v6082_v57, 16  ;;  %10055 = vmatprep.mubr.bf16.mxu1 %v13324_v20  ;;  %v6580_v9 = vld [vmem:[#allocation2 + $0x90] sm:$0xe] }
 0x333   : > { %v6354_v41 = vrot.slane %v6353_v0, 4  ;;  %6806 = vst [vmem:[#allocation3 + $0x320] sm:$0xf] %v6720_v16  ;;  %v6374_v22 = vshrl.u32 %v6082_v57, 16  ;;  %v6349_v63 = vsel %vm13709_vm5, %v6344_v33, %v6348_v48  ;;  %v6366_v42 = vrot.slane %v6364_v6, 5 }
 0x334   : > { %v6723_v59 = vsel %vm13717_vm7, %v6721_v25, %v6722_v51  ;;  %v6380_v46 = vshll.u32 %v6083_v29, 16  ;;  %v6581_v53 = vld [vmem:[#allocation2 + $0x94] sm:$0xf]  ;;  %6532 = vst [vmem:[#allocation3 + $0x2d4] sm:$0xf] %v6349_v63  ;;  %v6372_v39 = vrot.slane %v6370_v13, 5 }
 0x335   : > { %v6359_v24 = vsel %vm13709_vm5, %v6354_v41, %v6358_v47  ;;  %6807 = vst [vmem:[#allocation3 + $0x344] sm:$0xf] %v6723_v59  ;;  %v6376_v38 = vrot.slane %v6374_v22, 4  ;;  %v6582_v7 = vld [vmem:[#allocation2 + $0x98] sm:$0x1]  ;;  %v6367_v4 = vor.u32 %v6366_v42, %v6363_v56  ;;  %v11473_v18 = vrot.slane %v6580_v9, 9 }
 0x336   : > { %v13328_v26 = vld [vmem:[#allocation3 + $0x290] ss:$36 sps:$4 sm:$0xff]   ;;  %6533 = vst [vmem:[#allocation3 + $0x2f8] sm:$0xf] %v6359_v24  ;;  %v13322_v17 = vld [vmem:[#allocation3 + $0x240] ss:$36 sps:$4 sm:$0xff]  }
 0x337   : > { %v13337_v12 = vld [vmem:[#allocation3 + $0x2dc] ss:$36 sps:$4 sm:$0xff]   ;;  %v6377_v55 = vor.u32 %v6376_v38, %v6372_v39  ;;  %v6382_v3 = vrot.slane %v6380_v46, 5  ;;  %v6726_v14 = vrot.slane %v6581_v53, 5  ;;  %v13334_v2 = vld [vmem:[#allocation3 + $0x28c] ss:$36 sps:$4 sm:$0xff]   ;;  %10225 = vmatmul.mubr.bf16.gmra.mxu0 %v13328_v26  ;;  %10056 = vmatmul.mubr.bf16.gmra.mxu1 %v13322_v17 }
 0x338   : > { %v6368_v40 = vrot.slane %v6367_v4, 4  ;;  %v6729_v61 = vrot.slane %v6582_v7, 5  ;;  %v6840_v19 = vld [vmem:[#allocation2 + $0x9c] sm:$0xf]  ;;  %v6841_v60 = vld [vmem:[#allocation2 + $0xa0] sm:$0xf]  ;;  %10232 = vmatprep.mubr.bf16.mxu0 %v13337_v12  ;;  %10063 = vmatprep.mubr.bf16.mxu1 %v13334_v2 }
 0x339   : > { %v6378_v8 = vrot.slane %v6377_v55, 4  ;;  %v6727_v10 = vsel %vm13717_vm7, %v11473_v18, %v6726_v14  ;;  %v6728_v50 = vrot.slane %v6726_v14, 4  ;;  %6872 = vst [vmem:[#allocation3 + $0x36c] sm:$0xf] %v6840_v19  ;;  %6873 = vst [vmem:[#allocation3 + $0x390] sm:$0xf] %v6841_v60 }
 0x33a   : > { %v6008_v36 = vld [vmem:[#allocation2 + $0x90] sm:$0xf]  ;;  %v6009_v45 = vld [vmem:[#allocation2 + $0x94] sm:$0xf]  ;;  %v6373_v27 = vsel %vm13709_vm5, %v6368_v40, %v6372_v39  ;;  %6808 = vst [vmem:[#allocation3 + $0x368] sm:$0xf] %v6727_v10 }
 0x33b   : > { %6040 = vst [vmem:[#allocation3 + $0x360] sm:$0xf] %v6008_v36  ;;  %6041 = vst [vmem:[#allocation3 + $0x384] sm:$0xf] %v6009_v45  ;;  %v6084_v62 = vld [vmem:[#allocation2 + $0x90] sm:$0xf]  ;;  %v6383_v37 = vsel %vm13709_vm5, %v6378_v8, %v6382_v3  ;;  %v6730_v34 = vsel %vm13717_vm7, %v6728_v50, %v6729_v61 }
 0x33c   : > { %v6085_v49 = vld [vmem:[#allocation2 + $0x94] sm:$0xf]  ;;  %6534 = vst [vmem:[#allocation3 + $0x31c] sm:$0xf] %v6373_v27  ;;  %v6086_v58 = vld [vmem:[#allocation2 + $0x98] sm:$0x1] }
 0x33d   : > { %v6385_v23 = vshrl.u32 %v6084_v62, 16  ;;  %v6388_v11 = vshll.u32 %v6084_v62, 16  ;;  %6535 = vst [vmem:[#allocation3 + $0x340] sm:$0xf] %v6383_v37  ;;  %6809 = vst [vmem:[#allocation3 + $0x38c] sm:$0xf] %v6730_v34 }
 0x33e   : > { %v6394_v1 = vshll.u32 %v6085_v49, 16  ;;  %v6398_v44 = vshrl.u32 %v6085_v49, 16  ;;  %v6583_v21 = vld [vmem:[#allocation2 + $0x9c] sm:$0xe]  ;;  %v13335_v30 = vld [vmem:[#allocation3 + $0x2d8] ss:$36 sps:$4 sm:$0xff]  }
 0x33f   : > { %v6387_v32 = vrot.slane %v6385_v23, 4  ;;  %v6390_v48 = vrot.slane %v6388_v11, 5  ;;  %v6404_v5 = vshll.u32 %v6086_v58, 16  ;;  %v13332_v43 = vld [vmem:[#allocation3 + $0x288] ss:$36 sps:$4 sm:$0xff]   ;;  %v11474_v51 = vrot.slane %v6583_v21, 9  ;;  %10233 = vmatmul.mubr.bf16.gmra.mxu0 %v13335_v30  ;;  %v12377_v30 = vpop.f32.mrf.mxu1 }
 0x340   : > { %v6396_v15 = vrot.slane %v6394_v1, 5  ;;  %v6400_v31 = vrot.slane %v6398_v44, 4  ;;  %v13346_v47 = vld [vmem:[#allocation3 + $0x324] ss:$36 sps:$4 sm:$0xff]   ;;  %v6585_v0 = vld [vmem:[#allocation2 + $0xa4] sm:$0x1]  ;;  %10064 = vmatmul.mubr.bf16.gmra.mxu1 %v13332_v43 }
 0x341   : > { %v6584_v54 = vld [vmem:[#allocation2 + $0xa0] sm:$0xf]  ;;  %v13340_v57 = vld [vmem:[#allocation3 + $0x2d4] ss:$36 sps:$4 sm:$0xff]   ;;  %v6391_v29 = vor.u32 %v6390_v48, %v6387_v32  ;;  %v6406_v20 = vrot.slane %v6404_v5, 5  ;;  %v6736_v6 = vrot.slane %v6585_v0, 5  ;;  %10240 = vmatprep.mubr.bf16.mxu0 %v13346_v47 }
 0x342   : > { %v6401_v35 = vor.u32 %v6400_v31, %v6396_v15  ;;  %v6733_v33 = vrot.slane %v6584_v54, 5  ;;  %v6842_v16 = vld [vmem:[#allocation2 + $0xa8] sm:$0xf]  ;;  %v6843_v25 = vld [vmem:[#allocation2 + $0xac] sm:$0xf]  ;;  %10071 = vmatprep.mubr.bf16.mxu1 %v13340_v57 }
 0x343   : > { %6874 = vst [vmem:[#allocation3 + $0x3b4] sm:$0xf] %v6842_v16  ;;  %6875 = vst [vmem:[#allocation3 + $0x3d8] sm:$0xf] %v6843_v25  ;;  %v6010_v41 = vld [vmem:[#allocation2 + $0x9c] sm:$0xf] }
 0x344   : > { %v6011_v56 = vld [vmem:[#allocation2 + $0xa0] sm:$0xf]  ;;  %v6392_v13 = vrot.slane %v6391_v29, 4  ;;  %v6402_v22 = vrot.slane %v6401_v35, 4  ;;  %v6734_v63 = vsel %vm13717_vm7, %v11474_v51, %v6733_v33  ;;  %v6735_v59 = vrot.slane %v6733_v33, 4  ;;  %v12378_v35 = vpop.f32.mrf.mxu1 }
 0x345   : > { %6042 = vst [vmem:[#allocation3 + $0x3a8] sm:$0xf] %v6010_v41  ;;  %6043 = vst [vmem:[#allocation3 + $0x3cc] sm:$0xf] %v6011_v56  ;;  %v6087_v42 = vld [vmem:[#allocation2 + $0x9c] sm:$0xf] }
 0x346   : > { %6810 = vst [vmem:[#allocation3 + $0x3b0] sm:$0xf] %v6734_v63  ;;  %v6409_v46 = vshrl.u32 %v6087_v42, 16  ;;  %v6397_v9 = vsel %vm13709_vm5, %v6392_v13, %v6396_v15  ;;  %v6407_v53 = vsel %vm13709_vm5, %v6402_v22, %v6406_v20  ;;  %v6737_v24 = vsel %vm13717_vm7, %v6735_v59, %v6736_v6  ;;  %v6088_v38 = vld [vmem:[#allocation2 + $0xa0] sm:$0xf] }
 0x347   : > { %v6412_v39 = vshll.u32 %v6087_v42, 16  ;;  %6536 = vst [vmem:[#allocation3 + $0x364] sm:$0xf] %v6397_v9  ;;  %6537 = vst [vmem:[#allocation3 + $0x388] sm:$0xf] %v6407_v53  ;;  %v6418_v12 = vshll.u32 %v6088_v38, 16  ;;  %v15715_v6 = vadd.f32 %v12378_v35, %v12377_v30 }
 0x348   : > { %6811 = vst [vmem:[#allocation3 + $0x3d4] sm:$0xf] %v6737_v24  ;;  %v6089_v7 = vld [vmem:[#allocation2 + $0xa4] sm:$0x1]  ;;  %v6411_v26 = vrot.slane %v6409_v46, 4  ;;  %v6422_v55 = vshrl.u32 %v6088_v38, 16 }
 0x349   : > { %v13344_v4 = vld [vmem:[#allocation3 + $0x320] ss:$36 sps:$4 sm:$0xff]   ;;  %v6414_v17 = vrot.slane %v6412_v39, 5  ;;  %v6428_v3 = vshll.u32 %v6089_v7, 16  ;;  %v6586_v18 = vld [vmem:[#allocation2 + $0xa8] sm:$0xe] }
 0x34a   : > { %v13338_v14 = vld [vmem:[#allocation3 + $0x2d0] ss:$36 sps:$4 sm:$0xff]   ;;  %v11475_v61 = vrot.slane %v6586_v18, 9  ;;  %v13350_v19 = vld [vmem:[#allocation3 + $0x31c] ss:$36 sps:$4 sm:$0xff]   ;;  %v6420_v8 = vrot.slane %v6418_v12, 5  ;;  %10241 = vmatmul.mubr.bf16.gmra.mxu0 %v13344_v4 }
 0x34b   : > { %v13353_v2 = vld [vmem:[#allocation3 + $0x36c] ss:$36 sps:$4 sm:$0xff]   ;;  %v6587_v40 = vld [vmem:[#allocation2 + $0xac] sm:$0xf]  ;;  %v6415_v60 = vor.u32 %v6414_v17, %v6411_v26  ;;  %v6424_v10 = vrot.slane %v6422_v55, 4  ;;  %v6430_v45 = vrot.slane %v6428_v3, 5  ;;  %10072 = vmatmul.mubr.bf16.gmra.mxu1 %v13338_v14 }
 0x34c   : > { %v6588_v50 = vld [vmem:[#allocation2 + $0xb0] sm:$0x1]  ;;  %v6844_v36 = vld [vmem:[#allocation2 + $0xb4] sm:$0xf]  ;;  %v6740_v27 = vrot.slane %v6587_v40, 5  ;;  %10248 = vmatprep.mubr.bf16.mxu0 %v13353_v2  ;;  %10079 = vmatprep.mubr.bf16.mxu1 %v13350_v19 }
 0x34d   : > { %v6845_v62 = vld [vmem:[#allocation2 + $0xb8] sm:$0xf]  ;;  %6876 = vst [vmem:[#allocation3 + $0x3fc] sm:$0xf] %v6844_v36  ;;  %v6012_v49 = vld [vmem:[#allocation2 + $0xa8] sm:$0xf]  ;;  %v6425_v34 = vor.u32 %v6424_v10, %v6420_v8 }
 0x34e   : > { %v6416_v37 = vrot.slane %v6415_v60, 4  ;;  %6877 = vst [vmem:[#allocation3 + $0x420] sm:$0xf] %v6845_v62  ;;  %v6013_v58 = vld [vmem:[#allocation2 + $0xac] sm:$0xf]  ;;  %v6741_v11 = vsel %vm13717_vm7, %v11475_v61, %v6740_v27  ;;  %v6742_v1 = vrot.slane %v6740_v27, 4 }
 0x34f   : > { %6044 = vst [vmem:[#allocation3 + $0x3f0] sm:$0xf] %v6012_v49  ;;  %v6090_v23 = vld [vmem:[#allocation2 + $0xa8] sm:$0xf]  ;;  %v6743_v44 = vrot.slane %v6588_v50, 5  ;;  %v6426_v15 = vrot.slane %v6425_v34, 4 }
 0x350   : > { %6045 = vst [vmem:[#allocation3 + $0x414] sm:$0xf] %v6013_v58  ;;  %v6091_v21 = vld [vmem:[#allocation2 + $0xac] sm:$0xf]  ;;  %v6433_v32 = vshrl.u32 %v6090_v23, 16  ;;  %v6421_v48 = vsel %vm13709_vm5, %v6416_v37, %v6420_v8  ;;  %v6436_v5 = vshll.u32 %v6090_v23, 16 }
 0x351   : > { %6812 = vst [vmem:[#allocation3 + $0x3f8] sm:$0xf] %v6741_v11  ;;  %v6092_v31 = vld [vmem:[#allocation2 + $0xb0] sm:$0x1]  ;;  %6538 = vst [vmem:[#allocation3 + $0x3ac] sm:$0xf] %v6421_v48  ;;  %v6744_v43 = vsel %vm13717_vm7, %v6742_v1, %v6743_v44  ;;  %v6431_v0 = vsel %vm13709_vm5, %v6426_v15, %v6430_v45 }
 0x352   : > { %v6435_v47 = vrot.slane %v6433_v32, 4  ;;  %v13351_v54 = vld [vmem:[#allocation3 + $0x368] ss:$36 sps:$4 sm:$0xff]   ;;  %6813 = vst [vmem:[#allocation3 + $0x41c] sm:$0xf] %v6744_v43  ;;  %v6438_v51 = vrot.slane %v6436_v5, 5 }
 0x353   : > { %v6442_v57 = vshll.u32 %v6091_v21, 16  ;;  %v6446_v29 = vshrl.u32 %v6091_v21, 16  ;;  %v13348_v20 = vld [vmem:[#allocation3 + $0x318] ss:$36 sps:$4 sm:$0xff]   ;;  %6539 = vst [vmem:[#allocation3 + $0x3d0] sm:$0xf] %v6431_v0  ;;  %10249 = vmatmul.mubr.bf16.gmra.mxu0 %v13351_v54 }
 0x354   : > { %v6452_v33 = vshll.u32 %v6092_v31, 16  ;;  %v6589_v16 = vld [vmem:[#allocation2 + $0xb4] sm:$0xe]  ;;  %v6590_v25 = vld [vmem:[#allocation2 + $0xb8] sm:$0xf]  ;;  %v6439_v56 = vor.u32 %v6438_v51, %v6435_v47  ;;  %10080 = vmatmul.mubr.bf16.gmra.mxu1 %v13348_v20 }
 0x355   : > { %v13356_v41 = vld [vmem:[#allocation3 + $0x364] ss:$36 sps:$4 sm:$0xff]   ;;  %v6444_v13 = vrot.slane %v6442_v57, 5  ;;  %v6448_v22 = vrot.slane %v6446_v29, 4  ;;  %v11476_v59 = vrot.slane %v6589_v16, 9  ;;  %v6747_v46 = vrot.slane %v6590_v25, 5 }
 0x356   : > { %v6591_v63 = vld [vmem:[#allocation2 + $0xbc] sm:$0x1]  ;;  %v13362_v42 = vld [vmem:[#allocation3 + $0x3b4] ss:$36 sps:$4 sm:$0xff]   ;;  %v6846_v9 = vld [vmem:[#allocation2 + $0xc0] sm:$0xf]  ;;  %10087 = vmatprep.mubr.bf16.mxu1 %v13356_v41 }
 0x357   : > { %v6440_v53 = vrot.slane %v6439_v56, 4  ;;  %v6449_v24 = vor.u32 %v6448_v22, %v6444_v13  ;;  %v6750_v39 = vrot.slane %v6591_v63, 5  ;;  %v6847_v38 = vld [vmem:[#allocation2 + $0xc4] sm:$0xf]  ;;  %6878 = vst [vmem:[#allocation3 + $0x444] sm:$0xf] %v6846_v9  ;;  %10256 = vmatprep.mubr.bf16.mxu0 %v13362_v42  ;;  %v6748_v26 = vsel %vm13717_vm7, %v11476_v59, %v6747_v46 }
 0x358   : > { %v6014_v7 = vld [vmem:[#allocation2 + $0xb4] sm:$0xf]  ;;  %v6749_v4 = vrot.slane %v6747_v46, 4  ;;  %6879 = vst [vmem:[#allocation3 + $0x468] sm:$0xf] %v6847_v38  ;;  %v6454_v18 = vrot.slane %v6452_v33, 5 }
 0x359   : > { %v6015_v17 = vld [vmem:[#allocation2 + $0xb8] sm:$0xf]  ;;  %6046 = vst [vmem:[#allocation3 + $0x438] sm:$0xf] %v6014_v7  ;;  %v6093_v12 = vld [vmem:[#allocation2 + $0xb4] sm:$0xf]  ;;  %v6445_v55 = vsel %vm13709_vm5, %v6440_v53, %v6444_v13 }
 0x35a   : > { %v6450_v3 = vrot.slane %v6449_v24, 4  ;;  %6814 = vst [vmem:[#allocation3 + $0x440] sm:$0xf] %v6748_v26  ;;  %6047 = vst [vmem:[#allocation3 + $0x45c] sm:$0xf] %v6015_v17  ;;  %v6751_v2 = vsel %vm13717_vm7, %v6749_v4, %v6750_v39  ;;  %v6457_v40 = vshrl.u32 %v6093_v12, 16 }
 0x35b   : > { %v6094_v14 = vld [vmem:[#allocation2 + $0xb8] sm:$0xf]  ;;  %6540 = vst [vmem:[#allocation3 + $0x3f4] sm:$0xf] %v6445_v55  ;;  %v13360_v61 = vld [vmem:[#allocation3 + $0x3b0] ss:$36 sps:$4 sm:$0xff]  }
 0x35c   : > { %v6455_v19 = vsel %vm13709_vm5, %v6450_v3, %v6454_v18  ;;  %6815 = vst [vmem:[#allocation3 + $0x464] sm:$0xf] %v6751_v2  ;;  %v6095_v60 = vld [vmem:[#allocation2 + $0xbc] sm:$0x1]  ;;  %v6460_v8 = vshll.u32 %v6093_v12, 16  ;;  %v6459_v36 = vrot.slane %v6457_v40, 4  ;;  %10257 = vmatmul.mubr.bf16.gmra.mxu0 %v13360_v61 }
 0x35d   : > { %v13354_v10 = vld [vmem:[#allocation3 + $0x360] ss:$36 sps:$4 sm:$0xff]   ;;  %6541 = vst [vmem:[#allocation3 + $0x418] sm:$0xf] %v6455_v19  ;;  %v6466_v45 = vshll.u32 %v6094_v14, 16  ;;  %v6470_v27 = vshrl.u32 %v6094_v14, 16 }
 0x35e   : > { %v13369_v50 = vld [vmem:[#allocation3 + $0x3fc] ss:$36 sps:$4 sm:$0xff]   ;;  %v13366_v49 = vld [vmem:[#allocation3 + $0x3ac] ss:$36 sps:$4 sm:$0xff]   ;;  %v6462_v37 = vrot.slane %v6460_v8, 5  ;;  %v6476_v1 = vshll.u32 %v6095_v60, 16  ;;  %10088 = vmatmul.mubr.bf16.gmra.mxu1 %v13354_v10 }
 0x35f   : > { %v7648_v62 = vld [vmem:[#allocation2 + $0x18] sm:$0xf]  ;;  %v7649_v34 = vld [vmem:[#allocation2 + $0x1c] sm:$0xf]  ;;  %v6468_v23 = vrot.slane %v6466_v45, 5  ;;  %v6472_v11 = vrot.slane %v6470_v27, 4  ;;  %10264 = vmatprep.mubr.bf16.mxu0 %v13369_v50  ;;  %10095 = vmatprep.mubr.bf16.mxu1 %v13366_v49 }
 0x360   : > { %7680 = vst [vmem:[#allocation3 + $0x18] sm:$0xf] %v7648_v62  ;;  %v7712_v58 = vld [vmem:[#allocation2 + $0x18] sm:$0xf]  ;;  %7681 = vst [vmem:[#allocation3 + $0x3c] sm:$0xf] %v7649_v34  ;;  %v6463_v32 = vor.u32 %v6462_v37, %v6459_v36 }
 0x361   : > { %v7713_v44 = vld [vmem:[#allocation2 + $0x1c] sm:$0xf]  ;;  %v7761_v21 = vshrl.u32 %v7712_v58, 16  ;;  %v7714_v30 = vld [vmem:[#allocation2 + $0x20] sm:$0x1]  ;;  %v7764_v48 = vshll.u32 %v7712_v58, 16  ;;  %v6473_v5 = vor.u32 %v6472_v11, %v6468_v23 }
 0x362   : > { %v7770_v15 = vshll.u32 %v7713_v44, 16  ;;  %v7774_v31 = vshrl.u32 %v7713_v44, 16  ;;  %v7780_v47 = vshll.u32 %v7714_v30, 16  ;;  %v6880_v54 = vld [vmem:[#allocation2 + $0xc] sm:$0xf]  ;;  %v6464_v0 = vrot.slane %v6463_v32, 4 }
 0x363   : > { %v7763_v43 = vrot.slane %v7761_v21, 4  ;;  %v7766_v51 = vrot.slane %v7764_v48, 5  ;;  %v6474_v35 = vrot.slane %v6473_v5, 4  ;;  %v6478_v20 = vrot.slane %v6476_v1, 5  ;;  %v13367_v33 = vld [vmem:[#allocation3 + $0x3f8] ss:$36 sps:$4 sm:$0xff]  }
 0x364   : > { %v7772_v57 = vrot.slane %v7770_v15, 5  ;;  %v7776_v29 = vrot.slane %v7774_v31, 4  ;;  %v6469_v16 = vsel %vm13709_vm5, %v6464_v0, %v6468_v23  ;;  %v7782_v56 = vrot.slane %v7780_v47, 5  ;;  %v13364_v13 = vld [vmem:[#allocation3 + $0x3a8] ss:$36 sps:$4 sm:$0xff]   ;;  %10265 = vmatmul.mubr.bf16.gmra.mxu0 %v13367_v33 }
 0x365   : > { %v7767_v25 = vor.u32 %v7766_v51, %v7763_v43  ;;  %v13379_v22 = vld [vmem:[#allocation3 + $0x444] ss:$36 sps:$4 sm:$0xff]   ;;  %v6479_v63 = vsel %vm13709_vm5, %v6474_v35, %v6478_v20  ;;  %6542 = vst [vmem:[#allocation3 + $0x43c] sm:$0xf] %v6469_v16  ;;  %v6881_v59 = vld [vmem:[#allocation2 + $0x10] sm:$0xf] }
 0x366   : > { %v7777_v41 = vor.u32 %v7776_v29, %v7772_v57  ;;  %v6882_v42 = vld [vmem:[#allocation2 + $0x14] sm:$0x1]  ;;  %v6929_v46 = vshrl.u32 %v6880_v54, 16  ;;  %v6932_v9 = vshll.u32 %v6880_v54, 16  ;;  %v13372_v53 = vld [vmem:[#allocation3 + $0x3f4] ss:$36 sps:$4 sm:$0xff]   ;;  %10096 = vmatmul.mubr.bf16.gmra.mxu1 %v13364_v13  ;;  %10272 = vmatprep.mubr.bf16.mxu0 %v13379_v22 }
 0x367   : > { %6543 = vst [vmem:[#allocation3 + $0x460] sm:$0xf] %v6479_v63  ;;  %v7768_v24 = vrot.slane %v7767_v25, 4  ;;  %v6938_v38 = vshll.u32 %v6881_v59, 16  ;;  %v6942_v7 = vshrl.u32 %v6881_v59, 16  ;;  %v6948_v12 = vshll.u32 %v6882_v42, 16  ;;  %10103 = vmatprep.mubr.bf16.mxu1 %v13372_v53 }
 0x368   : > { %v7778_v39 = vrot.slane %v7777_v41, 4  ;;  %v7376_v26 = vld [vmem:[#allocation2 + $0xc] sm:$0xe]  ;;  %v6931_v4 = vrot.slane %v6929_v46, 4  ;;  %v6934_v17 = vrot.slane %v6932_v9, 5 }
 0x369   : > { %v7377_v55 = vld [vmem:[#allocation2 + $0x10] sm:$0xf]  ;;  %v11477_v3 = vrot.slane %v7376_v26, 9  ;;  %v7773_v18 = vsel %vm13709_vm5, %v7768_v24, %v7772_v57  ;;  %v6940_v2 = vrot.slane %v6938_v38, 5  ;;  %v6944_v40 = vrot.slane %v6942_v7, 4 }
 0x36a   : > { %v7783_v14 = vsel %vm13709_vm5, %v7778_v39, %v7782_v56  ;;  %v7378_v61 = vld [vmem:[#allocation2 + $0x14] sm:$0x1]  ;;  %v7650_v19 = vld [vmem:[#allocation2 + $0x24] sm:$0xf]  ;;  %8176 = vst [vmem:[#allocation3 + $0x1c] sm:$0xf] %v7773_v18  ;;  %v6935_v60 = vor.u32 %v6934_v17, %v6931_v4 }
 0x36b   : > { %8177 = vst [vmem:[#allocation3 + $0x40] sm:$0xf] %v7783_v14  ;;  %v6950_v8 = vrot.slane %v6948_v12, 5  ;;  %v7474_v10 = vrot.slane %v7377_v55, 5  ;;  %v7477_v50 = vrot.slane %v7378_v61, 5  ;;  %v6945_v45 = vor.u32 %v6944_v40, %v6940_v2 }
 0x36c   : > { %v7651_v36 = vld [vmem:[#allocation2 + $0x28] sm:$0xf]  ;;  %7682 = vst [vmem:[#allocation3 + $0x60] sm:$0xf] %v7650_v19  ;;  %v7715_v27 = vld [vmem:[#allocation2 + $0x24] sm:$0xf] }
 0x36d   : > { %7683 = vst [vmem:[#allocation3 + $0x84] sm:$0xf] %v7651_v36  ;;  %v7716_v62 = vld [vmem:[#allocation2 + $0x28] sm:$0xf]  ;;  %v7717_v49 = vld [vmem:[#allocation2 + $0x2c] sm:$0x1]  ;;  %v7475_v34 = vsel %vm13717_vm7, %v11477_v3, %v7474_v10 }
 0x36e   : > { %v6936_v37 = vrot.slane %v6935_v60, 4  ;;  %v7476_v58 = vrot.slane %v7474_v10, 4  ;;  %v7785_v23 = vshrl.u32 %v7715_v27, 16  ;;  %v6883_v11 = vld [vmem:[#allocation2 + $0x18] sm:$0xf]  ;;  %v6946_v1 = vrot.slane %v6945_v45, 4 }
 0x36f   : > { %7616 = vst [vmem:[#allocation3 + $0x14] sm:$0xf] %v7475_v34  ;;  %v7788_v44 = vshll.u32 %v7715_v27, 16  ;;  %v7794_v21 = vshll.u32 %v7716_v62, 16  ;;  %v7798_v32 = vshrl.u32 %v7716_v62, 16  ;;  %v7804_v57 = vshll.u32 %v7717_v49, 16 }
 0x370   : > { %v13370_v30 = vld [vmem:[#allocation3 + $0x3f0] ss:$36 sps:$4 sm:$0xff]   ;;  %v13377_v48 = vld [vmem:[#allocation3 + $0x440] ss:$36 sps:$4 sm:$0xff]   ;;  %v6941_v15 = vsel %vm13709_vm5, %v6936_v37, %v6940_v2  ;;  %v7478_v31 = vsel %vm13717_vm7, %v7476_v58, %v7477_v50  ;;  %v7787_v5 = vrot.slane %v7785_v23, 4  ;;  %v6951_v43 = vsel %vm13709_vm5, %v6946_v1, %v6950_v8 }
 0x371   : > { %7344 = vst [vmem:[#allocation3 + $0x10] sm:$0xf] %v6941_v15  ;;  %7617 = vst [vmem:[#allocation3 + $0x38] sm:$0xf] %v7478_v31  ;;  %v7790_v47 = vrot.slane %v7788_v44, 5  ;;  %v7796_v54 = vrot.slane %v7794_v21, 5  ;;  %10273 = vmatmul.mubr.bf16.gmra.mxu0 %v13377_v48  ;;  %10104 = vmatmul.mubr.bf16.gmra.mxu1 %v13370_v30 }
 0x372   : > { %v7800_v0 = vrot.slane %v7798_v32, 4  ;;  %v6884_v51 = vld [vmem:[#allocation2 + $0x1c] sm:$0xf]  ;;  %7345 = vst [vmem:[#allocation3 + $0x34] sm:$0xf] %v6951_v43  ;;  %v6953_v35 = vshrl.u32 %v6883_v11, 16 }
 0x373   : > { %v6885_v29 = vld [vmem:[#allocation2 + $0x20] sm:$0x1]  ;;  %v6956_v20 = vshll.u32 %v6883_v11, 16  ;;  %v6962_v33 = vshll.u32 %v6884_v51, 16  ;;  %v13384_v16 = vld [vmem:[#allocation3 + $0x43c] ss:$36 sps:$4 sm:$0xff]   ;;  %v7791_v25 = vor.u32 %v7790_v47, %v7787_v5 }
 0x374   : > { %v7801_v41 = vor.u32 %v7800_v0, %v7796_v54  ;;  %v6966_v56 = vshrl.u32 %v6884_v51, 16  ;;  %v13391_v13 = vld [vmem:[#allocation3 + $0x1c] ss:$36 sps:$4 sm:$0xff]   ;;  %v6955_v22 = vrot.slane %v6953_v35, 4  ;;  %v6972_v42 = vshll.u32 %v6885_v29, 16  ;;  %10111 = vmatprep.mubr.bf16.mxu1 %v13384_v16 }
 0x375   : > { %v6958_v63 = vrot.slane %v6956_v20, 5  ;;  %v6964_v59 = vrot.slane %v6962_v33, 5  ;;  %v7792_v46 = vrot.slane %v7791_v25, 4  ;;  %v7806_v53 = vrot.slane %v7804_v57, 5  ;;  %v7379_v39 = vld [vmem:[#allocation2 + $0x18] sm:$0xe]  ;;  %10474 = vmatprep.mubr.bf16.mxu0 %v13391_v13 }
 0x376   : > { %v7802_v9 = vrot.slane %v7801_v41, 4  ;;  %v6968_v24 = vrot.slane %v6966_v56, 4  ;;  %v7380_v7 = vld [vmem:[#allocation2 + $0x1c] sm:$0xf]  ;;  %v7381_v26 = vld [vmem:[#allocation2 + $0x20] sm:$0x1] }
 0x377   : > { %v6959_v38 = vor.u32 %v6958_v63, %v6955_v22  ;;  %v11478_v4 = vrot.slane %v7379_v39, 9  ;;  %v7797_v17 = vsel %vm13709_vm5, %v7792_v46, %v7796_v54  ;;  %v7481_v3 = vrot.slane %v7380_v7, 5  ;;  %v7652_v18 = vld [vmem:[#allocation2 + $0x30] sm:$0xf]  ;;  %v7653_v14 = vld [vmem:[#allocation2 + $0x34] sm:$0xf] }
 0x378   : > { %v7807_v12 = vsel %vm13709_vm5, %v7802_v9, %v7806_v53  ;;  %v6969_v55 = vor.u32 %v6968_v24, %v6964_v59  ;;  %v13382_v2 = vld [vmem:[#allocation3 + $0x438] ss:$36 sps:$4 sm:$0xff]   ;;  %8178 = vst [vmem:[#allocation3 + $0x64] sm:$0xf] %v7797_v17  ;;  %7684 = vst [vmem:[#allocation3 + $0xa8] sm:$0xf] %v7652_v18 }
 0x379   : > { %v13389_v40 = vld [vmem:[#allocation3 + $0x18] ss:$36 sps:$4 sm:$0xff]   ;;  %8179 = vst [vmem:[#allocation3 + $0x88] sm:$0xf] %v7807_v12  ;;  %v6960_v61 = vrot.slane %v6959_v38, 4  ;;  %v6974_v10 = vrot.slane %v6972_v42, 5  ;;  %v7482_v50 = vsel %vm13717_vm7, %v11478_v4, %v7481_v3  ;;  %10112 = vmatmul.mubr.bf16.gmra.mxu1 %v13382_v2 }
 0x37a   : > { %7685 = vst [vmem:[#allocation3 + $0xcc] sm:$0xf] %v7653_v14  ;;  %v7718_v19 = vld [vmem:[#allocation2 + $0x30] sm:$0xf]  ;;  %v6970_v8 = vrot.slane %v6969_v55, 4  ;;  %v7484_v36 = vrot.slane %v7381_v26, 5  ;;  %10475 = vmatmul.mubr.bf16.vlgmr.msra.gmra.mxu0 %v13389_v40 }
 0x37b   : > { %v13394_v60 = vld [vmem:[#allocation3 + $0x14] ss:$36 sps:$4 sm:$0xff]   ;;  %v6965_v45 = vsel %vm13709_vm5, %v6960_v61, %v6964_v59  ;;  %v7483_v27 = vrot.slane %v7481_v3, 4  ;;  %7618 = vst [vmem:[#allocation3 + $0x5c] sm:$0xf] %v7482_v50  ;;  %v7809_v37 = vshrl.u32 %v7718_v19, 16 }
 0x37c   : > { %v7719_v62 = vld [vmem:[#allocation2 + $0x34] sm:$0xf]  ;;  %v7720_v49 = vld [vmem:[#allocation2 + $0x38] sm:$0x1]  ;;  %v6975_v34 = vsel %vm13709_vm5, %v6970_v8, %v6974_v10  ;;  %7346 = vst [vmem:[#allocation3 + $0x58] sm:$0xf] %v6965_v45  ;;  %10313 = vmatprep.mubr.bf16.mxu1 %v13394_v60 }
 0x37d   : > { %v7812_v58 = vshll.u32 %v7718_v19, 16  ;;  %v7818_v23 = vshll.u32 %v7719_v62, 16  ;;  %v7822_v11 = vshrl.u32 %v7719_v62, 16  ;;  %v6886_v1 = vld [vmem:[#allocation2 + $0x24] sm:$0xf]  ;;  %v7485_v44 = vsel %vm13717_vm7, %v7483_v27, %v7484_v36  ;;  %v13410_v59 = vld [vmem:[%s16855_s3 + $0x230] sm:$0xff]  }
 0x37e   : > { %7347 = vst [vmem:[#allocation3 + $0x7c] sm:$0xf] %v6975_v34  ;;  %v7811_v21 = vrot.slane %v7809_v37, 4  ;;  %v7828_v32 = vshll.u32 %v7720_v49, 16  ;;  %v6887_v30 = vld [vmem:[#allocation2 + $0x28] sm:$0xf] }
 0x37f   : > { %v6888_v48 = vld [vmem:[#allocation2 + $0x2c] sm:$0x1]  ;;  %7619 = vst [vmem:[#allocation3 + $0x80] sm:$0xf] %v7485_v44  ;;  %v7814_v15 = vrot.slane %v7812_v58, 5  ;;  %v7820_v31 = vrot.slane %v7818_v23, 5 }
 0x380   : > { %v7824_v5 = vrot.slane %v7822_v11, 4  ;;  %v6977_v43 = vshrl.u32 %v6886_v1, 16  ;;  %v7382_v47 = vld [vmem:[#allocation2 + $0x24] sm:$0xe]  ;;  %v6980_v54 = vshll.u32 %v6886_v1, 16  ;;  %v6986_v0 = vshll.u32 %v6887_v30, 16 }
 0x381   : > { %v6990_v51 = vshrl.u32 %v6887_v30, 16  ;;  %v7383_v57 = vld [vmem:[#allocation2 + $0x28] sm:$0xf]  ;;  %v13398_v29 = vld [vmem:[#allocation3 + $0x60] ss:$36 sps:$4 sm:$0xff]   ;;  %v7815_v35 = vor.u32 %v7814_v15, %v7811_v21  ;;  %v6996_v16 = vshll.u32 %v6888_v48, 16 }
 0x382   : > { %v7825_v20 = vor.u32 %v7824_v5, %v7820_v31  ;;  %v6979_v33 = vrot.slane %v6977_v43, 4  ;;  %v13392_v25 = vld [vmem:[#allocation3 + $0x10] ss:$36 sps:$4 sm:$0xff]   ;;  %v13400_v41 = vld [vmem:[#allocation3 + $0x64] ss:$36 sps:$4 sm:$0xff]   ;;  %v6982_v56 = vrot.slane %v6980_v54, 5 }
 0x383   : > { %v6988_v13 = vrot.slane %v6986_v0, 5  ;;  %v6992_v22 = vrot.slane %v6990_v51, 4  ;;  %v11479_v63 = vrot.slane %v7382_v47, 9  ;;  %v7816_v42 = vrot.slane %v7815_v35, 4  ;;  %v7384_v53 = vld [vmem:[#allocation2 + $0x2c] sm:$0x1]  ;;  %10482 = vmatprep.mubr.bf16.mxu0 %v13400_v41  ;;  %10314 = vmatmul.mubr.bf16.vlgmr.msra.gmra.mxu1 %v13392_v25 }
 0x384   : > { %v7826_v46 = vrot.slane %v7825_v20, 4  ;;  %v7830_v9 = vrot.slane %v7828_v32, 5  ;;  %v7488_v24 = vrot.slane %v7383_v57, 5  ;;  %v6983_v39 = vor.u32 %v6982_v56, %v6979_v33  ;;  %v7654_v26 = vld [vmem:[#allocation2 + $0x3c] sm:$0xf]  ;;  %10483 = vmatmul.mubr.bf16.gmra.mxu0 %v13398_v29  ;;  %v13423_v37 = vld [vmem:[%s16855_s3 + $0x228] sm:$0xff]  }
 0x385   : > { %v6993_v38 = vor.u32 %v6992_v22, %v6988_v13  ;;  %v7491_v7 = vrot.slane %v7384_v53, 5  ;;  %v7655_v4 = vld [vmem:[#allocation2 + $0x40] sm:$0xf]  ;;  %v7821_v17 = vsel %vm13709_vm5, %v7816_v42, %v7820_v31  ;;  %7686 = vst [vmem:[#allocation3 + $0xf0] sm:$0xf] %v7654_v26  ;;  %v6998_v61 = vrot.slane %v6996_v16, 5 }
 0x386   : > { %v7831_v12 = vsel %vm13709_vm5, %v7826_v46, %v7830_v9  ;;  %v7489_v55 = vsel %vm13717_vm7, %v11479_v63, %v7488_v24  ;;  %v7490_v3 = vrot.slane %v7488_v24, 4  ;;  %7687 = vst [vmem:[#allocation3 + $0x114] sm:$0xf] %v7655_v4  ;;  %v7721_v18 = vld [vmem:[#allocation2 + $0x3c] sm:$0xf]  ;;  %v6984_v40 = vrot.slane %v6983_v39, 4 }
 0x387   : > { %v7722_v14 = vld [vmem:[#allocation2 + $0x40] sm:$0xf]  ;;  %v13403_v2 = vld [vmem:[#allocation3 + $0x5c] ss:$36 sps:$4 sm:$0xff]   ;;  %8180 = vst [vmem:[#allocation3 + $0xac] sm:$0xf] %v7821_v17 }
 0x388   : > { %8181 = vst [vmem:[#allocation3 + $0xd0] sm:$0xf] %v7831_v12  ;;  %7620 = vst [vmem:[#allocation3 + $0xa4] sm:$0xf] %v7489_v55  ;;  %v13528_v19 = vld [vmem:[%s16855_s3 + $0x238] sm:$0xff]   ;;  %v6994_v60 = vrot.slane %v6993_v38, 4  ;;  %v7492_v8 = vsel %vm13717_vm7, %v7490_v3, %v7491_v7  ;;  %10321 = vmatprep.mubr.bf16.mxu1 %v13403_v2  ;;  %v6989_v45 = vsel %vm13709_vm5, %v6984_v40, %v6988_v13 }
 0x389   : > { %12882 = vmatpush3.bf16.msra.mxu1 %v13528_v19  ;;  %v7723_v10 = vld [vmem:[#allocation2 + $0x44] sm:$0x1]  ;;  %v7833_v50 = vshrl.u32 %v7721_v18, 16  ;;  %v7836_v36 = vshll.u32 %v7721_v18, 16  ;;  %7621 = vst [vmem:[#allocation3 + $0xc8] sm:$0xf] %v7492_v8 }
 0x38a   : > { %12883 = vmatprep.subr.bf16.mxu1 %v13410_v59  ;;  %v7842_v27 = vshll.u32 %v7722_v14, 16  ;;  %v7846_v62 = vshrl.u32 %v7722_v14, 16  ;;  %v6889_v49 = vld [vmem:[#allocation2 + $0x30] sm:$0xf]  ;;  %v6999_v34 = vsel %vm13709_vm5, %v6994_v60, %v6998_v61  ;;  %7348 = vst [vmem:[#allocation3 + $0xa0] sm:$0xf] %v6989_v45 }
 0x38b   : > { %v7835_v58 = vrot.slane %v7833_v50, 4  ;;  %v7838_v23 = vrot.slane %v7836_v36, 5  ;;  %v6890_v11 = vld [vmem:[#allocation2 + $0x34] sm:$0xf]  ;;  %v6891_v1 = vld [vmem:[#allocation2 + $0x38] sm:$0x1] }
 0x38c   : > { %v13401_v44 = vld [vmem:[#allocation3 + $0x58] ss:$36 sps:$4 sm:$0xff]   ;;  %7349 = vst [vmem:[#allocation3 + $0xc4] sm:$0xf] %v6999_v34  ;;  %v7844_v21 = vrot.slane %v7842_v27, 5  ;;  %v7848_v32 = vrot.slane %v7846_v62, 4 }
 0x38d   : > { %v7852_v30 = vshll.u32 %v7723_v10, 16  ;;  %v7001_v48 = vshrl.u32 %v6889_v49, 16  ;;  %v7385_v15 = vld [vmem:[#allocation2 + $0x30] sm:$0xe]  ;;  %v7839_v31 = vor.u32 %v7838_v23, %v7835_v58  ;;  %12884 = vmatpush3.bf16.msra.mxu1 %v13410_v59  ;;  %v7004_v5 = vshll.u32 %v6889_v49, 16  ;;  %v13436_v20 = vld [vmem:[%s16855_s3 + $0x220] sm:$0xff]  }
 0x38e   : > { %v7010_v43 = vshll.u32 %v6890_v11, 16  ;;  %v7014_v47 = vshrl.u32 %v6890_v11, 16  ;;  %v7386_v54 = vld [vmem:[#allocation2 + $0x34] sm:$0xf]  ;;  %v7849_v0 = vor.u32 %v7848_v32, %v7844_v21  ;;  %v7020_v57 = vshll.u32 %v6891_v1, 16  ;;  %12885 = vmatprep.subr.bf16.mxu1 %v13423_v37  ;;  %10322 = vmatmul.mubr.bf16.gmra.mxu1 %v13401_v44  ;;  %v13449_v24 = vld [vmem:[%s16855_s3 + $0x218] sm:$0xff]  }
 0x38f   : > { %v7003_v51 = vrot.slane %v7001_v48, 4  ;;  %v7387_v29 = vld [vmem:[#allocation2 + $0x38] sm:$0x1]  ;;  %v11480_v35 = vrot.slane %v7385_v15, 9  ;;  %v13404_v33 = vld [vmem:[#allocation3 + $0xa8] ss:$36 sps:$4 sm:$0xff]  }
 0x390   : > { %v7840_v16 = vrot.slane %v7839_v31, 4  ;;  %v7006_v25 = vrot.slane %v7004_v5, 5  ;;  %v13406_v41 = vld [vmem:[#allocation3 + $0xac] ss:$36 sps:$4 sm:$0xff]   ;;  %v7850_v56 = vrot.slane %v7849_v0, 4  ;;  %v7854_v13 = vrot.slane %v7852_v30, 5 }
 0x391   : > { %v7012_v22 = vrot.slane %v7010_v43, 5  ;;  %v7016_v63 = vrot.slane %v7014_v47, 4  ;;  %v7495_v46 = vrot.slane %v7386_v54, 5  ;;  %v7656_v9 = vld [vmem:[#allocation2 + $0x48] sm:$0xf]  ;;  %12886 = vmatpush3.bf16.msra.mxu1 %v13423_v37  ;;  %10490 = vmatprep.mubr.bf16.mxu0 %v13406_v41  ;;  %v7022_v12 = vrot.slane %v7020_v57, 5 }
 0x392   : > { %v7845_v59 = vsel %vm13709_vm5, %v7840_v16, %v7844_v21  ;;  %v7007_v42 = vor.u32 %v7006_v25, %v7003_v51  ;;  %v7657_v53 = vld [vmem:[#allocation2 + $0x4c] sm:$0xf]  ;;  %v7855_v39 = vsel %vm13709_vm5, %v7850_v56, %v7854_v13  ;;  %7688 = vst [vmem:[#allocation3 + $0x138] sm:$0xf] %v7656_v9  ;;  %v7724_v7 = vld [vmem:[#allocation2 + $0x48] sm:$0xf]  ;;  %12887 = vmatprep.subr.bf16.mxu1 %v13436_v20 }
 0x393   : > { %8182 = vst [vmem:[#allocation3 + $0xf4] sm:$0xf] %v7845_v59  ;;  %v7017_v38 = vor.u32 %v7016_v63, %v7012_v22  ;;  %7689 = vst [vmem:[#allocation3 + $0x15c] sm:$0xf] %v7657_v53  ;;  %v7725_v26 = vld [vmem:[#allocation2 + $0x4c] sm:$0xf]  ;;  %10491 = vmatmul.mubr.bf16.gmra.mxu0 %v13404_v33  ;;  %v7496_v55 = vsel %vm13717_vm7, %v11480_v35, %v7495_v46 }
 0x394   : > { %v13409_v4 = vld [vmem:[#allocation3 + $0xa4] ss:$36 sps:$4 sm:$0xff]   ;;  %8183 = vst [vmem:[#allocation3 + $0x118] sm:$0xf] %v7855_v39  ;;  %v7008_v17 = vrot.slane %v7007_v42, 4  ;;  %v7498_v3 = vrot.slane %v7387_v29, 5 }
 0x395   : > { %v13407_v18 = vld [vmem:[#allocation3 + $0xa0] ss:$36 sps:$4 sm:$0xff]   ;;  %v7018_v14 = vrot.slane %v7017_v38, 4  ;;  %v7497_v2 = vrot.slane %v7495_v46, 4  ;;  %7622 = vst [vmem:[#allocation3 + $0xec] sm:$0xf] %v7496_v55  ;;  %10329 = vmatprep.mubr.bf16.mxu1 %v13409_v4  ;;  %12888 = vmatpush3.bf16.msra.mxu1 %v13436_v20 }
 0x396   : > { %v7726_v40 = vld [vmem:[#allocation2 + $0x50] sm:$0x1]  ;;  %v7857_v61 = vshrl.u32 %v7724_v7, 16  ;;  %v7860_v19 = vshll.u32 %v7724_v7, 16  ;;  %v7013_v60 = vsel %vm13709_vm5, %v7008_v17, %v7012_v22  ;;  %v7866_v8 = vshll.u32 %v7725_v26, 16  ;;  %12889 = vmatprep.subr.bf16.mxu1 %v13449_v24  ;;  %10330 = vmatmul.mubr.bf16.gmra.mxu1 %v13407_v18  ;;  %v15798_v5 = vld [vmem:[%s16855_s3 + $0x208] sm:$0xff]  }
 0x397   : > { %v7870_v10 = vshrl.u32 %v7725_v26, 16  ;;  %v7876_v50 = vshll.u32 %v7726_v40, 16  ;;  %v6892_v36 = vld [vmem:[#allocation2 + $0x3c] sm:$0xf]  ;;  %v13462_v45 = vld [vmem:[%s16855_s3 + $0x210] sm:$0xff]   ;;  %v7023_v27 = vsel %vm13709_vm5, %v7018_v14, %v7022_v12  ;;  %v7499_v62 = vsel %vm13717_vm7, %v7497_v2, %v7498_v3  ;;  %v13488_v39 = vld [vmem:[%s16855_s3 + $0x200] sm:$0xff]  }
 0x398   : > { %7350 = vst [vmem:[#allocation3 + $0xe8] sm:$0xf] %v7013_v60  ;;  %v7859_v49 = vrot.slane %v7857_v61, 4  ;;  %v7862_v37 = vrot.slane %v7860_v19, 5  ;;  %v6893_v34 = vld [vmem:[#allocation2 + $0x40] sm:$0xf] }
 0x399   : > { %v6894_v58 = vld [vmem:[#allocation2 + $0x44] sm:$0x1]  ;;  %7351 = vst [vmem:[#allocation3 + $0x10c] sm:$0xf] %v7023_v27  ;;  %7623 = vst [vmem:[#allocation3 + $0x110] sm:$0xf] %v7499_v62  ;;  %12890 = vmatpush3.bf16.msra.mxu1 %v13449_v24 }
 0x39a   : > { %v7868_v23 = vrot.slane %v7866_v8, 5  ;;  %v7872_v11 = vrot.slane %v7870_v10, 4  ;;  %v7878_v1 = vrot.slane %v7876_v50, 5  ;;  %v7025_v44 = vshrl.u32 %v6892_v36, 16  ;;  %v7388_v21 = vld [vmem:[#allocation2 + $0x3c] sm:$0xe]  ;;  %12891 = vmatprep.subr.bf16.mxu1 %v13462_v45 }
 0x39b   : > { %v7863_v32 = vor.u32 %v7862_v37, %v7859_v49  ;;  %v7028_v30 = vshll.u32 %v6892_v36, 16  ;;  %v7034_v48 = vshll.u32 %v6893_v34, 16  ;;  %v7038_v15 = vshrl.u32 %v6893_v34, 16  ;;  %v7389_v31 = vld [vmem:[#allocation2 + $0x40] sm:$0xf] }
 0x39c   : > { %v7873_v43 = vor.u32 %v7872_v11, %v7868_v23  ;;  %v7027_v47 = vrot.slane %v7025_v44, 4  ;;  %v7044_v54 = vshll.u32 %v6894_v58, 16  ;;  %v7390_v0 = vld [vmem:[#allocation2 + $0x44] sm:$0x1]  ;;  %v11481_v51 = vrot.slane %v7388_v21, 9 }
 0x39d   : > { %v13411_v57 = vld [vmem:[#allocation3 + $0xf0] ss:$36 sps:$4 sm:$0xff]   ;;  %v7864_v35 = vrot.slane %v7863_v32, 4  ;;  %v7030_v33 = vrot.slane %v7028_v30, 5  ;;  %v7036_v16 = vrot.slane %v7034_v48, 5  ;;  %v7040_v25 = vrot.slane %v7038_v15, 4  ;;  %12892 = vmatpush3.bf16.msra.mxu1 %v13462_v45 }
 0x39e   : > { %v13413_v29 = vld [vmem:[#allocation3 + $0xf4] ss:$36 sps:$4 sm:$0xff]   ;;  %v7874_v20 = vrot.slane %v7873_v43, 4  ;;  %v7658_v41 = vld [vmem:[#allocation2 + $0x54] sm:$0xf]  ;;  %v7046_v13 = vrot.slane %v7044_v54, 5  ;;  %12893 = vmatprep.subr.bf16.mxu1 %v15798_v5 }
 0x39f   : > { %10498 = vmatprep.mubr.bf16.mxu0 %v13413_v29  ;;  %v7869_v56 = vsel %vm13709_vm5, %v7864_v35, %v7868_v23  ;;  %v7502_v22 = vrot.slane %v7389_v31, 5  ;;  %v7659_v63 = vld [vmem:[#allocation2 + $0x58] sm:$0xf]  ;;  %7690 = vst [vmem:[#allocation3 + $0x180] sm:$0xf] %v7658_v41  ;;  %v7031_v42 = vor.u32 %v7030_v33, %v7027_v47  ;;  %v7041_v46 = vor.u32 %v7040_v25, %v7036_v16  ;;  %v12489_v25 = vpop.f32.mrf.mxu0 }
 0x3a0   : > { %10499 = vmatmul.mubr.bf16.gmra.mxu0 %v13411_v57  ;;  %v7879_v59 = vsel %vm13709_vm5, %v7874_v20, %v7878_v1  ;;  %8184 = vst [vmem:[#allocation3 + $0x13c] sm:$0xf] %v7869_v56  ;;  %v7505_v9 = vrot.slane %v7390_v0, 5  ;;  %7691 = vst [vmem:[#allocation3 + $0x1a4] sm:$0xf] %v7659_v63 }
 0x3a1   : > { %v7727_v53 = vld [vmem:[#allocation2 + $0x54] sm:$0xf]  ;;  %v7728_v24 = vld [vmem:[#allocation2 + $0x58] sm:$0xf]  ;;  %v13414_v38 = vld [vmem:[#allocation3 + $0xe8] ss:$36 sps:$4 sm:$0xff]   ;;  %v7503_v26 = vsel %vm13717_vm7, %v11481_v51, %v7502_v22  ;;  %12894 = vmatpush3.bf16.msra.mxu1 %v15798_v5 }
 0x3a2   : > { %v13416_v7 = vld [vmem:[#allocation3 + $0xec] ss:$36 sps:$4 sm:$0xff]   ;;  %8185 = vst [vmem:[#allocation3 + $0x160] sm:$0xf] %v7879_v59  ;;  %v7504_v4 = vrot.slane %v7502_v22, 4  ;;  %v7032_v17 = vrot.slane %v7031_v42, 4  ;;  %12895 = vmatprep.subr.bf16.mxu1 %v13488_v39 }
 0x3a3   : > { %v7042_v12 = vrot.slane %v7041_v46, 4  ;;  %7624 = vst [vmem:[#allocation3 + $0x134] sm:$0xf] %v7503_v26  ;;  %v7729_v55 = vld [vmem:[#allocation2 + $0x5c] sm:$0x1]  ;;  %v7881_v3 = vshrl.u32 %v7727_v53, 16  ;;  %10337 = vmatprep.mubr.bf16.mxu1 %v13416_v7 }
 0x3a4   : > { %v7884_v18 = vshll.u32 %v7727_v53, 16  ;;  %v7506_v14 = vsel %vm13717_vm7, %v7504_v4, %v7505_v9  ;;  %v7890_v2 = vshll.u32 %v7728_v24, 16  ;;  %v7894_v40 = vshrl.u32 %v7728_v24, 16  ;;  %v6895_v19 = vld [vmem:[#allocation2 + $0x48] sm:$0xf]  ;;  %10338 = vmatmul.mubr.bf16.gmra.mxu1 %v13414_v38  ;;  %v12490_v24 = vpop.f32.mrf.mxu0 }
 0x3a5   : > { %v7900_v61 = vshll.u32 %v7729_v55, 16  ;;  %v7037_v60 = vsel %vm13709_vm5, %v7032_v17, %v7036_v16  ;;  %v7047_v8 = vsel %vm13709_vm5, %v7042_v12, %v7046_v13  ;;  %7625 = vst [vmem:[#allocation3 + $0x158] sm:$0xf] %v7506_v14  ;;  %v7883_v10 = vrot.slane %v7881_v3, 4  ;;  %v6896_v36 = vld [vmem:[#allocation2 + $0x4c] sm:$0xf]  ;;  %12896 = vmatpush3.bf16.msra.mxu1 %v13488_v39 }
 0x3a6   : > { %v7886_v50 = vrot.slane %v7884_v18, 5  ;;  %v6897_v45 = vld [vmem:[#allocation2 + $0x50] sm:$0x1]  ;;  %7352 = vst [vmem:[#allocation3 + $0x130] sm:$0xf] %v7037_v60  ;;  %v7892_v27 = vrot.slane %v7890_v2, 5  ;;  %v15825_v14 = vpop.f32.mrf.mxu0 }
 0x3a7   : > { %7353 = vst [vmem:[#allocation3 + $0x154] sm:$0xf] %v7047_v8  ;;  %v7896_v62 = vrot.slane %v7894_v40, 4  ;;  %v7902_v49 = vrot.slane %v7900_v61, 5  ;;  %v7049_v37 = vshrl.u32 %v6895_v19, 16  ;;  %v7052_v23 = vshll.u32 %v6895_v19, 16 }
 0x3a8   : > { %v7391_v34 = vld [vmem:[#allocation2 + $0x48] sm:$0xe]  ;;  %v7887_v58 = vor.u32 %v7886_v50, %v7883_v10  ;;  %v7058_v11 = vshll.u32 %v6896_v36, 16  ;;  %v7062_v1 = vshrl.u32 %v6896_v36, 16  ;;  %v7392_v44 = vld [vmem:[#allocation2 + $0x4c] sm:$0xf] }
 0x3a9   : > { %v7897_v21 = vor.u32 %v7896_v62, %v7892_v27  ;;  %v7051_v32 = vrot.slane %v7049_v37, 4  ;;  %v7068_v30 = vshll.u32 %v6897_v45, 16  ;;  %v7393_v48 = vld [vmem:[#allocation2 + $0x50] sm:$0x1]  ;;  %v11482_v15 = vrot.slane %v7391_v34, 9 }
 0x3aa   : > { %v13417_v31 = vld [vmem:[#allocation3 + $0x138] ss:$36 sps:$4 sm:$0xff]   ;;  %v7888_v47 = vrot.slane %v7887_v58, 4  ;;  %v7054_v0 = vrot.slane %v7052_v23, 5  ;;  %v7060_v51 = vrot.slane %v7058_v11, 5  ;;  %v7064_v57 = vrot.slane %v7062_v1, 4  ;;  %v15831_v23 = vpop.f32.mrf.mxu0 }
 0x3ab   : > { %v13419_v43 = vld [vmem:[#allocation3 + $0x13c] ss:$36 sps:$4 sm:$0xff]   ;;  %v7898_v54 = vrot.slane %v7897_v21, 4  ;;  %v7660_v29 = vld [vmem:[#allocation2 + $0x60] sm:$0xf]  ;;  %v7070_v35 = vrot.slane %v7068_v30, 5 }
 0x3ac   : > { %10506 = vmatprep.mubr.bf16.mxu0 %v13419_v43  ;;  %v7893_v5 = vsel %vm13709_vm5, %v7888_v47, %v7892_v27  ;;  %v7509_v20 = vrot.slane %v7392_v44, 5  ;;  %v7512_v33 = vrot.slane %v7393_v48, 5  ;;  %v7661_v16 = vld [vmem:[#allocation2 + $0x64] sm:$0xf]  ;;  %7692 = vst [vmem:[#allocation3 + $0x1c8] sm:$0xf] %v7660_v29  ;;  %v7055_v56 = vor.u32 %v7054_v0, %v7051_v32 }
 0x3ad   : > { %10507 = vmatmul.mubr.bf16.gmra.mxu0 %v13417_v31  ;;  %v7903_v41 = vsel %vm13709_vm5, %v7898_v54, %v7902_v49  ;;  %8186 = vst [vmem:[#allocation3 + $0x184] sm:$0xf] %v7893_v5  ;;  %v7065_v13 = vor.u32 %v7064_v57, %v7060_v51  ;;  %7693 = vst [vmem:[#allocation3 + $0x1ec] sm:$0xf] %v7661_v16  ;;  %v7730_v22 = vld [vmem:[#allocation2 + $0x60] sm:$0xf]  ;;  %v15833_v31 = vadd.f32 %v12490_v24, %v12489_v25 }
 0x3ae   : > { %v7731_v63 = vld [vmem:[#allocation2 + $0x64] sm:$0xf]  ;;  %v7732_v59 = vld [vmem:[#allocation2 + $0x68] sm:$0x1]  ;;  %8187 = vst [vmem:[#allocation3 + $0x1a8] sm:$0xf] %v7903_v41  ;;  %v7510_v46 = vsel %vm13717_vm7, %v11482_v15, %v7509_v20 }
 0x3af   : > { %v13420_v42 = vld [vmem:[#allocation3 + $0x130] ss:$36 sps:$4 sm:$0xff]   ;;  %v7511_v9 = vrot.slane %v7509_v20, 4  ;;  %v7905_v53 = vshrl.u32 %v7730_v22, 16  ;;  %v7056_v38 = vrot.slane %v7055_v56, 4  ;;  %v7066_v7 = vrot.slane %v7065_v13, 4  ;;  %v12495_v20 = vpop.f32.mrf.mxu0 }
 0x3b0   : > { %v13422_v39 = vld [vmem:[#allocation3 + $0x134] ss:$36 sps:$4 sm:$0xff]   ;;  %7626 = vst [vmem:[#allocation3 + $0x17c] sm:$0xf] %v7510_v46  ;;  %v7908_v26 = vshll.u32 %v7730_v22, 16  ;;  %v7914_v4 = vshll.u32 %v7731_v63, 16 }
 0x3b1   : > { %v7513_v17 = vsel %vm13717_vm7, %v7511_v9, %v7512_v33  ;;  %v7907_v12 = vrot.slane %v7905_v53, 4  ;;  %v7918_v55 = vshrl.u32 %v7731_v63, 16  ;;  %v7924_v3 = vshll.u32 %v7732_v59, 16  ;;  %v6898_v18 = vld [vmem:[#allocation2 + $0x54] sm:$0xf]  ;;  %10345 = vmatprep.mubr.bf16.mxu1 %v13422_v39  ;;  %v12496_v46 = vpop.f32.mrf.mxu0 }
 0x3b2   : > { %v7061_v2 = vsel %vm13709_vm5, %v7056_v38, %v7060_v51  ;;  %v7071_v40 = vsel %vm13709_vm5, %v7066_v7, %v7070_v35  ;;  %7627 = vst [vmem:[#allocation3 + $0x1a0] sm:$0xf] %v7513_v17  ;;  %v7910_v61 = vrot.slane %v7908_v26, 5  ;;  %v7916_v19 = vrot.slane %v7914_v4, 5  ;;  %v6899_v60 = vld [vmem:[#allocation2 + $0x58] sm:$0xf]  ;;  %10346 = vmatmul.mubr.bf16.gmra.mxu1 %v13420_v42 }
 0x3b3   : > { %v6900_v8 = vld [vmem:[#allocation2 + $0x5c] sm:$0x1]  ;;  %7354 = vst [vmem:[#allocation3 + $0x178] sm:$0xf] %v7061_v2  ;;  %7355 = vst [vmem:[#allocation3 + $0x19c] sm:$0xf] %v7071_v40  ;;  %v15843_v7 = vadd.f32 %v12496_v46, %v12495_v20 }
 0x3b4   : > { %v7920_v10 = vrot.slane %v7918_v55, 4  ;;  %v7926_v50 = vrot.slane %v7924_v3, 5  ;;  %v7073_v36 = vshrl.u32 %v6898_v18, 16  ;;  %v7076_v45 = vshll.u32 %v6898_v18, 16  ;;  %v7394_v27 = vld [vmem:[#allocation2 + $0x54] sm:$0xe] }
 0x3b5   : > { %v7911_v62 = vor.u32 %v7910_v61, %v7907_v12  ;;  %v7082_v49 = vshll.u32 %v6899_v60, 16  ;;  %v7086_v37 = vshrl.u32 %v6899_v60, 16  ;;  %v7092_v34 = vshll.u32 %v6900_v8, 16  ;;  %v7395_v58 = vld [vmem:[#allocation2 + $0x58] sm:$0xf] }
 0x3b6   : > { %v7921_v11 = vor.u32 %v7920_v10, %v7916_v19  ;;  %v7075_v1 = vrot.slane %v7073_v36, 4  ;;  %v7078_v44 = vrot.slane %v7076_v45, 5  ;;  %v7396_v21 = vld [vmem:[#allocation2 + $0x5c] sm:$0x1]  ;;  %v11483_v32 = vrot.slane %v7394_v27, 9 }
 0x3b7   : > { %v13424_v30 = vld [vmem:[#allocation3 + $0x180] ss:$36 sps:$4 sm:$0xff]   ;;  %v7912_v15 = vrot.slane %v7911_v62, 4  ;;  %v7084_v54 = vrot.slane %v7082_v49, 5  ;;  %v7088_v0 = vrot.slane %v7086_v37, 4  ;;  %v7094_v29 = vrot.slane %v7092_v34, 5 }
 0x3b8   : > { %v13426_v48 = vld [vmem:[#allocation3 + $0x184] ss:$36 sps:$4 sm:$0xff]   ;;  %v7922_v43 = vrot.slane %v7921_v11, 4  ;;  %v7079_v47 = vor.u32 %v7078_v44, %v7075_v1  ;;  %v7662_v51 = vld [vmem:[#allocation2 + $0x6c] sm:$0xf]  ;;  %v7516_v5 = vrot.slane %v7395_v58, 5 }
 0x3b9   : > { %10514 = vmatprep.mubr.bf16.mxu0 %v13426_v48  ;;  %v7917_v57 = vsel %vm13709_vm5, %v7912_v15, %v7916_v19  ;;  %v7663_v35 = vld [vmem:[#allocation2 + $0x70] sm:$0xf]  ;;  %7694 = vst [vmem:[#allocation3 + $0x210] sm:$0xf] %v7662_v51  ;;  %v7089_v25 = vor.u32 %v7088_v0, %v7084_v54  ;;  %v7519_v41 = vrot.slane %v7396_v21, 5 }
 0x3ba   : > { %10515 = vmatmul.mubr.bf16.gmra.mxu0 %v13424_v30  ;;  %v7927_v33 = vsel %vm13709_vm5, %v7922_v43, %v7926_v50  ;;  %8188 = vst [vmem:[#allocation3 + $0x1cc] sm:$0xf] %v7917_v57  ;;  %v7080_v16 = vrot.slane %v7079_v47, 4  ;;  %7695 = vst [vmem:[#allocation3 + $0x234] sm:$0xf] %v7663_v35  ;;  %v7517_v63 = vsel %vm13717_vm7, %v11483_v32, %v7516_v5  ;;  %v7518_v59 = vrot.slane %v7516_v5, 4 }
 0x3bb   : > { %v7733_v56 = vld [vmem:[#allocation2 + $0x6c] sm:$0xf]  ;;  %v7734_v13 = vld [vmem:[#allocation2 + $0x70] sm:$0xf]  ;;  %8189 = vst [vmem:[#allocation3 + $0x1f0] sm:$0xf] %v7927_v33 }
 0x3bc   : > { %v13427_v22 = vld [vmem:[#allocation3 + $0x178] ss:$36 sps:$4 sm:$0xff]   ;;  %v7929_v42 = vshrl.u32 %v7733_v56, 16  ;;  %v7085_v53 = vsel %vm13709_vm5, %v7080_v16, %v7084_v54  ;;  %v7090_v24 = vrot.slane %v7089_v25, 4  ;;  %7628 = vst [vmem:[#allocation3 + $0x1c4] sm:$0xf] %v7517_v63  ;;  %v7520_v26 = vsel %vm13717_vm7, %v7518_v59, %v7519_v41  ;;  %v12380_v63 = vpop.f32.mrf.mxu1 }
 0x3bd   : > { %v13429_v9 = vld [vmem:[#allocation3 + $0x17c] ss:$36 sps:$4 sm:$0xff]   ;;  %v7932_v38 = vshll.u32 %v7733_v56, 16  ;;  %7356 = vst [vmem:[#allocation3 + $0x1c0] sm:$0xf] %v7085_v53  ;;  %v7938_v17 = vshll.u32 %v7734_v13, 16 }
 0x3be   : > { %v7735_v39 = vld [vmem:[#allocation2 + $0x74] sm:$0x1]  ;;  %v7931_v4 = vrot.slane %v7929_v42, 4  ;;  %v7942_v12 = vshrl.u32 %v7734_v13, 16  ;;  %v6901_v55 = vld [vmem:[#allocation2 + $0x60] sm:$0xf]  ;;  %10353 = vmatprep.mubr.bf16.mxu1 %v13429_v9  ;;  %v7095_v3 = vsel %vm13709_vm5, %v7090_v24, %v7094_v29  ;;  %v15857_v24 = vpop.f32.mrf.mxu0 }
 0x3bf   : > { %7629 = vst [vmem:[#allocation3 + $0x1e8] sm:$0xf] %v7520_v26  ;;  %v7934_v18 = vrot.slane %v7932_v38, 5  ;;  %v7948_v2 = vshll.u32 %v7735_v39, 16  ;;  %v6902_v40 = vld [vmem:[#allocation2 + $0x64] sm:$0xf]  ;;  %10354 = vmatmul.mubr.bf16.gmra.mxu1 %v13427_v22 }
 0x3c0   : > { %v6903_v61 = vld [vmem:[#allocation2 + $0x68] sm:$0x1]  ;;  %7357 = vst [vmem:[#allocation3 + $0x1e4] sm:$0xf] %v7095_v3  ;;  %v7940_v19 = vrot.slane %v7938_v17, 5  ;;  %v7944_v60 = vrot.slane %v7942_v12, 4 }
 0x3c1   : > { %v7097_v8 = vshrl.u32 %v6901_v55, 16  ;;  %v7100_v10 = vshll.u32 %v6901_v55, 16  ;;  %v7397_v50 = vld [vmem:[#allocation2 + $0x60] sm:$0xe]  ;;  %v7935_v36 = vor.u32 %v7934_v18, %v7931_v4  ;;  %v7950_v45 = vrot.slane %v7948_v2, 5 }
 0x3c2   : > { %v7106_v27 = vshll.u32 %v6902_v40, 16  ;;  %v7110_v62 = vshrl.u32 %v6902_v40, 16  ;;  %v7398_v49 = vld [vmem:[#allocation2 + $0x64] sm:$0xf]  ;;  %v7945_v37 = vor.u32 %v7944_v60, %v7940_v19  ;;  %v7116_v11 = vshll.u32 %v6903_v61, 16 }
 0x3c3   : > { %v7099_v34 = vrot.slane %v7097_v8, 4  ;;  %v7102_v58 = vrot.slane %v7100_v10, 5  ;;  %v7399_v1 = vld [vmem:[#allocation2 + $0x68] sm:$0x1]  ;;  %v13430_v44 = vld [vmem:[#allocation3 + $0x1c8] ss:$36 sps:$4 sm:$0xff]   ;;  %v12381_v10 = vpop.f32.mrf.mxu1 }
 0x3c4   : > { %v13432_v21 = vld [vmem:[#allocation3 + $0x1cc] ss:$36 sps:$4 sm:$0xff]   ;;  %v7936_v32 = vrot.slane %v7935_v36, 4  ;;  %v7946_v30 = vrot.slane %v7945_v37, 4  ;;  %v7108_v15 = vrot.slane %v7106_v27, 5  ;;  %v7112_v43 = vrot.slane %v7110_v62, 4 }
 0x3c5   : > { %v7103_v48 = vor.u32 %v7102_v58, %v7099_v34  ;;  %v7664_v47 = vld [vmem:[#allocation2 + $0x78] sm:$0xf]  ;;  %10522 = vmatprep.mubr.bf16.mxu0 %v13432_v21  ;;  %v7118_v0 = vrot.slane %v7116_v11, 5  ;;  %v11484_v51 = vrot.slane %v7397_v50, 9  ;;  %v7523_v57 = vrot.slane %v7398_v49, 5  ;;  %v15863_v49 = vpop.f32.mrf.mxu0 }
 0x3c6   : > { %v7941_v54 = vsel %vm13709_vm5, %v7936_v32, %v7940_v19  ;;  %v7665_v29 = vld [vmem:[#allocation2 + $0x7c] sm:$0xf]  ;;  %7696 = vst [vmem:[#allocation3 + $0x258] sm:$0xf] %v7664_v47  ;;  %10523 = vmatmul.mubr.bf16.gmra.mxu0 %v13430_v44  ;;  %v7951_v5 = vsel %vm13709_vm5, %v7946_v30, %v7950_v45  ;;  %v7113_v20 = vor.u32 %v7112_v43, %v7108_v15  ;;  %v7526_v33 = vrot.slane %v7399_v1, 5 }
 0x3c7   : > { %8190 = vst [vmem:[#allocation3 + $0x214] sm:$0xf] %v7941_v54  ;;  %v7104_v35 = vrot.slane %v7103_v48, 4  ;;  %7697 = vst [vmem:[#allocation3 + $0x27c] sm:$0xf] %v7665_v29  ;;  %v7524_v13 = vsel %vm13717_vm7, %v11484_v51, %v7523_v57  ;;  %v7525_v22 = vrot.slane %v7523_v57, 4  ;;  %v12382_v30 = vadd.f32 %v12381_v10, %v12380_v63  ;;  %v12383_v51 = vpop.f32.mrf.mxu1 }
 0x3c8   : > { %v7736_v16 = vld [vmem:[#allocation2 + $0x78] sm:$0xf]  ;;  %v7737_v25 = vld [vmem:[#allocation2 + $0x7c] sm:$0xf]  ;;  %8191 = vst [vmem:[#allocation3 + $0x238] sm:$0xf] %v7951_v5  ;;  %v15867_v48 = vadd.f32 %v15831_v23, %v15825_v14  ;;  %v15876_v14 = vpop.f32.mrf.mxu0 }
 0x3c9   : > { %v13433_v41 = vld [vmem:[#allocation3 + $0x1c0] ss:$36 sps:$4 sm:$0xff]   ;;  %v7109_v59 = vsel %vm13709_vm5, %v7104_v35, %v7108_v15  ;;  %v7114_v42 = vrot.slane %v7113_v20, 4  ;;  %7630 = vst [vmem:[#allocation3 + $0x20c] sm:$0xf] %v7524_v13  ;;  %v7953_v9 = vshrl.u32 %v7736_v16, 16  ;;  %v7527_v39 = vsel %vm13717_vm7, %v7525_v22, %v7526_v33  ;;  %v12384_v22 = vpop.f32.mrf.mxu1 }
 0x3ca   : > { %v13435_v56 = vld [vmem:[#allocation3 + $0x1c4] ss:$36 sps:$4 sm:$0xff]   ;;  %v7956_v53 = vshll.u32 %v7736_v16, 16  ;;  %7358 = vst [vmem:[#allocation3 + $0x208] sm:$0xf] %v7109_v59  ;;  %v7962_v38 = vshll.u32 %v7737_v25, 16 }
 0x3cb   : > { %v7738_v46 = vld [vmem:[#allocation2 + $0x80] sm:$0x1]  ;;  %10361 = vmatprep.mubr.bf16.mxu1 %v13435_v56  ;;  %v7966_v26 = vshrl.u32 %v7737_v25, 16  ;;  %v6904_v17 = vld [vmem:[#allocation2 + $0x6c] sm:$0xf]  ;;  %v7119_v12 = vsel %vm13709_vm5, %v7114_v42, %v7118_v0  ;;  %v7955_v55 = vrot.slane %v7953_v9, 4 }
 0x3cc   : > { %v7972_v4 = vshll.u32 %v7738_v46, 16  ;;  %10362 = vmatmul.mubr.bf16.gmra.mxu1 %v13433_v41  ;;  %7631 = vst [vmem:[#allocation3 + $0x230] sm:$0xf] %v7527_v39  ;;  %v7958_v3 = vrot.slane %v7956_v53, 5  ;;  %v6905_v18 = vld [vmem:[#allocation2 + $0x70] sm:$0xf]  ;;  %v15885_v53 = vadd.f32 %v12384_v22, %v12383_v51  ;;  %v15887_v39 = vpop.f32.mrf.mxu0 }
 0x3cd   : > { %v6906_v2 = vld [vmem:[#allocation2 + $0x74] sm:$0x1]  ;;  %7359 = vst [vmem:[#allocation3 + $0x22c] sm:$0xf] %v7119_v12  ;;  %v7964_v40 = vrot.slane %v7962_v38, 5  ;;  %v7968_v61 = vrot.slane %v7966_v26, 4  ;;  %v15889_v12 = vpop.f32.mrf.mxu1 }
 0x3ce   : > { %v7974_v19 = vrot.slane %v7972_v4, 5  ;;  %v7121_v60 = vshrl.u32 %v6904_v17, 16  ;;  %v7400_v8 = vld [vmem:[#allocation2 + $0x6c] sm:$0xe]  ;;  %v7959_v50 = vor.u32 %v7958_v3, %v7955_v55  ;;  %v7124_v36 = vshll.u32 %v6904_v17, 16 }
 0x3cf   : > { %v7130_v45 = vshll.u32 %v6905_v18, 16  ;;  %v7134_v27 = vshrl.u32 %v6905_v18, 16  ;;  %v7401_v62 = vld [vmem:[#allocation2 + $0x70] sm:$0xf]  ;;  %v7969_v37 = vor.u32 %v7968_v61, %v7964_v40  ;;  %v7140_v58 = vshll.u32 %v6906_v2, 16  ;;  %v15893_v61 = vpop.f32.mrf.mxu0 }
 0x3d0   : > { %v7123_v34 = vrot.slane %v7121_v60, 4  ;;  %v7402_v11 = vld [vmem:[#allocation2 + $0x74] sm:$0x1]  ;;  %v11485_v1 = vrot.slane %v7400_v8, 9  ;;  %v13437_v44 = vld [vmem:[#allocation3 + $0x210] ss:$36 sps:$4 sm:$0xff]  }
 0x3d1   : > { %v13439_v21 = vld [vmem:[#allocation3 + $0x214] ss:$36 sps:$4 sm:$0xff]   ;;  %v7960_v32 = vrot.slane %v7959_v50, 4  ;;  %v7970_v15 = vrot.slane %v7969_v37, 4  ;;  %v7126_v43 = vrot.slane %v7124_v36, 5  ;;  %v7132_v47 = vrot.slane %v7130_v45, 5  ;;  %v15899_v45 = vpop.f32.mrf.mxu1 }
 0x3d2   : > { %v7136_v54 = vrot.slane %v7134_v27, 4  ;;  %v15872_v0 = vld [vmem:[%s16856_s4] ss:$0 sm:$0xff]  ;;  %10530 = vmatprep.mubr.bf16.mxu0 %v13439_v21  ;;  %v7142_v29 = vrot.slane %v7140_v58, 5  ;;  %v7530_v5 = vrot.slane %v7401_v62, 5  ;;  %v7533_v35 = vrot.slane %v7402_v11, 5  ;;  %v15904_v11 = vpop.f32.mrf.mxu0 }
 0x3d3   : > { %v7965_v57 = vsel %vm13709_vm5, %v7960_v32, %v7964_v40  ;;  %v7666_v20 = vld [vmem:[#allocation2 + $0x84] sm:$0xf]  ;;  %10531 = vmatmul.mubr.bf16.gmra.mxu0 %v13437_v44  ;;  %v7975_v23 = vsel %vm13709_vm5, %v7970_v15, %v7974_v19  ;;  %v7127_v33 = vor.u32 %v7126_v43, %v7123_v34  ;;  %v9994_v25 = vadd.f32 %v15715_v6, %v15872_v0  ;;  %v7667_v41 = vld [vmem:[#allocation2 + $0x88] sm:$0xf]  ;;  %v7741_v26 = vld [vmem:[#allocation2 + $0x8c] sm:$0x1]  ;;  %v12389_v15 = vpop.f32.mrf.mxu1 }
 0x3d4   : > { %8192 = vst [vmem:[#allocation3 + $0x25c] sm:$0xf] %v7965_v57  ;;  %v7137_v16 = vor.u32 %v7136_v54, %v7132_v47  ;;  %7698 = vst [vmem:[#allocation3 + $0x2a0] sm:$0xf] %v7666_v20  ;;  %v7739_v56 = vld [vmem:[#allocation2 + $0x84] sm:$0xf]  ;;  %v7531_v42 = vsel %vm13717_vm7, %v11485_v1, %v7530_v5  ;;  %v9997_v9 = vadd.f32 %v12382_v30, %v15872_v0 }
 0x3d5   : > { %v7740_v13 = vld [vmem:[#allocation2 + $0x88] sm:$0xf]  ;;  %v13440_v63 = vld [vmem:[#allocation3 + $0x208] ss:$36 sps:$4 sm:$0xff]   ;;  %8193 = vst [vmem:[#allocation3 + $0x280] sm:$0xf] %v7975_v23  ;;  %v15902_v34 = vadd.f32 %v15833_v31, %v9994_v25  ;;  %v12390_v23 = vpop.f32.mrf.mxu1 }
 0x3d6   : > { %v13442_v59 = vld [vmem:[#allocation3 + $0x20c] ss:$36 sps:$4 sm:$0xff]   ;;  %v7532_v46 = vrot.slane %v7530_v5, 4  ;;  %7699 = vst [vmem:[#allocation3 + $0x2c4] sm:$0xf] %v7667_v41  ;;  %v7128_v6 = vrot.slane %v7127_v33, 4  ;;  %v15909_v20 = vadd.f32 %v15867_v48, %v9997_v9 }
 0x3d7   : > { %v7138_v38 = vrot.slane %v7137_v16, 4  ;;  %7632 = vst [vmem:[#allocation3 + $0x254] sm:$0xf] %v7531_v42  ;;  %v7977_v4 = vshrl.u32 %v7739_v56, 16  ;;  %v7980_v17 = vshll.u32 %v7739_v56, 16  ;;  %10369 = vmatprep.mubr.bf16.mxu1 %v13442_v59  ;;  %v7986_v3 = vshll.u32 %v7740_v13, 16 }
 0x3d8   : > { %v7534_v55 = vsel %vm13717_vm7, %v7532_v46, %v7533_v35  ;;  %v7990_v18 = vshrl.u32 %v7740_v13, 16  ;;  %v7996_v2 = vshll.u32 %v7741_v26, 16  ;;  %v6907_v40 = vld [vmem:[#allocation2 + $0x78] sm:$0xf]  ;;  %10370 = vmatmul.mubr.bf16.gmra.mxu1 %v13440_v63  ;;  %v7133_v19 = vsel %vm13709_vm5, %v7128_v6, %v7132_v47  ;;  %v6908_v50 = vld [vmem:[#allocation2 + $0x7c] sm:$0xf] }
 0x3d9   : > { %v7143_v60 = vsel %vm13709_vm5, %v7138_v38, %v7142_v29  ;;  %7633 = vst [vmem:[#allocation3 + $0x278] sm:$0xf] %v7534_v55  ;;  %v7979_v8 = vrot.slane %v7977_v4, 4  ;;  %v7982_v10 = vrot.slane %v7980_v17, 5  ;;  %v6909_v36 = vld [vmem:[#allocation2 + $0x80] sm:$0x1]  ;;  %v15906_v29 = vpop.f32.mrf.mxu0  ;;  %v15915_v42 = vadd.f32 %v15863_v49, %v15857_v24  ;;  %v15921_v17 = vpop.f32.mrf.mxu1 }
 0x3da   : > { %7360 = vst [vmem:[#allocation3 + $0x250] sm:$0xf] %v7133_v19  ;;  %7361 = vst [vmem:[#allocation3 + $0x274] sm:$0xf] %v7143_v60  ;;  %v7988_v27 = vrot.slane %v7986_v3, 5  ;;  %v7992_v62 = vrot.slane %v7990_v18, 4 }
 0x3db   : > { %v7998_v37 = vrot.slane %v7996_v2, 5  ;;  %16980 = vst [vmem:[#allocation24_spill] sm:$0xff] %v15902_v34  ;;  %v7403_v58 = vld [vmem:[#allocation2 + $0x78] sm:$0xe]  ;;  %v7983_v1 = vor.u32 %v7982_v10, %v7979_v8  ;;  %v7145_v44 = vshrl.u32 %v6907_v40, 16  ;;  %v7148_v21 = vshll.u32 %v6907_v40, 16  ;;  %v15917_v48 = vpop.f32.mrf.mxu0 }
 0x3dc   : > { %v7154_v32 = vshll.u32 %v6908_v50, 16  ;;  %v7404_v30 = vld [vmem:[#allocation2 + $0x7c] sm:$0xf]  ;;  %v7993_v43 = vor.u32 %v7992_v62, %v7988_v27  ;;  %v7158_v47 = vshrl.u32 %v6908_v50, 16  ;;  %v7164_v54 = vshll.u32 %v6909_v36, 16  ;;  %16981 = vst [vmem:[#allocation25_spill] sm:$0xff] %v15909_v20 }
 0x3dd   : > { %v7405_v51 = vld [vmem:[#allocation2 + $0x80] sm:$0x1]  ;;  %v11486_v57 = vrot.slane %v7403_v58, 9  ;;  %v13443_v5 = vld [vmem:[#allocation3 + $0x258] ss:$36 sps:$4 sm:$0xff]   ;;  %v7984_v31 = vrot.slane %v7983_v1, 4  ;;  %v15927_v8 = vadd.f32 %v15887_v39, %v15876_v14  ;;  %v15929_v10 = vadd.f32 %v12390_v23, %v12389_v15  ;;  %v15933_v58 = vpop.f32.mrf.mxu0 }
 0x3de   : > { %v13445_v35 = vld [vmem:[#allocation3 + $0x25c] ss:$36 sps:$4 sm:$0xff]   ;;  %v7994_v33 = vrot.slane %v7993_v43, 4  ;;  %v7147_v16 = vrot.slane %v7145_v44, 4  ;;  %v7150_v25 = vrot.slane %v7148_v21, 5  ;;  %v7156_v41 = vrot.slane %v7154_v32, 5  ;;  %v12393_v32 = vpop.f32.mrf.mxu1 }
 0x3df   : > { %v7668_v56 = vld [vmem:[#allocation2 + $0x90] sm:$0xf]  ;;  %10538 = vmatprep.mubr.bf16.mxu0 %v13445_v35  ;;  %v7989_v13 = vsel %vm13709_vm5, %v7984_v31, %v7988_v27  ;;  %v7160_v22 = vrot.slane %v7158_v47, 4  ;;  %v7537_v63 = vrot.slane %v7404_v30, 5  ;;  %v7669_v59 = vld [vmem:[#allocation2 + $0x94] sm:$0xf] }
 0x3e0   : > { %7700 = vst [vmem:[#allocation3 + $0x2e8] sm:$0xf] %v7668_v56  ;;  %10539 = vmatmul.mubr.bf16.gmra.mxu0 %v13443_v5  ;;  %v7999_v46 = vsel %vm13709_vm5, %v7994_v33, %v7998_v37  ;;  %8194 = vst [vmem:[#allocation3 + $0x2a4] sm:$0xf] %v7989_v13  ;;  %v7151_v9 = vor.u32 %v7150_v25, %v7147_v16  ;;  %v7166_v6 = vrot.slane %v7164_v54, 5  ;;  %v7540_v38 = vrot.slane %v7405_v51, 5 }
 0x3e1   : > { %7701 = vst [vmem:[#allocation3 + $0x30c] sm:$0xf] %v7669_v59  ;;  %v7742_v26 = vld [vmem:[#allocation2 + $0x90] sm:$0xf]  ;;  %v7743_v4 = vld [vmem:[#allocation2 + $0x94] sm:$0xf]  ;;  %v7161_v3 = vor.u32 %v7160_v22, %v7156_v41  ;;  %v7538_v24 = vsel %vm13717_vm7, %v11486_v57, %v7537_v63  ;;  %v15943_v59 = vadd.f32 %v15885_v53, %v15872_v0 }
 0x3e2   : > { %v13446_v55 = vld [vmem:[#allocation3 + $0x250] ss:$36 sps:$4 sm:$0xff]   ;;  %8195 = vst [vmem:[#allocation3 + $0x2c8] sm:$0xf] %v7999_v46  ;;  %v7539_v49 = vrot.slane %v7537_v63, 4  ;;  %v8001_v18 = vshrl.u32 %v7742_v26, 16  ;;  %v12388_v46 = vadd.f32 %v15899_v45, %v15889_v12 }
 0x3e3   : > { %v13448_v2 = vld [vmem:[#allocation3 + $0x254] ss:$36 sps:$4 sm:$0xff]   ;;  %v7152_v40 = vrot.slane %v7151_v9, 4  ;;  %7634 = vst [vmem:[#allocation3 + $0x29c] sm:$0xf] %v7538_v24  ;;  %v8004_v60 = vshll.u32 %v7742_v26, 16  ;;  %v12395_v9 = vpop.f32.mrf.mxu1 }
 0x3e4   : > { %v7744_v19 = vld [vmem:[#allocation2 + $0x98] sm:$0x1]  ;;  %v7162_v50 = vrot.slane %v7161_v3, 4  ;;  %v7541_v36 = vsel %vm13717_vm7, %v7539_v49, %v7540_v38  ;;  %v8003_v27 = vrot.slane %v8001_v18, 4  ;;  %v8010_v62 = vshll.u32 %v7743_v4, 16  ;;  %10377 = vmatprep.mubr.bf16.mxu1 %v13448_v2 }
 0x3e5   : > { %v6910_v37 = vld [vmem:[#allocation2 + $0x84] sm:$0xf]  ;;  %v7157_v1 = vsel %vm13709_vm5, %v7152_v40, %v7156_v41  ;;  %7635 = vst [vmem:[#allocation3 + $0x2c0] sm:$0xf] %v7541_v36  ;;  %v8006_v44 = vrot.slane %v8004_v60, 5  ;;  %v8014_v21 = vshrl.u32 %v7743_v4, 16  ;;  %10378 = vmatmul.mubr.bf16.gmra.mxu1 %v13446_v55  ;;  %v15939_v41 = vpop.f32.mrf.mxu0  ;;  %v12396_v40 = vpop.f32.mrf.mxu1 }
 0x3e6   : > { %v8020_v14 = vshll.u32 %v7744_v19, 16  ;;  %v6911_v39 = vld [vmem:[#allocation2 + $0x88] sm:$0xf]  ;;  %v7167_v30 = vsel %vm13709_vm5, %v7162_v50, %v7166_v6  ;;  %7362 = vst [vmem:[#allocation3 + $0x298] sm:$0xf] %v7157_v1  ;;  %v8012_v15 = vrot.slane %v8010_v62, 5  ;;  %v15950_v50 = vadd.f32 %v12393_v32, %v15921_v17 }
 0x3e7   : > { %v6912_v43 = vld [vmem:[#allocation2 + $0x8c] sm:$0x1]  ;;  %v7169_v47 = vshrl.u32 %v6910_v37, 16  ;;  %v7172_v54 = vshll.u32 %v6910_v37, 16  ;;  %7363 = vst [vmem:[#allocation3 + $0x2bc] sm:$0xf] %v7167_v30  ;;  %v8007_v51 = vor.u32 %v8006_v44, %v8003_v27  ;;  %v15952_v36 = vpop.f32.mrf.mxu0 }
 0x3e8   : > { %v8016_v57 = vrot.slane %v8014_v21, 4  ;;  %v8022_v5 = vrot.slane %v8020_v14, 5  ;;  %v7178_v35 = vshll.u32 %v6911_v39, 16  ;;  %v7406_v31 = vld [vmem:[#allocation2 + $0x84] sm:$0xe]  ;;  %v7182_v16 = vshrl.u32 %v6911_v39, 16  ;;  %v12398_v14 = vpop.f32.mrf.mxu1 }
 0x3e9   : > { %v7171_v23 = vrot.slane %v7169_v47, 4  ;;  %v7174_v33 = vrot.slane %v7172_v54, 5  ;;  %v7188_v25 = vshll.u32 %v6912_v43, 16  ;;  %v13450_v56 = vld [vmem:[#allocation3 + $0x2a0] ss:$36 sps:$4 sm:$0xff]   ;;  %v8008_v22 = vrot.slane %v8007_v51, 4  ;;  %v12514_v47 = vpop.f32.mrf.mxu0 }
 0x3ea   : > { %v13452_v13 = vld [vmem:[#allocation3 + $0x2a4] ss:$36 sps:$4 sm:$0xff]   ;;  %v8017_v63 = vor.u32 %v8016_v57, %v8012_v15  ;;  %v7180_v38 = vrot.slane %v7178_v35, 5  ;;  %v7184_v26 = vrot.slane %v7182_v16, 4  ;;  %v7407_v55 = vld [vmem:[#allocation2 + $0x88] sm:$0xf]  ;;  %v15960_v21 = vadd.f32 %v15917_v48, %v15906_v29 }
 0x3eb   : > { %v7175_v6 = vor.u32 %v7174_v33, %v7171_v23  ;;  %v7190_v4 = vrot.slane %v7188_v25, 5  ;;  %10546 = vmatprep.mubr.bf16.mxu0 %v13452_v13  ;;  %v8013_v3 = vsel %vm13709_vm5, %v8008_v22, %v8012_v15  ;;  %v7408_v49 = vld [vmem:[#allocation2 + $0x8c] sm:$0x1]  ;;  %v11487_v18 = vrot.slane %v7406_v31, 9  ;;  %v7670_v45 = vld [vmem:[#allocation2 + $0x9c] sm:$0xf]  ;;  %v15977_v25 = vpop.f32.mrf.mxu0 }
 0x3ec   : > { %v8018_v24 = vrot.slane %v8017_v63, 4  ;;  %v7544_v2 = vrot.slane %v7407_v55, 5  ;;  %10547 = vmatmul.mubr.bf16.gmra.mxu0 %v13450_v56  ;;  %8196 = vst [vmem:[#allocation3 + $0x2ec] sm:$0xf] %v8013_v3  ;;  %v7185_v19 = vor.u32 %v7184_v26, %v7180_v38  ;;  %v7547_v12 = vrot.slane %v7408_v49, 5 }
 0x3ed   : > { %v7176_v53 = vrot.slane %v7175_v6, 4  ;;  %v7671_v60 = vld [vmem:[#allocation2 + $0xa0] sm:$0xf]  ;;  %7702 = vst [vmem:[#allocation3 + $0x330] sm:$0xf] %v7670_v45  ;;  %v15965_v15 = vadd.f32 %v12388_v46, %v15872_v0  ;;  %v15967_v43 = vadd.f32 %v12396_v40, %v12395_v9  ;;  %v15975_v16 = vadd.f32 %v15929_v10, %v15872_v0  ;;  %v12399_v9 = vpop.f32.mrf.mxu1  ;;  %v12517_v3 = vpop.f32.mrf.mxu0 }
 0x3ee   : > { %v8023_v27 = vsel %vm13709_vm5, %v8018_v24, %v8022_v5  ;;  %v7545_v62 = vsel %vm13717_vm7, %v11487_v18, %v7544_v2  ;;  %v7546_v37 = vrot.slane %v7544_v2, 4  ;;  %7703 = vst [vmem:[#allocation3 + $0x354] sm:$0xf] %v7671_v60  ;;  %v7745_v1 = vld [vmem:[#allocation2 + $0x9c] sm:$0xf]  ;;  %v7186_v30 = vrot.slane %v7185_v19, 4 }
 0x3ef   : > { %v7746_v44 = vld [vmem:[#allocation2 + $0xa0] sm:$0xf]  ;;  %v13453_v17 = vld [vmem:[#allocation3 + $0x298] ss:$36 sps:$4 sm:$0xff]   ;;  %8197 = vst [vmem:[#allocation3 + $0x310] sm:$0xf] %v8023_v27  ;;  %v7181_v32 = vsel %vm13709_vm5, %v7176_v53, %v7180_v38  ;;  %v15979_v60 = vpop.f32.mrf.mxu0 }
 0x3f0   : > { %v13455_v39 = vld [vmem:[#allocation3 + $0x29c] ss:$36 sps:$4 sm:$0xff]   ;;  %7636 = vst [vmem:[#allocation3 + $0x2e4] sm:$0xf] %v7545_v62  ;;  %7364 = vst [vmem:[#allocation3 + $0x2e0] sm:$0xf] %v7181_v32  ;;  %v7548_v29 = vsel %vm13717_vm7, %v7546_v37, %v7547_v12  ;;  %v7191_v5 = vsel %vm13709_vm5, %v7186_v30, %v7190_v4 }
 0x3f1   : > { %v7747_v48 = vld [vmem:[#allocation2 + $0xa4] sm:$0x1]  ;;  %v8025_v54 = vshrl.u32 %v7745_v1, 16  ;;  %v8028_v51 = vshll.u32 %v7745_v1, 16  ;;  %v8034_v57 = vshll.u32 %v7746_v44, 16  ;;  %10385 = vmatprep.mubr.bf16.mxu1 %v13455_v39  ;;  %v8038_v35 = vshrl.u32 %v7746_v44, 16 }
 0x3f2   : > { %7637 = vst [vmem:[#allocation3 + $0x308] sm:$0xf] %v7548_v29  ;;  %v8044_v31 = vshll.u32 %v7747_v48, 16  ;;  %v6913_v23 = vld [vmem:[#allocation2 + $0x90] sm:$0xf]  ;;  %10386 = vmatmul.mubr.bf16.gmra.mxu1 %v13453_v17  ;;  %v15983_v1 = vadd.f32 %v15939_v41, %v15933_v58  ;;  %v15985_v44 = vadd.f32 %v12399_v9, %v12398_v14  ;;  %v12401_v17 = vpop.f32.mrf.mxu1  ;;  %v15988_v39 = vadd.f32 %v12514_v47, %v15952_v36 }
 0x3f3   : > { %v6914_v33 = vld [vmem:[#allocation2 + $0x94] sm:$0xf]  ;;  %7365 = vst [vmem:[#allocation3 + $0x304] sm:$0xf] %v7191_v5  ;;  %v8027_v56 = vrot.slane %v8025_v54, 4  ;;  %v8030_v13 = vrot.slane %v8028_v51, 5  ;;  %v15990_v51 = vpop.f32.mrf.mxu0  ;;  %v15996_v41 = vadd.f32 %v15904_v11, %v15893_v61 }
 0x3f4   : > { %v8036_v22 = vrot.slane %v8034_v57, 5  ;;  %v6915_v63 = vld [vmem:[#allocation2 + $0x98] sm:$0x1]  ;;  %v7193_v46 = vshrl.u32 %v6913_v23, 16  ;;  %v8040_v6 = vrot.slane %v8038_v35, 4  ;;  %v8046_v38 = vrot.slane %v8044_v31, 5  ;;  %v12402_v47 = vpop.f32.mrf.mxu1 }
 0x3f5   : > { %v7196_v26 = vshll.u32 %v6913_v23, 16  ;;  %v7202_v4 = vshll.u32 %v6914_v33, 16  ;;  %v7409_v55 = vld [vmem:[#allocation2 + $0x90] sm:$0xe]  ;;  %v8031_v24 = vor.u32 %v8030_v13, %v8027_v56  ;;  %v7206_v10 = vshrl.u32 %v6914_v33, 16 }
 0x3f6   : > { %v7195_v49 = vrot.slane %v7193_v46, 4  ;;  %v7212_v18 = vshll.u32 %v6915_v63, 16  ;;  %v7410_v2 = vld [vmem:[#allocation2 + $0x94] sm:$0xf]  ;;  %v8041_v40 = vor.u32 %v8040_v6, %v8036_v22  ;;  %v7411_v12 = vld [vmem:[#allocation2 + $0x98] sm:$0x1]  ;;  %v16000_v13 = vadd.f32 %v12402_v47, %v12401_v17  ;;  %v12404_v6 = vpop.f32.mrf.mxu1 }
 0x3f7   : > { %v7198_v53 = vrot.slane %v7196_v26, 5  ;;  %v7204_v19 = vrot.slane %v7202_v4, 5  ;;  %v11488_v45 = vrot.slane %v7409_v55, 9  ;;  %v13456_v27 = vld [vmem:[#allocation3 + $0x2e8] ss:$36 sps:$4 sm:$0xff]   ;;  %v8032_v37 = vrot.slane %v8031_v24, 4 }
 0x3f8   : > { %v13458_v62 = vld [vmem:[#allocation3 + $0x2ec] ss:$36 sps:$4 sm:$0xff]   ;;  %v8042_v32 = vrot.slane %v8041_v40, 4  ;;  %v7208_v29 = vrot.slane %v7206_v10, 4  ;;  %v7214_v48 = vrot.slane %v7212_v18, 5  ;;  %v7551_v5 = vrot.slane %v7410_v2, 5 }
 0x3f9   : > { %v7199_v30 = vor.u32 %v7198_v53, %v7195_v49  ;;  %v7672_v54 = vld [vmem:[#allocation2 + $0xa8] sm:$0xf]  ;;  %10554 = vmatprep.mubr.bf16.mxu0 %v13458_v62  ;;  %v8037_v57 = vsel %vm13709_vm5, %v8032_v37, %v8036_v22  ;;  %v7554_v58 = vrot.slane %v7411_v12, 5  ;;  %v7673_v14 = vld [vmem:[#allocation2 + $0xac] sm:$0xf]  ;;  %v16002_v22 = vpop.f32.mrf.mxu0  ;;  %v16007_v26 = vadd.f32 %v12517_v3, %v15977_v25  ;;  %v12405_v53 = vpop.f32.mrf.mxu1 }
 0x3fa   : > { %7704 = vst [vmem:[#allocation3 + $0x378] sm:$0xf] %v7672_v54  ;;  %v7748_v36 = vld [vmem:[#allocation2 + $0xa8] sm:$0xf]  ;;  %v13459_v35 = vld [vmem:[#allocation3 + $0x2e0] ss:$36 sps:$4 sm:$0xff]   ;;  %10555 = vmatmul.mubr.bf16.gmra.mxu0 %v13456_v27  ;;  %v8047_v23 = vsel %vm13709_vm5, %v8042_v32, %v8046_v38  ;;  %v7209_v56 = vor.u32 %v7208_v29, %v7204_v19  ;;  %v7552_v61 = vsel %vm13717_vm7, %v11488_v45, %v7551_v5 }
 0x3fb   : > { %v13461_v31 = vld [vmem:[#allocation3 + $0x2e4] ss:$36 sps:$4 sm:$0xff]   ;;  %8198 = vst [vmem:[#allocation3 + $0x334] sm:$0xf] %v8037_v57  ;;  %v7200_v33 = vrot.slane %v7199_v30, 4  ;;  %v7553_v11 = vrot.slane %v7551_v5, 4  ;;  %v16011_v10 = vpop.f32.mrf.mxu0  ;;  %v16021_v17 = vadd.f32 %v15950_v50, %v15872_v0  ;;  %v12407_v57 = vpop.f32.mrf.mxu1 }
 0x3fc   : > { %7705 = vst [vmem:[#allocation3 + $0x39c] sm:$0xf] %v7673_v14  ;;  %8199 = vst [vmem:[#allocation3 + $0x358] sm:$0xf] %v8047_v23  ;;  %v7749_v63 = vld [vmem:[#allocation2 + $0xac] sm:$0xf]  ;;  %10393 = vmatprep.mubr.bf16.mxu1 %v13461_v31 }
 0x3fd   : > { %v7750_v46 = vld [vmem:[#allocation2 + $0xb0] sm:$0x1]  ;;  %v8049_v9 = vshrl.u32 %v7748_v36, 16  ;;  %16982 = vst [vmem:[#allocation26_spill] sm:$0xff] %v16007_v26  ;;  %v7205_v38 = vsel %vm13709_vm5, %v7200_v33, %v7204_v19  ;;  %v7210_v4 = vrot.slane %v7209_v56, 4  ;;  %v8052_v55 = vshll.u32 %v7748_v36, 16  ;;  %10394 = vmatmul.mubr.bf16.gmra.mxu1 %v13459_v35  ;;  %v16017_v37 = vpop.f32.mrf.mxu0 }
 0x3fe   : > { %7638 = vst [vmem:[#allocation3 + $0x32c] sm:$0xf] %v7552_v61  ;;  %v8058_v24 = vshll.u32 %v7749_v63, 16  ;;  %v6916_v49 = vld [vmem:[#allocation2 + $0x9c] sm:$0xf]  ;;  %v7555_v18 = vsel %vm13717_vm7, %v7553_v11, %v7554_v58  ;;  %v8062_v40 = vshrl.u32 %v7749_v63, 16  ;;  %v12408_v61 = vpop.f32.mrf.mxu1 }
 0x3ff   : > { %7366 = vst [vmem:[#allocation3 + $0x328] sm:$0xf] %v7205_v38  ;;  %v8051_v2 = vrot.slane %v8049_v9, 4  ;;  %v8068_v25 = vshll.u32 %v7750_v46, 16  ;;  %v6917_v3 = vld [vmem:[#allocation2 + $0xa0] sm:$0xf]  ;;  %v7215_v19 = vsel %vm13709_vm5, %v7210_v4, %v7214_v48  ;;  %v16023_v47 = vpop.f32.mrf.mxu0  ;;  %v16025_v46 = vadd.f32 %v12405_v53, %v12404_v6 }
 0x400   : > { %7639 = vst [vmem:[#allocation3 + $0x350] sm:$0xf] %v7555_v18  ;;  %v8054_v12 = vrot.slane %v8052_v55, 5  ;;  %v8060_v45 = vrot.slane %v8058_v24, 5  ;;  %v6918_v27 = vld [vmem:[#allocation2 + $0xa4] sm:$0x1]  ;;  %v16029_v9 = vadd.f32 %v15990_v51, %v15979_v60  ;;  %v16035_v18 = vadd.f32 %v15967_v43, %v15872_v0 }
 0x401   : > { %v7217_v62 = vshrl.u32 %v6916_v49, 16  ;;  %7367 = vst [vmem:[#allocation3 + $0x34c] sm:$0xf] %v7215_v19  ;;  %v8064_v32 = vrot.slane %v8062_v40, 4  ;;  %v7220_v30 = vshll.u32 %v6916_v49, 16  ;;  %v7226_v29 = vshll.u32 %v6917_v3, 16  ;;  %v16031_v38 = vpop.f32.mrf.mxu0  ;;  %v12410_v40 = vpop.f32.mrf.mxu1 }
 0x402   : > { %v7412_v54 = vld [vmem:[#allocation2 + $0x9c] sm:$0xe]  ;;  %v8055_v5 = vor.u32 %v8054_v12, %v8051_v2  ;;  %v7230_v48 = vshrl.u32 %v6917_v3, 16  ;;  %v7236_v14 = vshll.u32 %v6918_v27, 16  ;;  %v7413_v36 = vld [vmem:[#allocation2 + $0xa0] sm:$0xf] }
 0x403   : > { %v7219_v58 = vrot.slane %v7217_v62, 4  ;;  %v8065_v35 = vor.u32 %v8064_v32, %v8060_v45  ;;  %v8070_v31 = vrot.slane %v8068_v25, 5  ;;  %v7222_v23 = vrot.slane %v7220_v30, 5  ;;  %v7414_v56 = vld [vmem:[#allocation2 + $0xa4] sm:$0x1]  ;;  %16983 = vst [vmem:[#allocation23_spill] sm:$0xff] %v16029_v9  ;;  %v16039_v53 = vpop.f32.mrf.mxu0 }
 0x404   : > { %v7228_v33 = vrot.slane %v7226_v29, 5  ;;  %v13465_v50 = vld [vmem:[#allocation3 + $0x334] ss:$36 sps:$4 sm:$0xff]   ;;  %v8056_v11 = vrot.slane %v8055_v5, 4  ;;  %v11489_v63 = vrot.slane %v7412_v54, 9  ;;  %v7232_v49 = vrot.slane %v7230_v48, 4 }
 0x405   : > { %v13463_v4 = vld [vmem:[#allocation3 + $0x330] ss:$36 sps:$4 sm:$0xff]   ;;  %v8066_v55 = vrot.slane %v8065_v35, 4  ;;  %v7223_v24 = vor.u32 %v7222_v23, %v7219_v58  ;;  %v7674_v2 = vld [vmem:[#allocation2 + $0xb4] sm:$0xf]  ;;  %10562 = vmatprep.mubr.bf16.mxu0 %v13465_v50  ;;  %v7238_v25 = vrot.slane %v7236_v14, 5  ;;  %v16043_v32 = vadd.f32 %v12408_v61, %v12407_v57  ;;  %v16053_v14 = vpop.f32.mrf.mxu0 }
 0x406   : > { %v8061_v6 = vsel %vm13709_vm5, %v8056_v11, %v8060_v45  ;;  %v7558_v3 = vrot.slane %v7413_v36, 5  ;;  %v7561_v60 = vrot.slane %v7414_v56, 5  ;;  %v7675_v51 = vld [vmem:[#allocation2 + $0xb8] sm:$0xf]  ;;  %7706 = vst [vmem:[#allocation3 + $0x3c0] sm:$0xf] %v7674_v2  ;;  %10563 = vmatmul.mubr.bf16.gmra.mxu0 %v13463_v4  ;;  %v7233_v12 = vor.u32 %v7232_v49, %v7228_v33  ;;  %v12411_v45 = vpop.f32.mrf.mxu1 }
 0x407   : > { %v8071_v19 = vsel %vm13709_vm5, %v8066_v55, %v8070_v31  ;;  %8200 = vst [vmem:[#allocation3 + $0x37c] sm:$0xf] %v8061_v6  ;;  %v7224_v43 = vrot.slane %v7223_v24, 4  ;;  %7707 = vst [vmem:[#allocation3 + $0x3e4] sm:$0xf] %v7675_v51  ;;  %v16049_v58 = vadd.f32 %v16011_v10, %v16002_v22  ;;  %v16051_v48 = vadd.f32 %v12411_v45, %v12410_v40 }
 0x408   : > { %v7751_v27 = vld [vmem:[#allocation2 + $0xb4] sm:$0xf]  ;;  %v7752_v62 = vld [vmem:[#allocation2 + $0xb8] sm:$0xf]  ;;  %v13466_v30 = vld [vmem:[#allocation3 + $0x328] ss:$36 sps:$4 sm:$0xff]   ;;  %v7559_v54 = vsel %vm13717_vm7, %v11489_v63, %v7558_v3  ;;  %v12413_v56 = vpop.f32.mrf.mxu1  ;;  %v16059_v63 = vpop.f32.mrf.mxu0  ;;  %v16065_v4 = vadd.f32 %v15985_v44, %v15872_v0 }
 0x409   : > { %v13468_v29 = vld [vmem:[#allocation3 + $0x32c] ss:$36 sps:$4 sm:$0xff]   ;;  %8201 = vst [vmem:[#allocation3 + $0x3a0] sm:$0xf] %v8071_v19  ;;  %v7560_v5 = vrot.slane %v7558_v3, 4  ;;  %16984 = vst [vmem:[#allocation9_spill] sm:$0xff] %v16049_v58  ;;  %v7229_v57 = vsel %vm13709_vm5, %v7224_v43, %v7228_v33 }
 0x40a   : > { %v7234_v36 = vrot.slane %v7233_v12, 4  ;;  %7640 = vst [vmem:[#allocation3 + $0x374] sm:$0xf] %v7559_v54  ;;  %v7753_v35 = vld [vmem:[#allocation2 + $0xbc] sm:$0x1]  ;;  %v8073_v31 = vshrl.u32 %v7751_v27, 16  ;;  %10401 = vmatprep.mubr.bf16.mxu1 %v13468_v29  ;;  %v12414_v40 = vpop.f32.mrf.mxu1  ;;  %v16067_v43 = vpop.f32.mrf.mxu0 }
 0x40b   : > { %v8076_v23 = vshll.u32 %v7751_v27, 16  ;;  %7368 = vst [vmem:[#allocation3 + $0x370] sm:$0xf] %v7229_v57  ;;  %v7562_v61 = vsel %vm13717_vm7, %v7560_v5, %v7561_v60  ;;  %v8082_v22 = vshll.u32 %v7752_v62, 16  ;;  %v8086_v10 = vshrl.u32 %v7752_v62, 16  ;;  %10402 = vmatmul.mubr.bf16.gmra.mxu1 %v13466_v30 }
 0x40c   : > { %v8092_v50 = vshll.u32 %v7753_v35, 16  ;;  %v6919_v11 = vld [vmem:[#allocation2 + $0xa8] sm:$0xf]  ;;  %v7239_v33 = vsel %vm13709_vm5, %v7234_v36, %v7238_v25  ;;  %7641 = vst [vmem:[#allocation3 + $0x398] sm:$0xf] %v7562_v61  ;;  %v8075_v55 = vrot.slane %v8073_v31, 4  ;;  %v12416_v44 = vpop.f32.mrf.mxu1  ;;  %v16069_v36 = vpop.f32.mrf.mxu0  ;;  %v16073_v61 = vadd.f32 %v16000_v13, %v15872_v0 }
 0x40d   : > { %v8078_v24 = vrot.slane %v8076_v23, 5  ;;  %v6920_v49 = vld [vmem:[#allocation2 + $0xac] sm:$0xf]  ;;  %v6921_v2 = vld [vmem:[#allocation2 + $0xb0] sm:$0x1]  ;;  %v8084_v6 = vrot.slane %v8082_v22, 5  ;;  %v16077_v22 = vadd.f32 %v16023_v47, %v16017_v37 }
 0x40e   : > { %7369 = vst [vmem:[#allocation3 + $0x394] sm:$0xf] %v7239_v33  ;;  %v8088_v3 = vrot.slane %v8086_v10, 4  ;;  %v8094_v60 = vrot.slane %v8092_v50, 5  ;;  %v7241_v51 = vshrl.u32 %v6919_v11, 16  ;;  %v7244_v25 = vshll.u32 %v6919_v11, 16  ;;  %v12417_v50 = vpop.f32.mrf.mxu1 }
 0x40f   : > { %v7415_v19 = vld [vmem:[#allocation2 + $0xa8] sm:$0xe]  ;;  %v8079_v12 = vor.u32 %v8078_v24, %v8075_v55  ;;  %v7250_v27 = vshll.u32 %v6920_v49, 16  ;;  %v7254_v62 = vshrl.u32 %v6920_v49, 16  ;;  %v7416_v45 = vld [vmem:[#allocation2 + $0xac] sm:$0xf]  ;;  %v16079_v10 = vadd.f32 %v12414_v40, %v12413_v56 }
 0x410   : > { %v8089_v30 = vor.u32 %v8088_v3, %v8084_v6  ;;  %v7243_v29 = vrot.slane %v7241_v51, 4  ;;  %v7260_v54 = vshll.u32 %v6921_v2, 16  ;;  %v7417_v5 = vld [vmem:[#allocation2 + $0xb0] sm:$0x1]  ;;  %v11490_v57 = vrot.slane %v7415_v19, 9  ;;  %16985 = vst [vmem:[#allocation7_spill] sm:$0xff] %v16077_v22  ;;  %v16081_v2 = vpop.f32.mrf.mxu0  ;;  %v16085_v37 = vpop.f32.mrf.mxu1 }
 0x411   : > { %v13469_v35 = vld [vmem:[#allocation3 + $0x378] ss:$36 sps:$4 sm:$0xff]   ;;  %v8080_v23 = vrot.slane %v8079_v12, 4  ;;  %v7246_v33 = vrot.slane %v7244_v25, 5  ;;  %v7252_v55 = vrot.slane %v7250_v27, 5  ;;  %v7256_v24 = vrot.slane %v7254_v62, 4 }
 0x412   : > { %v13471_v31 = vld [vmem:[#allocation3 + $0x37c] ss:$36 sps:$4 sm:$0xff]   ;;  %v8090_v11 = vrot.slane %v8089_v30, 4  ;;  %v7676_v49 = vld [vmem:[#allocation2 + $0xc0] sm:$0xf]  ;;  %v7262_v13 = vrot.slane %v7260_v54, 5  ;;  %v16091_v25 = vadd.f32 %v16025_v46, %v15872_v0  ;;  %v12420_v46 = vpop.f32.mrf.mxu1  ;;  %v16123_v22 = vadd.f32 %v16043_v32, %v15872_v0 }
 0x413   : > { %10570 = vmatprep.mubr.bf16.mxu0 %v13471_v31  ;;  %v8085_v3 = vsel %vm13709_vm5, %v8080_v23, %v8084_v6  ;;  %v7565_v51 = vrot.slane %v7416_v45, 5  ;;  %v7568_v19 = vrot.slane %v7417_v5, 5  ;;  %v7677_v12 = vld [vmem:[#allocation2 + $0xc4] sm:$0xf]  ;;  %7708 = vst [vmem:[#allocation3 + $0x408] sm:$0xf] %v7676_v49  ;;  %v7247_v56 = vor.u32 %v7246_v33, %v7243_v29  ;;  %v16093_v45 = vpop.f32.mrf.mxu0 }
 0x414   : > { %10571 = vmatmul.mubr.bf16.gmra.mxu0 %v13469_v35  ;;  %v8095_v47 = vsel %vm13709_vm5, %v8090_v11, %v8094_v60  ;;  %8202 = vst [vmem:[#allocation3 + $0x3c4] sm:$0xf] %v8085_v3  ;;  %v7257_v40 = vor.u32 %v7256_v24, %v7252_v55  ;;  %16986 = vst [vmem:[#allocation10_spill] sm:$0xff] %v16091_v25  ;;  %v7754_v6 = vld [vmem:[#allocation2 + $0xc0] sm:$0xf]  ;;  %v16099_v29 = vadd.f32 %v16039_v53, %v16031_v38  ;;  %v16107_v53 = vpop.f32.mrf.mxu1 }
 0x415   : > { %7709 = vst [vmem:[#allocation3 + $0x42c] sm:$0xf] %v7677_v12  ;;  %v7755_v27 = vld [vmem:[#allocation2 + $0xc4] sm:$0xf]  ;;  %v7756_v62 = vld [vmem:[#allocation2 + $0xc8] sm:$0x1]  ;;  %v7566_v5 = vsel %vm13717_vm7, %v11490_v57, %v7565_v51  ;;  %v16101_v35 = vadd.f32 %v12417_v50, %v12416_v44  ;;  %v16103_v49 = vpop.f32.mrf.mxu0 }
 0x416   : > { %v13472_v30 = vld [vmem:[#allocation3 + $0x370] ss:$36 sps:$4 sm:$0xff]   ;;  %8203 = vst [vmem:[#allocation3 + $0x3e8] sm:$0xf] %v8095_v47  ;;  %v7567_v60 = vrot.slane %v7565_v51, 4  ;;  %16987 = vst [vmem:[#allocation8_spill] sm:$0xff] %v16099_v29 }
 0x417   : > { %v13474_v54 = vld [vmem:[#allocation3 + $0x374] ss:$36 sps:$4 sm:$0xff]   ;;  %v7248_v31 = vrot.slane %v7247_v56, 4  ;;  %v7258_v23 = vrot.slane %v7257_v40, 4  ;;  %7642 = vst [vmem:[#allocation3 + $0x3bc] sm:$0xf] %v7566_v5 }
 0x418   : > { %v8097_v11 = vshrl.u32 %v7754_v6, 16  ;;  %v8100_v33 = vshll.u32 %v7754_v6, 16  ;;  %v6922_v24 = vld [vmem:[#allocation2 + $0xb4] sm:$0xf]  ;;  %10409 = vmatprep.mubr.bf16.mxu1 %v13474_v54  ;;  %v7569_v57 = vsel %vm13717_vm7, %v7567_v60, %v7568_v19  ;;  %v8106_v3 = vshll.u32 %v7755_v27, 16  ;;  %v16113_v54 = vpop.f32.mrf.mxu0  ;;  %v16115_v60 = vpop.f32.mrf.mxu1  ;;  %16988 = vst [vmem:[#allocation13_spill] sm:$0xff] %v16123_v22 }
 0x419   : > { %v8110_v51 = vshrl.u32 %v7755_v27, 16  ;;  %v8116_v12 = vshll.u32 %v7756_v62, 16  ;;  %v6923_v38 = vld [vmem:[#allocation2 + $0xb8] sm:$0xf]  ;;  %10410 = vmatmul.mubr.bf16.gmra.mxu1 %v13472_v30  ;;  %v7253_v44 = vsel %vm13709_vm5, %v7248_v31, %v7252_v55  ;;  %v7263_v50 = vsel %vm13709_vm5, %v7258_v23, %v7262_v13  ;;  %7643 = vst [vmem:[#allocation3 + $0x3e0] sm:$0xf] %v7569_v57 }
 0x41a   : > { %v8099_v47 = vrot.slane %v8097_v11, 4  ;;  %v8102_v56 = vrot.slane %v8100_v33, 5  ;;  %v6924_v40 = vld [vmem:[#allocation2 + $0xbc] sm:$0x1]  ;;  %v7418_v6 = vld [vmem:[#allocation2 + $0xb4] sm:$0xe]  ;;  %v16117_v11 = vpop.f32.mrf.mxu0 }
 0x41b   : > { %7370 = vst [vmem:[#allocation3 + $0x3b8] sm:$0xf] %v7253_v44  ;;  %7371 = vst [vmem:[#allocation3 + $0x3dc] sm:$0xf] %v7263_v50  ;;  %v8108_v19 = vrot.slane %v8106_v3, 5  ;;  %v8112_v27 = vrot.slane %v8110_v51, 4  ;;  %v16119_v50 = vpop.f32.mrf.mxu1 }
 0x41c   : > { %v8118_v62 = vrot.slane %v8116_v12, 5  ;;  %v7265_v5 = vshrl.u32 %v6922_v24, 16  ;;  %v7419_v30 = vld [vmem:[#allocation2 + $0xb8] sm:$0xf]  ;;  %v8103_v55 = vor.u32 %v8102_v56, %v8099_v47  ;;  %v7268_v31 = vshll.u32 %v6922_v24, 16  ;;  %v16132_v47 = vpop.f32.mrf.mxu0 }
 0x41d   : > { %v7274_v20 = vshll.u32 %v6923_v38, 16  ;;  %v7278_v13 = vshrl.u32 %v6923_v38, 16  ;;  %v7420_v23 = vld [vmem:[#allocation2 + $0xbc] sm:$0x1]  ;;  %v8113_v33 = vor.u32 %v8112_v27, %v8108_v19  ;;  %v7284_v34 = vshll.u32 %v6924_v40, 16  ;;  %v16134_v58 = vpop.f32.mrf.mxu1 }
 0x41e   : > { %v7267_v57 = vrot.slane %v7265_v5, 4  ;;  %v11491_v29 = vrot.slane %v7418_v6, 9  ;;  %v6925_v44 = vld [vmem:[#allocation2 + $0xc0] sm:$0xf]  ;;  %v13476_v3 = vld [vmem:[#allocation3 + $0x3c0] ss:$36 sps:$4 sm:$0xff]   ;;  %v16127_v24 = vadd.f32 %v16059_v63, %v16053_v14  ;;  %v16130_v38 = vadd.f32 %v12420_v46, %v16085_v37 }
 0x41f   : > { %v13478_v51 = vld [vmem:[#allocation3 + $0x3c4] ss:$36 sps:$4 sm:$0xff]   ;;  %v8104_v12 = vrot.slane %v8103_v55, 4  ;;  %v8114_v56 = vrot.slane %v8113_v33, 4  ;;  %v7270_v40 = vrot.slane %v7268_v31, 5  ;;  %v7276_v6 = vrot.slane %v7274_v20, 5 }
 0x420   : > { %16989 = vst [vmem:[#allocation11_spill] sm:$0xff] %v16127_v24  ;;  %v7280_v27 = vrot.slane %v7278_v13, 4  ;;  %v6926_v5 = vld [vmem:[#allocation2 + $0xc4] sm:$0xf]  ;;  %10578 = vmatprep.mubr.bf16.mxu0 %v13478_v51  ;;  %v7286_v32 = vrot.slane %v7284_v34, 5  ;;  %v7572_v55 = vrot.slane %v7419_v30, 5  ;;  %v16138_v24 = vpop.f32.mrf.mxu0  ;;  %v16142_v51 = vpop.f32.mrf.mxu1 }
 0x421   : > { %v8109_v0 = vsel %vm13709_vm5, %v8104_v12, %v8108_v19  ;;  %v7575_v14 = vrot.slane %v7420_v23, 5  ;;  %v6927_v63 = vld [vmem:[#allocation2 + $0xc8] sm:$0x1]  ;;  %10579 = vmatmul.mubr.bf16.gmra.mxu0 %v13476_v3  ;;  %v8119_v37 = vsel %vm13709_vm5, %v8114_v56, %v8118_v62  ;;  %v7271_v20 = vor.u32 %v7270_v40, %v7267_v57  ;;  %v7421_v13 = vld [vmem:[#allocation2 + $0xc0] sm:$0xe] }
 0x422   : > { %8204 = vst [vmem:[#allocation3 + $0x40c] sm:$0xf] %v8109_v0  ;;  %v7281_v46 = vor.u32 %v7280_v27, %v7276_v6  ;;  %v7289_v31 = vshrl.u32 %v6925_v44, 16  ;;  %v7422_v33 = vld [vmem:[#allocation2 + $0xc4] sm:$0xf]  ;;  %v7573_v34 = vsel %vm13717_vm7, %v11491_v29, %v7572_v55  ;;  %v7574_v19 = vrot.slane %v7572_v55, 4  ;;  %v16155_v57 = vpop.f32.mrf.mxu0  ;;  %v16157_v29 = vpop.f32.mrf.mxu1 }
 0x423   : > { %v13479_v9 = vld [vmem:[#allocation3 + $0x3b8] ss:$36 sps:$4 sm:$0xff]   ;;  %8205 = vst [vmem:[#allocation3 + $0x430] sm:$0xf] %v8119_v37  ;;  %v16149_v30 = vld [vmem:[%s16856_s4] ss:$0 sm:$0xff] }
 0x424   : > { %v16153_v62 = vadd.f32 %v16149_v30, %v16051_v48  ;;  %v7292_v23 = vshll.u32 %v6925_v44, 16  ;;  %v13481_v3 = vld [vmem:[#allocation3 + $0x3bc] ss:$36 sps:$4 sm:$0xff]   ;;  %v7272_v12 = vrot.slane %v7271_v20, 4  ;;  %v7282_v56 = vrot.slane %v7281_v46, 4  ;;  %v16161_v48 = vpop.f32.mrf.mxu0 }
 0x425   : > { %7644 = vst [vmem:[#allocation3 + $0x404] sm:$0xf] %v7573_v34  ;;  %v7291_v40 = vrot.slane %v7289_v31, 4  ;;  %v7298_v27 = vshll.u32 %v6926_v5, 16  ;;  %v7576_v0 = vsel %vm13717_vm7, %v7574_v19, %v7575_v14  ;;  %v7302_v37 = vshrl.u32 %v6926_v5, 16  ;;  %10417 = vmatprep.mubr.bf16.mxu1 %v13481_v3  ;;  %v16167_v34 = vpop.f32.mrf.mxu1 }
 0x426   : > { %16990 = vst [vmem:[#allocation14_spill] sm:$0xff] %v16153_v62  ;;  %v7294_v55 = vrot.slane %v7292_v23, 5  ;;  %v7308_v22 = vshll.u32 %v6927_v63, 16  ;;  %v7423_v26 = vld [vmem:[#allocation2 + $0xc8] sm:$0x1]  ;;  %v7277_v44 = vsel %vm13709_vm5, %v7272_v12, %v7276_v6  ;;  %v7287_v20 = vsel %vm13709_vm5, %v7282_v56, %v7286_v32  ;;  %10418 = vmatmul.mubr.bf16.gmra.mxu1 %v13479_v9  ;;  %v16169_v3 = vpop.f32.mrf.mxu0 }
 0x427   : > { %7645 = vst [vmem:[#allocation3 + $0x428] sm:$0xf] %v7576_v0  ;;  %v7300_v46 = vrot.slane %v7298_v27, 5  ;;  %v11492_v31 = vrot.slane %v7421_v13, 9  ;;  %7372 = vst [vmem:[#allocation3 + $0x400] sm:$0xf] %v7277_v44  ;;  %v16173_v13 = vadd.f32 %v16069_v36, %v16067_v43  ;;  %v16177_v9 = vadd.f32 %v16115_v60, %v16107_v53  ;;  %v16179_v56 = vpop.f32.mrf.mxu1 }
 0x428   : > { %7373 = vst [vmem:[#allocation3 + $0x424] sm:$0xf] %v7287_v20  ;;  %v7295_v5 = vor.u32 %v7294_v55, %v7291_v40  ;;  %v7304_v14 = vrot.slane %v7302_v37, 4  ;;  %v7310_v63 = vrot.slane %v7308_v22, 5  ;;  %v7579_v19 = vrot.slane %v7422_v33, 5  ;;  %v16183_v0 = vpop.f32.mrf.mxu0 }
 0x429   : > { %v8208_v23 = vld [vmem:[#allocation2 + $0x18] sm:$0xe]  ;;  %v7582_v62 = vrot.slane %v7423_v26, 5  ;;  %v13494_v6 = vld [vmem:[#allocation3 + $0x454] ss:$36 sps:$4 sm:$0xff]   ;;  %v16187_v43 = vadd.f32 %v16149_v30, %v16079_v10  ;;  %v16191_v53 = vadd.f32 %v16093_v45, %v16081_v2  ;;  %v16195_v60 = vadd.f32 %v16134_v58, %v16119_v50  ;;  %v16197_v44 = vpop.f32.mrf.mxu1 }
 0x42a   : > { %v8209_v12 = vld [vmem:[#allocation2 + $0x1c] sm:$0xf]  ;;  %v8210_v25 = vld [vmem:[#allocation2 + $0x20] sm:$0x1]  ;;  %v11493_v32 = vrot.slane %v8208_v23, 9  ;;  %v7296_v22 = vrot.slane %v7295_v5, 4  ;;  %v7305_v33 = vor.u32 %v7304_v14, %v7300_v46  ;;  %v7580_v40 = vsel %vm13717_vm7, %v11492_v31, %v7579_v19  ;;  %v16203_v23 = vpop.f32.mrf.mxu0 }
 0x42b   : > { %v7581_v26 = vrot.slane %v7579_v19, 4  ;;  %v8211_v27 = vld [vmem:[#allocation2 + $0x24] sm:$0xe]  ;;  %7646 = vst [vmem:[#allocation3 + $0x44c] sm:$0xf] %v7580_v40  ;;  %v8306_v36 = vrot.slane %v8209_v12, 5 }
 0x42c   : > { %v13482_v55 = vld [vmem:[#allocation3 + $0x408] ss:$36 sps:$4 sm:$0xff]   ;;  %v7301_v20 = vsel %vm13709_vm5, %v7296_v22, %v7300_v46  ;;  %v7306_v31 = vrot.slane %v7305_v33, 4  ;;  %v8309_v10 = vrot.slane %v8210_v25, 5  ;;  %v8212_v14 = vld [vmem:[#allocation2 + $0x28] sm:$0xf]  ;;  %v16207_v46 = vpop.f32.mrf.mxu1 }
 0x42d   : > { %v13484_v37 = vld [vmem:[#allocation3 + $0x40c] ss:$36 sps:$4 sm:$0xff]   ;;  %v7583_v5 = vsel %vm13717_vm7, %v7581_v26, %v7582_v62  ;;  %v8213_v19 = vld [vmem:[#allocation2 + $0x2c] sm:$0x1]  ;;  %7374 = vst [vmem:[#allocation3 + $0x448] sm:$0xf] %v7301_v20  ;;  %v8307_v58 = vsel %vm13717_vm7, %v11493_v32, %v8306_v36  ;;  %v16213_v62 = vadd.f32 %v16149_v30, %v16101_v35  ;;  %v16215_v32 = vpop.f32.mrf.mxu0 }
 0x42e   : > { %10586 = vmatprep.mubr.bf16.mxu0 %v13484_v37  ;;  %7647 = vst [vmem:[#allocation3 + $0x470] sm:$0xf] %v7583_v5  ;;  %v8308_v2 = vrot.slane %v8306_v36, 4  ;;  %v11494_v45 = vrot.slane %v8211_v27, 9  ;;  %v8313_v50 = vrot.slane %v8212_v14, 5  ;;  %v7311_v25 = vsel %vm13709_vm5, %v7306_v31, %v7310_v63  ;;  %v12437_v35 = vpop.f32.mrf.mxu1 }
 0x42f   : > { %v8214_v12 = vld [vmem:[#allocation2 + $0x30] sm:$0xe]  ;;  %10587 = vmatmul.mubr.bf16.gmra.mxu0 %v13482_v55  ;;  %8448 = vst [vmem:[#allocation3 + $0x20] sm:$0xf] %v8307_v58  ;;  %v8316_v22 = vrot.slane %v8213_v19, 5  ;;  %v16223_v5 = vadd.f32 %v16113_v54, %v16103_v49  ;;  %v16231_v19 = vpop.f32.mrf.mxu0 }
 0x430   : > { %v8215_v33 = vld [vmem:[#allocation2 + $0x34] sm:$0xf]  ;;  %v8216_v40 = vld [vmem:[#allocation2 + $0x38] sm:$0x1]  ;;  %v11495_v26 = vrot.slane %v8214_v12, 9  ;;  %10594 = vmatprep.mubr.bf16.mxu0 %v13494_v6  ;;  %v8310_v55 = vsel %vm13717_vm7, %v8308_v2, %v8309_v10  ;;  %v8314_v28 = vsel %vm13717_vm7, %v11494_v45, %v8313_v50  ;;  %v8315_v63 = vrot.slane %v8313_v50, 4  ;;  %v12438_v12 = vpop.f32.mrf.mxu1 }
 0x431   : > { %v13485_v27 = vld [vmem:[#allocation3 + $0x400] ss:$36 sps:$4 sm:$0xff]   ;;  %7375 = vst [vmem:[#allocation3 + $0x46c] sm:$0xf] %v7311_v25  ;;  %v8320_v37 = vrot.slane %v8215_v33, 5  ;;  %v8323_v31 = vrot.slane %v8216_v40, 5  ;;  %v12430_v6 = vadd.f32 %v16157_v29, %v16142_v51  ;;  %v16229_v10 = vadd.f32 %v16132_v47, %v16117_v11  ;;  %v12558_v33 = vpop.f32.mrf.mxu0 }
 0x432   : > { %v13487_v36 = vld [vmem:[#allocation3 + $0x404] ss:$36 sps:$4 sm:$0xff]   ;;  %v13492_v20 = vld [vmem:[#allocation3 + $0x450] ss:$36 sps:$4 sm:$0xff]   ;;  %8449 = vst [vmem:[#allocation3 + $0x44] sm:$0xf] %v8310_v55  ;;  %v8317_v58 = vsel %vm13717_vm7, %v8315_v63, %v8316_v22  ;;  %v16239_v51 = vadd.f32 %v16149_v30, %v16130_v38  ;;  %v16243_v11 = vadd.f32 %v16149_v30, %v16177_v9  ;;  %v12433_v22 = vadd.f32 %v16179_v56, %v16167_v34  ;;  %v12440_v63 = vpop.f32.mrf.mxu1 }
 0x433   : > { %8450 = vst [vmem:[#allocation3 + $0x68] sm:$0xf] %v8314_v28  ;;  %v8217_v14 = vld [vmem:[#allocation2 + $0x3c] sm:$0xe]  ;;  %v8321_v2 = vsel %vm13717_vm7, %v11495_v26, %v8320_v37  ;;  %v8322_v45 = vrot.slane %v8320_v37, 4  ;;  %10425 = vmatprep.mubr.bf16.mxu1 %v13487_v36  ;;  %v16251_v9 = vadd.f32 %v16155_v57, %v16138_v24  ;;  %v12436_v24 = vadd.f32 %v16207_v46, %v16197_v44 }
 0x434   : > { %v8218_v50 = vld [vmem:[#allocation2 + $0x40] sm:$0xf]  ;;  %v8219_v49 = vld [vmem:[#allocation2 + $0x44] sm:$0x1]  ;;  %v11496_v54 = vrot.slane %v8217_v14, 9  ;;  %10426 = vmatmul.mubr.bf16.gmra.mxu1 %v13485_v27  ;;  %v12559_v14 = vpop.f32.mrf.mxu0  ;;  %v16269_v44 = vadd.f32 %v16149_v30, %v16195_v60 }
 0x435   : > { %8451 = vst [vmem:[#allocation3 + $0x8c] sm:$0xf] %v8317_v58  ;;  %8452 = vst [vmem:[#allocation3 + $0xb0] sm:$0xf] %v8321_v2  ;;  %v8327_v47 = vrot.slane %v8218_v50, 5  ;;  %v8324_v40 = vsel %vm13717_vm7, %v8322_v45, %v8323_v31  ;;  %v8330_v34 = vrot.slane %v8219_v49, 5  ;;  %v12441_v45 = vpop.f32.mrf.mxu1 }
 0x436   : > { %v8220_v29 = vld [vmem:[#allocation2 + $0x48] sm:$0xe]  ;;  %v8221_v25 = vld [vmem:[#allocation2 + $0x4c] sm:$0xf]  ;;  %v8222_v26 = vld [vmem:[#allocation2 + $0x50] sm:$0x1] }
 0x437   : > { %v11497_v38 = vrot.slane %v8220_v29, 9  ;;  %v8334_v55 = vrot.slane %v8221_v25, 5  ;;  %v8223_v28 = vld [vmem:[#allocation2 + $0x54] sm:$0xe]  ;;  %8453 = vst [vmem:[#allocation3 + $0xd4] sm:$0xf] %v8324_v40  ;;  %v8328_v37 = vsel %vm13717_vm7, %v11496_v54, %v8327_v47  ;;  %10595 = vmatmul.mubr.bf16.gmra.mxu0 %v13492_v20  ;;  %v16265_v29 = vadd.f32 %v12438_v12, %v12437_v35  ;;  %v12561_v25 = vpop.f32.mrf.mxu0 }
 0x438   : > { %v8329_v36 = vrot.slane %v8327_v47, 4  ;;  %v8337_v56 = vrot.slane %v8222_v26, 5  ;;  %v8224_v27 = vld [vmem:[#allocation2 + $0x58] sm:$0xf]  ;;  %8454 = vst [vmem:[#allocation3 + $0xf8] sm:$0xf] %v8328_v37  ;;  %v16263_v47 = vadd.f32 %v16169_v3, %v16161_v48  ;;  %v16275_v20 = vadd.f32 %v16203_v23, %v16183_v0  ;;  %v12443_v48 = vpop.f32.mrf.mxu1 }
 0x439   : > { %v8335_v31 = vsel %vm13717_vm7, %v11497_v38, %v8334_v55  ;;  %v8336_v58 = vrot.slane %v8334_v55, 4  ;;  %v8225_v57 = vld [vmem:[#allocation2 + $0x5c] sm:$0x1]  ;;  %v11498_v2 = vrot.slane %v8223_v28, 9  ;;  %v13491_v50 = vld [vmem:[#allocation3 + $0x44c] ss:$36 sps:$4 sm:$0xff]   ;;  %v16277_v26 = vadd.f32 %v12441_v45, %v12440_v63  ;;  %v12562_v28 = vpop.f32.mrf.mxu0 }
 0x43a   : > { %v8331_v54 = vsel %vm13717_vm7, %v8329_v36, %v8330_v34  ;;  %8456 = vst [vmem:[#allocation3 + $0x140] sm:$0xf] %v8335_v31  ;;  %v8341_v49 = vrot.slane %v8224_v27, 5  ;;  %v13489_v40 = vld [vmem:[#allocation3 + $0x448] ss:$36 sps:$4 sm:$0xff]   ;;  %10433 = vmatprep.mubr.bf16.mxu1 %v13491_v50  ;;  %v16280_v3 = vadd.f32 %v16149_v30, %v12430_v6  ;;  %v8344_v12 = vrot.slane %v8225_v57, 5  ;;  %v12444_v6 = vpop.f32.mrf.mxu1 }
 0x43b   : > { %8455 = vst [vmem:[#allocation3 + $0x11c] sm:$0xf] %v8331_v54  ;;  %v8338_v46 = vsel %vm13717_vm7, %v8336_v58, %v8337_v56  ;;  %v8226_v38 = vld [vmem:[#allocation2 + $0x60] sm:$0xe]  ;;  %v8227_v55 = vld [vmem:[#allocation2 + $0x64] sm:$0xf]  ;;  %v16285_v0 = vadd.f32 %v16149_v30, %v12433_v22  ;;  %v16289_v23 = vadd.f32 %v16231_v19, %v16215_v32  ;;  %v16291_v63 = vadd.f32 %v12559_v14, %v12558_v33  ;;  %v12564_v22 = vpop.f32.mrf.mxu0 }
 0x43c   : > { %8457 = vst [vmem:[#allocation3 + $0x164] sm:$0xf] %v8338_v46  ;;  %v8342_v60 = vsel %vm13717_vm7, %v11498_v2, %v8341_v49  ;;  %v8343_v35 = vrot.slane %v8341_v49, 4  ;;  %v13495_v37 = vld [vmem:[#allocation3 + $0x20] ss:$36 sps:$4 sm:$0xff]   ;;  %v16293_v36 = vadd.f32 %v12562_v28, %v12561_v25  ;;  %v11499_v27 = vrot.slane %v8226_v38, 9  ;;  %10434 = vmatmul.mubr.bf16.gmra.mxu1 %v13489_v40  ;;  %v12446_v19 = vpop.f32.mrf.mxu1 }
 0x43d   : > { %8458 = vst [vmem:[#allocation3 + $0x188] sm:$0xf] %v8342_v60  ;;  %v8228_v56 = vld [vmem:[#allocation2 + $0x68] sm:$0x1]  ;;  %v8348_v31 = vrot.slane %v8227_v55, 5  ;;  %v16297_v57 = vadd.f32 %v12444_v6, %v12443_v48  ;;  %v16300_v2 = vadd.f32 %v16149_v30, %v12436_v24  ;;  %v16304_v33 = vadd.f32 %v15843_v7, %v15943_v59  ;;  %12897 = vmatprep.mubr.bf16.mxu1 %v13495_v37  ;;  %v12565_v24 = vpop.f32.mrf.mxu0 }
 0x43e   : > { %v8345_v34 = vsel %vm13717_vm7, %v8343_v35, %v8344_v12  ;;  %v8229_v58 = vld [vmem:[#allocation2 + $0x6c] sm:$0xe]  ;;  %v16308_v14 = vadd.f32 %v15915_v42, %v15965_v15  ;;  %v8351_v54 = vrot.slane %v8228_v56, 5  ;;  %v8230_v49 = vld [vmem:[#allocation2 + $0x70] sm:$0xf]  ;;  %v16314_v25 = vadd.f32 %v15927_v8, %v15975_v16  ;;  %v12447_v59 = vpop.f32.mrf.mxu1 }
 0x43f   : > { %8459 = vst [vmem:[#allocation3 + $0x1ac] sm:$0xf] %v8345_v34  ;;  %v11500_v32 = vrot.slane %v8229_v58, 9  ;;  %v8349_v45 = vsel %vm13717_vm7, %v11499_v27, %v8348_v31  ;;  %v8350_v50 = vrot.slane %v8348_v31, 4  ;;  %v8231_v40 = vld [vmem:[#allocation2 + $0x74] sm:$0x1]  ;;  %v16316_v46 = vadd.f32 %v12565_v24, %v12564_v22  ;;  %v12567_v16 = vpop.f32.mrf.mxu0 }
 0x440   : > { %8460 = vst [vmem:[#allocation3 + $0x1d0] sm:$0xf] %v8349_v45  ;;  %v8355_v7 = vrot.slane %v8230_v49, 5  ;;  %v16320_v42 = vadd.f32 %v15996_v41, %v16021_v17  ;;  %v16324_v15 = vadd.f32 %v15960_v21, %v16035_v18  ;;  %v8358_v60 = vrot.slane %v8231_v40, 5  ;;  %v13496_v12 = vld [vmem:[#allocation3 + $0x68] ss:$36 sps:$4 sm:$0xff]   ;;  %v12449_v38 = vpop.f32.mrf.mxu1 }
 0x441   : > { %v8352_v48 = vsel %vm13717_vm7, %v8350_v50, %v8351_v54  ;;  %v16328_v8 = vadd.f32 %v12447_v59, %v12446_v19  ;;  %v16332_v35 = vadd.f32 %v15983_v1, %v16065_v4  ;;  %v16338_v21 = vadd.f32 %v15988_v39, %v16073_v61  ;;  %v16991_v18 = vld [vmem:[#allocation10_spill] sm:$0xff]  ;;  %v8232_v1 = vld [vmem:[#allocation2 + $0x78] sm:$0xe]  ;;  %v8233_v4 = vld [vmem:[#allocation2 + $0x7c] sm:$0xf]  ;;  %v12568_v6 = vpop.f32.mrf.mxu0 }
 0x442   : > { %8461 = vst [vmem:[#allocation3 + $0x1f4] sm:$0xf] %v8352_v48  ;;  %v8356_v41 = vsel %vm13717_vm7, %v11500_v32, %v8355_v7  ;;  %v8357_v17 = vrot.slane %v8355_v7, 4  ;;  %v16992_v55 = vld [vmem:[#allocation26_spill] sm:$0xff]  ;;  %v10074_v37 = vadd.f32 %v16149_v30, %v16265_v29  ;;  %v16993_v34 = vld [vmem:[#allocation13_spill] sm:$0xff]  ;;  %v16994_v56 = vld [vmem:[#allocation23_spill] sm:$0xff]  ;;  %v12450_v54 = vpop.f32.mrf.mxu1  ;;  %v16360_v49 = vadd.f32 %v12568_v6, %v12567_v16 }
 0x443   : > { %v16342_v28 = vadd.f32 %v16992_v55, %v16991_v18  ;;  %8462 = vst [vmem:[#allocation3 + $0x218] sm:$0xf] %v8356_v41  ;;  %v16348_v27 = vadd.f32 %v16994_v56, %v16993_v34  ;;  %v16995_v31 = vld [vmem:[#allocation14_spill] sm:$0xff]  ;;  %v16996_v58 = vld [vmem:[#allocation9_spill] sm:$0xff]  ;;  %v16997_v39 = vld [vmem:[#allocation7_spill] sm:$0xff]  ;;  %v11501_v19 = vrot.slane %v8232_v1, 9  ;;  %v16362_v59 = vadd.f32 %v12450_v54, %v12449_v38  ;;  %v12570_v48 = vpop.f32.mrf.mxu0 }
 0x444   : > { %v16352_v22 = vadd.f32 %v16996_v58, %v16995_v31  ;;  %v16356_v61 = vadd.f32 %v16997_v39, %v16187_v43  ;;  %v8359_v32 = vsel %vm13717_vm7, %v8357_v17, %v8358_v60  ;;  %v8234_v29 = vld [vmem:[#allocation2 + $0x80] sm:$0x1]  ;;  %v8362_v45 = vrot.slane %v8233_v4, 5  ;;  %v8235_v50 = vld [vmem:[#allocation2 + $0x84] sm:$0xe]  ;;  %v16998_v43 = vld [vmem:[#allocation8_spill] sm:$0xff]  ;;  %12898 = vmatmul.mubr.bf16.vlgmr.msra.gmra.mxu1 %v13496_v12  ;;  %v12452_v16 = vpop.f32.mrf.mxu1 }
 0x445   : > { %v13497_v24 = vld [vmem:[#allocation3 + $0xb0] ss:$36 sps:$4 sm:$0xff]   ;;  %8463 = vst [vmem:[#allocation3 + $0x23c] sm:$0xf] %v8359_v32  ;;  %v8365_v40 = vrot.slane %v8234_v29, 5  ;;  %v11502_v7 = vrot.slane %v8235_v50, 9  ;;  %v16366_v41 = vadd.f32 %v16998_v43, %v16213_v62  ;;  %v16376_v38 = vadd.f32 %v16173_v13, %v16243_v11  ;;  %v12571_v56 = vpop.f32.mrf.mxu0 }
 0x446   : > { %v8363_v60 = vsel %vm13717_vm7, %v11501_v19, %v8362_v45  ;;  %v8364_v17 = vrot.slane %v8362_v45, 4  ;;  %v8236_v18 = vld [vmem:[#allocation2 + $0x88] sm:$0xf]  ;;  %v8237_v55 = vld [vmem:[#allocation2 + $0x8c] sm:$0x1]  ;;  %v16999_v1 = vld [vmem:[#allocation11_spill] sm:$0xff]  ;;  %12901 = vmatprep.mubr.bf16.mxu1 %v13497_v24  ;;  %v10077_v62 = vadd.f32 %v16149_v30, %v16277_v26  ;;  %v16382_v31 = vadd.f32 %v16191_v53, %v16269_v44  ;;  %v12453_v11 = vpop.f32.mrf.mxu1 }
 0x447   : > { %v16372_v4 = vadd.f32 %v16999_v1, %v16239_v51  ;;  %8464 = vst [vmem:[#allocation3 + $0x260] sm:$0xf] %v8363_v60  ;;  %v8369_v12 = vrot.slane %v8236_v18, 5  ;;  %v8372_v6 = vrot.slane %v8237_v55, 5  ;;  %v8238_v34 = vld [vmem:[#allocation2 + $0x90] sm:$0xe]  ;;  %v16386_v32 = vadd.f32 %v12571_v56, %v12570_v48  ;;  %v12573_v45 = vpop.f32.mrf.mxu0 }
 0x448   : > { %v8366_v51 = vsel %vm13717_vm7, %v8364_v17, %v8365_v40  ;;  %v8239_v58 = vld [vmem:[#allocation2 + $0x94] sm:$0xf]  ;;  %v8240_v39 = vld [vmem:[#allocation2 + $0x98] sm:$0x1]  ;;  %v11503_v13 = vrot.slane %v8238_v34, 9  ;;  %v16390_v26 = vadd.f32 %v16223_v5, %v16280_v3  ;;  %v16394_v44 = vadd.f32 %v12453_v11, %v12452_v16  ;;  %v12455_v54 = vpop.f32.mrf.mxu1 }
 0x449   : > { %8465 = vst [vmem:[#allocation3 + $0x284] sm:$0xf] %v8366_v51  ;;  %v8370_v29 = vsel %vm13717_vm7, %v11502_v7, %v8369_v12  ;;  %v8371_v19 = vrot.slane %v8369_v12, 4  ;;  %v8376_v53 = vrot.slane %v8239_v58, 5  ;;  %v13498_v50 = vld [vmem:[#allocation3 + $0xf8] ss:$36 sps:$4 sm:$0xff]   ;;  %v16398_v40 = vadd.f32 %v16229_v10, %v16285_v0  ;;  %v12574_v55 = vpop.f32.mrf.mxu0 }
 0x44a   : > { %8466 = vst [vmem:[#allocation3 + $0x2a8] sm:$0xf] %v8370_v29  ;;  %v8241_v24 = vld [vmem:[#allocation2 + $0x9c] sm:$0xe]  ;;  %v16402_v5 = vadd.f32 %v16251_v9, %v16300_v2  ;;  %v16405_v3 = vadd.f32 %v16263_v47, %v10074_v37  ;;  %v8379_v60 = vrot.slane %v8240_v39, 5  ;;  %v12456_v2 = vpop.f32.mrf.mxu1  ;;  %v16411_v16 = vadd.f32 %v12574_v55, %v12573_v45 }
 0x44b   : > { %v8373_v7 = vsel %vm13717_vm7, %v8371_v19, %v8372_v6  ;;  %v8377_v48 = vsel %vm13717_vm7, %v11503_v13, %v8376_v53  ;;  %v8378_v43 = vrot.slane %v8376_v53, 4  ;;  %v8242_v17 = vld [vmem:[#allocation2 + $0xa0] sm:$0xf]  ;;  %v8243_v18 = vld [vmem:[#allocation2 + $0xa4] sm:$0x1]  ;;  %v11504_v0 = vrot.slane %v8241_v24, 9  ;;  %v12576_v34 = vpop.f32.mrf.mxu0 }
 0x44c   : > { %v13499_v10 = vld [vmem:[#allocation3 + $0x140] ss:$36 sps:$4 sm:$0xff]   ;;  %8467 = vst [vmem:[#allocation3 + $0x2cc] sm:$0xf] %v8373_v7  ;;  %8468 = vst [vmem:[#allocation3 + $0x2f0] sm:$0xf] %v8377_v48  ;;  %v16415_v6 = vadd.f32 %v12456_v2, %v12455_v54  ;;  %v16418_v56 = vadd.f32 %v16275_v20, %v10077_v62  ;;  %12902 = vmatmul.mubr.bf16.gmra.mxu1 %v13498_v50  ;;  %v12458_v11 = vpop.f32.mrf.mxu1  ;;  %v10082_v54 = vadd.f32 %v16149_v30, %v16297_v57 }
 0x44d   : > { %v8383_v9 = vrot.slane %v8242_v17, 5  ;;  %v8380_v47 = vsel %vm13717_vm7, %v8378_v43, %v8379_v60  ;;  %v8386_v37 = vrot.slane %v8243_v18, 5  ;;  %v8244_v1 = vld [vmem:[#allocation2 + $0xa8] sm:$0xe]  ;;  %v8245_v12 = vld [vmem:[#allocation2 + $0xac] sm:$0xf]  ;;  %12905 = vmatprep.mubr.bf16.mxu1 %v13499_v10  ;;  %v12577_v45 = vpop.f32.mrf.mxu0 }
 0x44e   : > { %8469 = vst [vmem:[#allocation3 + $0x314] sm:$0xf] %v8380_v47  ;;  %v8246_v39 = vld [vmem:[#allocation2 + $0xb0] sm:$0x1]  ;;  %v11505_v13 = vrot.slane %v8244_v1, 9  ;;  %v8390_v29 = vrot.slane %v8245_v12, 5  ;;  %v12459_v50 = vpop.f32.mrf.mxu1  ;;  %v16426_v7 = vadd.f32 %v12577_v45, %v12576_v34  ;;  %v16443_v45 = vadd.f32 %v16289_v23, %v10082_v54 }
 0x44f   : > { %v8384_v51 = vsel %vm13717_vm7, %v11504_v0, %v8383_v9  ;;  %v8385_v58 = vrot.slane %v8383_v9, 4  ;;  %v8247_v19 = vld [vmem:[#allocation2 + $0xb4] sm:$0xe]  ;;  %v8248_v53 = vld [vmem:[#allocation2 + $0xb8] sm:$0xf]  ;;  %v8393_v62 = vrot.slane %v8246_v39, 5  ;;  %v16430_v60 = vadd.f32 %v12459_v50, %v12458_v11  ;;  %v12579_v55 = vpop.f32.mrf.mxu0 }
 0x450   : > { %8470 = vst [vmem:[#allocation3 + $0x338] sm:$0xf] %v8384_v51  ;;  %v8249_v24 = vld [vmem:[#allocation2 + $0xbc] sm:$0x1]  ;;  %v8391_v48 = vsel %vm13717_vm7, %v11505_v13, %v8390_v29  ;;  %v8392_v43 = vrot.slane %v8390_v29, 4  ;;  %v11506_v17 = vrot.slane %v8247_v19, 9  ;;  %v12461_v57 = vpop.f32.mrf.mxu1  ;;  %v10085_v11 = vadd.f32 %v16149_v30, %v16328_v8 }
 0x451   : > { %v8387_v20 = vsel %vm13717_vm7, %v8385_v58, %v8386_v37  ;;  %v8250_v18 = vld [vmem:[#allocation2 + $0xc0] sm:$0xe]  ;;  %8472 = vst [vmem:[#allocation3 + $0x380] sm:$0xf] %v8391_v48  ;;  %v8397_v10 = vrot.slane %v8248_v53, 5  ;;  %v8400_v0 = vrot.slane %v8249_v24, 5  ;;  %v12580_v37 = vpop.f32.mrf.mxu0 }
 0x452   : > { %8471 = vst [vmem:[#allocation3 + $0x35c] sm:$0xf] %v8387_v20  ;;  %v8251_v9 = vld [vmem:[#allocation2 + $0xc4] sm:$0xf]  ;;  %v8394_v2 = vsel %vm13717_vm7, %v8392_v43, %v8393_v62  ;;  %v8252_v47 = vld [vmem:[#allocation2 + $0xc8] sm:$0x1]  ;;  %v12462_v39 = vpop.f32.mrf.mxu1  ;;  %v16440_v19 = vadd.f32 %v12580_v37, %v12579_v55  ;;  %v16456_v55 = vadd.f32 %v16291_v63, %v10085_v11 }
 0x453   : > { %v13500_v1 = vld [vmem:[#allocation3 + $0x188] ss:$36 sps:$4 sm:$0xff]   ;;  %8473 = vst [vmem:[#allocation3 + $0x3a4] sm:$0xf] %v8394_v2  ;;  %v8398_v12 = vsel %vm13717_vm7, %v11506_v17, %v8397_v10  ;;  %v8399_v34 = vrot.slane %v8397_v10, 4  ;;  %v11507_v51 = vrot.slane %v8250_v18, 9  ;;  %v16438_v29 = vadd.f32 %v12462_v39, %v12461_v57  ;;  %v12582_v53 = vpop.f32.mrf.mxu0 }
 0x454   : > { %v8404_v58 = vrot.slane %v8251_v9, 5  ;;  %v13501_v13 = vld [vmem:[#allocation3 + $0x1d0] ss:$36 sps:$4 sm:$0xff]   ;;  %8474 = vst [vmem:[#allocation3 + $0x3c8] sm:$0xf] %v8398_v12  ;;  %12906 = vmatmul.mubr.bf16.gmra.mxu1 %v13500_v1  ;;  %v8407_v24 = vrot.slane %v8252_v47, 5  ;;  %v12464_v48 = vpop.f32.mrf.mxu1  ;;  %v10090_v10 = vadd.f32 %v16149_v30, %v16362_v59 }
 0x455   : > { %v8401_v20 = vsel %vm13717_vm7, %v8399_v34, %v8400_v0  ;;  %12909 = vmatprep.mubr.bf16.mxu1 %v13501_v13  ;;  %v12583_v8 = vpop.f32.mrf.mxu0  ;;  %v13502_v9 = vld [vmem:[#allocation3 + $0x218] ss:$36 sps:$4 sm:$0xff]   ;;  %v13503_v52 = vld [vmem:[#allocation3 + $0x260] ss:$36 sps:$4 sm:$0xff]  }
 0x456   : > { %v8405_v62 = vsel %vm13717_vm7, %v11507_v51, %v8404_v58  ;;  %v8406_v50 = vrot.slane %v8404_v58, 4  ;;  %8475 = vst [vmem:[#allocation3 + $0x3ec] sm:$0xf] %v8401_v20  ;;  %v12465_v17 = vpop.f32.mrf.mxu1  ;;  %v16451_v23 = vadd.f32 %v12583_v8, %v12582_v53  ;;  %v16465_v63 = vadd.f32 %v16293_v36, %v10090_v10  ;;  %v13504_v20 = vld [vmem:[#allocation3 + $0x2a8] ss:$36 sps:$4 sm:$0xff]  }
 0x457   : > { %8476 = vst [vmem:[#allocation3 + $0x410] sm:$0xf] %v8405_v62  ;;  %v16453_v54 = vadd.f32 %v12465_v17, %v12464_v48  ;;  %v12713_v18 = vpop.f32.mrf.mxu0  ;;  %v10093_v51 = vadd.f32 %v16149_v30, %v16394_v44  ;;  %v13505_v36 = vld [vmem:[#allocation3 + $0x2f0] ss:$36 sps:$4 sm:$0xff]   ;;  %v10098_v8 = vadd.f32 %v16149_v30, %v16415_v6 }
 0x458   : > { %v8408_v43 = vsel %vm13717_vm7, %v8406_v50, %v8407_v24  ;;  %v12467_v57 = vpop.f32.mrf.mxu1 }
 0x459   : > { %8477 = vst [vmem:[#allocation3 + $0x434] sm:$0xf] %v8408_v43  ;;  %v12714_v0 = vpop.f32.mrf.mxu0  ;;  %v16478_v50 = vadd.f32 %v16316_v46, %v10093_v51  ;;  %v17000_v43 = vld [vmem:[#allocation24_spill] sm:$0xff]  ;;  %v17001_v46 = vld [vmem:[#allocation25_spill] sm:$0xff] }
 0x45a   : > { %v12468_v2 = vpop.f32.mrf.mxu1  ;;  %v16460_v47 = vadd.f32 %v12714_v0, %v12713_v18  ;;  %v13507_v6 = vld [vmem:[#allocation3 + $0x380] ss:$36 sps:$4 sm:$0xff]  }
 0x45b   : > { %v16462_v37 = vadd.f32 %v12468_v2, %v12467_v57  ;;  %v12716_v1 = vpop.f32.mrf.mxu0  ;;  %v16493_v2 = vadd.f32 %v16360_v49, %v10098_v8 }
 0x45c   : > { %12910 = vmatmul.mubr.bf16.gmra.mxu1 %v13502_v9  ;;  %v12470_v12 = vpop.f32.mrf.mxu1 }
 0x45d   : > { %12913 = vmatprep.mubr.bf16.mxu1 %v13503_v52  ;;  %v12717_v34 = vpop.f32.mrf.mxu0  ;;  %v13506_v52 = vld [vmem:[#allocation3 + $0x338] ss:$36 sps:$4 sm:$0xff]  }
 0x45e   : > { %v12471_v59 = vpop.f32.mrf.mxu1  ;;  %v16469_v58 = vadd.f32 %v12717_v34, %v12716_v1  ;;  %v10101_v1 = vadd.f32 %v16149_v30, %v16430_v60  ;;  %v10106_v60 = vadd.f32 %v16149_v30, %v16438_v29 }
 0x45f   : > { %v16471_v39 = vadd.f32 %v12471_v59, %v12470_v12  ;;  %v16473_v13 = vpop.f32.mrf.mxu0 }
 0x460   : > { %v12601_v11 = vpop.f32.mrf.mxu1 }
 0x461   : > { %v16475_v53 = vpop.f32.mrf.mxu0 }
 0x462   : > { %v12602_v62 = vpop.f32.mrf.mxu1 }
 0x463   : > { %v12603_v24 = vadd.f32 %v12602_v62, %v12601_v11  ;;  %v16480_v48 = vpop.f32.mrf.mxu0 }
 0x464   : > { %12914 = vmatmul.mubr.bf16.gmra.mxu1 %v13504_v20  ;;  %v12604_v44 = vpop.f32.mrf.mxu1 }
 0x465   : > { %12917 = vmatprep.mubr.bf16.mxu1 %v13505_v36  ;;  %v16485_v17 = vadd.f32 %v12603_v24, %v17000_v43  ;;  %v16487_v10 = vpop.f32.mrf.mxu0  ;;  %v16501_v36 = vadd.f32 %v16386_v32, %v10101_v1  ;;  %v16513_v32 = vadd.f32 %v16411_v16, %v10106_v60 }
 0x466   : > { %v12605_v18 = vpop.f32.mrf.mxu1 }
 0x467   : > { %v12606_v57 = vadd.f32 %v12605_v18, %v12604_v44  ;;  %v12725_v51 = vpop.f32.mrf.mxu0  ;;  %v13508_v18 = vld [vmem:[#allocation3 + $0x3c8] ss:$36 sps:$4 sm:$0xff]  }
 0x468   : > { %v12607_v0 = vpop.f32.mrf.mxu1 }
 0x469   : > { %v16490_v9 = vadd.f32 %v12606_v57, %v17001_v46  ;;  %v12726_v20 = vpop.f32.mrf.mxu0  ;;  %v13509_v57 = vld [vmem:[#allocation3 + $0x410] ss:$36 sps:$4 sm:$0xff]  }
 0x46a   : > { %v12608_v12 = vpop.f32.mrf.mxu1 }
 0x46b   : > { %v12609_v34 = vadd.f32 %v12608_v12, %v12607_v0  ;;  %v16503_v24 = vpop.f32.mrf.mxu0 }
 0x46c   : > { %12918 = vmatmul.mubr.bf16.gmra.mxu1 %v13506_v52  ;;  %v12610_v59 = vpop.f32.mrf.mxu1  ;;  %v10109_v52 = vadd.f32 %v16149_v30, %v16453_v54 }
 0x46d   : > { %12921 = vmatprep.mubr.bf16.mxu1 %v13507_v6  ;;  %v16498_v11 = vadd.f32 %v12609_v34, %v16304_v33  ;;  %v16510_v43 = vpop.f32.mrf.mxu0  ;;  %v13510_v34 = vld [vmem:[#allocation3 + $0x458] ss:$36 sps:$4 sm:$0xff]  }
 0x46e   : > { %v12611_v62 = vpop.f32.mrf.mxu1  ;;  %v16530_v54 = vadd.f32 %v16426_v7, %v10109_v52 }
 0x46f   : > { %v12612_v49 = vadd.f32 %v12611_v62, %v12610_v59  ;;  %v16518_v1 = vpop.f32.mrf.mxu0  ;;  %v10114_v59 = vadd.f32 %v16149_v30, %v16462_v37 }
 0x470   : > { %v12613_v44 = vpop.f32.mrf.mxu1 }
 0x471   : > { %v16508_v8 = vadd.f32 %v12612_v49, %v16308_v14  ;;  %v16520_v6 = vpop.f32.mrf.mxu0  ;;  %v16537_v37 = vadd.f32 %v16440_v19, %v10114_v59  ;;  %v16558_v59 = vadd.f32 %v16460_v47, %v16485_v17 }
 0x472   : > { %v12614_v33 = vpop.f32.mrf.mxu1 }
 0x473   : > { %v12615_v0 = vadd.f32 %v12614_v33, %v12613_v44  ;;  %v16527_v49 = vpop.f32.mrf.mxu0  ;;  %17002 = vst [vmem:[#allocation12_spill] sm:$0xff] %v16537_v37 }
 0x474   : > { %12922 = vmatmul.mubr.bf16.gmra.mxu1 %v13508_v18  ;;  %v12616_v46 = vpop.f32.mrf.mxu1  ;;  %v10117_v18 = vadd.f32 %v16149_v30, %v16471_v39 }
 0x475   : > { %12925 = vmatprep.mubr.bf16.mxu1 %v13509_v57  ;;  %v10332_v29 = vadd.f32 %v12615_v0, %v16314_v25  ;;  %v16532_v44 = vpop.f32.mrf.mxu0 }
 0x476   : > { %v12617_v14 = vpop.f32.mrf.mxu1  ;;  %v16545_v7 = vadd.f32 %v16451_v23, %v10117_v18 }
 0x477   : > { %v12618_v12 = vadd.f32 %v12617_v14, %v12616_v46  ;;  %v16542_v46 = vpop.f32.mrf.mxu0 }
 0x478   : > { %v12619_v16 = vpop.f32.mrf.mxu1  ;;  %17003 = vst [vmem:[#allocation17_spill] sm:$0xff] %v16545_v7 }
 0x479   : > { %v16525_v62 = vadd.f32 %v12618_v12, %v16320_v42  ;;  %v16550_v14 = vpop.f32.mrf.mxu0 }
 0x47a   : > { %v12620_v25 = vpop.f32.mrf.mxu1 }
 0x47b   : > { %v12621_v60 = vadd.f32 %v12620_v25, %v12619_v16  ;;  %v16552_v39 = vpop.f32.mrf.mxu0 }
 0x47c   : > { %12926 = vmatmul.mubr.bf16.gmra.mxu1 %v13510_v34  ;;  %v12622_v33 = vpop.f32.mrf.mxu1 }
 0x47d   : > { %v16540_v42 = vadd.f32 %v12621_v60, %v16324_v15  ;;  %v16554_v15 = vpop.f32.mrf.mxu0 }
 0x47e   : > { %v12623_v57 = vpop.f32.mrf.mxu1 }
 0x47f   : > { %v12624_v0 = vadd.f32 %v12623_v57, %v12622_v33  ;;  %v16563_v25 = vpop.f32.mrf.mxu0  ;;  %v12727_v33 = vadd.f32 %v12726_v20, %v12725_v51 }
 0x480   : > { %v12625_v30 = vpop.f32.mrf.mxu1 }
 0x481   : > { %v16548_v52 = vadd.f32 %v12624_v0, %v16332_v35  ;;  %v16568_v57 = vpop.f32.mrf.mxu0  ;;  %v16572_v0 = vadd.f32 %v16469_v58, %v16490_v9 }
 0x482   : > { %v12626_v19 = vpop.f32.mrf.mxu1 }
 0x483   : > { %v12627_v12 = vadd.f32 %v12626_v19, %v12625_v30  ;;  %v16574_v30 = vadd.f32 %v12727_v33, %v10332_v29 }
 0x484   : > { %v12628_v34 = vpop.f32.mrf.mxu1 }
 0x485   : > { %v16561_v23 = vadd.f32 %v12627_v12, %v16338_v21  ;;  %v16579_v12 = vpop.f32.mrf.mxu0 }
 0x486   : > { %v12629_v16 = vpop.f32.mrf.mxu1 }
 0x487   : > { %v12630_v35 = vadd.f32 %v12629_v16, %v12628_v34  ;;  %v16581_v16 = vpop.f32.mrf.mxu0 }
 0x488   : > { %v12631_v18 = vpop.f32.mrf.mxu1 }
 0x489   : > { %v16566_v60 = vadd.f32 %v12630_v35, %v16342_v28  ;;  %v16586_v9 = vpop.f32.mrf.mxu0 }
 0x48a   : > { %v12632_v47 = vpop.f32.mrf.mxu1 }
 0x48b   : > { %v12633_v17 = vadd.f32 %v12632_v47, %v12631_v18  ;;  %v16591_v33 = vpop.f32.mrf.mxu0 }
 0x48c   : > { %v12634_v21 = vpop.f32.mrf.mxu1 }
 0x48d   : > { %v16577_v19 = vadd.f32 %v12633_v17, %v16348_v27 }
 0x48e   : > { %v12635_v28 = vpop.f32.mrf.mxu1 }
 0x48f   : > { %v12636_v34 = vadd.f32 %v12635_v28, %v12634_v21  ;;  %v16596_v21 = vpop.f32.mrf.mxu0 }
 0x490   : > { %v12637_v20 = vpop.f32.mrf.mxu1  ;;  %17006 = vst [vmem:[#allocation27_spill] sm:$0xff] %v16596_v21 }
 0x491   : > { %v16584_v51 = vadd.f32 %v12636_v34, %v16352_v22  ;;  %v16598_v7 = vpop.f32.mrf.mxu0 }
 0x492   : > { %v12638_v58 = vpop.f32.mrf.mxu1  ;;  %17007 = vst [vmem:[#allocation18_spill] sm:$0xff] %v16598_v7 }
 0x493   : > { %v12639_v35 = vadd.f32 %v12638_v58, %v12637_v20 }
 0x494   : > { %v12640_v29 = vpop.f32.mrf.mxu1 }
 0x495   : > { %v16589_v18 = vadd.f32 %v12639_v35, %v16356_v61  ;;  %v16603_v35 = vpop.f32.mrf.mxu0 }
 0x496   : > { %v12641_v27 = vpop.f32.mrf.mxu1 }
 0x497   : > { %17004 = vst [vmem:[#allocation15_spill] sm:$0xff] %v16589_v18  ;;  %v12642_v47 = vadd.f32 %v12641_v27, %v12640_v29 }
 0x498   : > { %v12643_v22 = vpop.f32.mrf.mxu1 }
 0x499   : > { %v16594_v17 = vadd.f32 %v12642_v47, %v16366_v41  ;;  %v16608_v41 = vpop.f32.mrf.mxu0 }
 0x49a   : > { %v12644_v28 = vpop.f32.mrf.mxu1 }
 0x49b   : > { %17005 = vst [vmem:[#allocation16_spill] sm:$0xff] %v16594_v17  ;;  %v12645_v34 = vadd.f32 %v12644_v28, %v12643_v22  ;;  %v16610_v21 = vpop.f32.mrf.mxu0 }
 0x49c   : > { %v12646_v37 = vpop.f32.mrf.mxu1 }
 0x49d   : > { %v16601_v20 = vadd.f32 %v12645_v34, %v16372_v4  ;;  %v16615_v7 = vpop.f32.mrf.mxu0 }
 0x49e   : > { %v12647_v61 = vpop.f32.mrf.mxu1 }
 0x49f   : > { %v12648_v58 = vadd.f32 %v12647_v61, %v12646_v37 }
 0x4a0   : > { %v16620_v61 = vpop.f32.mrf.mxu0 }
 0x4a1   : > { %v16606_v29 = vadd.f32 %v12648_v58, %v16376_v38  ;;  %17011 = vst [vmem:[#allocation31_spill] sm:$0xff] %v16620_v61 }
 0x4a3   : > { %17008 = vst [vmem:[#allocation19_spill] sm:$0xff] %v16606_v29 }
 0x4a5   : > { %v12649_v27 = vpop.f32.mrf.mxu1 }
 0x4a7   : > { %v12650_v47 = vpop.f32.mrf.mxu1 }
 0x4a8   : > { %v12651_v17 = vadd.f32 %v12650_v47, %v12649_v27  ;;  %v16622_v27 = vpop.f32.mrf.mxu0 }
 0x4a9   : > { %v12652_v22 = vpop.f32.mrf.mxu1  ;;  %17012 = vst [vmem:[#allocation33_spill] sm:$0xff] %v16622_v27 }
 0x4aa   : > { %v16613_v28 = vadd.f32 %v12651_v17, %v16382_v31 }
 0x4ab   : > { %v12653_v4 = vpop.f32.mrf.mxu1 }
 0x4ac   : > { %17009 = vst [vmem:[#allocation20_spill] sm:$0xff] %v16613_v28  ;;  %v12654_v34 = vadd.f32 %v12653_v4, %v12652_v22  ;;  %v16627_v28 = vpop.f32.mrf.mxu0 }
 0x4ad   : > { %17013 = vst [vmem:[#allocation35_spill] sm:$0xff] %v16627_v28 }
 0x4ae   : > { %v16618_v37 = vadd.f32 %v12654_v34, %v16390_v26  ;;  %v16632_v34 = vpop.f32.mrf.mxu0 }
 0x4af   : > { %17015 = vst [vmem:[#allocation41_spill] sm:$0xff] %v16632_v34 }
 0x4b0   : > { %17010 = vst [vmem:[#allocation28_spill] sm:$0xff] %v16618_v37  ;;  %v16637_v27 = vpop.f32.mrf.mxu0 }
 0x4b2   : > { %v12655_v38 = vpop.f32.mrf.mxu1 }
 0x4b4   : > { %v12656_v58 = vpop.f32.mrf.mxu1 }
 0x4b5   : > { %v12657_v29 = vadd.f32 %v12656_v58, %v12655_v38 }
 0x4b6   : > { %v12658_v18 = vpop.f32.mrf.mxu1 }
 0x4b7   : > { %v16625_v47 = vadd.f32 %v12657_v29, %v16398_v40  ;;  %v16642_v29 = vpop.f32.mrf.mxu0 }
 0x4b8   : > { %v12659_v31 = vpop.f32.mrf.mxu1 }
 0x4b9   : > { %v12660_v17 = vadd.f32 %v12659_v31, %v12658_v18 }
 0x4bb   : > { %v16630_v22 = vadd.f32 %v12660_v17, %v16402_v5  ;;  %v16644_v17 = vpop.f32.mrf.mxu0 }
 0x4bd   : > { %17014 = vst [vmem:[#allocation36_spill] sm:$0xff] %v16630_v22  ;;  %v12661_v26 = vpop.f32.mrf.mxu1 }
 0x4bf   : > { %v12662_v4 = vpop.f32.mrf.mxu1 }
 0x4c0   : > { %v12663_v37 = vadd.f32 %v12662_v4, %v12661_v26 }
 0x4c1   : > { %v12664_v61 = vpop.f32.mrf.mxu1 }
 0x4c2   : > { %v16635_v38 = vadd.f32 %v12663_v37, %v16405_v3  ;;  %v16649_v37 = vpop.f32.mrf.mxu0 }
 0x4c3   : > { %v12665_v58 = vpop.f32.mrf.mxu1 }
 0x4c4   : > { %17016 = vst [vmem:[#allocation21_spill] sm:$0xff] %v16635_v38  ;;  %v12666_v40 = vadd.f32 %v12665_v58, %v12664_v61 }
 0x4c6   : > { %v16640_v18 = vadd.f32 %v12666_v40, %v16418_v56  ;;  %v16654_v56 = vpop.f32.mrf.mxu0 }
 0x4c8   : > { %17017 = vst [vmem:[#allocation22_spill] sm:$0xff] %v16640_v18  ;;  %v16656_v38 = vpop.f32.mrf.mxu0 }
 0x4cb   : > { %v12667_v5 = vpop.f32.mrf.mxu1 }
 0x4cd   : > { %v12668_v31 = vpop.f32.mrf.mxu1 }
 0x4ce   : > { %v12669_v22 = vadd.f32 %v12668_v31, %v12667_v5  ;;  %v16661_v31 = vpop.f32.mrf.mxu0 }
 0x4cf   : > { %v12670_v34 = vpop.f32.mrf.mxu1 }
 0x4d0   : > { %v16647_v26 = vadd.f32 %v12669_v22, %v16443_v45 }
 0x4d1   : > { %v12671_v3 = vpop.f32.mrf.mxu1 }
 0x4d2   : > { %17018 = vst [vmem:[#allocation32_spill] sm:$0xff] %v16647_v26  ;;  %v12672_v4 = vadd.f32 %v12671_v3, %v12670_v34 }
 0x4d4   : > { %v16652_v61 = vadd.f32 %v12672_v4, %v16456_v55  ;;  %v16666_v55 = vpop.f32.mrf.mxu0 }
 0x4d5   : > { %17022 = vst [vmem:[#allocation37_spill] sm:$0xff] %v16666_v55 }
 0x4d6   : > { %17019 = vst [vmem:[#allocation29_spill] sm:$0xff] %v16652_v61  ;;  %v16668_v26 = vpop.f32.mrf.mxu0 }
 0x4d9   : > { %v12673_v58 = vpop.f32.mrf.mxu1 }
 0x4db   : > { %v12674_v40 = vpop.f32.mrf.mxu1 }
 0x4dc   : > { %v12675_v18 = vadd.f32 %v12674_v40, %v12673_v58 }
 0x4dd   : > { %v12676_v28 = vpop.f32.mrf.mxu1 }
 0x4de   : > { %v16659_v5 = vadd.f32 %v12675_v18, %v16465_v63 }
 0x4df   : > { %v12677_v45 = vpop.f32.mrf.mxu1 }
 0x4e0   : > { %17020 = vst [vmem:[#allocation30_spill] sm:$0xff] %v16659_v5  ;;  %v12678_v22 = vadd.f32 %v12677_v45, %v12676_v28  ;;  %v16673_v5 = vpop.f32.mrf.mxu0 }
 0x4e2   : > { %v16664_v34 = vadd.f32 %v12678_v22, %v16478_v50  ;;  %v16678_v45 = vpop.f32.mrf.mxu0 }
 0x4e4   : > { %17021 = vst [vmem:[#allocation34_spill] sm:$0xff] %v16664_v34 }
 0x4e6   : > { %v12679_v3 = vpop.f32.mrf.mxu1 }
 0x4e8   : > { %v12680_v4 = vpop.f32.mrf.mxu1 }
 0x4e9   : > { %v12681_v61 = vadd.f32 %v12680_v4, %v12679_v3  ;;  %v16680_v3 = vpop.f32.mrf.mxu0 }
 0x4ea   : > { %v12682_v58 = vpop.f32.mrf.mxu1 }
 0x4eb   : > { %v16671_v40 = vadd.f32 %v12681_v61, %v16493_v2 }
 0x4ec   : > { %v12683_v63 = vpop.f32.mrf.mxu1 }
 0x4ed   : > { %17023 = vst [vmem:[#allocation39_spill] sm:$0xff] %v16671_v40  ;;  %v12684_v18 = vadd.f32 %v12683_v63, %v12682_v58  ;;  %v16687_v63 = vpop.f32.mrf.mxu0 }
 0x4ef   : > { %v16676_v28 = vadd.f32 %v12684_v18, %v16501_v36 }
 0x4f1   : > { %17024 = vst [vmem:[#allocation40_spill] sm:$0xff] %v16676_v28 }
 0x4f4   : > { %v12685_v50 = vpop.f32.mrf.mxu1 }
 0x4f6   : > { %v12686_v22 = vpop.f32.mrf.mxu1 }
 0x4f7   : > { %v12687_v34 = vadd.f32 %v12686_v22, %v12685_v50  ;;  %v12721_v22 = vadd.f32 %v16475_v53, %v16473_v13 }
 0x4f8   : > { %v12688_v55 = vpop.f32.mrf.mxu1 }
 0x4f9   : > { %v16683_v4 = vadd.f32 %v12687_v34, %v16513_v32  ;;  %v16698_v32 = vpop.f32.mrf.mxu0 }
 0x4fa   : > { %v12689_v2 = vpop.f32.mrf.mxu1  ;;  %17030 = vst [vmem:[#allocation10_spill] sm:$0xff] %v16698_v32 }
 0x4fb   : > { %17025 = vst [vmem:[#allocation38_spill] sm:$0xff] %v16683_v4  ;;  %v12690_v61 = vadd.f32 %v12689_v2, %v12688_v55  ;;  %v10485_v55 = vadd.f32 %v12721_v22, %v16498_v11  ;;  %v12724_v4 = vadd.f32 %v16487_v10, %v16480_v48  ;;  %v16705_v28 = vpop.f32.mrf.mxu0  ;;  %v12733_v11 = vadd.f32 %v16520_v6, %v16518_v1 }
 0x4fc   : > { %v16685_v58 = vpop.f32.mrf.mxu1  ;;  %17032 = vst [vmem:[#allocation13_spill] sm:$0xff] %v16705_v28 }
 0x4fd   : > { %17026 = vst [vmem:[#allocation6_spill] sm:$0xff] %v16685_v58  ;;  %v16690_v36 = vadd.f32 %v12690_v61, %v16530_v54  ;;  %v13530_v61 = vld [vmem:[%s13698_s14 + $0x8] sm:$0xff]   ;;  %v10488_v53 = vadd.f32 %v12724_v4, %v16508_v8  ;;  %v16713_v22 = vpop.f32.mrf.mxu0  ;;  %v10501_v32 = vadd.f32 %v12733_v11, %v16540_v42  ;;  %v12736_v8 = vadd.f32 %v16532_v44, %v16527_v49  ;;  %v13533_v44 = vld [vmem:[%s13698_s14 + $0x10] sm:$0xff]  }
 0x4fe   : > { %v16692_v18 = vpop.f32.mrf.mxu1  ;;  %v10768_v42 = vunpack.c.l.bf16 %v13533_v44 }
 0x4ff   : > { %17027 = vst [vmem:[#allocation42_spill] sm:$0xff] %v16690_v36  ;;  %17028 = vst [vmem:[#allocation5_spill] sm:$0xff] %v16692_v18  ;;  %v10766_v36 = vunpack.c.l.bf16 %v13530_v61  ;;  %v13531_v18 = vld [vmem:[%s13698_s14] sm:$0xff]   ;;  %v16720_v6 = vpop.f32.mrf.mxu0 }
 0x500   : > { %v16694_v50 = vpop.f32.mrf.mxu1  ;;  %v10764_v13 = vunpack.c.l.bf16 %v13531_v18 }
 0x501   : > { %17029 = vst [vmem:[#allocation4_spill] sm:$0xff] %v16694_v50 }
 0x502   : > { %v16700_v34 = vpop.f32.mrf.mxu1 }
 0x503   : > { %17031 = vst [vmem:[#allocation26_spill] sm:$0xff] %v16700_v34  ;;  %v10767_v34 = vunpack.c.h.bf16 %v13530_v61  ;;  %v13532_v61 = vld [vmem:[%s13698_s14 + $0x18] sm:$0xff]  }
 0x504   : > { %v12899_v2 = vpop.f32.mrf.mxu1  ;;  %v10770_v1 = vunpack.c.l.bf16 %v13532_v61 }
 0x505   : > { %v10646_v54 = vadd.f32 %v12899_v2, %v10485_v55  ;;  %v10765_v55 = vunpack.c.h.bf16 %v13531_v18 }
 0x506   : > { %v10637_v40 = vpop.f32.mrf.mxu1 }
 0x507   : > { %v10638_v50 = vadd.f32 %v10637_v40, %v16558_v59  ;;  %v10798_v48 = vadd.f32 %v10766_v36, %v10646_v54 }
 0x508   : > { %v12900_v58 = vpop.f32.mrf.mxu1 }
 0x509   : > { %v10649_v10 = vadd.f32 %v12900_v58, %v10488_v53  ;;  %v10796_v28 = vadd.f32 %v10764_v13, %v10638_v50  ;;  %v10830_v36 = vmax.f32 %v10798_v48, 0.0  ;;  %v12730_v50 = vadd.f32 %v16510_v43, %v16503_v24 }
 0x50a   : > { %v10640_v2 = vpop.f32.mrf.mxu1  ;;  %v12745_v24 = vadd.f32 %v16568_v57, %v16563_v25 }
 0x50b   : > { %v10799_v59 = vadd.f32 %v10767_v34, %v10649_v10  ;;  %v10641_v40 = vadd.f32 %v10640_v2, %v16572_v0  ;;  %v10504_v0 = vadd.f32 %v12736_v8, %v16548_v52  ;;  %v10771_v34 = vunpack.c.h.bf16 %v13532_v61  ;;  %v16737_v10 = vpop.f32.mrf.mxu0  ;;  %v13534_v61 = vld [vmem:[%s13698_s14 + $0x28] sm:$0xff]  }
 0x50c   : > { %v12903_v4 = vpop.f32.mrf.mxu1  ;;  %v10828_v13 = vmax.f32 %v10796_v28, 0.0  ;;  %v10496_v48 = vadd.f32 %v12730_v50, %v16525_v62  ;;  %v12739_v28 = vadd.f32 %v16550_v14, %v16542_v46  ;;  %v10517_v57 = vadd.f32 %v12745_v24, %v16577_v19  ;;  %v13535_v19 = vld [vmem:[%s13698_s14 + $0x20] sm:$0xff]  }
 0x50d   : > { %v10831_v58 = vmax.f32 %v10799_v59, 0.0  ;;  %v10797_v18 = vadd.f32 %v10765_v55, %v10641_v40  ;;  %v10662_v54 = vadd.f32 %v12903_v4, %v10501_v32  ;;  %v10769_v59 = vunpack.c.h.bf16 %v13533_v44 }
 0x50e   : > { %v10653_v49 = vpop.f32.mrf.mxu1  ;;  %v12748_v62 = vadd.f32 %v16581_v16, %v16579_v12  ;;  %v12742_v50 = vadd.f32 %v16554_v15, %v16552_v39  ;;  %v10772_v44 = vunpack.c.l.bf16 %v13535_v19  ;;  %v10775_v16 = vunpack.c.h.bf16 %v13534_v61 }
 0x50f   : > { %v11802_v53 = vpack.c.bf16 %v10831_v58, %v10830_v36  ;;  %v10829_v32 = vmax.f32 %v10797_v18, 0.0  ;;  %v10654_v11 = vadd.f32 %v10653_v49, %v16574_v30  ;;  %v10802_v2 = vadd.f32 %v10770_v1, %v10662_v54  ;;  %v16748_v58 = vpop.f32.mrf.mxu0 }
 0x510   : > { %v12904_v43 = vpop.f32.mrf.mxu1  ;;  %v10774_v36 = vunpack.c.l.bf16 %v13534_v61  ;;  %v10509_v1 = vadd.f32 %v12739_v28, %v16561_v23  ;;  %v10520_v12 = vadd.f32 %v12748_v62, %v16584_v51  ;;  %v17034_v62 = vld [vmem:[#allocation27_spill] sm:$0xff] }
 0x511   : > { %11874 = vst [vmem:[%s16729_s24 + $0x8] sm:$0xff] %v11802_v53   ;;  %v11797_v55 = vpack.c.bf16 %v10829_v32, %v10828_v13  ;;  %v10665_v52 = vadd.f32 %v12904_v43, %v10504_v0  ;;  %v10800_v30 = vadd.f32 %v10768_v42, %v10654_v11  ;;  %v10834_v18 = vmax.f32 %v10802_v2, 0.0  ;;  %v16757_v39 = vpop.f32.mrf.mxu0 }
 0x512   : > { %v10656_v40 = vpop.f32.mrf.mxu1  ;;  %v10512_v53 = vadd.f32 %v12742_v50, %v16566_v60  ;;  %v10773_v32 = vunpack.c.h.bf16 %v13535_v19  ;;  %v12757_v11 = vadd.f32 %v16608_v41, %v16603_v35  ;;  %v12751_v43 = vadd.f32 %v16591_v33, %v16586_v9  ;;  %v17037_v19 = vld [vmem:[#allocation16_spill] sm:$0xff] }
 0x513   : > { %11798 = vst [vmem:[%s16729_s24] sm:$0xff] %v11797_v55   ;;  %v10803_v8 = vadd.f32 %v10771_v34, %v10665_v52  ;;  %v10657_v25 = vadd.f32 %v10656_v40, %v10496_v48  ;;  %v10832_v42 = vmax.f32 %v10800_v30, 0.0  ;;  %v12760_v35 = vadd.f32 %v16615_v7, %v16610_v21  ;;  %v17033_v40 = vld [vmem:[#allocation15_spill] sm:$0xff] }
 0x514   : > { %v12907_v4 = vpop.f32.mrf.mxu1  ;;  %v10533_v52 = vadd.f32 %v12757_v11, %v16601_v20  ;;  %v10525_v30 = vadd.f32 %v12751_v43, %v17033_v40  ;;  %v13537_v20 = vld [vmem:[%s13698_s14 + $0x30] sm:$0xff]  }
 0x515   : > { %v10835_v46 = vmax.f32 %v10803_v8, 0.0  ;;  %v10801_v14 = vadd.f32 %v10769_v59, %v10657_v25  ;;  %v10678_v54 = vadd.f32 %v12907_v4, %v10517_v57  ;;  %v13536_v59 = vld [vmem:[%s13698_s14 + $0x38] sm:$0xff]   ;;  %v16768_v8 = vpop.f32.mrf.mxu0  ;;  %v17035_v4 = vld [vmem:[#allocation18_spill] sm:$0xff]  ;;  %v17041_v40 = vld [vmem:[#allocation35_spill] sm:$0xff] }
 0x516   : > { %v10669_v49 = vpop.f32.mrf.mxu1  ;;  %v10778_v28 = vunpack.c.l.bf16 %v13536_v59  ;;  %v12754_v61 = vadd.f32 %v17035_v4, %v17034_v62  ;;  %v10779_v21 = vunpack.c.h.bf16 %v13536_v59 }
 0x517   : > { %v11812_v0 = vpack.c.bf16 %v10835_v46, %v10834_v18  ;;  %v10833_v23 = vmax.f32 %v10801_v14, 0.0  ;;  %v10670_v34 = vadd.f32 %v10669_v49, %v10509_v1  ;;  %v10806_v24 = vadd.f32 %v10774_v36, %v10678_v54  ;;  %v17036_v18 = vld [vmem:[#allocation19_spill] sm:$0xff] }
 0x518   : > { %v12908_v13 = vpop.f32.mrf.mxu1  ;;  %v10776_v1 = vunpack.c.l.bf16 %v13537_v20  ;;  %v10536_v7 = vadd.f32 %v12760_v35, %v17036_v18 }
 0x519   : > { %11876 = vst [vmem:[%s16729_s24 + $0x18] sm:$0xff] %v11812_v0   ;;  %v11807_v15 = vpack.c.bf16 %v10833_v23, %v10832_v42  ;;  %v10681_v51 = vadd.f32 %v12908_v13, %v10520_v12  ;;  %v10804_v55 = vadd.f32 %v10772_v44, %v10670_v34  ;;  %v10838_v25 = vmax.f32 %v10806_v24, 0.0  ;;  %v16777_v42 = vpop.f32.mrf.mxu0  ;;  %v17038_v13 = vld [vmem:[#allocation31_spill] sm:$0xff] }
 0x51a   : > { %v10672_v48 = vpop.f32.mrf.mxu1  ;;  %v10528_v44 = vadd.f32 %v12754_v61, %v17037_v19  ;;  %v10777_v12 = vunpack.c.h.bf16 %v13537_v20 }
 0x51b   : > { %11875 = vst [vmem:[%s16729_s24 + $0x10] sm:$0xff] %v11807_v15   ;;  %v10807_v2 = vadd.f32 %v10775_v16, %v10681_v51  ;;  %v10673_v60 = vadd.f32 %v10672_v48, %v10512_v53  ;;  %v10836_v46 = vmax.f32 %v10804_v55, 0.0  ;;  %v12769_v16 = vadd.f32 %v16642_v29, %v16637_v27  ;;  %v17039_v53 = vld [vmem:[#allocation33_spill] sm:$0xff]  ;;  %v13538_v48 = vld [vmem:[%s13698_s14 + $0x48] sm:$0xff]  }
 0x51c   : > { %v12911_v41 = vpop.f32.mrf.mxu1  ;;  %v12772_v27 = vadd.f32 %v16649_v37, %v16644_v17  ;;  %v10782_v55 = vunpack.c.l.bf16 %v13538_v48  ;;  %v10783_v37 = vunpack.c.h.bf16 %v13538_v48 }
 0x51d   : > { %v10839_v9 = vmax.f32 %v10807_v2, 0.0  ;;  %v10805_v33 = vadd.f32 %v10773_v32, %v10673_v60  ;;  %v10694_v57 = vadd.f32 %v12911_v41, %v10533_v52  ;;  %v12763_v32 = vadd.f32 %v17039_v53, %v17038_v13  ;;  %v17040_v2 = vld [vmem:[#allocation20_spill] sm:$0xff]  ;;  %v16788_v52 = vpop.f32.mrf.mxu0 }
 0x51e   : > { %v10685_v36 = vpop.f32.mrf.mxu1  ;;  %v10549_v43 = vadd.f32 %v12769_v16, %v16625_v47  ;;  %v13539_v47 = vld [vmem:[%s13698_s14 + $0x40] sm:$0xff]   ;;  %v13540_v13 = vld [vmem:[%s13698_s14 + $0x58] sm:$0xff]  }
 0x51f   : > { %v11822_v14 = vpack.c.bf16 %v10839_v9, %v10838_v25  ;;  %v10837_v54 = vmax.f32 %v10805_v33, 0.0  ;;  %v10686_v50 = vadd.f32 %v10685_v36, %v10525_v30  ;;  %v10810_v23 = vadd.f32 %v10778_v28, %v10694_v57  ;;  %v17042_v30 = vld [vmem:[#allocation41_spill] sm:$0xff]  ;;  %v17043_v57 = vld [vmem:[#allocation36_spill] sm:$0xff] }
 0x520   : > { %v12912_v49 = vpop.f32.mrf.mxu1  ;;  %v10541_v60 = vadd.f32 %v12763_v32, %v17040_v2  ;;  %v12766_v25 = vadd.f32 %v17042_v30, %v17041_v40  ;;  %v10780_v33 = vunpack.c.l.bf16 %v13539_v47  ;;  %v10552_v17 = vadd.f32 %v12772_v27, %v17043_v57  ;;  %v17046_v32 = vld [vmem:[#allocation21_spill] sm:$0xff]  ;;  %v17049_v40 = vld [vmem:[#allocation22_spill] sm:$0xff] }
 0x521   : > { %11878 = vst [vmem:[%s16729_s24 + $0x28] sm:$0xff] %v11822_v14   ;;  %v11817_v0 = vpack.c.bf16 %v10837_v54, %v10836_v46  ;;  %v10697_v34 = vadd.f32 %v12912_v49, %v10536_v7  ;;  %v10808_v15 = vadd.f32 %v10776_v1, %v10686_v50  ;;  %v10842_v35 = vmax.f32 %v10810_v23, 0.0  ;;  %v17044_v1 = vld [vmem:[#allocation28_spill] sm:$0xff]  ;;  %v16797_v46 = vpop.f32.mrf.mxu0  ;;  %v17050_v57 = vld [vmem:[#allocation10_spill] sm:$0xff] }
 0x522   : > { %v10688_v11 = vpop.f32.mrf.mxu1  ;;  %v10544_v18 = vadd.f32 %v12766_v25, %v17044_v1  ;;  %v10781_v7 = vunpack.c.h.bf16 %v13539_v47  ;;  %v12775_v49 = vadd.f32 %v16656_v38, %v16654_v56  ;;  %v17045_v23 = vld [vmem:[#allocation32_spill] sm:$0xff]  ;;  %v10786_v53 = vunpack.c.l.bf16 %v13540_v13  ;;  %v13543_v1 = vld [vmem:[%s13698_s14 + $0x60] sm:$0xff]  }
 0x523   : > { %11877 = vst [vmem:[%s16729_s24 + $0x20] sm:$0xff] %v11817_v0   ;;  %v10811_v24 = vadd.f32 %v10779_v21, %v10697_v34  ;;  %v10689_v51 = vadd.f32 %v10688_v11, %v10528_v44  ;;  %v10840_v62 = vmax.f32 %v10808_v15, 0.0  ;;  %v12781_v21 = vadd.f32 %v16673_v5, %v16668_v26  ;;  %v12803_v44 = vpop.f32.mrf.mxu0 }
 0x524   : > { %v12915_v29 = vpop.f32.mrf.mxu1  ;;  %v12784_v26 = vadd.f32 %v16680_v3, %v16678_v45  ;;  %v10557_v11 = vadd.f32 %v12775_v49, %v17046_v32 }
 0x525   : > { %v10843_v41 = vmax.f32 %v10811_v24, 0.0  ;;  %v10809_v59 = vadd.f32 %v10777_v12, %v10689_v51  ;;  %v10710_v28 = vadd.f32 %v12915_v29, %v10549_v43  ;;  %v10565_v34 = vadd.f32 %v12781_v21, %v17045_v23  ;;  %v17047_v51 = vld [vmem:[#allocation37_spill] sm:$0xff]  ;;  %v13541_v29 = vld [vmem:[%s13698_s14 + $0x50] sm:$0xff]   ;;  %v12804_v45 = vpop.f32.mrf.mxu0 }
 0x526   : > { %v10701_v9 = vpop.f32.mrf.mxu1  ;;  %v12778_v43 = vadd.f32 %v17047_v51, %v16661_v31  ;;  %v10784_v48 = vunpack.c.l.bf16 %v13541_v29  ;;  %v10785_v25 = vunpack.c.h.bf16 %v13541_v29  ;;  %v12793_v31 = vadd.f32 %v16737_v10, %v16720_v6  ;;  %v17053_v10 = vld [vmem:[#allocation39_spill] sm:$0xff] }
 0x527   : > { %v11832_v4 = vpack.c.bf16 %v10843_v41, %v10842_v35  ;;  %v10841_v61 = vmax.f32 %v10809_v59, 0.0  ;;  %v10702_v36 = vadd.f32 %v10701_v9, %v10541_v60  ;;  %v10814_v54 = vadd.f32 %v10782_v55, %v10710_v28  ;;  %v17048_v55 = vld [vmem:[#allocation29_spill] sm:$0xff] }
 0x528   : > { %v12916_v20 = vpop.f32.mrf.mxu1  ;;  %v10568_v2 = vadd.f32 %v12784_v26, %v17048_v55  ;;  %v10787_v60 = vunpack.c.h.bf16 %v13540_v13  ;;  %v10560_v30 = vadd.f32 %v12778_v43, %v17049_v40  ;;  %v17056_v13 = vld [vmem:[#allocation12_spill] sm:$0xff]  ;;  %v12805_v32 = vadd.f32 %v12804_v45, %v12803_v44  ;;  %v17060_v44 = vld [vmem:[#allocation34_spill] sm:$0xff] }
 0x529   : > { %11880 = vst [vmem:[%s16729_s24 + $0x38] sm:$0xff] %v11832_v4   ;;  %v11827_v14 = vpack.c.bf16 %v10841_v61, %v10840_v62  ;;  %v10713_v50 = vadd.f32 %v12916_v20, %v10552_v17  ;;  %v10812_v12 = vadd.f32 %v10780_v33, %v10702_v36  ;;  %v10846_v15 = vmax.f32 %v10814_v54, 0.0  ;;  %v17052_v62 = vld [vmem:[#allocation5_spill] sm:$0xff]  ;;  %v13542_v36 = vld [vmem:[%s13698_s14 + $0x68] sm:$0xff]  }
 0x52a   : > { %v10704_v19 = vpop.f32.mrf.mxu1  ;;  %v12787_v17 = vadd.f32 %v17050_v57, %v16687_v63  ;;  %v10790_v20 = vunpack.c.l.bf16 %v13542_v36  ;;  %v10581_v54 = vadd.f32 %v12793_v31, %v17053_v10  ;;  %v12796_v63 = vadd.f32 %v16757_v39, %v16748_v58  ;;  %v17062_v57 = vld [vmem:[#allocation38_spill] sm:$0xff] }
 0x52b   : > { %11879 = vst [vmem:[%s16729_s24 + $0x30] sm:$0xff] %v11827_v14   ;;  %v10815_v16 = vadd.f32 %v10783_v37, %v10713_v50  ;;  %v10705_v0 = vadd.f32 %v10704_v19, %v10544_v18  ;;  %v10844_v3 = vmax.f32 %v10812_v12, 0.0  ;;  %v17051_v37 = vld [vmem:[#allocation6_spill] sm:$0xff]  ;;  %v10788_v18 = vunpack.c.l.bf16 %v13543_v1  ;;  %v17054_v50 = vld [vmem:[#allocation13_spill] sm:$0xff] }
 0x52c   : > { %v12919_v5 = vpop.f32.mrf.mxu1  ;;  %v12693_v4 = vadd.f32 %v17052_v62, %v17051_v37  ;;  %v12790_v49 = vadd.f32 %v16713_v22, %v17054_v50  ;;  %v17055_v12 = vld [vmem:[#allocation30_spill] sm:$0xff]  ;;  %v17059_v22 = vld [vmem:[#allocation40_spill] sm:$0xff] }
 0x52d   : > { %v10847_v24 = vmax.f32 %v10815_v16, 0.0  ;;  %v10813_v38 = vadd.f32 %v10781_v7, %v10705_v0  ;;  %v10726_v56 = vadd.f32 %v12919_v5, %v10565_v34  ;;  %v12806_v7 = vpop.f32.mrf.mxu0  ;;  %v10573_v16 = vadd.f32 %v12787_v17, %v17055_v12 }
 0x52e   : > { %v10717_v27 = vpop.f32.mrf.mxu1  ;;  %v10791_v0 = vunpack.c.h.bf16 %v13542_v36  ;;  %v10576_v45 = vadd.f32 %v12790_v49, %v17060_v44  ;;  %v13545_v36 = vld [vmem:[%s13698_s14 + $0x70] sm:$0xff]  }
 0x52f   : > { %v11842_v35 = vpack.c.bf16 %v10847_v24, %v10846_v15  ;;  %v10845_v41 = vmax.f32 %v10813_v38, 0.0  ;;  %v10718_v59 = vadd.f32 %v10717_v27, %v10557_v11  ;;  %v10818_v47 = vadd.f32 %v10786_v53, %v10726_v56  ;;  %v17057_v11 = vld [vmem:[#allocation4_spill] sm:$0xff]  ;;  %v17058_v15 = vld [vmem:[#allocation26_spill] sm:$0xff]  ;;  %v12807_v51 = vpop.f32.mrf.mxu0 }
 0x530   : > { %v12920_v28 = vpop.f32.mrf.mxu1  ;;  %v10436_v53 = vadd.f32 %v12693_v4, %v17056_v13  ;;  %v12696_v24 = vadd.f32 %v17058_v15, %v17057_v11  ;;  %v10584_v56 = vadd.f32 %v12796_v63, %v17059_v22 }
 0x531   : > { %11882 = vst [vmem:[%s16729_s24 + $0x48] sm:$0xff] %v11842_v35   ;;  %v11837_v9 = vpack.c.bf16 %v10845_v41, %v10844_v3  ;;  %v10729_v33 = vadd.f32 %v12920_v28, %v10568_v2  ;;  %v10816_v21 = vadd.f32 %v10784_v48, %v10718_v59  ;;  %v10850_v23 = vmax.f32 %v10818_v47, 0.0  ;;  %v17061_v35 = vld [vmem:[#allocation17_spill] sm:$0xff]  ;;  %v13544_v47 = vld [vmem:[%s13698_s14 + $0x78] sm:$0xff]  }
 0x532   : > { %v10720_v61 = vpop.f32.mrf.mxu1  ;;  %v10789_v48 = vunpack.c.h.bf16 %v13543_v1  ;;  %v12799_v3 = vadd.f32 %v16777_v42, %v16768_v8  ;;  %v10439_v41 = vadd.f32 %v12696_v24, %v17061_v35  ;;  %v12808_v59 = vadd.f32 %v12807_v51, %v12806_v7 }
 0x533   : > { %11881 = vst [vmem:[%s16729_s24 + $0x40] sm:$0xff] %v11837_v9   ;;  %v10819_v14 = vadd.f32 %v10787_v60, %v10729_v33  ;;  %v10721_v6 = vadd.f32 %v10720_v61, %v10560_v30  ;;  %v10848_v58 = vmax.f32 %v10816_v21, 0.0  ;;  %v10597_v31 = vadd.f32 %v12805_v32, %v10436_v53 }
 0x534   : > { %v12923_v19 = vpop.f32.mrf.mxu1  ;;  %v10794_v33 = vunpack.c.l.bf16 %v13544_v47  ;;  %v10589_v17 = vadd.f32 %v12799_v3, %v17062_v57  ;;  %v12802_v42 = vadd.f32 %v16797_v46, %v16788_v52  ;;  %v10600_v1 = vadd.f32 %v12808_v59, %v10439_v41 }
 0x535   : > { %v10851_v34 = vmax.f32 %v10819_v14, 0.0  ;;  %v10817_v26 = vadd.f32 %v10785_v25, %v10721_v6  ;;  %v10742_v5 = vadd.f32 %v12923_v19, %v10581_v54  ;;  %v10793_v54 = vunpack.c.h.bf16 %v13545_v36  ;;  %v17063_v19 = vld [vmem:[#allocation42_spill] sm:$0xff] }
 0x536   : > { %v10733_v38 = vpop.f32.mrf.mxu1  ;;  %v10592_v52 = vadd.f32 %v12802_v42, %v17063_v19 }
 0x537   : > { %v11852_v39 = vpack.c.bf16 %v10851_v34, %v10850_v23  ;;  %v10849_v43 = vmax.f32 %v10817_v26, 0.0  ;;  %v10734_v27 = vadd.f32 %v10733_v38, %v10573_v16  ;;  %v10822_v2 = vadd.f32 %v10790_v20, %v10742_v5 }
 0x538   : > { %v12924_v29 = vpop.f32.mrf.mxu1  ;;  %v10792_v20 = vunpack.c.l.bf16 %v13545_v36 }
 0x539   : > { %11884 = vst [vmem:[%s16729_s24 + $0x58] sm:$0xff] %v11852_v39   ;;  %v11847_v55 = vpack.c.bf16 %v10849_v43, %v10848_v58  ;;  %v10745_v60 = vadd.f32 %v12924_v29, %v10584_v56  ;;  %v10820_v40 = vadd.f32 %v10788_v18, %v10734_v27  ;;  %v10854_v37 = vmax.f32 %v10822_v2, 0.0 }
 0x53a   : > { %v10736_v28 = vpop.f32.mrf.mxu1  ;;  %v10795_v18 = vunpack.c.h.bf16 %v13544_v47 }
 0x53b   : > { %11883 = vst [vmem:[%s16729_s24 + $0x50] sm:$0xff] %v11847_v55   ;;  %v10823_v30 = vadd.f32 %v10791_v0, %v10745_v60  ;;  %v10737_v25 = vadd.f32 %v10736_v28, %v10576_v45  ;;  %v10852_v7 = vmax.f32 %v10820_v40, 0.0 }
 0x53c   : > { %v12927_v9 = vpop.f32.mrf.mxu1 }
 0x53d   : > { %v10855_v62 = vmax.f32 %v10823_v30, 0.0  ;;  %v10821_v4 = vadd.f32 %v10789_v48, %v10737_v25  ;;  %v10758_v8 = vadd.f32 %v12927_v9, %v10597_v31 }
 0x53e   : > { %v10749_v61 = vpop.f32.mrf.mxu1 }
 0x53f   : > { %v11862_v21 = vpack.c.bf16 %v10855_v62, %v10854_v37  ;;  %v10853_v14 = vmax.f32 %v10821_v4, 0.0  ;;  %v10750_v6 = vadd.f32 %v10749_v61, %v10589_v17  ;;  %v10826_v49 = vadd.f32 %v10794_v33, %v10758_v8 }
 0x540   : > { %v12928_v10 = vpop.f32.mrf.mxu1 }
 0x541   : > { %11886 = vst [vmem:[%s16729_s24 + $0x68] sm:$0xff] %v11862_v21   ;;  %v11857_v50 = vpack.c.bf16 %v10853_v14, %v10852_v7  ;;  %v10761_v63 = vadd.f32 %v12928_v10, %v10600_v1  ;;  %v10824_v12 = vadd.f32 %v10792_v20, %v10750_v6  ;;  %v10858_v23 = vmax.f32 %v10826_v49, 0.0 }
 0x542   : > { %v10752_v46 = vpop.f32.mrf.mxu1 }
 0x543   : > { %11885 = vst [vmem:[%s16729_s24 + $0x60] sm:$0xff] %v11857_v50   ;;  %v10827_v16 = vadd.f32 %v10795_v18, %v10761_v63  ;;  %v10753_v0 = vadd.f32 %v10752_v46, %v10592_v52  ;;  %v10856_v5 = vmax.f32 %v10824_v12, 0.0 }
 0x545   : > { %v10859_v34 = vmax.f32 %v10827_v16, 0.0  ;;  %v10825_v26 = vadd.f32 %v10793_v54, %v10753_v0 }
 0x547   : > { %v11872_v13 = vpack.c.bf16 %v10859_v34, %v10858_v23  ;;  %v10857_v53 = vmax.f32 %v10825_v26, 0.0 }
 0x549   : > { %11888 = vst [vmem:[%s16729_s24 + $0x78] sm:$0xff] %v11872_v13   ;;  %v11867_v32 = vpack.c.bf16 %v10857_v53, %v10856_v5 }
 0x54b   : > { %11887 = vst [vmem:[%s16729_s24 + $0x70] sm:$0xff] %v11867_v32  }
 0x54c PF: > { %s15_s18 = sadd.s32 1, %s13552_s18  }
 0x54d   : > { %p12_p4 = scmp.ge.s32.totalorder %s15_s18, 4  }
 0x54f   :  { %14 = sbr.rel (!%p12_p4) target bundleno = 1 (0x1), region = 73 }

</bundles_post_ra>
